<compile_context>
chip_gen: v7x
topology: tpu7x:2x2x1
jax: 0.10.0
libtpu: 0.0.40
codegen_flags: <defaults>
</compile_context>

<pallas_src>
import jax
import jax.numpy as jnp
from jax.experimental import pallas as pl
from jax.experimental.pallas import tpu as pltpu


_NUM_CLASSES = 10
_K1_PAD = 16                        # conv1 im2col K (3*3*1 = 9) zero-padded to 16
_VMEM_LIMIT = 32 * 1024 * 1024      # safe scoped-VMEM budget on v5e / v6e / v7x


def _round_up(a, b):
    return (a + b - 1) // b * b


def _pick_batch_block(batch):
    """(padded_batch, images_per_grid_step): even block, >=2 grid steps (v7x)."""
    for nb in (32, 16, 8, 4, 2):
        if batch % nb == 0 and batch // nb >= 2:
            return batch, nb
    nb = 8 if batch > 8 else 2
    return max(_round_up(batch, nb), 2 * nb), nb


# ----------------------------------------------------------------------------
# Wrapper-side im2col in 2x2-pool-window order (pure layout plumbing).
# ----------------------------------------------------------------------------
def _pooled_patches(x, kh, kw, k_pad):
    """x: (B, H, W, C) NHWC -> patches (4, B*Hp*Wp, k_pad).

    Column order of K is (di, dj, cin), matching the flattened conv weights.
    Leading axis is the 2x2 max-pool window element (u*2+v); row p of the inner
    axis is pooled pixel (b, i, j) with p = b*Hp*Wp + i*Wp + j.
    """
    b, h, w, c = x.shape
    ho, wo = h - kh + 1, w - kw + 1
    hp, wp = ho // 2, wo // 2
    cols = [x[:, di:di + ho, dj:dj + wo, :]
            for di in range(kh) for dj in range(kw)]
    pat = jnp.concatenate(cols, axis=-1)                     # (B, Ho, Wo, kh*kw*C)
    k = kh * kw * c
    if k_pad > k:
        pat = jnp.pad(pat, ((0, 0), (0, 0), (0, 0), (0, k_pad - k)))
    # (B,Ho,Wo,K) -> (B,Hp,2,Wp,2,K) -> (2,2,B,Hp,Wp,K) -> (4, B*Hp*Wp, K)
    pat = pat.reshape(b, hp, 2, wp, 2, k_pad).transpose(2, 4, 0, 1, 3, 5)
    return pat.reshape(4, b * hp * wp, k_pad), hp, wp


# ----------------------------------------------------------------------------
# Fused Conv2d + BatchNorm(eval, folded) + ReLU + MaxPool2d(2,2) kernel
# ----------------------------------------------------------------------------
def _conv_bn_relu_pool_kernel(x_ref, w_ref, scale_ref, shift_ref, o_ref):
    # x_ref:     (4, m_tile, K) bf16  im2col patches (taps folded into K,
    #            leading axis = the 4 elements of each 2x2 pool window)
    # w_ref:     (K, Cout) bf16
    # scale_ref / shift_ref: (1, Cout) f32  (folded BN affine + conv bias)
    # o_ref:     (m_tile, Cout) bf16  pooled output, one store per grid step
    w = w_ref[...]
    scale = scale_ref[...]
    shift = shift_ref[...]
    best = jnp.dot(x_ref[0], w, preferred_element_type=jnp.float32) * scale + shift
    for q in range(1, 4):                       # static 4-way window loop
        y = jnp.dot(x_ref[q], w, preferred_element_type=jnp.float32) * scale + shift
        best = jnp.maximum(best, y)
    # ReLU commutes with max, so one ReLU after the window max == pool(relu(bn)).
    o_ref[...] = jnp.maximum(best, 0.0).astype(o_ref.dtype)


def conv_bn_relu_pool(patches, w, scale, shift, *, nb, hp, wp):
    """patches: (4, B*hp*wp, K) bf16 -> pooled activations (B*hp*wp, Cout) bf16."""
    _, m_total, k = patches.shape
    kw_rows, cout = w.shape
    assert kw_rows == k
    m_img = hp * wp
    batch = m_total // m_img
    assert batch % nb == 0
    m_tile = nb * m_img
    grid = (batch // nb,)

    flops = 2 * patches.size * cout
    bytes_accessed = (patches.size * 2 + w.size * 2
                      + (scale.size + shift.size) * 4 + m_total * cout * 2)

    return pl.pallas_call(
        _conv_bn_relu_pool_kernel,
        out_shape=jax.ShapeDtypeStruct((m_total, cout), jnp.bfloat16),
        grid=grid,
        in_specs=[
            pl.BlockSpec((4, m_tile, k), lambda g: (0, g, 0)),
            pl.BlockSpec((k, cout), lambda g: (0, 0)),
            pl.BlockSpec((1, cout), lambda g: (0, 0)),
            pl.BlockSpec((1, cout), lambda g: (0, 0)),
        ],
        out_specs=pl.BlockSpec((m_tile, cout), lambda g: (g, 0)),
        compiler_params=pltpu.CompilerParams(
            dimension_semantics=("parallel",),
            vmem_limit_bytes=_VMEM_LIMIT),
        cost_estimate=pl.CostEstimate(flops=flops, transcendentals=0,
                                      bytes_accessed=bytes_accessed),
    )(patches, w, scale, shift)


# ----------------------------------------------------------------------------
# Fused fc1 -> dropout(identity) -> fc2 -> fc3 kernel (single pallas_call)
# ----------------------------------------------------------------------------
def _fc_fused_kernel(x_ref, w1_ref, b1_ref, w2_ref, b2_ref, w3_ref, b3_ref, o_ref):
    h = jnp.dot(x_ref[...], w1_ref[...],
                preferred_element_type=jnp.float32) + b1_ref[...]
    # TODO(synk): Dropout(0.25) is the identity in eval mode; training-mode RNG mask not implemented.
    h = jnp.dot(h.astype(w2_ref.dtype), w2_ref[...],
                preferred_element_type=jnp.float32) + b2_ref[...]
    h = jnp.dot(h.astype(w3_ref.dtype), w3_ref[...],
                preferred_element_type=jnp.float32) + b3_ref[...]
    o_ref[...] = h.astype(o_ref.dtype)


def fc_fused(feats, prep):
    """feats: (B, 2304) bf16 -> logits (B, 10) f32."""
    b0, k1 = feats.shape
    n1 = prep["fw1"].shape[1]
    n2 = prep["fw2"].shape[1]
    n3 = prep["fw3"].shape[1]

    # MXU-native M tile, and always >= 2 grid steps so both v7x cores work.
    tile_m = 256 if b0 > 256 else 128
    mp = max(_round_up(b0, tile_m), 2 * tile_m)
    if mp != b0:
        feats = jnp.pad(feats, ((0, mp - b0), (0, 0)))

    flops = 2 * mp * (k1 * n1 + n1 * n2 + n2 * n3)
    bytes_accessed = (mp * k1 * 2 + prep["fw1"].size * 2 + prep["fw2"].size * 2
                      + prep["fw3"].size * 2 + (n1 + n2 + n3) * 4 + mp * n3 * 4)

    out = pl.pallas_call(
        _fc_fused_kernel,
        out_shape=jax.ShapeDtypeStruct((mp, n3), jnp.float32),
        grid=(mp // tile_m,),
        in_specs=[
            pl.BlockSpec((tile_m, k1), lambda i: (i, 0)),
            pl.BlockSpec((k1, n1), lambda i: (0, 0)),
            pl.BlockSpec((1, n1), lambda i: (0, 0)),
            pl.BlockSpec((n1, n2), lambda i: (0, 0)),
            pl.BlockSpec((1, n2), lambda i: (0, 0)),
            pl.BlockSpec((n2, n3), lambda i: (0, 0)),
            pl.BlockSpec((1, n3), lambda i: (0, 0)),
        ],
        out_specs=pl.BlockSpec((tile_m, n3), lambda i: (i, 0)),
        compiler_params=pltpu.CompilerParams(
            dimension_semantics=("parallel",),
            vmem_limit_bytes=_VMEM_LIMIT),
        cost_estimate=pl.CostEstimate(flops=flops, transcendentals=0,
                                      bytes_accessed=bytes_accessed),
    )(feats, prep["fw1"], prep["fb1"], prep["fw2"], prep["fb2"],
      prep["fw3"], prep["fb3"])
    return out[:b0, :_NUM_CLASSES]


# ----------------------------------------------------------------------------
# Parameter preparation (done once, hoisted out of the forward pass)
# ----------------------------------------------------------------------------
def init_params(key):
    """Deterministic synthetic parameters with the nn.Module's shapes."""
    ks = jax.random.split(key, 10)
    f32 = jnp.float32
    p = {
        "conv1_w": jax.random.normal(ks[0], (32, 1, 3, 3), f32) * 0.10,
        "conv1_b": jax.random.normal(ks[1], (32,), f32) * 0.10,
        "conv2_w": jax.random.normal(ks[2], (64, 32, 3, 3), f32) * 0.05,
        "conv2_b": jax.random.normal(ks[3], (64,), f32) * 0.05,
        "fc1_w": jax.random.normal(ks[4], (600, 64 * 6 * 6), f32) * 0.02,
        "fc1_b": jax.random.normal(ks[5], (600,), f32) * 0.02,
        "fc2_w": jax.random.normal(ks[6], (120, 600), f32) * 0.02,
        "fc2_b": jax.random.normal(ks[7], (120,), f32) * 0.02,
        "fc3_w": jax.random.normal(ks[8], (10, 120), f32) * 0.02,
        "fc3_b": jax.random.normal(ks[9], (10,), f32) * 0.02,
    }
    for name, c in (("bn1", 32), ("bn2", 64)):
        p[name + "_gamma"] = jnp.ones((c,), f32)
        p[name + "_beta"] = jnp.zeros((c,), f32)
        p[name + "_mean"] = jnp.zeros((c,), f32)
        p[name + "_var"] = jnp.ones((c,), f32)
    return p


def prepare_params(p, eps=1e-5):
    # TODO(synk): BatchNorm is folded with running stats (eval mode); training-mode batch stats not implemented.
    f32, bf16 = jnp.float32, jnp.bfloat16

    def fold_bn(bias, gamma, beta, mean, var):
        s = gamma / jnp.sqrt(var + eps)
        sh = (bias - mean) * s + beta
        return s.reshape(1, -1).astype(f32), sh.reshape(1, -1).astype(f32)

    s1, sh1 = fold_bn(p["conv1_b"], p["bn1_gamma"], p["bn1_beta"],
                      p["bn1_mean"], p["bn1_var"])
    s2, sh2 = fold_bn(p["conv2_b"], p["bn2_gamma"], p["bn2_beta"],
                      p["bn2_mean"], p["bn2_var"])

    # conv weights flattened taps-major (di, dj, cin) to match im2col K order.
    w1 = jnp.transpose(p["conv1_w"], (2, 3, 1, 0)).reshape(9, 32)        # (9, 32)
    w1 = jnp.pad(w1, ((0, _K1_PAD - 9), (0, 0))).astype(bf16)            # (16, 32)
    w2 = jnp.transpose(p["conv2_w"], (2, 3, 1, 0)).reshape(288, 64).astype(bf16)

    # fc1: permute once so the NHWC (h,w,c) flatten matches PyTorch's (c,h,w).
    n1 = p["fc1_w"].shape[0]                                   # 600
    fw1 = p["fc1_w"].reshape(n1, 64, 6, 6).transpose(0, 2, 3, 1).reshape(n1, -1).T
    n1p = _round_up(n1, 128)                                   # 640
    fw1 = jnp.pad(fw1, ((0, 0), (0, n1p - n1))).astype(bf16)
    fb1 = jnp.pad(p["fc1_b"], (0, n1p - n1)).reshape(1, n1p).astype(f32)

    n2 = p["fc2_w"].shape[0]                                   # 120
    n2p = _round_up(n2, 128)                                   # 128
    fw2 = jnp.pad(p["fc2_w"].T, ((0, n1p - n1), (0, n2p - n2))).astype(bf16)
    fb2 = jnp.pad(p["fc2_b"], (0, n2p - n2)).reshape(1, n2p).astype(f32)

    n3 = p["fc3_w"].shape[0]                                   # 10
    n3p = _round_up(n3, 128)                                   # 128
    fw3 = jnp.pad(p["fc3_w"].T, ((0, n2p - n2), (0, n3p - n3))).astype(bf16)
    fb3 = jnp.pad(p["fc3_b"], (0, n3p - n3)).reshape(1, n3p).astype(f32)

    return {"w1": w1, "s1": s1, "sh1": sh1,
            "w2": w2, "s2": s2, "sh2": sh2,
            "fw1": fw1, "fb1": fb1, "fw2": fw2, "fb2": fb2,
            "fw3": fw3, "fb3": fb3}


# ----------------------------------------------------------------------------
# Forward pass
# ----------------------------------------------------------------------------
def cnn_forward(prep, x):
    """x: (B, 1, 28, 28) NCHW float32 -> logits (B, 10) float32 (eval mode)."""
    b = x.shape[0]
    bp, nb = _pick_batch_block(b)

    # Layout plumbing (wrapper only): NCHW->NHWC, batch pad, conv1's pad=1, bf16.
    xh = jnp.transpose(x, (0, 2, 3, 1)).astype(jnp.bfloat16)           # (B,28,28,1)
    xh = jnp.pad(xh, ((0, bp - b), (1, 1), (1, 1), (0, 0)))            # (Bp,30,30,1)

    # layer1: Conv2d(1,32,3,pad=1)+BN+ReLU+MaxPool2 -> (Bp,14,14,32)
    p1, hp1, wp1 = _pooled_patches(xh, 3, 3, k_pad=prep["w1"].shape[0])
    y1 = conv_bn_relu_pool(p1, prep["w1"], prep["s1"], prep["sh1"],
                           nb=nb, hp=hp1, wp=wp1)
    y1 = y1.reshape(bp, hp1, wp1, 32)

    # layer2: Conv2d(32,64,3)+BN+ReLU+MaxPool2 -> (Bp,6,6,64)
    p2, hp2, wp2 = _pooled_patches(y1, 3, 3, k_pad=prep["w2"].shape[0])
    y2 = conv_bn_relu_pool(p2, prep["w2"], prep["s2"], prep["sh2"],
                           nb=nb, hp=hp2, wp=wp2)

    # (Bp*36, 64) -> (Bp, 2304): free reshape, (h,w,c) order matches fw1 prep.
    feats = y2.reshape(bp, hp2 * wp2 * 64)
    return fc_fused(feats, prep)[:b]


if __name__ == "__main__":
    key = jax.random.PRNGKey(0)
    pkey, xkey = jax.random.split(key)
    params = init_params(pkey)
    prep = prepare_params(params)               # weight prep / BN fold hoisted out
    # fc1 expects 64*6*6 features, which pins the input to 1x28x28 (MNIST-like).
    x = jax.random.normal(xkey, (2, 1, 28, 28), jnp.float32)
    fwd = jax.jit(cnn_forward)
    out = jax.block_until_ready(fwd(prep, x))
    assert out.shape == (2, _NUM_CLASSES) and out.dtype == jnp.float32
    assert bool(jnp.all(jnp.isfinite(out)))
    print("KERNEL_OK")
</pallas_src>

<mosaic_0001>
module attributes {stable_mosaic.version = 11 : i64} {
  func.func @_conv_bn_relu_pool_kernel(%arg0: i32, %arg1: memref<4x392x16xbf16, #tpu.memory_space<vmem>>, %arg2: memref<16x32xbf16, #tpu.memory_space<vmem>>, %arg3: memref<1x32xf32, #tpu.memory_space<vmem>>, %arg4: memref<1x32xf32, #tpu.memory_space<vmem>>, %arg5: memref<392x32xbf16, #tpu.memory_space<vmem>>) attributes {dimension_semantics = [#tpu.dimension_semantics<parallel>], iteration_bounds = array<i64: 2>, scalar_prefetch = 0 : i64, scratch_operands = 0 : i64, tpu.core_type = #tpu.core_type<tc>, window_params = [{transform_indices = @transform_0, window_bounds = array<i64: 4, 392, 16>}, {pipeline_mode = #tpu.pipeline_mode<synchronous>, transform_indices = @transform_1, window_bounds = array<i64: 16, 32>}, {pipeline_mode = #tpu.pipeline_mode<synchronous>, transform_indices = @transform_2, window_bounds = array<i64: 1, 32>}, {pipeline_mode = #tpu.pipeline_mode<synchronous>, transform_indices = @transform_3, window_bounds = array<i64: 1, 32>}, {transform_indices = @transform_4, window_bounds = array<i64: 392, 32>}]} {
    %c0 = arith.constant 0 : index
    %c0_0 = arith.constant 0 : index
    %0 = vector.load %arg2[%c0, %c0_0] : memref<16x32xbf16, #tpu.memory_space<vmem>>, vector<16x32xbf16>
    %c0_1 = arith.constant 0 : index
    %c0_2 = arith.constant 0 : index
    %1 = vector.load %arg3[%c0_1, %c0_2] : memref<1x32xf32, #tpu.memory_space<vmem>>, vector<1x32xf32>
    %c0_3 = arith.constant 0 : index
    %c0_4 = arith.constant 0 : index
    %2 = vector.load %arg4[%c0_3, %c0_4] : memref<1x32xf32, #tpu.memory_space<vmem>>, vector<1x32xf32>
    %c0_5 = arith.constant 0 : index
    %c0_6 = arith.constant 0 : index
    %c0_7 = arith.constant 0 : index
    %3 = vector.load %arg1[%c0_5, %c0_6, %c0_7] : memref<4x392x16xbf16, #tpu.memory_space<vmem>>, vector<1x392x16xbf16>
    %4 = vector.shape_cast %3 : vector<1x392x16xbf16> to vector<392x16xbf16>
    %cst = arith.constant dense<0.000000e+00> : vector<392x32xf32>
    %5 = tpu.matmul %4, %0, %cst {dimension_numbers = #tpu.dot_dimension_numbers<[1], [0], [0], [1], [0, 0, 1, 1], [], []>} : vector<392x16xbf16>, vector<16x32xbf16>, vector<392x32xf32> -> vector<392x32xf32>
    %6 = vector.broadcast %1 : vector<1x32xf32> to vector<392x32xf32>
    %7 = arith.mulf %5, %6 : vector<392x32xf32>
    %8 = vector.broadcast %2 : vector<1x32xf32> to vector<392x32xf32>
    %9 = arith.addf %7, %8 : vector<392x32xf32>
    %c1 = arith.constant 1 : index
    %c0_8 = arith.constant 0 : index
    %c0_9 = arith.constant 0 : index
    %10 = vector.load %arg1[%c1, %c0_8, %c0_9] : memref<4x392x16xbf16, #tpu.memory_space<vmem>>, vector<1x392x16xbf16>
    %11 = vector.shape_cast %10 : vector<1x392x16xbf16> to vector<392x16xbf16>
    %cst_10 = arith.constant dense<0.000000e+00> : vector<392x32xf32>
    %12 = tpu.matmul %11, %0, %cst_10 {dimension_numbers = #tpu.dot_dimension_numbers<[1], [0], [0], [1], [0, 0, 1, 1], [], []>} : vector<392x16xbf16>, vector<16x32xbf16>, vector<392x32xf32> -> vector<392x32xf32>
    %13 = vector.broadcast %1 : vector<1x32xf32> to vector<392x32xf32>
    %14 = arith.mulf %12, %13 : vector<392x32xf32>
    %15 = vector.broadcast %2 : vector<1x32xf32> to vector<392x32xf32>
    %16 = arith.addf %14, %15 : vector<392x32xf32>
    %17 = arith.maximumf %9, %16 : vector<392x32xf32>
    %c2 = arith.constant 2 : index
    %c0_11 = arith.constant 0 : index
    %c0_12 = arith.constant 0 : index
    %18 = vector.load %arg1[%c2, %c0_11, %c0_12] : memref<4x392x16xbf16, #tpu.memory_space<vmem>>, vector<1x392x16xbf16>
    %19 = vector.shape_cast %18 : vector<1x392x16xbf16> to vector<392x16xbf16>
    %cst_13 = arith.constant dense<0.000000e+00> : vector<392x32xf32>
    %20 = tpu.matmul %19, %0, %cst_13 {dimension_numbers = #tpu.dot_dimension_numbers<[1], [0], [0], [1], [0, 0, 1, 1], [], []>} : vector<392x16xbf16>, vector<16x32xbf16>, vector<392x32xf32> -> vector<392x32xf32>
    %21 = vector.broadcast %1 : vector<1x32xf32> to vector<392x32xf32>
    %22 = arith.mulf %20, %21 : vector<392x32xf32>
    %23 = vector.broadcast %2 : vector<1x32xf32> to vector<392x32xf32>
    %24 = arith.addf %22, %23 : vector<392x32xf32>
    %25 = arith.maximumf %17, %24 : vector<392x32xf32>
    %c3 = arith.constant 3 : index
    %c0_14 = arith.constant 0 : index
    %c0_15 = arith.constant 0 : index
    %26 = vector.load %arg1[%c3, %c0_14, %c0_15] : memref<4x392x16xbf16, #tpu.memory_space<vmem>>, vector<1x392x16xbf16>
    %27 = vector.shape_cast %26 : vector<1x392x16xbf16> to vector<392x16xbf16>
    %cst_16 = arith.constant dense<0.000000e+00> : vector<392x32xf32>
    %28 = tpu.matmul %27, %0, %cst_16 {dimension_numbers = #tpu.dot_dimension_numbers<[1], [0], [0], [1], [0, 0, 1, 1], [], []>} : vector<392x16xbf16>, vector<16x32xbf16>, vector<392x32xf32> -> vector<392x32xf32>
    %29 = vector.broadcast %1 : vector<1x32xf32> to vector<392x32xf32>
    %30 = arith.mulf %28, %29 : vector<392x32xf32>
    %31 = vector.broadcast %2 : vector<1x32xf32> to vector<392x32xf32>
    %32 = arith.addf %30, %31 : vector<392x32xf32>
    %33 = arith.maximumf %25, %32 : vector<392x32xf32>
    %cst_17 = arith.constant 0.000000e+00 : f32
    %34 = vector.broadcast %cst_17 : f32 to vector<392x32xf32>
    %35 = arith.maximumf %33, %34 : vector<392x32xf32>
    %36 = arith.truncf %35 : vector<392x32xf32> to vector<392x32xbf16>
    %c0_18 = arith.constant 0 : index
    %c0_19 = arith.constant 0 : index
    %37 = vector.load %arg5[%c0_18, %c0_19] : memref<392x32xbf16, #tpu.memory_space<vmem>>, vector<392x32xbf16>
    tpu.vector_store %arg5[%c0_18, %c0_19], %36 {strides = array<i32>} : memref<392x32xbf16, #tpu.memory_space<vmem>>, vector<392x32xbf16>,
    return
  }
  func.func @transform_0(%arg0: i32) -> (i32, i32, i32) {
    %c0_i32 = arith.constant 0 : i32
    %c0_i32_0 = arith.constant 0 : i32
    %c0_i32_1 = arith.constant 0 : i32
    return %c0_i32, %arg0, %c0_i32_0 : i32, i32, i32
  }
  func.func @transform_1(%arg0: i32) -> (i32, i32) {
    %c0_i32 = arith.constant 0 : i32
    %c0_i32_0 = arith.constant 0 : i32
    %c0_i32_1 = arith.constant 0 : i32
    return %c0_i32, %c0_i32_0 : i32, i32
  }
  func.func @transform_2(%arg0: i32) -> (i32, i32) {
    %c0_i32 = arith.constant 0 : i32
    %c0_i32_0 = arith.constant 0 : i32
    %c0_i32_1 = arith.constant 0 : i32
    return %c0_i32, %c0_i32_0 : i32, i32
  }
  func.func @transform_3(%arg0: i32) -> (i32, i32) {
    %c0_i32 = arith.constant 0 : i32
    %c0_i32_0 = arith.constant 0 : i32
    %c0_i32_1 = arith.constant 0 : i32
    return %c0_i32, %c0_i32_0 : i32, i32
  }
  func.func @transform_4(%arg0: i32) -> (i32, i32) {
    %c0_i32 = arith.constant 0 : i32
    %c0_i32_0 = arith.constant 0 : i32
    return %arg0, %c0_i32 : i32, i32
  }
}

module attributes {stable_mosaic.version = 11 : i64} {
  func.func @_conv_bn_relu_pool_kernel(%arg0: i32, %arg1: memref<4x72x288xbf16, #tpu.memory_space<vmem>>, %arg2: memref<288x64xbf16, #tpu.memory_space<vmem>>, %arg3: memref<1x64xf32, #tpu.memory_space<vmem>>, %arg4: memref<1x64xf32, #tpu.memory_space<vmem>>, %arg5: memref<72x64xbf16, #tpu.memory_space<vmem>>) attributes {dimension_semantics = [#tpu.dimension_semantics<parallel>], iteration_bounds = array<i64: 2>, scalar_prefetch = 0 : i64, scratch_operands = 0 : i64, tpu.core_type = #tpu.core_type<tc>, window_params = [{transform_indices = @transform_0, window_bounds = array<i64: 4, 72, 288>}, {pipeline_mode = #tpu.pipeline_mode<synchronous>, transform_indices = @transform_1, window_bounds = array<i64: 288, 64>}, {pipeline_mode = #tpu.pipeline_mode<synchronous>, transform_indices = @transform_2, window_bounds = array<i64: 1, 64>}, {pipeline_mode = #tpu.pipeline_mode<synchronous>, transform_indices = @transform_3, window_bounds = array<i64: 1, 64>}, {transform_indices = @transform_4, window_bounds = array<i64: 72, 64>}]} {
    %c0 = arith.constant 0 : index
    %c0_0 = arith.constant 0 : index
    %0 = vector.load %arg2[%c0, %c0_0] : memref<288x64xbf16, #tpu.memory_space<vmem>>, vector<288x64xbf16>
    %c0_1 = arith.constant 0 : index
    %c0_2 = arith.constant 0 : index
    %1 = vector.load %arg3[%c0_1, %c0_2] : memref<1x64xf32, #tpu.memory_space<vmem>>, vector<1x64xf32>
    %c0_3 = arith.constant 0 : index
    %c0_4 = arith.constant 0 : index
    %2 = vector.load %arg4[%c0_3, %c0_4] : memref<1x64xf32, #tpu.memory_space<vmem>>, vector<1x64xf32>
    %c0_5 = arith.constant 0 : index
    %c0_6 = arith.constant 0 : index
    %c0_7 = arith.constant 0 : index
    %3 = vector.load %arg1[%c0_5, %c0_6, %c0_7] : memref<4x72x288xbf16, #tpu.memory_space<vmem>>, vector<1x72x288xbf16>
    %4 = vector.shape_cast %3 : vector<1x72x288xbf16> to vector<72x288xbf16>
    %cst = arith.constant dense<0.000000e+00> : vector<72x64xf32>
    %5 = tpu.matmul %4, %0, %cst {dimension_numbers = #tpu.dot_dimension_numbers<[1], [0], [0], [1], [0, 0, 1, 1], [], []>} : vector<72x288xbf16>, vector<288x64xbf16>, vector<72x64xf32> -> vector<72x64xf32>
    %6 = vector.broadcast %1 : vector<1x64xf32> to vector<72x64xf32>
    %7 = arith.mulf %5, %6 : vector<72x64xf32>
    %8 = vector.broadcast %2 : vector<1x64xf32> to vector<72x64xf32>
    %9 = arith.addf %7, %8 : vector<72x64xf32>
    %c1 = arith.constant 1 : index
    %c0_8 = arith.constant 0 : index
    %c0_9 = arith.constant 0 : index
    %10 = vector.load %arg1[%c1, %c0_8, %c0_9] : memref<4x72x288xbf16, #tpu.memory_space<vmem>>, vector<1x72x288xbf16>
    %11 = vector.shape_cast %10 : vector<1x72x288xbf16> to vector<72x288xbf16>
    %cst_10 = arith.constant dense<0.000000e+00> : vector<72x64xf32>
    %12 = tpu.matmul %11, %0, %cst_10 {dimension_numbers = #tpu.dot_dimension_numbers<[1], [0], [0], [1], [0, 0, 1, 1], [], []>} : vector<72x288xbf16>, vector<288x64xbf16>, vector<72x64xf32> -> vector<72x64xf32>
    %13 = vector.broadcast %1 : vector<1x64xf32> to vector<72x64xf32>
    %14 = arith.mulf %12, %13 : vector<72x64xf32>
    %15 = vector.broadcast %2 : vector<1x64xf32> to vector<72x64xf32>
    %16 = arith.addf %14, %15 : vector<72x64xf32>
    %17 = arith.maximumf %9, %16 : vector<72x64xf32>
    %c2 = arith.constant 2 : index
    %c0_11 = arith.constant 0 : index
    %c0_12 = arith.constant 0 : index
    %18 = vector.load %arg1[%c2, %c0_11, %c0_12] : memref<4x72x288xbf16, #tpu.memory_space<vmem>>, vector<1x72x288xbf16>
    %19 = vector.shape_cast %18 : vector<1x72x288xbf16> to vector<72x288xbf16>
    %cst_13 = arith.constant dense<0.000000e+00> : vector<72x64xf32>
    %20 = tpu.matmul %19, %0, %cst_13 {dimension_numbers = #tpu.dot_dimension_numbers<[1], [0], [0], [1], [0, 0, 1, 1], [], []>} : vector<72x288xbf16>, vector<288x64xbf16>, vector<72x64xf32> -> vector<72x64xf32>
    %21 = vector.broadcast %1 : vector<1x64xf32> to vector<72x64xf32>
    %22 = arith.mulf %20, %21 : vector<72x64xf32>
    %23 = vector.broadcast %2 : vector<1x64xf32> to vector<72x64xf32>
    %24 = arith.addf %22, %23 : vector<72x64xf32>
    %25 = arith.maximumf %17, %24 : vector<72x64xf32>
    %c3 = arith.constant 3 : index
    %c0_14 = arith.constant 0 : index
    %c0_15 = arith.constant 0 : index
    %26 = vector.load %arg1[%c3, %c0_14, %c0_15] : memref<4x72x288xbf16, #tpu.memory_space<vmem>>, vector<1x72x288xbf16>
    %27 = vector.shape_cast %26 : vector<1x72x288xbf16> to vector<72x288xbf16>
    %cst_16 = arith.constant dense<0.000000e+00> : vector<72x64xf32>
    %28 = tpu.matmul %27, %0, %cst_16 {dimension_numbers = #tpu.dot_dimension_numbers<[1], [0], [0], [1], [0, 0, 1, 1], [], []>} : vector<72x288xbf16>, vector<288x64xbf16>, vector<72x64xf32> -> vector<72x64xf32>
    %29 = vector.broadcast %1 : vector<1x64xf32> to vector<72x64xf32>
    %30 = arith.mulf %28, %29 : vector<72x64xf32>
    %31 = vector.broadcast %2 : vector<1x64xf32> to vector<72x64xf32>
    %32 = arith.addf %30, %31 : vector<72x64xf32>
    %33 = arith.maximumf %25, %32 : vector<72x64xf32>
    %cst_17 = arith.constant 0.000000e+00 : f32
    %34 = vector.broadcast %cst_17 : f32 to vector<72x64xf32>
    %35 = arith.maximumf %33, %34 : vector<72x64xf32>
    %36 = arith.truncf %35 : vector<72x64xf32> to vector<72x64xbf16>
    %c0_18 = arith.constant 0 : index
    %c0_19 = arith.constant 0 : index
    %37 = vector.load %arg5[%c0_18, %c0_19] : memref<72x64xbf16, #tpu.memory_space<vmem>>, vector<72x64xbf16>
    tpu.vector_store %arg5[%c0_18, %c0_19], %36 {strides = array<i32>} : memref<72x64xbf16, #tpu.memory_space<vmem>>, vector<72x64xbf16>,
    return
  }
  func.func @transform_0(%arg0: i32) -> (i32, i32, i32) {
    %c0_i32 = arith.constant 0 : i32
    %c0_i32_0 = arith.constant 0 : i32
    %c0_i32_1 = arith.constant 0 : i32
    return %c0_i32, %arg0, %c0_i32_0 : i32, i32, i32
  }
  func.func @transform_1(%arg0: i32) -> (i32, i32) {
    %c0_i32 = arith.constant 0 : i32
    %c0_i32_0 = arith.constant 0 : i32
    %c0_i32_1 = arith.constant 0 : i32
    return %c0_i32, %c0_i32_0 : i32, i32
  }
  func.func @transform_2(%arg0: i32) -> (i32, i32) {
    %c0_i32 = arith.constant 0 : i32
    %c0_i32_0 = arith.constant 0 : i32
    %c0_i32_1 = arith.constant 0 : i32
    return %c0_i32, %c0_i32_0 : i32, i32
  }
  func.func @transform_3(%arg0: i32) -> (i32, i32) {
    %c0_i32 = arith.constant 0 : i32
    %c0_i32_0 = arith.constant 0 : i32
    %c0_i32_1 = arith.constant 0 : i32
    return %c0_i32, %c0_i32_0 : i32, i32
  }
  func.func @transform_4(%arg0: i32) -> (i32, i32) {
    %c0_i32 = arith.constant 0 : i32
    %c0_i32_0 = arith.constant 0 : i32
    return %arg0, %c0_i32 : i32, i32
  }
}

module attributes {stable_mosaic.version = 11 : i64} {
  func.func @_fc_fused_kernel(%arg0: i32, %arg1: memref<128x2304xbf16, #tpu.memory_space<vmem>>, %arg2: memref<2304x640xbf16, #tpu.memory_space<vmem>>, %arg3: memref<1x640xf32, #tpu.memory_space<vmem>>, %arg4: memref<640x128xbf16, #tpu.memory_space<vmem>>, %arg5: memref<1x128xf32, #tpu.memory_space<vmem>>, %arg6: memref<128x128xbf16, #tpu.memory_space<vmem>>, %arg7: memref<1x128xf32, #tpu.memory_space<vmem>>, %arg8: memref<128x128xf32, #tpu.memory_space<vmem>>) attributes {dimension_semantics = [#tpu.dimension_semantics<parallel>], iteration_bounds = array<i64: 2>, scalar_prefetch = 0 : i64, scratch_operands = 0 : i64, tpu.core_type = #tpu.core_type<tc>, window_params = [{transform_indices = @transform_0, window_bounds = array<i64: 128, 2304>}, {pipeline_mode = #tpu.pipeline_mode<synchronous>, transform_indices = @transform_1, window_bounds = array<i64: 2304, 640>}, {pipeline_mode = #tpu.pipeline_mode<synchronous>, transform_indices = @transform_2, window_bounds = array<i64: 1, 640>}, {pipeline_mode = #tpu.pipeline_mode<synchronous>, transform_indices = @transform_3, window_bounds = array<i64: 640, 128>}, {pipeline_mode = #tpu.pipeline_mode<synchronous>, transform_indices = @transform_4, window_bounds = array<i64: 1, 128>}, {pipeline_mode = #tpu.pipeline_mode<synchronous>, transform_indices = @transform_5, window_bounds = array<i64: 128, 128>}, {pipeline_mode = #tpu.pipeline_mode<synchronous>, transform_indices = @transform_6, window_bounds = array<i64: 1, 128>}, {transform_indices = @transform_7, window_bounds = array<i64: 128, 128>}]} {
    %c0 = arith.constant 0 : index
    %c0_0 = arith.constant 0 : index
    %0 = vector.load %arg1[%c0, %c0_0] : memref<128x2304xbf16, #tpu.memory_space<vmem>>, vector<128x2304xbf16>
    %c0_1 = arith.constant 0 : index
    %c0_2 = arith.constant 0 : index
    %1 = vector.load %arg2[%c0_1, %c0_2] : memref<2304x640xbf16, #tpu.memory_space<vmem>>, vector<2304x640xbf16>
    %cst = arith.constant dense<0.000000e+00> : vector<128x640xf32>
    %2 = tpu.matmul %0, %1, %cst {dimension_numbers = #tpu.dot_dimension_numbers<[1], [0], [0], [1], [0, 0, 1, 1], [], []>} : vector<128x2304xbf16>, vector<2304x640xbf16>, vector<128x640xf32> -> vector<128x640xf32>
    %c0_3 = arith.constant 0 : index
    %c0_4 = arith.constant 0 : index
    %3 = vector.load %arg3[%c0_3, %c0_4] : memref<1x640xf32, #tpu.memory_space<vmem>>, vector<1x640xf32>
    %4 = vector.broadcast %3 : vector<1x640xf32> to vector<128x640xf32>
    %5 = arith.addf %2, %4 : vector<128x640xf32>
    %6 = arith.truncf %5 : vector<128x640xf32> to vector<128x640xbf16>
    %c0_5 = arith.constant 0 : index
    %c0_6 = arith.constant 0 : index
    %7 = vector.load %arg4[%c0_5, %c0_6] : memref<640x128xbf16, #tpu.memory_space<vmem>>, vector<640x128xbf16>
    %cst_7 = arith.constant dense<0.000000e+00> : vector<128x128xf32>
    %8 = tpu.matmul %6, %7, %cst_7 {dimension_numbers = #tpu.dot_dimension_numbers<[1], [0], [0], [1], [0, 0, 1, 1], [], []>} : vector<128x640xbf16>, vector<640x128xbf16>, vector<128x128xf32> -> vector<128x128xf32>
    %c0_8 = arith.constant 0 : index
    %c0_9 = arith.constant 0 : index
    %9 = vector.load %arg5[%c0_8, %c0_9] : memref<1x128xf32, #tpu.memory_space<vmem>>, vector<1x128xf32>
    %10 = vector.broadcast %9 : vector<1x128xf32> to vector<128x128xf32>
    %11 = arith.addf %8, %10 : vector<128x128xf32>
    %12 = arith.truncf %11 : vector<128x128xf32> to vector<128x128xbf16>
    %c0_10 = arith.constant 0 : index
    %c0_11 = arith.constant 0 : index
    %13 = vector.load %arg6[%c0_10, %c0_11] : memref<128x128xbf16, #tpu.memory_space<vmem>>, vector<128x128xbf16>
    %cst_12 = arith.constant dense<0.000000e+00> : vector<128x128xf32>
    %14 = tpu.matmul %12, %13, %cst_12 {dimension_numbers = #tpu.dot_dimension_numbers<[1], [0], [0], [1], [0, 0, 1, 1], [], []>} : vector<128x128xbf16>, vector<128x128xbf16>, vector<128x128xf32> -> vector<128x128xf32>
    %c0_13 = arith.constant 0 : index
    %c0_14 = arith.constant 0 : index
    %15 = vector.load %arg7[%c0_13, %c0_14] : memref<1x128xf32, #tpu.memory_space<vmem>>, vector<1x128xf32>
    %16 = vector.broadcast %15 : vector<1x128xf32> to vector<128x128xf32>
    %17 = arith.addf %14, %16 : vector<128x128xf32>
    %c0_15 = arith.constant 0 : index
    %c0_16 = arith.constant 0 : index
    %18 = vector.load %arg8[%c0_15, %c0_16] : memref<128x128xf32, #tpu.memory_space<vmem>>, vector<128x128xf32>
    tpu.vector_store %arg8[%c0_15, %c0_16], %17 {strides = array<i32>} : memref<128x128xf32, #tpu.memory_space<vmem>>, vector<128x128xf32>,
    return
  }
  func.func @transform_0(%arg0: i32) -> (i32, i32) {
    %c0_i32 = arith.constant 0 : i32
    %c0_i32_0 = arith.constant 0 : i32
    return %arg0, %c0_i32 : i32, i32
  }
  func.func @transform_1(%arg0: i32) -> (i32, i32) {
    %c0_i32 = arith.constant 0 : i32
    %c0_i32_0 = arith.constant 0 : i32
    %c0_i32_1 = arith.constant 0 : i32
    return %c0_i32, %c0_i32_0 : i32, i32
  }
  func.func @transform_2(%arg0: i32) -> (i32, i32) {
    %c0_i32 = arith.constant 0 : i32
    %c0_i32_0 = arith.constant 0 : i32
    %c0_i32_1 = arith.constant 0 : i32
    return %c0_i32, %c0_i32_0 : i32, i32
  }
  func.func @transform_3(%arg0: i32) -> (i32, i32) {
    %c0_i32 = arith.constant 0 : i32
    %c0_i32_0 = arith.constant 0 : i32
    %c0_i32_1 = arith.constant 0 : i32
    return %c0_i32, %c0_i32_0 : i32, i32
  }
  func.func @transform_4(%arg0: i32) -> (i32, i32) {
    %c0_i32 = arith.constant 0 : i32
    %c0_i32_0 = arith.constant 0 : i32
    %c0_i32_1 = arith.constant 0 : i32
    return %c0_i32, %c0_i32_0 : i32, i32
  }
  func.func @transform_5(%arg0: i32) -> (i32, i32) {
    %c0_i32 = arith.constant 0 : i32
    %c0_i32_0 = arith.constant 0 : i32
    %c0_i32_1 = arith.constant 0 : i32
    return %c0_i32, %c0_i32_0 : i32, i32
  }
  func.func @transform_6(%arg0: i32) -> (i32, i32) {
    %c0_i32 = arith.constant 0 : i32
    %c0_i32_0 = arith.constant 0 : i32
    %c0_i32_1 = arith.constant 0 : i32
    return %c0_i32, %c0_i32_0 : i32, i32
  }
  func.func @transform_7(%arg0: i32) -> (i32, i32) {
    %c0_i32 = arith.constant 0 : i32
    %c0_i32_0 = arith.constant 0 : i32
    return %arg0, %c0_i32 : i32, i32
  }
}

</mosaic_0001>

<bundles_post_ra>
// kernel: cnn_forward.3
= control target key start
LH: loop header
LB: loop body
LE: loop exit
PB: predicated region body
PF: predicated region fallthrough
CT: control target
= control target key end

     0   :  { %s5016_s15 = smov 0   ;;  %s5018_s16 = smov 0   ;;  %s6644_s0 = inlined_call_operand.vmem [shape: bf16[4,784,16], index: 0, kind: input, shape index: {}]   ;;  %s6645_s1 = inlined_call_operand.vmem [shape: bf16[16,32], index: 1, kind: input, shape index: {}]   ;;  %s6646_s2 = inlined_call_operand.vmem [shape: f32[1,32], index: 2, kind: input, shape index: {}]   ;;  %s6647_s3 = inlined_call_operand.vmem [shape: f32[1,32], index: 3, kind: input, shape index: {}]   ;;  %s6648_s4 = inlined_call_operand.vmem [shape: bf16[784,32], index: 4, kind: output, shape index: {}]  }
   0x1   :  { %s5020_s17 = smov 0  }
   0x2 LB: > { %s3862_s18 = sadd.s32 4294967295, %s4987_s17   ;;  %s5033_s19 = sadd.s32 1, %s4987_s17   ;;  %s4987_s17 = sphi %s5020_s17, %s6862_s17   ;;  %s4983_s16 = sphi %s5018_s16, %s6861_s16   ;;  %s4979_s15 = sphi %s5016_s15, %s6860_s15  }
   0x3   : > { %s18_s20 = ssub.s32 %s4987_s17, %s5033_s19  ;;  %s21_s21 = sadd.s32 1, %s4983_s16 }
   0x4   : > { %p19_p0 = scmp.eq.s32.totalorder %s18_s20, 0  ;;  %p28_p1 = scmp.ne.s32.totalorder %s4983_s16, %s4979_s15 }
   0x5   : > { %p29_p2 = scmp.eq.s32.totalorder %s4987_s17, 0  ;;  %p3865_p4 = scmp.ge.s32.totalorder %s4987_s17, 2 }
   0x6   : > { %s5042_s22 = scalar_select %p19_p0, %s4983_s16, %s21_s21  }
   0x7   : > { %p30_p3 = por %p29_p2, %p28_p1  ;;  %152 = sbr.rel (%p3865_p4) target bundleno = 69 (0x45), region = 28 }
   0xe   : > { %155 = sbr.rel (!%p30_p3) target bundleno = 69 (0x45), region = 32  ;;  %s157_s23 = sand.u32 (%p30_p3), 1, %s4983_s16  }
   0xf   : > { %s4270_s24 = smul.u32 (%p30_p3), 196, %s4987_s17 }
  0x10   : > { %s4832_s25 = smul.u32 (%p30_p3), 784, %s157_s23 }
  0x11   : > { %s5050_s28 = scalar_lea.vmem (%p30_p3), %s6644_s0, %s4270_s24 }
  0x12   : > { %v178_v0 = vld [vmem:[%s5050_s28] sm:$0xff] (%p30_p3)   ;;  %v182_v1 = vld [vmem:[%s5050_s28 + $0x8] sm:$0xff] (%p30_p3)   ;;  %v186_v2 = vld [vmem:[%s5050_s28 + $0x10] sm:$0xff] (%p30_p3)   ;;  %s5055_s29 = scalar_lea.vmem (%p30_p3), [#allocation2], %s4832_s25 }
  0x13   : > { %179 = vst [vmem:[%s5055_s29] sm:$0xff] (%p30_p3), %v178_v0   ;;  %183 = vst [vmem:[%s5055_s29 + $0x8] sm:$0xff] (%p30_p3), %v182_v1   ;;  %v190_v3 = vld [vmem:[%s5050_s28 + $0x18] sm:$0xff] (%p30_p3)   ;;  %v194_v4 = vld [vmem:[%s5050_s28 + $0x20] sm:$0xff] (%p30_p3)  }
  0x14   : > { %187 = vst [vmem:[%s5055_s29 + $0x10] sm:$0xff] (%p30_p3), %v186_v2   ;;  %v198_v5 = vld [vmem:[%s5050_s28 + $0x28] sm:$0xff] (%p30_p3)   ;;  %191 = vst [vmem:[%s5055_s29 + $0x18] sm:$0xff] (%p30_p3), %v190_v3   ;;  %v202_v6 = vld [vmem:[%s5050_s28 + $0x30] sm:$0xff] (%p30_p3)  }
  0x15   : > { %195 = vst [vmem:[%s5055_s29 + $0x20] sm:$0xff] %v194_v4   ;;  %199 = vst [vmem:[%s5055_s29 + $0x28] sm:$0xff] %v198_v5   ;;  %v206_v7 = vld [vmem:[%s5050_s28 + $0x38] sm:$0xff]   ;;  %v210_v8 = vld [vmem:[%s5050_s28 + $0x40] sm:$0xff]  }
  0x16   : > { %203 = vst [vmem:[%s5055_s29 + $0x30] sm:$0xff] %v202_v6   ;;  %207 = vst [vmem:[%s5055_s29 + $0x38] sm:$0xff] %v206_v7   ;;  %v214_v9 = vld [vmem:[%s5050_s28 + $0x48] sm:$0xff]   ;;  %v218_v10 = vld [vmem:[%s5050_s28 + $0x50] sm:$0xff]  }
  0x17   : > { %211 = vst [vmem:[%s5055_s29 + $0x40] sm:$0xff] %v210_v8   ;;  %v222_v11 = vld [vmem:[%s5050_s28 + $0x58] sm:$0xff]   ;;  %215 = vst [vmem:[%s5055_s29 + $0x48] sm:$0xff] %v214_v9   ;;  %v226_v12 = vld [vmem:[%s5050_s28 + $0x60] sm:$0xff]  }
  0x18   : > { %219 = vst [vmem:[%s5055_s29 + $0x50] sm:$0xff] %v218_v10   ;;  %223 = vst [vmem:[%s5055_s29 + $0x58] sm:$0xff] %v222_v11   ;;  %v230_v13 = vld [vmem:[%s5050_s28 + $0x68] sm:$0xff]   ;;  %v234_v14 = vld [vmem:[%s5050_s28 + $0x70] sm:$0xff]  }
  0x19   : > { %227 = vst [vmem:[%s5055_s29 + $0x60] sm:$0xff] %v226_v12   ;;  %231 = vst [vmem:[%s5055_s29 + $0x68] sm:$0xff] %v230_v13   ;;  %v238_v15 = vld [vmem:[%s5050_s28 + $0x78] sm:$0xff]   ;;  %v242_v16 = vld [vmem:[%s5050_s28 + $0x80] sm:$0xff]  }
  0x1a   : > { %235 = vst [vmem:[%s5055_s29 + $0x70] sm:$0xff] %v234_v14   ;;  %v246_v17 = vld [vmem:[%s5050_s28 + $0x88] sm:$0xff]   ;;  %239 = vst [vmem:[%s5055_s29 + $0x78] sm:$0xff] %v238_v15   ;;  %v250_v18 = vld [vmem:[%s5050_s28 + $0x90] sm:$0xff]  }
  0x1b   : > { %243 = vst [vmem:[%s5055_s29 + $0x80] sm:$0xff] %v242_v16   ;;  %247 = vst [vmem:[%s5055_s29 + $0x88] sm:$0xff] %v246_v17   ;;  %v254_v19 = vld [vmem:[%s5050_s28 + $0x98] sm:$0xff]   ;;  %v258_v20 = vld [vmem:[%s5050_s28 + $0xa0] sm:$0xff]  }
  0x1c   : > { %251 = vst [vmem:[%s5055_s29 + $0x90] sm:$0xff] %v250_v18   ;;  %255 = vst [vmem:[%s5055_s29 + $0x98] sm:$0xff] %v254_v19   ;;  %v262_v21 = vld [vmem:[%s5050_s28 + $0xa8] sm:$0xff]   ;;  %v266_v22 = vld [vmem:[%s5050_s28 + $0xb0] sm:$0xff]  }
  0x1d   : > { %259 = vst [vmem:[%s5055_s29 + $0xa0] sm:$0xff] %v258_v20   ;;  %v270_v23 = vld [vmem:[%s5050_s28 + $0xb8] sm:$0xff]   ;;  %263 = vst [vmem:[%s5055_s29 + $0xa8] sm:$0xff] %v262_v21   ;;  %v274_v24 = vld [vmem:[%s5050_s28 + $0xc0] sm:$0xf] }
  0x1e   : > { %267 = vst [vmem:[%s5055_s29 + $0xb0] sm:$0xff] %v266_v22   ;;  %271 = vst [vmem:[%s5055_s29 + $0xb8] sm:$0xff] %v270_v23   ;;  %v276_v25 = vld [vmem:[%s5050_s28 + $0x188] sm:$0xff]   ;;  %v280_v26 = vld [vmem:[%s5050_s28 + $0x190] sm:$0xff]  }
  0x1f   : > { %275 = vst [vmem:[%s5055_s29 + $0xc0] sm:$0xf] %v274_v24  ;;  %277 = vst [vmem:[%s5055_s29 + $0xc4] sm:$0xff] %v276_v25   ;;  %v284_v27 = vld [vmem:[%s5050_s28 + $0x198] sm:$0xff]   ;;  %v288_v28 = vld [vmem:[%s5050_s28 + $0x1a0] sm:$0xff]  }
  0x20   : > { %281 = vst [vmem:[%s5055_s29 + $0xcc] sm:$0xff] %v280_v26   ;;  %v292_v29 = vld [vmem:[%s5050_s28 + $0x1a8] sm:$0xff]   ;;  %285 = vst [vmem:[%s5055_s29 + $0xd4] sm:$0xff] %v284_v27   ;;  %v296_v30 = vld [vmem:[%s5050_s28 + $0x1b0] sm:$0xff]  }
  0x21   : > { %289 = vst [vmem:[%s5055_s29 + $0xdc] sm:$0xff] %v288_v28   ;;  %293 = vst [vmem:[%s5055_s29 + $0xe4] sm:$0xff] %v292_v29   ;;  %v300_v31 = vld [vmem:[%s5050_s28 + $0x1b8] sm:$0xff]   ;;  %v304_v32 = vld [vmem:[%s5050_s28 + $0x1c0] sm:$0xff]  }
  0x22   : > { %297 = vst [vmem:[%s5055_s29 + $0xec] sm:$0xff] %v296_v30   ;;  %301 = vst [vmem:[%s5055_s29 + $0xf4] sm:$0xff] %v300_v31   ;;  %v308_v33 = vld [vmem:[%s5050_s28 + $0x1c8] sm:$0xff]   ;;  %v312_v34 = vld [vmem:[%s5050_s28 + $0x1d0] sm:$0xff]  }
  0x23   : > { %305 = vst [vmem:[%s5055_s29 + $0xfc] sm:$0xff] %v304_v32   ;;  %v316_v35 = vld [vmem:[%s5050_s28 + $0x1d8] sm:$0xff]   ;;  %309 = vst [vmem:[%s5055_s29 + $0x104] sm:$0xff] %v308_v33   ;;  %v320_v36 = vld [vmem:[%s5050_s28 + $0x1e0] sm:$0xff]  }
  0x24   : > { %313 = vst [vmem:[%s5055_s29 + $0x10c] sm:$0xff] %v312_v34   ;;  %317 = vst [vmem:[%s5055_s29 + $0x114] sm:$0xff] %v316_v35   ;;  %v324_v37 = vld [vmem:[%s5050_s28 + $0x1e8] sm:$0xff]   ;;  %v328_v38 = vld [vmem:[%s5050_s28 + $0x1f0] sm:$0xff]  }
  0x25   : > { %321 = vst [vmem:[%s5055_s29 + $0x11c] sm:$0xff] %v320_v36   ;;  %325 = vst [vmem:[%s5055_s29 + $0x124] sm:$0xff] %v324_v37   ;;  %v332_v39 = vld [vmem:[%s5050_s28 + $0x1f8] sm:$0xff]   ;;  %v336_v40 = vld [vmem:[%s5050_s28 + $0x200] sm:$0xff]  }
  0x26   : > { %329 = vst [vmem:[%s5055_s29 + $0x12c] sm:$0xff] %v328_v38   ;;  %v340_v41 = vld [vmem:[%s5050_s28 + $0x208] sm:$0xff]   ;;  %333 = vst [vmem:[%s5055_s29 + $0x134] sm:$0xff] %v332_v39   ;;  %v344_v42 = vld [vmem:[%s5050_s28 + $0x210] sm:$0xff]  }
  0x27   : > { %337 = vst [vmem:[%s5055_s29 + $0x13c] sm:$0xff] %v336_v40   ;;  %341 = vst [vmem:[%s5055_s29 + $0x144] sm:$0xff] %v340_v41   ;;  %v348_v43 = vld [vmem:[%s5050_s28 + $0x218] sm:$0xff]   ;;  %v352_v44 = vld [vmem:[%s5050_s28 + $0x220] sm:$0xff]  }
  0x28   : > { %345 = vst [vmem:[%s5055_s29 + $0x14c] sm:$0xff] %v344_v42   ;;  %349 = vst [vmem:[%s5055_s29 + $0x154] sm:$0xff] %v348_v43   ;;  %v356_v45 = vld [vmem:[%s5050_s28 + $0x228] sm:$0xff]   ;;  %v360_v46 = vld [vmem:[%s5050_s28 + $0x230] sm:$0xff]  }
  0x29   : > { %353 = vst [vmem:[%s5055_s29 + $0x15c] sm:$0xff] %v352_v44   ;;  %v364_v47 = vld [vmem:[%s5050_s28 + $0x238] sm:$0xff]   ;;  %357 = vst [vmem:[%s5055_s29 + $0x164] sm:$0xff] %v356_v45   ;;  %v368_v48 = vld [vmem:[%s5050_s28 + $0x240] sm:$0xff]  }
  0x2a   : > { %361 = vst [vmem:[%s5055_s29 + $0x16c] sm:$0xff] %v360_v46   ;;  %365 = vst [vmem:[%s5055_s29 + $0x174] sm:$0xff] %v364_v47   ;;  %v372_v49 = vld [vmem:[%s5050_s28 + $0x248] sm:$0xf]  ;;  %v374_v50 = vld [vmem:[%s5050_s28 + $0x310] sm:$0xff]  }
  0x2b   : > { %369 = vst [vmem:[%s5055_s29 + $0x17c] sm:$0xff] %v368_v48   ;;  %373 = vst [vmem:[%s5055_s29 + $0x184] sm:$0xf] %v372_v49  ;;  %v378_v51 = vld [vmem:[%s5050_s28 + $0x318] sm:$0xff]   ;;  %v382_v52 = vld [vmem:[%s5050_s28 + $0x320] sm:$0xff]  }
  0x2c   : > { %375 = vst [vmem:[%s5055_s29 + $0x188] sm:$0xff] %v374_v50   ;;  %v386_v53 = vld [vmem:[%s5050_s28 + $0x328] sm:$0xff]   ;;  %379 = vst [vmem:[%s5055_s29 + $0x190] sm:$0xff] %v378_v51   ;;  %v390_v54 = vld [vmem:[%s5050_s28 + $0x330] sm:$0xff]  }
  0x2d   : > { %383 = vst [vmem:[%s5055_s29 + $0x198] sm:$0xff] %v382_v52   ;;  %387 = vst [vmem:[%s5055_s29 + $0x1a0] sm:$0xff] %v386_v53   ;;  %v394_v55 = vld [vmem:[%s5050_s28 + $0x338] sm:$0xff]   ;;  %v398_v56 = vld [vmem:[%s5050_s28 + $0x340] sm:$0xff]  }
  0x2e   : > { %391 = vst [vmem:[%s5055_s29 + $0x1a8] sm:$0xff] %v390_v54   ;;  %395 = vst [vmem:[%s5055_s29 + $0x1b0] sm:$0xff] %v394_v55   ;;  %v402_v57 = vld [vmem:[%s5050_s28 + $0x348] sm:$0xff]   ;;  %v406_v58 = vld [vmem:[%s5050_s28 + $0x350] sm:$0xff]  }
  0x2f   : > { %399 = vst [vmem:[%s5055_s29 + $0x1b8] sm:$0xff] %v398_v56   ;;  %v410_v59 = vld [vmem:[%s5050_s28 + $0x358] sm:$0xff]   ;;  %403 = vst [vmem:[%s5055_s29 + $0x1c0] sm:$0xff] %v402_v57   ;;  %v414_v60 = vld [vmem:[%s5050_s28 + $0x360] sm:$0xff]  }
  0x30   : > { %407 = vst [vmem:[%s5055_s29 + $0x1c8] sm:$0xff] %v406_v58   ;;  %411 = vst [vmem:[%s5055_s29 + $0x1d0] sm:$0xff] %v410_v59   ;;  %v418_v61 = vld [vmem:[%s5050_s28 + $0x368] sm:$0xff]   ;;  %v422_v62 = vld [vmem:[%s5050_s28 + $0x370] sm:$0xff]  }
  0x31   : > { %415 = vst [vmem:[%s5055_s29 + $0x1d8] sm:$0xff] %v414_v60   ;;  %419 = vst [vmem:[%s5055_s29 + $0x1e0] sm:$0xff] %v418_v61   ;;  %v426_v63 = vld [vmem:[%s5050_s28 + $0x378] sm:$0xff]   ;;  %v430_v0 = vld [vmem:[%s5050_s28 + $0x380] sm:$0xff]  }
  0x32   : > { %423 = vst [vmem:[%s5055_s29 + $0x1e8] sm:$0xff] %v422_v62   ;;  %v434_v1 = vld [vmem:[%s5050_s28 + $0x388] sm:$0xff]   ;;  %427 = vst [vmem:[%s5055_s29 + $0x1f0] sm:$0xff] %v426_v63   ;;  %v438_v2 = vld [vmem:[%s5050_s28 + $0x390] sm:$0xff]  }
  0x33   : > { %431 = vst [vmem:[%s5055_s29 + $0x1f8] sm:$0xff] %v430_v0   ;;  %435 = vst [vmem:[%s5055_s29 + $0x200] sm:$0xff] %v434_v1   ;;  %v442_v3 = vld [vmem:[%s5050_s28 + $0x398] sm:$0xff]   ;;  %v446_v4 = vld [vmem:[%s5050_s28 + $0x3a0] sm:$0xff]  }
  0x34   : > { %439 = vst [vmem:[%s5055_s29 + $0x208] sm:$0xff] %v438_v2   ;;  %443 = vst [vmem:[%s5055_s29 + $0x210] sm:$0xff] %v442_v3   ;;  %v450_v5 = vld [vmem:[%s5050_s28 + $0x3a8] sm:$0xff]   ;;  %v454_v6 = vld [vmem:[%s5050_s28 + $0x3b0] sm:$0xff]  }
  0x35   : > { %447 = vst [vmem:[%s5055_s29 + $0x218] sm:$0xff] %v446_v4   ;;  %v458_v7 = vld [vmem:[%s5050_s28 + $0x3b8] sm:$0xff]   ;;  %451 = vst [vmem:[%s5055_s29 + $0x220] sm:$0xff] %v450_v5   ;;  %v462_v8 = vld [vmem:[%s5050_s28 + $0x3c0] sm:$0xff]  }
  0x36   : > { %455 = vst [vmem:[%s5055_s29 + $0x228] sm:$0xff] %v454_v6   ;;  %459 = vst [vmem:[%s5055_s29 + $0x230] sm:$0xff] %v458_v7   ;;  %v466_v9 = vld [vmem:[%s5050_s28 + $0x3c8] sm:$0xff]   ;;  %v470_v10 = vld [vmem:[%s5050_s28 + $0x3d0] sm:$0xf] }
  0x37   : > { %463 = vst [vmem:[%s5055_s29 + $0x238] sm:$0xff] %v462_v8   ;;  %467 = vst [vmem:[%s5055_s29 + $0x240] sm:$0xff] %v466_v9   ;;  %v472_v11 = vld [vmem:[%s5050_s28 + $0x498] sm:$0xff]   ;;  %v476_v12 = vld [vmem:[%s5050_s28 + $0x4a0] sm:$0xff]  }
  0x38   : > { %471 = vst [vmem:[%s5055_s29 + $0x248] sm:$0xf] %v470_v10  ;;  %v480_v13 = vld [vmem:[%s5050_s28 + $0x4a8] sm:$0xff]   ;;  %473 = vst [vmem:[%s5055_s29 + $0x24c] sm:$0xff] %v472_v11   ;;  %v484_v14 = vld [vmem:[%s5050_s28 + $0x4b0] sm:$0xff]  }
  0x39   : > { %477 = vst [vmem:[%s5055_s29 + $0x254] sm:$0xff] %v476_v12   ;;  %481 = vst [vmem:[%s5055_s29 + $0x25c] sm:$0xff] %v480_v13   ;;  %v488_v15 = vld [vmem:[%s5050_s28 + $0x4b8] sm:$0xff]   ;;  %v492_v16 = vld [vmem:[%s5050_s28 + $0x4c0] sm:$0xff]  }
  0x3a   : > { %485 = vst [vmem:[%s5055_s29 + $0x264] sm:$0xff] %v484_v14   ;;  %489 = vst [vmem:[%s5055_s29 + $0x26c] sm:$0xff] %v488_v15   ;;  %v496_v17 = vld [vmem:[%s5050_s28 + $0x4c8] sm:$0xff]   ;;  %v500_v18 = vld [vmem:[%s5050_s28 + $0x4d0] sm:$0xff]  }
  0x3b   : > { %493 = vst [vmem:[%s5055_s29 + $0x274] sm:$0xff] %v492_v16   ;;  %v504_v19 = vld [vmem:[%s5050_s28 + $0x4d8] sm:$0xff]   ;;  %497 = vst [vmem:[%s5055_s29 + $0x27c] sm:$0xff] %v496_v17   ;;  %v508_v20 = vld [vmem:[%s5050_s28 + $0x4e0] sm:$0xff]  }
  0x3c   : > { %501 = vst [vmem:[%s5055_s29 + $0x284] sm:$0xff] %v500_v18   ;;  %505 = vst [vmem:[%s5055_s29 + $0x28c] sm:$0xff] %v504_v19   ;;  %v512_v21 = vld [vmem:[%s5050_s28 + $0x4e8] sm:$0xff]   ;;  %v516_v22 = vld [vmem:[%s5050_s28 + $0x4f0] sm:$0xff]  }
  0x3d   : > { %509 = vst [vmem:[%s5055_s29 + $0x294] sm:$0xff] %v508_v20   ;;  %513 = vst [vmem:[%s5055_s29 + $0x29c] sm:$0xff] %v512_v21   ;;  %v520_v23 = vld [vmem:[%s5050_s28 + $0x4f8] sm:$0xff]   ;;  %v524_v24 = vld [vmem:[%s5050_s28 + $0x500] sm:$0xff]  }
  0x3e   : > { %517 = vst [vmem:[%s5055_s29 + $0x2a4] sm:$0xff] %v516_v22   ;;  %v528_v25 = vld [vmem:[%s5050_s28 + $0x508] sm:$0xff]   ;;  %521 = vst [vmem:[%s5055_s29 + $0x2ac] sm:$0xff] %v520_v23   ;;  %v532_v26 = vld [vmem:[%s5050_s28 + $0x510] sm:$0xff]  }
  0x3f   : > { %525 = vst [vmem:[%s5055_s29 + $0x2b4] sm:$0xff] %v524_v24   ;;  %529 = vst [vmem:[%s5055_s29 + $0x2bc] sm:$0xff] %v528_v25   ;;  %v536_v27 = vld [vmem:[%s5050_s28 + $0x518] sm:$0xff]   ;;  %v540_v28 = vld [vmem:[%s5050_s28 + $0x520] sm:$0xff]  }
  0x40   : > { %533 = vst [vmem:[%s5055_s29 + $0x2c4] sm:$0xff] %v532_v26   ;;  %537 = vst [vmem:[%s5055_s29 + $0x2cc] sm:$0xff] %v536_v27   ;;  %v544_v29 = vld [vmem:[%s5050_s28 + $0x528] sm:$0xff]   ;;  %v548_v30 = vld [vmem:[%s5050_s28 + $0x530] sm:$0xff]  }
  0x41   : > { %541 = vst [vmem:[%s5055_s29 + $0x2d4] sm:$0xff] %v540_v28   ;;  %v552_v31 = vld [vmem:[%s5050_s28 + $0x538] sm:$0xff]   ;;  %545 = vst [vmem:[%s5055_s29 + $0x2dc] sm:$0xff] %v544_v29   ;;  %v556_v32 = vld [vmem:[%s5050_s28 + $0x540] sm:$0xff]  }
  0x42   : > { %549 = vst [vmem:[%s5055_s29 + $0x2e4] sm:$0xff] %v548_v30   ;;  %553 = vst [vmem:[%s5055_s29 + $0x2ec] sm:$0xff] %v552_v31   ;;  %v560_v33 = vld [vmem:[%s5050_s28 + $0x548] sm:$0xff]   ;;  %v564_v34 = vld [vmem:[%s5050_s28 + $0x550] sm:$0xff]  }
  0x43   : > { %557 = vst [vmem:[%s5055_s29 + $0x2f4] sm:$0xff] %v556_v32   ;;  %561 = vst [vmem:[%s5055_s29 + $0x2fc] sm:$0xff] %v560_v33   ;;  %v568_v35 = vld [vmem:[%s5050_s28 + $0x558] sm:$0xf] }
  0x44   : > { %565 = vst [vmem:[%s5055_s29 + $0x304] sm:$0xff] %v564_v34   ;;  %569 = vst [vmem:[%s5055_s29 + $0x30c] sm:$0xf] %v568_v35 }
  0x45 PF: > { %p3867_p5 = scmp.ge.s32.totalorder %s4987_s17, 1  ;;  %p983_p6 = scmp.lt.s32.totalorder %s4987_s17, 3 }
  0x47   : > { %p984_p7 = pnand %p3867_p5, %p983_p6 }
  0x49   : > { %987 = sbr.rel (%p984_p7) target bundleno = 702 (0x2be), region = 73 }
  0x50   : > { %v4860_v36 = vld [vmem:[%s6645_s1] sm:$0xff]   ;;  %v6649_v37 = vmov 0.0   ;;  %s990_s6 = sand.u32 1, %s4979_s15   ;;  %vm4990_vm0 = vmmov 0   ;;  %vm1205_vm1 = vcmask 130048   ;;  %s1016_s21 = smul.u32 49, %s3862_s18 }
  0x51   : > { %4424 = vmatprep.subr.bf16.mxu0 %v6649_v37  ;;  %4526 = vmatprep.subr.bf16.mxu1 %v6649_v37  ;;  %s4833_s7 = smul.u32 784, %s990_s6  ;;  %v5485_v28 = vld [vmem:[%s6646_s2] ss:$0 sm:$0xff]  ;;  %vm3750_vm2 = vcmask 257024  }
  0x52   : > { %4425 = vmatpush3.bf16.msra.mxu0 %v4860_v36  ;;  %4527 = vmatpush3.bf16.msra.mxu1 %v4860_v36  ;;  %v5494_v29 = vld [vmem:[%s6647_s3] ss:$0 sm:$0xff]  ;;  %p1017_p8 = scmp.lt.s32.totalorder %s1016_s21, 97 }
  0x53   : > { %4426 = vmatprep.mubr.msk.bf16.mxu0 %vm4990_vm0, %v6649_v37  ;;  %4528 = vmatprep.mubr.msk.bf16.mxu1 %vm4990_vm0, %v6649_v37  ;;  %s5268_s8 = scalar_lea.vmem [#allocation2], %s4833_s7 }
  0x54   : > { %4628 = vmatprep.subr.bf16.mxu0 %v6649_v37  ;;  %4730 = vmatprep.subr.bf16.mxu1 %v6649_v37  ;;  %v4861_v38 = vld [vmem:[%s5268_s8] sm:$0xff]   ;;  %v4863_v40 = vld [vmem:[%s5268_s8 + $0x8] sm:$0xff]   ;;  %v4865_v42 = vld [vmem:[%s5268_s8 + $0x10] sm:$0xff]   ;;  %s6864_s21 = smov (!%p1017_p8, %s1016_s21), 97 }
  0x55   : > { %v4862_v39 = vld [vmem:[%s5268_s8 + $0xc4] sm:$0xff]   ;;  %4427 = vmatmul.mubr.msk.bf16.vlgmr.msra.gmra.mrb[0].mxu0 %vm1205_vm1, %v4861_v38  ;;  %v4864_v41 = vld [vmem:[%s5268_s8 + $0xcc] sm:$0xff]   ;;  %v4866_v43 = vld [vmem:[%s5268_s8 + $0xd4] sm:$0xff]   ;;  %s3868_s17 = sshll.u32 %s6864_s21, 2 }
  0x56   : > { %4529 = vmatmul.mubr.msk.bf16.vlgmr.msra.gmra.mrb[0].mxu1 %vm1205_vm1, %v4862_v39  ;;  %4629 = vmatpush3.bf16.msra.mxu0 %v4860_v36  ;;  %v4867_v44 = vld [vmem:[%s5268_s8 + $0x18] sm:$0xff]   ;;  %v4869_v46 = vld [vmem:[%s5268_s8 + $0x20] sm:$0xff]   ;;  %v4871_v48 = vld [vmem:[%s5268_s8 + $0x28] sm:$0xff]   ;;  %s6196_s24 = scalar_lea.vmem %s6648_s4, %s3868_s17 }
  0x57   : > { %4731 = vmatpush3.bf16.msra.mxu1 %v4860_v36  ;;  %4430 = vmatprep.mubr.msk.bf16.mxu0 %vm4990_vm0, %v6649_v37  ;;  %v4868_v45 = vld [vmem:[%s5268_s8 + $0xdc] sm:$0xff]   ;;  %v4870_v47 = vld [vmem:[%s5268_s8 + $0xe4] sm:$0xff]   ;;  %v4872_v49 = vld [vmem:[%s5268_s8 + $0xec] sm:$0xff]  }
  0x58   : > { %4532 = vmatprep.mubr.msk.bf16.mxu1 %vm4990_vm0, %v6649_v37  ;;  %v4873_v50 = vld [vmem:[%s5268_s8 + $0x30] sm:$0xff]   ;;  %v4875_v52 = vld [vmem:[%s5268_s8 + $0x38] sm:$0xff]   ;;  %v4877_v54 = vld [vmem:[%s5268_s8 + $0x40] sm:$0xff]  }
  0x59   : > { %v4874_v51 = vld [vmem:[%s5268_s8 + $0xf4] sm:$0xff]   ;;  %v4876_v53 = vld [vmem:[%s5268_s8 + $0xfc] sm:$0xff]   ;;  %v4878_v55 = vld [vmem:[%s5268_s8 + $0x104] sm:$0xff]  }
  0x5a   : > { %v4879_v56 = vld [vmem:[%s5268_s8 + $0x48] sm:$0xff]   ;;  %v4881_v58 = vld [vmem:[%s5268_s8 + $0x50] sm:$0xff]   ;;  %v4883_v60 = vld [vmem:[%s5268_s8 + $0x58] sm:$0xff]  }
  0x5b   : > { %v4880_v57 = vld [vmem:[%s5268_s8 + $0x10c] sm:$0xff]   ;;  %v4882_v59 = vld [vmem:[%s5268_s8 + $0x114] sm:$0xff]   ;;  %v4884_v61 = vld [vmem:[%s5268_s8 + $0x11c] sm:$0xff]  }
  0x5c   : > { %v4885_v62 = vld [vmem:[%s5268_s8 + $0x60] sm:$0xff]   ;;  %v4887_v0 = vld [vmem:[%s5268_s8 + $0x68] sm:$0xff]   ;;  %v4889_v2 = vld [vmem:[%s5268_s8 + $0x70] sm:$0xff]  }
  0x5d   : > { %4431 = vmatmul.mubr.msk.bf16.gmra.mrb[4].mxu0 %vm1205_vm1, %v4863_v40  ;;  %v4886_v63 = vld [vmem:[%s5268_s8 + $0x124] sm:$0xff]   ;;  %v4888_v1 = vld [vmem:[%s5268_s8 + $0x12c] sm:$0xff]   ;;  %v4890_v3 = vld [vmem:[%s5268_s8 + $0x134] sm:$0xff]  }
  0x5e   : > { %4533 = vmatmul.mubr.msk.bf16.gmra.mrb[4].mxu1 %vm1205_vm1, %v4864_v41  ;;  %4434 = vmatprep.mubr.msk.bf16.mxu0 %vm4990_vm0, %v6649_v37  ;;  %v4891_v4 = vld [vmem:[%s5268_s8 + $0x78] sm:$0xff]   ;;  %v4893_v6 = vld [vmem:[%s5268_s8 + $0x80] sm:$0xff]   ;;  %v4895_v8 = vld [vmem:[%s5268_s8 + $0x88] sm:$0xff]  }
  0x5f   : > { %4536 = vmatprep.mubr.msk.bf16.mxu1 %vm4990_vm0, %v6649_v37  ;;  %v4892_v5 = vld [vmem:[%s5268_s8 + $0x13c] sm:$0xff]   ;;  %v4894_v7 = vld [vmem:[%s5268_s8 + $0x144] sm:$0xff]   ;;  %v4896_v9 = vld [vmem:[%s5268_s8 + $0x14c] sm:$0xff]  }
  0x60   : > { %v4897_v10 = vld [vmem:[%s5268_s8 + $0x90] sm:$0xff]   ;;  %v4899_v12 = vld [vmem:[%s5268_s8 + $0x98] sm:$0xff]   ;;  %v4901_v14 = vld [vmem:[%s5268_s8 + $0xa0] sm:$0xff]  }
  0x61   : > { %v4898_v11 = vld [vmem:[%s5268_s8 + $0x154] sm:$0xff]   ;;  %v4900_v13 = vld [vmem:[%s5268_s8 + $0x15c] sm:$0xff]   ;;  %v4902_v15 = vld [vmem:[%s5268_s8 + $0x164] sm:$0xff]  }
  0x62   : > { %v4903_v16 = vld [vmem:[%s5268_s8 + $0xa8] sm:$0xff]   ;;  %v4905_v18 = vld [vmem:[%s5268_s8 + $0xb0] sm:$0xff]   ;;  %v4907_v20 = vld [vmem:[%s5268_s8 + $0xb8] sm:$0xff]  }
  0x63   : > { %v4904_v17 = vld [vmem:[%s5268_s8 + $0x16c] sm:$0xff]   ;;  %v4906_v19 = vld [vmem:[%s5268_s8 + $0x174] sm:$0xff]   ;;  %v4908_v21 = vld [vmem:[%s5268_s8 + $0x17c] sm:$0xff]  }
  0x64   : > { %v4909_v22 = vld [vmem:[%s5268_s8 + $0xc0] ss:$0 sps:$4 sm:$0xff]   ;;  %v4910_v23 = vld [vmem:[%s5268_s8 + $0x184] ss:$0 sps:$4 sm:$0xff]   ;;  %v4911_v24 = vld [vmem:[%s5268_s8 + $0x188] sm:$0xff]  }
  0x65   : > { %4435 = vmatmul.mubr.msk.bf16.gmra.mrb[8].mxu0 %vm1205_vm1, %v4865_v42  ;;  %v4912_v25 = vld [vmem:[%s5268_s8 + $0x24c] sm:$0xff]   ;;  %v4914_v27 = vld [vmem:[%s5268_s8 + $0x254] sm:$0xff]   ;;  %v4916_v39 = vld [vmem:[%s5268_s8 + $0x25c] sm:$0xff]  }
  0x66   : > { %4537 = vmatmul.mubr.msk.bf16.gmra.mrb[8].mxu1 %vm1205_vm1, %v4866_v43  ;;  %4438 = vmatprep.mubr.msk.bf16.mxu0 %vm4990_vm0, %v6649_v37  ;;  %v4913_v26 = vld [vmem:[%s5268_s8 + $0x190] sm:$0xff]   ;;  %v4915_v34 = vld [vmem:[%s5268_s8 + $0x198] sm:$0xff]  }
  0x67   : > { %4540 = vmatprep.mubr.msk.bf16.mxu1 %vm4990_vm0, %v6649_v37 }
  0x6d   : > { %4439 = vmatmul.mubr.msk.bf16.gmra.mrb[12].mxu0 %vm1205_vm1, %v4867_v44 }
  0x6e   : > { %4541 = vmatmul.mubr.msk.bf16.gmra.mrb[12].mxu1 %vm1205_vm1, %v4868_v45  ;;  %4442 = vmatprep.mubr.msk.bf16.mxu0 %vm4990_vm0, %v6649_v37 }
  0x6f   : > { %4544 = vmatprep.mubr.msk.bf16.mxu1 %vm4990_vm0, %v6649_v37 }
  0x75   : > { %4443 = vmatmul.mubr.msk.bf16.gmra.mrb[16].mxu0 %vm1205_vm1, %v4869_v46 }
  0x76   : > { %4545 = vmatmul.mubr.msk.bf16.gmra.mrb[16].mxu1 %vm1205_vm1, %v4870_v47  ;;  %4446 = vmatprep.mubr.msk.bf16.mxu0 %vm4990_vm0, %v6649_v37 }
  0x77   : > { %4548 = vmatprep.mubr.msk.bf16.mxu1 %vm4990_vm0, %v6649_v37 }
  0x7d   : > { %4447 = vmatmul.mubr.msk.bf16.gmra.mrb[20].mxu0 %vm1205_vm1, %v4871_v48 }
  0x7e   : > { %4549 = vmatmul.mubr.msk.bf16.gmra.mrb[20].mxu1 %vm1205_vm1, %v4872_v49  ;;  %4450 = vmatprep.mubr.msk.bf16.mxu0 %vm4990_vm0, %v6649_v37 }
  0x7f   : > { %4552 = vmatprep.mubr.msk.bf16.mxu1 %vm4990_vm0, %v6649_v37 }
  0x85   : > { %4451 = vmatmul.mubr.msk.bf16.gmra.mrb[24].mxu0 %vm1205_vm1, %v4873_v50 }
  0x86   : > { %4553 = vmatmul.mubr.msk.bf16.gmra.mrb[24].mxu1 %vm1205_vm1, %v4874_v51  ;;  %4454 = vmatprep.mubr.msk.bf16.mxu0 %vm4990_vm0, %v6649_v37 }
  0x87   : > { %4556 = vmatprep.mubr.msk.bf16.mxu1 %vm4990_vm0, %v6649_v37 }
  0x8d   : > { %4455 = vmatmul.mubr.msk.bf16.gmra.mrb[28].mxu0 %vm1205_vm1, %v4875_v52 }
  0x8e   : > { %4557 = vmatmul.mubr.msk.bf16.gmra.mrb[28].mxu1 %vm1205_vm1, %v4876_v53  ;;  %4458 = vmatprep.mubr.msk.bf16.mxu0 %vm4990_vm0, %v6649_v37 }
  0x8f   : > { %4560 = vmatprep.mubr.msk.bf16.mxu1 %vm4990_vm0, %v6649_v37 }
  0x95   : > { %4459 = vmatmul.mubr.msk.bf16.gmra.mrb[32].mxu0 %vm1205_vm1, %v4877_v54 }
  0x96   : > { %4561 = vmatmul.mubr.msk.bf16.gmra.mrb[32].mxu1 %vm1205_vm1, %v4878_v55  ;;  %4462 = vmatprep.mubr.msk.bf16.mxu0 %vm4990_vm0, %v6649_v37  ;;  %v4917_v55 = vld [vmem:[%s5268_s8 + $0x1a0] sm:$0xff]  }
  0x97   : > { %4564 = vmatprep.mubr.msk.bf16.mxu1 %vm4990_vm0, %v6649_v37 }
  0x9d   : > { %4463 = vmatmul.mubr.msk.bf16.gmra.mrb[36].mxu0 %vm1205_vm1, %v4879_v56 }
  0x9e   : > { %4565 = vmatmul.mubr.msk.bf16.gmra.mrb[36].mxu1 %vm1205_vm1, %v4880_v57  ;;  %4466 = vmatprep.mubr.msk.bf16.mxu0 %vm4990_vm0, %v6649_v37 }
  0x9f   : > { %4568 = vmatprep.mubr.msk.bf16.mxu1 %vm4990_vm0, %v6649_v37 }
  0xa5   : > { %4467 = vmatmul.mubr.msk.bf16.gmra.mrb[40].mxu0 %vm1205_vm1, %v4881_v58 }
  0xa6   : > { %4569 = vmatmul.mubr.msk.bf16.gmra.mrb[40].mxu1 %vm1205_vm1, %v4882_v59  ;;  %4470 = vmatprep.mubr.msk.bf16.mxu0 %vm4990_vm0, %v6649_v37  ;;  %v4918_v59 = vld [vmem:[%s5268_s8 + $0x264] sm:$0xff]  }
  0xa7   : > { %4572 = vmatprep.mubr.msk.bf16.mxu1 %vm4990_vm0, %v6649_v37 }
  0xad   : > { %4471 = vmatmul.mubr.msk.bf16.gmra.mrb[44].mxu0 %vm1205_vm1, %v4883_v60 }
  0xae   : > { %4573 = vmatmul.mubr.msk.bf16.gmra.mrb[44].mxu1 %vm1205_vm1, %v4884_v61  ;;  %4474 = vmatprep.mubr.msk.bf16.mxu0 %vm4990_vm0, %v6649_v37 }
  0xaf   : > { %4576 = vmatprep.mubr.msk.bf16.mxu1 %vm4990_vm0, %v6649_v37 }
  0xb5   : > { %4475 = vmatmul.mubr.msk.bf16.gmra.mrb[48].mxu0 %vm1205_vm1, %v4885_v62 }
  0xb6   : > { %4577 = vmatmul.mubr.msk.bf16.gmra.mrb[48].mxu1 %vm1205_vm1, %v4886_v63  ;;  %4478 = vmatprep.mubr.msk.bf16.mxu0 %vm4990_vm0, %v6649_v37 }
  0xb7   : > { %4580 = vmatprep.mubr.msk.bf16.mxu1 %vm4990_vm0, %v6649_v37 }
  0xbd   : > { %4479 = vmatmul.mubr.msk.bf16.gmra.mrb[52].mxu0 %vm1205_vm1, %v4887_v0 }
  0xbe   : > { %4581 = vmatmul.mubr.msk.bf16.gmra.mrb[52].mxu1 %vm1205_vm1, %v4888_v1  ;;  %4482 = vmatprep.mubr.msk.bf16.mxu0 %vm4990_vm0, %v6649_v37 }
  0xbf   : > { %4584 = vmatprep.mubr.msk.bf16.mxu1 %vm4990_vm0, %v6649_v37 }
  0xc5   : > { %4483 = vmatmul.mubr.msk.bf16.gmra.mrb[56].mxu0 %vm1205_vm1, %v4889_v2 }
  0xc6   : > { %4585 = vmatmul.mubr.msk.bf16.gmra.mrb[56].mxu1 %vm1205_vm1, %v4890_v3  ;;  %4486 = vmatprep.mubr.msk.bf16.mxu0 %vm4990_vm0, %v6649_v37 }
  0xc7   : > { %4588 = vmatprep.mubr.msk.bf16.mxu1 %vm4990_vm0, %v6649_v37 }
  0xcd   : > { %4487 = vmatmul.mubr.msk.bf16.gmra.mrb[60].mxu0 %vm1205_vm1, %v4891_v4 }
  0xce   : > { %4589 = vmatmul.mubr.msk.bf16.gmra.mrb[60].mxu1 %vm1205_vm1, %v4892_v5  ;;  %4490 = vmatprep.mubr.msk.bf16.mxu0 %vm4990_vm0, %v6649_v37 }
  0xcf   : > { %4592 = vmatprep.mubr.msk.bf16.mxu1 %vm4990_vm0, %v6649_v37 }
  0xd5   : > { %4491 = vmatmul.mubr.msk.bf16.gmra.mrb[64].mxu0 %vm1205_vm1, %v4893_v6 }
  0xd6   : > { %4593 = vmatmul.mubr.msk.bf16.gmra.mrb[64].mxu1 %vm1205_vm1, %v4894_v7  ;;  %4494 = vmatprep.mubr.msk.bf16.mxu0 %vm4990_vm0, %v6649_v37 }
  0xd7   : > { %4596 = vmatprep.mubr.msk.bf16.mxu1 %vm4990_vm0, %v6649_v37 }
  0xdd   : > { %4495 = vmatmul.mubr.msk.bf16.gmra.mrb[68].mxu0 %vm1205_vm1, %v4895_v8 }
  0xde   : > { %4597 = vmatmul.mubr.msk.bf16.gmra.mrb[68].mxu1 %vm1205_vm1, %v4896_v9  ;;  %4498 = vmatprep.mubr.msk.bf16.mxu0 %vm4990_vm0, %v6649_v37 }
  0xdf   : > { %4600 = vmatprep.mubr.msk.bf16.mxu1 %vm4990_vm0, %v6649_v37 }
  0xe5   : > { %4499 = vmatmul.mubr.msk.bf16.gmra.mrb[72].mxu0 %vm1205_vm1, %v4897_v10 }
  0xe6   : > { %4601 = vmatmul.mubr.msk.bf16.gmra.mrb[72].mxu1 %vm1205_vm1, %v4898_v11  ;;  %4502 = vmatprep.mubr.msk.bf16.mxu0 %vm4990_vm0, %v6649_v37  ;;  %v4919_v11 = vld [vmem:[%s5268_s8 + $0x1a8] sm:$0xff]  }
  0xe7   : > { %4604 = vmatprep.mubr.msk.bf16.mxu1 %vm4990_vm0, %v6649_v37 }
  0xed   : > { %4503 = vmatmul.mubr.msk.bf16.gmra.mrb[76].mxu0 %vm1205_vm1, %v4899_v12 }
  0xee   : > { %4605 = vmatmul.mubr.msk.bf16.gmra.mrb[76].mxu1 %vm1205_vm1, %v4900_v13  ;;  %4506 = vmatprep.mubr.msk.bf16.mxu0 %vm4990_vm0, %v6649_v37 }
  0xef   : > { %4608 = vmatprep.mubr.msk.bf16.mxu1 %vm4990_vm0, %v6649_v37 }
  0xf5   : > { %4507 = vmatmul.mubr.msk.bf16.gmra.mrb[80].mxu0 %vm1205_vm1, %v4901_v14 }
  0xf6   : > { %4609 = vmatmul.mubr.msk.bf16.gmra.mrb[80].mxu1 %vm1205_vm1, %v4902_v15  ;;  %4510 = vmatprep.mubr.msk.bf16.mxu0 %vm4990_vm0, %v6649_v37  ;;  %v4920_v15 = vld [vmem:[%s5268_s8 + $0x26c] sm:$0xff]  }
  0xf7   : > { %4612 = vmatprep.mubr.msk.bf16.mxu1 %vm4990_vm0, %v6649_v37 }
  0xfd   : > { %4511 = vmatmul.mubr.msk.bf16.gmra.mrb[84].mxu0 %vm1205_vm1, %v4903_v16 }
  0xfe   : > { %4613 = vmatmul.mubr.msk.bf16.gmra.mrb[84].mxu1 %vm1205_vm1, %v4904_v17  ;;  %4514 = vmatprep.mubr.msk.bf16.mxu0 %vm4990_vm0, %v6649_v37 }
  0xff   : > { %4616 = vmatprep.mubr.msk.bf16.mxu1 %vm4990_vm0, %v6649_v37 }
 0x105   : > { %4515 = vmatmul.mubr.msk.bf16.gmra.mrb[88].mxu0 %vm1205_vm1, %v4905_v18 }
 0x106   : > { %4617 = vmatmul.mubr.msk.bf16.gmra.mrb[88].mxu1 %vm1205_vm1, %v4906_v19  ;;  %4518 = vmatprep.mubr.msk.bf16.mxu0 %vm4990_vm0, %v6649_v37 }
 0x107   : > { %4620 = vmatprep.mubr.msk.bf16.mxu1 %vm4990_vm0, %v6649_v37 }
 0x10d   : > { %4519 = vmatmul.mubr.msk.bf16.gmra.mrb[92].mxu0 %vm1205_vm1, %v4907_v20 }
 0x10e   : > { %4621 = vmatmul.mubr.msk.bf16.gmra.mrb[92].mxu1 %vm1205_vm1, %v4908_v21  ;;  %4522 = vmatprep.mubr.msk.bf16.mxu0 %vm4990_vm0, %v6649_v37 }
 0x10f   : > { %4624 = vmatprep.mubr.msk.bf16.mxu1 %vm4990_vm0, %v6649_v37 }
 0x115   : > { %4523 = vmatmul.mubr.msk.bf16.gmra.mrb[96].mxu0 %vm1205_vm1, %v4909_v22 }
 0x116   : > { %4625 = vmatmul.mubr.msk.bf16.gmra.mrb[96].mxu1 %vm1205_vm1, %v4910_v23  ;;  %4630 = vmatprep.mubr.msk.bf16.mxu0 %vm4990_vm0, %v6649_v37 }
 0x117   : > { %4732 = vmatprep.mubr.msk.bf16.mxu1 %vm4990_vm0, %v6649_v37 }
 0x11d   : > { %4631 = vmatmul.mubr.msk.bf16.vlgmr.msra.gmra.mrb[100].mxu0 %vm1205_vm1, %v4911_v24 }
 0x11e   : > { %4733 = vmatmul.mubr.msk.bf16.vlgmr.msra.gmra.mrb[100].mxu1 %vm1205_vm1, %v4912_v25  ;;  %4634 = vmatprep.mubr.msk.bf16.mxu0 %vm4990_vm0, %v6649_v37 }
 0x11f   : > { %4736 = vmatprep.mubr.msk.bf16.mxu1 %vm4990_vm0, %v6649_v37 }
 0x125   : > { %4635 = vmatmul.mubr.msk.bf16.gmra.mrb[104].mxu0 %vm1205_vm1, %v4913_v26 }
 0x126   : > { %4737 = vmatmul.mubr.msk.bf16.gmra.mrb[104].mxu1 %vm1205_vm1, %v4914_v27  ;;  %4638 = vmatprep.mubr.msk.bf16.mxu0 %vm4990_vm0, %v6649_v37 }
 0x127   : > { %4740 = vmatprep.mubr.msk.bf16.mxu1 %vm4990_vm0, %v6649_v37 }
 0x128   : > { %v1315_v30 = vpop.f32.mrb[0].mxu0 }
 0x129   : > { %v1519_v31 = vmul.f32 %v5485_v28, %v1315_v30  ;;  %v1905_v32 = vpop.f32.mrb[0].mxu1  ;;  %v4428_v33 = vpop.f32.mrb[1].mxu0 }
 0x12a   : > { %v2103_v35 = vmul.f32 %v5485_v28, %v1905_v32  ;;  %v4530_v36 = vpop.f32.mrb[1].mxu1  ;;  %v1318_v38 = vpop.f32.mrb[2].mxu0  ;;  %v4921_v33 = vld [vmem:[%s5268_s8 + $0x1b0] sm:$0xff]  }
 0x12b   : > { %v5501_v40 = vadd.f32 %v5494_v29, %v1519_v31  ;;  %v1520_v41 = vmul.f32 %v5485_v28, %v1318_v38  ;;  %v1908_v42 = vpop.f32.mrb[2].mxu1  ;;  %v4429_v43 = vpop.f32.mrb[3].mxu0  ;;  %v4922_v38 = vld [vmem:[%s5268_s8 + $0x274] sm:$0xff]  }
 0x12c   : > { %v5505_v44 = vadd.f32 %v5494_v29, %v2103_v35  ;;  %v2104_v45 = vmul.f32 %v5485_v28, %v1908_v42  ;;  %v4531_v46 = vpop.f32.mrb[3].mxu1 }
 0x12d   : > { %v5509_v47 = vadd.f32 %v5494_v29, %v1520_v41  ;;  %4639 = vmatmul.mubr.msk.bf16.gmra.mrb[108].mxu0 %vm1205_vm1, %v4915_v34 }
 0x12e   : > { %v5515_v49 = vadd.f32 %v5494_v29, %v2104_v45  ;;  %4741 = vmatmul.mubr.msk.bf16.gmra.mrb[108].mxu1 %vm1205_vm1, %v4916_v39  ;;  %4642 = vmatprep.mubr.msk.bf16.mxu0 %vm4990_vm0, %v6649_v37 }
 0x12f   : > { %4744 = vmatprep.mubr.msk.bf16.mxu1 %vm4990_vm0, %v6649_v37 }
 0x130   : > { %v1323_v51 = vpop.f32.mrb[4].mxu0 }
 0x131   : > { %v1521_v52 = vmul.f32 %v5485_v28, %v1323_v51  ;;  %v1913_v53 = vpop.f32.mrb[4].mxu1  ;;  %v4432_v54 = vpop.f32.mrb[5].mxu0 }
 0x132   : > { %v2105_v56 = vmul.f32 %v5485_v28, %v1913_v53  ;;  %v4534_v57 = vpop.f32.mrb[5].mxu1  ;;  %v1326_v58 = vpop.f32.mrb[6].mxu0 }
 0x133   : > { %v5529_v60 = vadd.f32 %v5494_v29, %v1521_v52  ;;  %v1522_v61 = vmul.f32 %v5485_v28, %v1326_v58  ;;  %v1916_v62 = vpop.f32.mrb[6].mxu1  ;;  %v4433_v63 = vpop.f32.mrb[7].mxu0 }
 0x134   : > { %v5533_v0 = vadd.f32 %v5494_v29, %v2105_v56  ;;  %v2106_v1 = vmul.f32 %v5485_v28, %v1916_v62  ;;  %v4535_v2 = vpop.f32.mrb[7].mxu1 }
 0x135   : > { %v5537_v3 = vadd.f32 %v5494_v29, %v1522_v61  ;;  %4643 = vmatmul.mubr.msk.bf16.gmra.mrb[112].mxu0 %vm1205_vm1, %v4917_v55  ;;  %v4923_v61 = vld [vmem:[%s5268_s8 + $0x1b8] sm:$0xff]  }
 0x136   : > { %v5543_v5 = vadd.f32 %v5494_v29, %v2106_v1  ;;  %4745 = vmatmul.mubr.msk.bf16.gmra.mrb[112].mxu1 %vm1205_vm1, %v4918_v59  ;;  %4646 = vmatprep.mubr.msk.bf16.mxu0 %vm4990_vm0, %v6649_v37  ;;  %v4924_v2 = vld [vmem:[%s5268_s8 + $0x27c] sm:$0xff]  }
 0x137   : > { %4748 = vmatprep.mubr.msk.bf16.mxu1 %vm4990_vm0, %v6649_v37 }
 0x138   : > { %v1331_v7 = vpop.f32.mrb[8].mxu0 }
 0x139   : > { %v1523_v8 = vmul.f32 %v5485_v28, %v1331_v7  ;;  %v1921_v9 = vpop.f32.mrb[8].mxu1  ;;  %v4436_v10 = vpop.f32.mrb[9].mxu0 }
 0x13a   : > { %v2107_v12 = vmul.f32 %v5485_v28, %v1921_v9  ;;  %v4538_v13 = vpop.f32.mrb[9].mxu1  ;;  %v1334_v14 = vpop.f32.mrb[10].mxu0 }
 0x13b   : > { %v5557_v16 = vadd.f32 %v5494_v29, %v1523_v8  ;;  %v1524_v17 = vmul.f32 %v5485_v28, %v1334_v14  ;;  %v1924_v18 = vpop.f32.mrb[10].mxu1  ;;  %v4437_v19 = vpop.f32.mrb[11].mxu0 }
 0x13c   : > { %v5561_v20 = vadd.f32 %v5494_v29, %v2107_v12  ;;  %v2108_v21 = vmul.f32 %v5485_v28, %v1924_v18  ;;  %v4539_v22 = vpop.f32.mrb[11].mxu1 }
 0x13d   : > { %v5565_v23 = vadd.f32 %v5494_v29, %v1524_v17  ;;  %4647 = vmatmul.mubr.msk.bf16.gmra.mrb[116].mxu0 %vm1205_vm1, %v4919_v11 }
 0x13e   : > { %v5571_v25 = vadd.f32 %v5494_v29, %v2108_v21  ;;  %4749 = vmatmul.mubr.msk.bf16.gmra.mrb[116].mxu1 %vm1205_vm1, %v4920_v15  ;;  %4650 = vmatprep.mubr.msk.bf16.mxu0 %vm4990_vm0, %v6649_v37 }
 0x13f   : > { %4752 = vmatprep.mubr.msk.bf16.mxu1 %vm4990_vm0, %v6649_v37 }
 0x140   : > { %v1339_v27 = vpop.f32.mrb[12].mxu0 }
 0x141   : > { %v1525_v30 = vmul.f32 %v5485_v28, %v1339_v27  ;;  %v1929_v31 = vpop.f32.mrb[12].mxu1  ;;  %v4440_v32 = vpop.f32.mrb[13].mxu0 }
 0x142   : > { %v2109_v34 = vmul.f32 %v5485_v28, %v1929_v31  ;;  %v4542_v35 = vpop.f32.mrb[13].mxu1  ;;  %v1342_v36 = vpop.f32.mrb[14].mxu0 }
 0x143   : > { %v5585_v39 = vadd.f32 %v5494_v29, %v1525_v30  ;;  %v1526_v41 = vmul.f32 %v5485_v28, %v1342_v36  ;;  %v1932_v42 = vpop.f32.mrb[14].mxu1  ;;  %v4441_v43 = vpop.f32.mrb[15].mxu0  ;;  %v4925_v30 = vld [vmem:[%s5268_s8 + $0x1c0] sm:$0xff]  }
 0x144   : > { %v5589_v45 = vadd.f32 %v5494_v29, %v2109_v34  ;;  %v2110_v46 = vmul.f32 %v5485_v28, %v1932_v42  ;;  %v4543_v51 = vpop.f32.mrb[15].mxu1  ;;  %v4926_v34 = vld [vmem:[%s5268_s8 + $0x284] sm:$0xff]  }
 0x145   : > { %v5593_v52 = vadd.f32 %v5494_v29, %v1526_v41  ;;  %4651 = vmatmul.mubr.msk.bf16.gmra.mrb[120].mxu0 %vm1205_vm1, %v4921_v33 }
 0x146   : > { %v5599_v54 = vadd.f32 %v5494_v29, %v2110_v46  ;;  %4753 = vmatmul.mubr.msk.bf16.gmra.mrb[120].mxu1 %vm1205_vm1, %v4922_v38  ;;  %4654 = vmatprep.mubr.msk.bf16.mxu0 %vm4990_vm0, %v6649_v37 }
 0x147   : > { %4756 = vmatprep.mubr.msk.bf16.mxu1 %vm4990_vm0, %v6649_v37 }
 0x148   : > { %v1347_v56 = vpop.f32.mrb[16].mxu0 }
 0x149   : > { %v1527_v57 = vmul.f32 %v5485_v28, %v1347_v56  ;;  %v1937_v58 = vpop.f32.mrb[16].mxu1  ;;  %v4444_v59 = vpop.f32.mrb[17].mxu0 }
 0x14a   : > { %v2111_v62 = vmul.f32 %v5485_v28, %v1937_v58  ;;  %v4546_v63 = vpop.f32.mrb[17].mxu1  ;;  %v1350_v1 = vpop.f32.mrb[18].mxu0 }
 0x14b   : > { %v5613_v7 = vadd.f32 %v5494_v29, %v1527_v57  ;;  %v1528_v8 = vmul.f32 %v5485_v28, %v1350_v1  ;;  %v1940_v9 = vpop.f32.mrb[18].mxu1  ;;  %v4445_v10 = vpop.f32.mrb[19].mxu0  ;;  %v4927_v1 = vld [vmem:[%s5268_s8 + $0x1c8] sm:$0xff]  }
 0x14c   : > { %v5617_v11 = vadd.f32 %v5494_v29, %v2111_v62  ;;  %v2112_v12 = vmul.f32 %v5485_v28, %v1940_v9  ;;  %v4547_v13 = vpop.f32.mrb[19].mxu1  ;;  %v4928_v10 = vld [vmem:[%s5268_s8 + $0x28c] sm:$0xff]  }
 0x14d   : > { %v5621_v14 = vadd.f32 %v5494_v29, %v1528_v8  ;;  %4655 = vmatmul.mubr.msk.bf16.gmra.mrb[124].mxu0 %vm1205_vm1, %v4923_v61 }
 0x14e   : > { %v5627_v17 = vadd.f32 %v5494_v29, %v2112_v12  ;;  %4757 = vmatmul.mubr.msk.bf16.gmra.mrb[124].mxu1 %vm1205_vm1, %v4924_v2  ;;  %4658 = vmatprep.mubr.msk.bf16.mxu0 %vm4990_vm0, %v6649_v37 }
 0x14f   : > { %4760 = vmatprep.mubr.msk.bf16.mxu1 %vm4990_vm0, %v6649_v37 }
 0x150   : > { %v1355_v19 = vpop.f32.mrb[20].mxu0 }
 0x151   : > { %v1529_v21 = vmul.f32 %v5485_v28, %v1355_v19  ;;  %v1945_v22 = vpop.f32.mrb[20].mxu1  ;;  %v4448_v27 = vpop.f32.mrb[21].mxu0 }
 0x152   : > { %v2113_v31 = vmul.f32 %v5485_v28, %v1945_v22  ;;  %v4550_v32 = vpop.f32.mrb[21].mxu1  ;;  %v1358_v33 = vpop.f32.mrb[22].mxu0 }
 0x153   : > { %v5641_v35 = vadd.f32 %v5494_v29, %v1529_v21  ;;  %v1530_v36 = vmul.f32 %v5485_v28, %v1358_v33  ;;  %v1948_v38 = vpop.f32.mrb[22].mxu1  ;;  %v4449_v41 = vpop.f32.mrb[23].mxu0 }
 0x154   : > { %v5645_v42 = vadd.f32 %v5494_v29, %v2113_v31  ;;  %v2114_v43 = vmul.f32 %v5485_v28, %v1948_v38  ;;  %v4551_v46 = vpop.f32.mrb[23].mxu1 }
 0x155   : > { %v5649_v51 = vadd.f32 %v5494_v29, %v1530_v36  ;;  %4659 = vmatmul.mubr.msk.bf16.gmra.mrb[128].mxu0 %vm1205_vm1, %v4925_v30  ;;  %v4929_v46 = vld [vmem:[%s5268_s8 + $0x1d0] sm:$0xff]  }
 0x156   : > { %v5655_v57 = vadd.f32 %v5494_v29, %v2114_v43  ;;  %4761 = vmatmul.mubr.msk.bf16.gmra.mrb[128].mxu1 %vm1205_vm1, %v4926_v34  ;;  %4662 = vmatprep.mubr.msk.bf16.mxu0 %vm4990_vm0, %v6649_v37 }
 0x157   : > { %4764 = vmatprep.mubr.msk.bf16.mxu1 %vm4990_vm0, %v6649_v37 }
 0x158   : > { %v1363_v59 = vpop.f32.mrb[24].mxu0 }
 0x159   : > { %v1531_v61 = vmul.f32 %v5485_v28, %v1363_v59  ;;  %v1953_v62 = vpop.f32.mrb[24].mxu1  ;;  %v4452_v63 = vpop.f32.mrb[25].mxu0 }
 0x15a   : > { %v2115_v2 = vmul.f32 %v5485_v28, %v1953_v62  ;;  %v4554_v8 = vpop.f32.mrb[25].mxu1  ;;  %v1366_v9 = vpop.f32.mrb[26].mxu0  ;;  %v4930_v63 = vld [vmem:[%s5268_s8 + $0x294] sm:$0xff]  }
 0x15b   : > { %v5669_v12 = vadd.f32 %v5494_v29, %v1531_v61  ;;  %v1532_v13 = vmul.f32 %v5485_v28, %v1366_v9  ;;  %v1956_v19 = vpop.f32.mrb[26].mxu1  ;;  %v4453_v21 = vpop.f32.mrb[27].mxu0 }
 0x15c   : > { %v5673_v22 = vadd.f32 %v5494_v29, %v2115_v2  ;;  %v2116_v27 = vmul.f32 %v5485_v28, %v1956_v19  ;;  %v4555_v30 = vpop.f32.mrb[27].mxu1 }
 0x15d   : > { %v5677_v31 = vadd.f32 %v5494_v29, %v1532_v13  ;;  %4663 = vmatmul.mubr.msk.bf16.gmra.mrb[132].mxu0 %vm1205_vm1, %v4927_v1 }
 0x15e   : > { %v5683_v33 = vadd.f32 %v5494_v29, %v2116_v27  ;;  %4765 = vmatmul.mubr.msk.bf16.gmra.mrb[132].mxu1 %vm1205_vm1, %v4928_v10  ;;  %4666 = vmatprep.mubr.msk.bf16.mxu0 %vm4990_vm0, %v6649_v37 }
 0x15f   : > { %4768 = vmatprep.mubr.msk.bf16.mxu1 %vm4990_vm0, %v6649_v37 }
 0x160   : > { %v1371_v36 = vpop.f32.mrb[28].mxu0 }
 0x161   : > { %v1533_v38 = vmul.f32 %v5485_v28, %v1371_v36  ;;  %v1961_v41 = vpop.f32.mrb[28].mxu1  ;;  %v4456_v43 = vpop.f32.mrb[29].mxu0 }
 0x162   : > { %v2117_v59 = vmul.f32 %v5485_v28, %v1961_v41  ;;  %v4558_v61 = vpop.f32.mrb[29].mxu1  ;;  %v1374_v62 = vpop.f32.mrb[30].mxu0 }
 0x163   : > { %v5697_v1 = vadd.f32 %v5494_v29, %v1533_v38  ;;  %v1534_v2 = vmul.f32 %v5485_v28, %v1374_v62  ;;  %v1964_v8 = vpop.f32.mrb[30].mxu1  ;;  %v4457_v9 = vpop.f32.mrb[31].mxu0 }
 0x164   : > { %v5701_v10 = vadd.f32 %v5494_v29, %v2117_v59  ;;  %v2118_v13 = vmul.f32 %v5485_v28, %v1964_v8  ;;  %v4559_v19 = vpop.f32.mrb[31].mxu1  ;;  %v4931_v59 = vld [vmem:[%s5268_s8 + $0x1d8] sm:$0xff]  }
 0x165   : > { %v5705_v21 = vadd.f32 %v5494_v29, %v1534_v2  ;;  %4667 = vmatmul.mubr.msk.bf16.gmra.mrb[136].mxu0 %vm1205_vm1, %v4929_v46 }
 0x166   : > { %v5711_v30 = vadd.f32 %v5494_v29, %v2118_v13  ;;  %4769 = vmatmul.mubr.msk.bf16.gmra.mrb[136].mxu1 %vm1205_vm1, %v4930_v63  ;;  %4670 = vmatprep.mubr.msk.bf16.mxu0 %vm4990_vm0, %v6649_v37  ;;  %v4932_v63 = vld [vmem:[%s5268_s8 + $0x29c] sm:$0xff]  }
 0x167   : > { %4772 = vmatprep.mubr.msk.bf16.mxu1 %vm4990_vm0, %v6649_v37 }
 0x168   : > { %v1379_v38 = vpop.f32.mrb[32].mxu0 }
 0x169   : > { %v1535_v41 = vmul.f32 %v5485_v28, %v1379_v38  ;;  %v1969_v43 = vpop.f32.mrb[32].mxu1  ;;  %v4460_v46 = vpop.f32.mrb[33].mxu0 }
 0x16a   : > { %v2119_v61 = vmul.f32 %v5485_v28, %v1969_v43  ;;  %v4562_v62 = vpop.f32.mrb[33].mxu1  ;;  %v1382_v2 = vpop.f32.mrb[34].mxu0 }
 0x16b   : > { %v5725_v8 = vadd.f32 %v5494_v29, %v1535_v41  ;;  %v1536_v9 = vmul.f32 %v5485_v28, %v1382_v2  ;;  %v1972_v13 = vpop.f32.mrb[34].mxu1  ;;  %v4461_v19 = vpop.f32.mrb[35].mxu0 }
 0x16c   : > { %v5729_v36 = vadd.f32 %v5494_v29, %v2119_v61  ;;  %v2120_v38 = vmul.f32 %v5485_v28, %v1972_v13  ;;  %v4563_v46 = vpop.f32.mrb[35].mxu1  ;;  %v4933_v13 = vld [vmem:[%s5268_s8 + $0x1e0] sm:$0xff]  }
 0x16d   : > { %v5733_v27 = vadd.f32 %v5494_v29, %v1536_v9  ;;  %4671 = vmatmul.mubr.msk.bf16.gmra.mrb[140].mxu0 %vm1205_vm1, %v4931_v59 }
 0x16e   : > { %v5739_v43 = vadd.f32 %v5494_v29, %v2120_v38  ;;  %4773 = vmatmul.mubr.msk.bf16.gmra.mrb[140].mxu1 %vm1205_vm1, %v4932_v63  ;;  %4674 = vmatprep.mubr.msk.bf16.mxu0 %vm4990_vm0, %v6649_v37  ;;  %v4934_v63 = vld [vmem:[%s5268_s8 + $0x2a4] sm:$0xff]  }
 0x16f   : > { %4776 = vmatprep.mubr.msk.bf16.mxu1 %vm4990_vm0, %v6649_v37 }
 0x170   : > { %v1387_v62 = vpop.f32.mrb[36].mxu0 }
 0x171   : > { %v1537_v59 = vmul.f32 %v5485_v28, %v1387_v62  ;;  %v1977_v2 = vpop.f32.mrb[36].mxu1  ;;  %v4464_v9 = vpop.f32.mrb[37].mxu0 }
 0x172   : > { %v2121_v19 = vmul.f32 %v5485_v28, %v1977_v2  ;;  %v4566_v38 = vpop.f32.mrb[37].mxu1  ;;  %v1390_v46 = vpop.f32.mrb[38].mxu0 }
 0x173   : > { %v5753_v41 = vadd.f32 %v5494_v29, %v1537_v59  ;;  %v1538_v34 = vmul.f32 %v5485_v28, %v1390_v46  ;;  %v1980_v32 = vpop.f32.mrb[38].mxu1  ;;  %v4465_v58 = vpop.f32.mrb[39].mxu0  ;;  %v4935_v38 = vld [vmem:[%s5268_s8 + $0x1e8] sm:$0xff]  }
 0x174   : > { %v5757_v61 = vadd.f32 %v5494_v29, %v2121_v19  ;;  %v2122_v62 = vmul.f32 %v5485_v28, %v1980_v32  ;;  %v4567_v9 = vpop.f32.mrb[39].mxu1 }
 0x175   : > { %v5761_v56 = vadd.f32 %v5494_v29, %v1538_v34  ;;  %4675 = vmatmul.mubr.msk.bf16.gmra.mrb[144].mxu0 %vm1205_vm1, %v4933_v13 }
 0x176   : > { %v5767_v2 = vadd.f32 %v5494_v29, %v2122_v62  ;;  %4777 = vmatmul.mubr.msk.bf16.gmra.mrb[144].mxu1 %vm1205_vm1, %v4934_v63  ;;  %4678 = vmatprep.mubr.msk.bf16.mxu0 %vm4990_vm0, %v6649_v37  ;;  %v4936_v63 = vld [vmem:[%s5268_s8 + $0x2ac] sm:$0xff]  }
 0x177   : > { %4780 = vmatprep.mubr.msk.bf16.mxu1 %vm4990_vm0, %v6649_v37 }
 0x178   : > { %v1395_v32 = vpop.f32.mrb[40].mxu0 }
 0x179   : > { %v1539_v34 = vmul.f32 %v5485_v28, %v1395_v32  ;;  %v1985_v13 = vpop.f32.mrb[40].mxu1  ;;  %v4468_v19 = vpop.f32.mrb[41].mxu0 }
 0x17a   : > { %v2123_v46 = vmul.f32 %v5485_v28, %v1985_v13  ;;  %v4570_v62 = vpop.f32.mrb[41].mxu1  ;;  %v1398_v9 = vpop.f32.mrb[42].mxu0 }
 0x17b   : > { %v5781_v59 = vadd.f32 %v5494_v29, %v1539_v34  ;;  %v1540_v18 = vmul.f32 %v5485_v28, %v1398_v9  ;;  %v1988_v15 = vpop.f32.mrb[42].mxu1  ;;  %v4469_v55 = vpop.f32.mrb[43].mxu0  ;;  %v4937_v62 = vld [vmem:[%s5268_s8 + $0x1f0] sm:$0xff]  }
 0x17c   : > { %v5785_v58 = vadd.f32 %v5494_v29, %v2123_v46  ;;  %v2124_v32 = vmul.f32 %v5485_v28, %v1988_v15  ;;  %v4571_v19 = vpop.f32.mrb[43].mxu1 }
 0x17d   : > { %v5789_v53 = vadd.f32 %v5494_v29, %v1540_v18  ;;  %4679 = vmatmul.mubr.msk.bf16.gmra.mrb[148].mxu0 %vm1205_vm1, %v4935_v38 }
 0x17e   : > { %v5795_v13 = vadd.f32 %v5494_v29, %v2124_v32  ;;  %4781 = vmatmul.mubr.msk.bf16.gmra.mrb[148].mxu1 %vm1205_vm1, %v4936_v63  ;;  %4682 = vmatprep.mubr.msk.bf16.mxu0 %vm4990_vm0, %v6649_v37  ;;  %v4938_v63 = vld [vmem:[%s5268_s8 + $0x2b4] sm:$0xff]  }
 0x17f   : > { %4784 = vmatprep.mubr.msk.bf16.mxu1 %vm4990_vm0, %v6649_v37 }
 0x180   : > { %v1403_v15 = vpop.f32.mrb[44].mxu0 }
 0x181   : > { %v1541_v18 = vmul.f32 %v5485_v28, %v1403_v15  ;;  %v1993_v38 = vpop.f32.mrb[44].mxu1  ;;  %v4472_v46 = vpop.f32.mrb[45].mxu0 }
 0x182   : > { %v2125_v9 = vmul.f32 %v5485_v28, %v1993_v38  ;;  %v4574_v32 = vpop.f32.mrb[45].mxu1  ;;  %v1406_v19 = vpop.f32.mrb[46].mxu0 }
 0x183   : > { %v5809_v34 = vadd.f32 %v5494_v29, %v1541_v18  ;;  %v1542_v26 = vmul.f32 %v5485_v28, %v1406_v19  ;;  %v1996_v24 = vpop.f32.mrb[46].mxu1  ;;  %v4473_v6 = vpop.f32.mrb[47].mxu0  ;;  %v4939_v32 = vld [vmem:[%s5268_s8 + $0x1f8] sm:$0xff]  }
 0x184   : > { %v5813_v55 = vadd.f32 %v5494_v29, %v2125_v9  ;;  %v2126_v15 = vmul.f32 %v5485_v28, %v1996_v24  ;;  %v4575_v46 = vpop.f32.mrb[47].mxu1 }
 0x185   : > { %v5817_v4 = vadd.f32 %v5494_v29, %v1542_v26  ;;  %4683 = vmatmul.mubr.msk.bf16.gmra.mrb[152].mxu0 %vm1205_vm1, %v4937_v62 }
 0x186   : > { %6704 = vst [vmem:[#allocation3_spill] sm:$0xff] %v5813_v55  ;;  %v5823_v38 = vadd.f32 %v5494_v29, %v2126_v15  ;;  %4785 = vmatmul.mubr.msk.bf16.gmra.mrb[152].mxu1 %vm1205_vm1, %v4938_v63  ;;  %4686 = vmatprep.mubr.msk.bf16.mxu0 %vm4990_vm0, %v6649_v37  ;;  %v4940_v63 = vld [vmem:[%s5268_s8 + $0x2bc] sm:$0xff]  }
 0x187   : > { %6705 = vst [vmem:[#allocation4_spill] sm:$0xff] %v5817_v4  ;;  %4788 = vmatprep.mubr.msk.bf16.mxu1 %vm4990_vm0, %v6649_v37 }
 0x188   : > { %6706 = vst [vmem:[#allocation5_spill] sm:$0xff] %v5823_v38  ;;  %v1411_v24 = vpop.f32.mrb[48].mxu0 }
 0x189   : > { %v1543_v26 = vmul.f32 %v5485_v28, %v1411_v24  ;;  %v2001_v62 = vpop.f32.mrb[48].mxu1  ;;  %v4476_v9 = vpop.f32.mrb[49].mxu0 }
 0x18a   : > { %v2127_v19 = vmul.f32 %v5485_v28, %v2001_v62  ;;  %v4578_v15 = vpop.f32.mrb[49].mxu1  ;;  %v1414_v46 = vpop.f32.mrb[50].mxu0 }
 0x18b   : > { %v5837_v18 = vadd.f32 %v5494_v29, %v1543_v26  ;;  %v1544_v50 = vmul.f32 %v5485_v28, %v1414_v46  ;;  %v2004_v48 = vpop.f32.mrb[50].mxu1  ;;  %v4477_v37 = vpop.f32.mrb[51].mxu0  ;;  %v4941_v46 = vld [vmem:[%s5268_s8 + $0x200] sm:$0xff]  }
 0x18c   : > { %v5841_v6 = vadd.f32 %v5494_v29, %v2127_v19  ;;  %v2128_v24 = vmul.f32 %v5485_v28, %v2004_v48  ;;  %v4579_v9 = vpop.f32.mrb[51].mxu1  ;;  %v6711_v37 = vmov 0.0  }
 0x18d   : > { %6707 = vst [vmem:[#allocation6_spill] sm:$0xff] %v5837_v18  ;;  %v5845_v38 = vadd.f32 %v5494_v29, %v1544_v50  ;;  %4687 = vmatmul.mubr.msk.bf16.gmra.mrb[156].mxu0 %vm1205_vm1, %v4939_v32 }
 0x18e   : > { %6708 = vst [vmem:[#allocation7_spill] sm:$0xff] %v5841_v6  ;;  %v5851_v62 = vadd.f32 %v5494_v29, %v2128_v24  ;;  %4789 = vmatmul.mubr.msk.bf16.gmra.mrb[156].mxu1 %vm1205_vm1, %v4940_v63  ;;  %4690 = vmatprep.mubr.msk.bf16.mxu0 %vm4990_vm0, %v6711_v37  ;;  %v4942_v63 = vld [vmem:[%s5268_s8 + $0x2c4] sm:$0xff]  }
 0x18f   : > { %6709 = vst [vmem:[#allocation8_spill] sm:$0xff] %v5845_v38  ;;  %4792 = vmatprep.mubr.msk.bf16.mxu1 %vm4990_vm0, %v6711_v37 }
 0x190   : > { %6710 = vst [vmem:[#allocation9_spill] sm:$0xff] %v5851_v62  ;;  %v1419_v50 = vpop.f32.mrb[52].mxu0 }
 0x191   : > { %v1545_v32 = vmul.f32 %v5485_v28, %v1419_v50  ;;  %v2009_v19 = vpop.f32.mrb[52].mxu1  ;;  %v4480_v15 = vpop.f32.mrb[53].mxu0 }
 0x192   : > { %v2129_v24 = vmul.f32 %v5485_v28, %v2009_v19  ;;  %v4582_v9 = vpop.f32.mrb[53].mxu1  ;;  %v1422_v26 = vpop.f32.mrb[54].mxu0 }
 0x193   : > { %v5865_v6 = vadd.f32 %v5494_v29, %v1545_v32  ;;  %v1546_v18 = vmul.f32 %v5485_v28, %v1422_v26  ;;  %v2012_v4 = vpop.f32.mrb[54].mxu1  ;;  %v4481_v55 = vpop.f32.mrb[55].mxu0 }
 0x194   : > { %v5869_v48 = vadd.f32 %v5494_v29, %v2129_v24  ;;  %v2130_v50 = vmul.f32 %v5485_v28, %v2012_v4  ;;  %v4583_v15 = vpop.f32.mrb[55].mxu1  ;;  %v4943_v24 = vld [vmem:[%s5268_s8 + $0x208] sm:$0xff]  }
 0x195   : > { %6712 = vst [vmem:[#allocation10_spill] sm:$0xff] %v5865_v6  ;;  %v5873_v62 = vadd.f32 %v5494_v29, %v1546_v18  ;;  %4691 = vmatmul.mubr.msk.bf16.gmra.mrb[160].mxu0 %vm1205_vm1, %v4941_v46 }
 0x196   : > { %6713 = vst [vmem:[#allocation11_spill] sm:$0xff] %v5869_v48  ;;  %v5879_v26 = vadd.f32 %v5494_v29, %v2130_v50  ;;  %4793 = vmatmul.mubr.msk.bf16.gmra.mrb[160].mxu1 %vm1205_vm1, %v4942_v63  ;;  %4694 = vmatprep.mubr.msk.bf16.mxu0 %vm4990_vm0, %v6711_v37  ;;  %v4944_v63 = vld [vmem:[%s5268_s8 + $0x2cc] sm:$0xff]  }
 0x197   : > { %6714 = vst [vmem:[#allocation12_spill] sm:$0xff] %v5873_v62  ;;  %4796 = vmatprep.mubr.msk.bf16.mxu1 %vm4990_vm0, %v6711_v37 }
 0x198   : > { %6715 = vst [vmem:[#allocation13_spill] sm:$0xff] %v5879_v26  ;;  %v1427_v55 = vpop.f32.mrb[56].mxu0 }
 0x199   : > { %v1547_v18 = vmul.f32 %v5485_v28, %v1427_v55  ;;  %v2017_v19 = vpop.f32.mrb[56].mxu1  ;;  %v4484_v46 = vpop.f32.mrb[57].mxu0 }
 0x19a   : > { %v2131_v9 = vmul.f32 %v5485_v28, %v2017_v19  ;;  %v4586_v50 = vpop.f32.mrb[57].mxu1  ;;  %v1430_v15 = vpop.f32.mrb[58].mxu0 }
 0x19b   : > { %v5893_v32 = vadd.f32 %v5494_v29, %v1547_v18  ;;  %v1548_v48 = vmul.f32 %v5485_v28, %v1430_v15  ;;  %v2020_v6 = vpop.f32.mrb[58].mxu1  ;;  %v4485_v38 = vpop.f32.mrb[59].mxu0  ;;  %v4945_v50 = vld [vmem:[%s5268_s8 + $0x210] sm:$0xff]  }
 0x19c   : > { %v5897_v4 = vadd.f32 %v5494_v29, %v2131_v9  ;;  %v2132_v55 = vmul.f32 %v5485_v28, %v2020_v6  ;;  %v4587_v46 = vpop.f32.mrb[59].mxu1 }
 0x19d   : > { %6716 = vst [vmem:[#allocation14_spill] sm:$0xff] %v5893_v32  ;;  %v5901_v26 = vadd.f32 %v5494_v29, %v1548_v48  ;;  %4695 = vmatmul.mubr.msk.bf16.gmra.mrb[164].mxu0 %vm1205_vm1, %v4943_v24 }
 0x19e   : > { %6717 = vst [vmem:[#allocation15_spill] sm:$0xff] %v5897_v4  ;;  %v5907_v19 = vadd.f32 %v5494_v29, %v2132_v55  ;;  %4797 = vmatmul.mubr.msk.bf16.gmra.mrb[164].mxu1 %vm1205_vm1, %v4944_v63  ;;  %4698 = vmatprep.mubr.msk.bf16.mxu0 %vm4990_vm0, %v6711_v37  ;;  %v4946_v63 = vld [vmem:[%s5268_s8 + $0x2d4] sm:$0xff]  }
 0x19f   : > { %6718 = vst [vmem:[#allocation16_spill] sm:$0xff] %v5901_v26  ;;  %4800 = vmatprep.mubr.msk.bf16.mxu1 %vm4990_vm0, %v6711_v37 }
 0x1a0   : > { %6719 = vst [vmem:[#allocation17_spill] sm:$0xff] %v5907_v19  ;;  %v1435_v6 = vpop.f32.mrb[60].mxu0 }
 0x1a1   : > { %v1549_v48 = vmul.f32 %v5485_v28, %v1435_v6  ;;  %v2025_v24 = vpop.f32.mrb[60].mxu1  ;;  %v4488_v9 = vpop.f32.mrb[61].mxu0 }
 0x1a2   : > { %v2133_v15 = vmul.f32 %v5485_v28, %v2025_v24  ;;  %v4590_v55 = vpop.f32.mrb[61].mxu1  ;;  %v1438_v46 = vpop.f32.mrb[62].mxu0 }
 0x1a3   : > { %v5921_v18 = vadd.f32 %v5494_v29, %v1549_v48  ;;  %v1550_v4 = vmul.f32 %v5485_v28, %v1438_v46  ;;  %v2028_v32 = vpop.f32.mrb[62].mxu1  ;;  %v4489_v62 = vpop.f32.mrb[63].mxu0  ;;  %v4947_v55 = vld [vmem:[%s5268_s8 + $0x218] sm:$0xff]  }
 0x1a4   : > { %v5925_v38 = vadd.f32 %v5494_v29, %v2133_v15  ;;  %v2134_v6 = vmul.f32 %v5485_v28, %v2028_v32  ;;  %v4591_v9 = vpop.f32.mrb[63].mxu1 }
 0x1a5   : > { %6720 = vst [vmem:[#allocation18_spill] sm:$0xff] %v5921_v18  ;;  %v5929_v19 = vadd.f32 %v5494_v29, %v1550_v4  ;;  %4699 = vmatmul.mubr.msk.bf16.gmra.mrb[168].mxu0 %vm1205_vm1, %v4945_v50 }
 0x1a6   : > { %6721 = vst [vmem:[#allocation19_spill] sm:$0xff] %v5925_v38  ;;  %v5935_v24 = vadd.f32 %v5494_v29, %v2134_v6  ;;  %4801 = vmatmul.mubr.msk.bf16.gmra.mrb[168].mxu1 %vm1205_vm1, %v4946_v63  ;;  %4702 = vmatprep.mubr.msk.bf16.mxu0 %vm4990_vm0, %v6711_v37  ;;  %v4948_v63 = vld [vmem:[%s5268_s8 + $0x2dc] sm:$0xff]  }
 0x1a7   : > { %6722 = vst [vmem:[#allocation20_spill] sm:$0xff] %v5929_v19  ;;  %4804 = vmatprep.mubr.msk.bf16.mxu1 %vm4990_vm0, %v6711_v37 }
 0x1a8   : > { %6723 = vst [vmem:[#allocation21_spill] sm:$0xff] %v5935_v24  ;;  %v1443_v32 = vpop.f32.mrb[64].mxu0 }
 0x1a9   : > { %v1551_v4 = vmul.f32 %v5485_v28, %v1443_v32  ;;  %v2033_v50 = vpop.f32.mrb[64].mxu1  ;;  %v4492_v15 = vpop.f32.mrb[65].mxu0 }
 0x1aa   : > { %v2135_v46 = vmul.f32 %v5485_v28, %v2033_v50  ;;  %v4594_v6 = vpop.f32.mrb[65].mxu1  ;;  %v1446_v9 = vpop.f32.mrb[66].mxu0 }
 0x1ab   : > { %v5949_v48 = vadd.f32 %v5494_v29, %v1551_v4  ;;  %v1552_v38 = vmul.f32 %v5485_v28, %v1446_v9  ;;  %v2036_v18 = vpop.f32.mrb[66].mxu1  ;;  %v4493_v26 = vpop.f32.mrb[67].mxu0  ;;  %v4949_v6 = vld [vmem:[%s5268_s8 + $0x220] sm:$0xff]  }
 0x1ac   : > { %v5953_v62 = vadd.f32 %v5494_v29, %v2135_v46  ;;  %v2136_v32 = vmul.f32 %v5485_v28, %v2036_v18  ;;  %v4595_v15 = vpop.f32.mrb[67].mxu1 }
 0x1ad   : > { %6724 = vst [vmem:[#allocation22_spill] sm:$0xff] %v5949_v48  ;;  %v5957_v24 = vadd.f32 %v5494_v29, %v1552_v38  ;;  %4703 = vmatmul.mubr.msk.bf16.gmra.mrb[172].mxu0 %vm1205_vm1, %v4947_v55 }
 0x1ae   : > { %6725 = vst [vmem:[#allocation23_spill] sm:$0xff] %v5953_v62  ;;  %v5963_v50 = vadd.f32 %v5494_v29, %v2136_v32  ;;  %4805 = vmatmul.mubr.msk.bf16.gmra.mrb[172].mxu1 %vm1205_vm1, %v4948_v63  ;;  %4706 = vmatprep.mubr.msk.bf16.mxu0 %vm4990_vm0, %v6711_v37  ;;  %v4950_v63 = vld [vmem:[%s5268_s8 + $0x2e4] sm:$0xff]  }
 0x1af   : > { %6726 = vst [vmem:[#allocation24_spill] sm:$0xff] %v5957_v24  ;;  %4808 = vmatprep.mubr.msk.bf16.mxu1 %vm4990_vm0, %v6711_v37 }
 0x1b0   : > { %6727 = vst [vmem:[#allocation25_spill] sm:$0xff] %v5963_v50  ;;  %v1451_v18 = vpop.f32.mrb[68].mxu0 }
 0x1b1   : > { %v1553_v38 = vmul.f32 %v5485_v28, %v1451_v18  ;;  %v2041_v55 = vpop.f32.mrb[68].mxu1  ;;  %v4496_v46 = vpop.f32.mrb[69].mxu0 }
 0x1b2   : > { %v2137_v9 = vmul.f32 %v5485_v28, %v2041_v55  ;;  %v4598_v32 = vpop.f32.mrb[69].mxu1  ;;  %v1454_v15 = vpop.f32.mrb[70].mxu0 }
 0x1b3   : > { %v5977_v4 = vadd.f32 %v5494_v29, %v1553_v38  ;;  %v1554_v62 = vmul.f32 %v5485_v28, %v1454_v15  ;;  %v2044_v48 = vpop.f32.mrb[70].mxu1  ;;  %v4497_v19 = vpop.f32.mrb[71].mxu0  ;;  %v4951_v32 = vld [vmem:[%s5268_s8 + $0x228] sm:$0xff]  }
 0x1b4   : > { %v5981_v26 = vadd.f32 %v5494_v29, %v2137_v9  ;;  %v2138_v18 = vmul.f32 %v5485_v28, %v2044_v48  ;;  %v4599_v46 = vpop.f32.mrb[71].mxu1 }
 0x1b5   : > { %6728 = vst [vmem:[#allocation26_spill] sm:$0xff] %v5977_v4  ;;  %v5985_v50 = vadd.f32 %v5494_v29, %v1554_v62  ;;  %4707 = vmatmul.mubr.msk.bf16.gmra.mrb[176].mxu0 %vm1205_vm1, %v4949_v6 }
 0x1b6   : > { %6729 = vst [vmem:[#allocation27_spill] sm:$0xff] %v5981_v26  ;;  %v5991_v55 = vadd.f32 %v5494_v29, %v2138_v18  ;;  %4809 = vmatmul.mubr.msk.bf16.gmra.mrb[176].mxu1 %vm1205_vm1, %v4950_v63  ;;  %4710 = vmatprep.mubr.msk.bf16.mxu0 %vm4990_vm0, %v6711_v37  ;;  %v4952_v63 = vld [vmem:[%s5268_s8 + $0x2ec] sm:$0xff]  }
 0x1b7   : > { %6730 = vst [vmem:[#allocation28_spill] sm:$0xff] %v5985_v50  ;;  %4812 = vmatprep.mubr.msk.bf16.mxu1 %vm4990_vm0, %v6711_v37 }
 0x1b8   : > { %6731 = vst [vmem:[#allocation29_spill] sm:$0xff] %v5991_v55  ;;  %v1459_v48 = vpop.f32.mrb[72].mxu0 }
 0x1b9   : > { %v1555_v62 = vmul.f32 %v5485_v28, %v1459_v48  ;;  %v2049_v6 = vpop.f32.mrb[72].mxu1  ;;  %v4500_v9 = vpop.f32.mrb[73].mxu0 }
 0x1ba   : > { %v2139_v15 = vmul.f32 %v5485_v28, %v2049_v6  ;;  %v4602_v18 = vpop.f32.mrb[73].mxu1  ;;  %v1462_v46 = vpop.f32.mrb[74].mxu0 }
 0x1bb   : > { %v6005_v38 = vadd.f32 %v5494_v29, %v1555_v62  ;;  %v1556_v26 = vmul.f32 %v5485_v28, %v1462_v46  ;;  %v2052_v4 = vpop.f32.mrb[74].mxu1  ;;  %v4501_v24 = vpop.f32.mrb[75].mxu0  ;;  %v4953_v18 = vld [vmem:[%s5268_s8 + $0x230] sm:$0xff]  }
 0x1bc   : > { %v6009_v19 = vadd.f32 %v5494_v29, %v2139_v15  ;;  %v2140_v48 = vmul.f32 %v5485_v28, %v2052_v4  ;;  %v4603_v9 = vpop.f32.mrb[75].mxu1 }
 0x1bd   : > { %6732 = vst [vmem:[#allocation30_spill] sm:$0xff] %v6005_v38  ;;  %v6013_v55 = vadd.f32 %v5494_v29, %v1556_v26  ;;  %4711 = vmatmul.mubr.msk.bf16.gmra.mrb[180].mxu0 %vm1205_vm1, %v4951_v32 }
 0x1be   : > { %6733 = vst [vmem:[#allocation31_spill] sm:$0xff] %v6009_v19  ;;  %v6019_v6 = vadd.f32 %v5494_v29, %v2140_v48  ;;  %4813 = vmatmul.mubr.msk.bf16.gmra.mrb[180].mxu1 %vm1205_vm1, %v4952_v63  ;;  %4714 = vmatprep.mubr.msk.bf16.mxu0 %vm4990_vm0, %v6711_v37  ;;  %v4954_v63 = vld [vmem:[%s5268_s8 + $0x2f4] sm:$0xff]  }
 0x1bf   : > { %6734 = vst [vmem:[#allocation32_spill] sm:$0xff] %v6013_v55  ;;  %4816 = vmatprep.mubr.msk.bf16.mxu1 %vm4990_vm0, %v6711_v37 }
 0x1c0   : > { %6735 = vst [vmem:[#allocation33_spill] sm:$0xff] %v6019_v6  ;;  %v1467_v4 = vpop.f32.mrb[76].mxu0 }
 0x1c1   : > { %v1557_v26 = vmul.f32 %v5485_v28, %v1467_v4  ;;  %v2057_v32 = vpop.f32.mrb[76].mxu1  ;;  %v4504_v15 = vpop.f32.mrb[77].mxu0 }
 0x1c2   : > { %v2141_v46 = vmul.f32 %v5485_v28, %v2057_v32  ;;  %v4606_v48 = vpop.f32.mrb[77].mxu1  ;;  %v1470_v9 = vpop.f32.mrb[78].mxu0 }
 0x1c3   : > { %v6033_v62 = vadd.f32 %v5494_v29, %v1557_v26  ;;  %v1558_v19 = vmul.f32 %v5485_v28, %v1470_v9  ;;  %v2060_v38 = vpop.f32.mrb[78].mxu1  ;;  %v4505_v50 = vpop.f32.mrb[79].mxu0  ;;  %v4955_v48 = vld [vmem:[%s5268_s8 + $0x238] sm:$0xff]  }
 0x1c4   : > { %v6037_v24 = vadd.f32 %v5494_v29, %v2141_v46  ;;  %v2142_v4 = vmul.f32 %v5485_v28, %v2060_v38  ;;  %v4607_v15 = vpop.f32.mrb[79].mxu1 }
 0x1c5   : > { %6736 = vst [vmem:[#allocation34_spill] sm:$0xff] %v6033_v62  ;;  %v6041_v6 = vadd.f32 %v5494_v29, %v1558_v19  ;;  %4715 = vmatmul.mubr.msk.bf16.gmra.mrb[184].mxu0 %vm1205_vm1, %v4953_v18 }
 0x1c6   : > { %6737 = vst [vmem:[#allocation35_spill] sm:$0xff] %v6037_v24  ;;  %v6047_v32 = vadd.f32 %v5494_v29, %v2142_v4  ;;  %4817 = vmatmul.mubr.msk.bf16.gmra.mrb[184].mxu1 %vm1205_vm1, %v4954_v63  ;;  %4718 = vmatprep.mubr.msk.bf16.mxu0 %vm4990_vm0, %v6711_v37  ;;  %v4956_v63 = vld [vmem:[%s5268_s8 + $0x2fc] sm:$0xff]  }
 0x1c7   : > { %6738 = vst [vmem:[#allocation36_spill] sm:$0xff] %v6041_v6  ;;  %4820 = vmatprep.mubr.msk.bf16.mxu1 %vm4990_vm0, %v6711_v37 }
 0x1c8   : > { %6739 = vst [vmem:[#allocation37_spill] sm:$0xff] %v6047_v32  ;;  %v1475_v38 = vpop.f32.mrb[80].mxu0 }
 0x1c9   : > { %v1559_v19 = vmul.f32 %v5485_v28, %v1475_v38  ;;  %v2065_v18 = vpop.f32.mrb[80].mxu1  ;;  %v4508_v46 = vpop.f32.mrb[81].mxu0 }
 0x1ca   : > { %v2143_v9 = vmul.f32 %v5485_v28, %v2065_v18  ;;  %v4610_v4 = vpop.f32.mrb[81].mxu1  ;;  %v1478_v15 = vpop.f32.mrb[82].mxu0 }
 0x1cb   : > { %v6061_v26 = vadd.f32 %v5494_v29, %v1559_v19  ;;  %v1560_v24 = vmul.f32 %v5485_v28, %v1478_v15  ;;  %v2068_v62 = vpop.f32.mrb[82].mxu1  ;;  %v4509_v55 = vpop.f32.mrb[83].mxu0  ;;  %v4957_v4 = vld [vmem:[%s5268_s8 + $0x240] sm:$0xff]  }
 0x1cc   : > { %v6065_v50 = vadd.f32 %v5494_v29, %v2143_v9  ;;  %v2144_v38 = vmul.f32 %v5485_v28, %v2068_v62  ;;  %v4611_v46 = vpop.f32.mrb[83].mxu1  ;;  %v6096_v55 = vld [vmem:[%s6647_s3] ss:$0 sm:$0xff] }
 0x1cd   : > { %6740 = vst [vmem:[#allocation38_spill] sm:$0xff] %v6061_v26  ;;  %v6069_v32 = vadd.f32 %v5494_v29, %v1560_v24  ;;  %4719 = vmatmul.mubr.msk.bf16.gmra.mrb[188].mxu0 %vm1205_vm1, %v4955_v48  ;;  %v4958_v46 = vld [vmem:[%s5268_s8 + $0x304] sm:$0xff]  }
 0x1ce   : > { %6741 = vst [vmem:[#allocation39_spill] sm:$0xff] %v6065_v50  ;;  %v6075_v18 = vadd.f32 %v5494_v29, %v2144_v38  ;;  %4821 = vmatmul.mubr.msk.bf16.gmra.mrb[188].mxu1 %vm1205_vm1, %v4956_v63  ;;  %4722 = vmatprep.mubr.msk.bf16.mxu0 %vm4990_vm0, %v6711_v37  ;;  %v6089_v29 = vld [vmem:[%s6646_s2] ss:$0 sm:$0xff] }
 0x1cf   : > { %6742 = vst [vmem:[#allocation40_spill] sm:$0xff] %v6069_v32  ;;  %4824 = vmatprep.mubr.msk.bf16.mxu1 %vm4990_vm0, %v6711_v37 }
 0x1d0   : > { %6743 = vst [vmem:[#allocation41_spill] sm:$0xff] %v6075_v18  ;;  %v1483_v62 = vpop.f32.mrb[84].mxu0 }
 0x1d1   : > { %v1561_v24 = vmul.f32 %v5485_v28, %v1483_v62  ;;  %v2073_v48 = vpop.f32.mrb[84].mxu1  ;;  %v4512_v9 = vpop.f32.mrb[85].mxu0 }
 0x1d2   : > { %v2145_v15 = vmul.f32 %v6089_v29, %v2073_v48  ;;  %v4614_v63 = vpop.f32.mrb[85].mxu1  ;;  %v1486_v38 = vpop.f32.mrb[86].mxu0 }
 0x1d3   : > { %v6099_v28 = vadd.f32 %v6096_v55, %v1561_v24  ;;  %v1562_v62 = vmul.f32 %v6089_v29, %v1486_v38  ;;  %v2076_v9 = vpop.f32.mrb[86].mxu1  ;;  %v4513_v19 = vpop.f32.mrb[87].mxu0 }
 0x1d4   : > { %v6103_v18 = vadd.f32 %v6096_v55, %v2145_v15  ;;  %v2146_v48 = vmul.f32 %v6089_v29, %v2076_v9  ;;  %v4615_v63 = vpop.f32.mrb[87].mxu1 }
 0x1d5   : > { %6744 = vst [vmem:[#allocation42_spill] sm:$0xff] %v6099_v28  ;;  %v6107_v32 = vadd.f32 %v6096_v55, %v1562_v62  ;;  %4723 = vmatmul.mubr.msk.bf16.gmra.mrb[192].mxu0 %vm1205_vm1, %v4957_v4  ;;  %v4959_v63 = vld [vmem:[%s5268_s8 + $0x248] ss:$0 sps:$4 sm:$0xff]  }
 0x1d6   : > { %6745 = vst [vmem:[#allocation43_spill] sm:$0xff] %v6103_v18  ;;  %v6113_v38 = vadd.f32 %v6096_v55, %v2146_v48  ;;  %4825 = vmatmul.mubr.msk.bf16.gmra.mrb[192].mxu1 %vm1205_vm1, %v4958_v46  ;;  %4726 = vmatprep.mubr.msk.bf16.mxu0 %vm4990_vm0, %v6711_v37  ;;  %v4960_v46 = vld [vmem:[%s5268_s8 + $0x30c] ss:$0 sps:$4 sm:$0xff]  }
 0x1d7   : > { %6746 = vst [vmem:[#allocation44_spill] sm:$0xff] %v6107_v32  ;;  %4828 = vmatprep.mubr.msk.bf16.mxu1 %vm4990_vm0, %v6711_v37 }
 0x1d8   : > { %6747 = vst [vmem:[#allocation45_spill] sm:$0xff] %v6113_v38  ;;  %v1491_v15 = vpop.f32.mrb[88].mxu0 }
 0x1d9   : > { %v1563_v4 = vmul.f32 %v6089_v29, %v1491_v15  ;;  %v2081_v62 = vpop.f32.mrb[88].mxu1  ;;  %v4516_v9 = vpop.f32.mrb[89].mxu0 }
 0x1da   : > { %v2147_v48 = vmul.f32 %v6089_v29, %v2081_v62  ;;  %v4618_v24 = vpop.f32.mrb[89].mxu1  ;;  %v1494_v18 = vpop.f32.mrb[90].mxu0 }
 0x1db   : > { %v6127_v28 = vadd.f32 %v6096_v55, %v1563_v4  ;;  %v1564_v50 = vmul.f32 %v6089_v29, %v1494_v18  ;;  %v2084_v37 = vpop.f32.mrb[90].mxu1  ;;  %v4517_v26 = vpop.f32.mrb[91].mxu0 }
 0x1dc   : > { %v6131_v19 = vadd.f32 %v6096_v55, %v2147_v48  ;;  %v2148_v15 = vmul.f32 %v6089_v29, %v2084_v37  ;;  %v4619_v38 = vpop.f32.mrb[91].mxu1 }
 0x1dd   : > { %6748 = vst [vmem:[#allocation46_spill] sm:$0xff] %v6127_v28  ;;  %v6135_v9 = vadd.f32 %v6096_v55, %v1564_v50  ;;  %4727 = vmatmul.mubr.msk.bf16.gmra.mrb[196].mxu0 %vm1205_vm1, %v4959_v63 }
 0x1de   : > { %6749 = vst [vmem:[#allocation47_spill] sm:$0xff] %v6131_v19  ;;  %v6141_v4 = vadd.f32 %v6096_v55, %v2148_v15  ;;  %4829 = vmatmul.mubr.msk.bf16.gmra.mrb[196].mxu1 %vm1205_vm1, %v4960_v46 }
 0x1df   : > { %6750 = vst [vmem:[#allocation48_spill] sm:$0xff] %v6135_v9 }
 0x1e0   : > { %6751 = vst [vmem:[#allocation49_spill] sm:$0xff] %v6141_v4  ;;  %v1499_v18 = vpop.f32.mrb[92].mxu0 }
 0x1e1   : > { %v1565_v62 = vmul.f32 %v6089_v29, %v1499_v18  ;;  %v2089_v38 = vpop.f32.mrb[92].mxu1  ;;  %v4520_v48 = vpop.f32.mrb[93].mxu0 }
 0x1e2   : > { %v2149_v50 = vmul.f32 %v6089_v29, %v2089_v38  ;;  %v4622_v37 = vpop.f32.mrb[93].mxu1  ;;  %v1502_v63 = vpop.f32.mrb[94].mxu0 }
 0x1e3   : > { %v6149_v32 = vadd.f32 %v6096_v55, %v1565_v62  ;;  %v1566_v15 = vmul.f32 %v6089_v29, %v1502_v63  ;;  %v2092_v24 = vpop.f32.mrb[94].mxu1  ;;  %v4521_v19 = vpop.f32.mrb[95].mxu0 }
 0x1e4   : > { %v6153_v46 = vadd.f32 %v6096_v55, %v2149_v50  ;;  %v2150_v26 = vmul.f32 %v6089_v29, %v2092_v24  ;;  %v4623_v18 = vpop.f32.mrb[95].mxu1 }
 0x1e5   : > { %6752 = vst [vmem:[#allocation50_spill] sm:$0xff] %v6149_v32  ;;  %v6157_v48 = vadd.f32 %v6096_v55, %v1566_v15 }
 0x1e6   : > { %6753 = vst [vmem:[#allocation51_spill] sm:$0xff] %v6153_v46  ;;  %v6162_v62 = vadd.f32 %v6096_v55, %v2150_v26 }
 0x1e7   : > { %6754 = vst [vmem:[#allocation52_spill] sm:$0xff] %v6157_v48 }
 0x1e8   : > { %6755 = vst [vmem:[#allocation53_spill] sm:$0xff] %v6162_v62  ;;  %v1507_v19 = vpop.f32.mrb[96].mxu0 }
 0x1e9   : > { %v1567_v50 = vmul.f32 %v6089_v29, %v1507_v19  ;;  %v2097_v63 = vpop.f32.mrb[96].mxu1  ;;  %v4524_v4 = vpop.f32.mrb[97].mxu0 }
 0x1ea   : > { %v2151_v24 = vmul.f32 %v6089_v29, %v2097_v63  ;;  %v4626_v18 = vpop.f32.mrb[97].mxu1  ;;  %v1510_v9 = vpop.f32.mrb[98].mxu0 }
 0x1eb   : > { %v6169_v15 = vadd.f32 %v6096_v55, %v1567_v50  ;;  %v2100_v28 = vpop.f32.mrb[98].mxu1  ;;  %v4525_v38 = vpop.f32.mrb[99].mxu0 }
 0x1ec   : > { %v6174_v26 = vadd.f32 %v6096_v55, %v2151_v24  ;;  %v4627_v37 = vpop.f32.mrb[99].mxu1 }
 0x1ed   : > { %6756 = vst [vmem:[#allocation54_spill] sm:$0xff] %v6169_v15 }
 0x1ee   : > { %6757 = vst [vmem:[#allocation55_spill] sm:$0xff] %v6174_v26 }
 0x1f0   : > { %v2532_v4 = vpop.f32.mrb[100].mxu0 }
 0x1f1   : > { %v2730_v63 = vmul.f32 %v6089_v29, %v2532_v4  ;;  %v3159_v18 = vpop.f32.mrb[100].mxu1  ;;  %v4632_v9 = vpop.f32.mrb[101].mxu0  ;;  %v6758_v4 = vmax.f32 %v5501_v40, %v5505_v44 }
 0x1f2   : > { %v3357_v50 = vmul.f32 %v6089_v29, %v3159_v18  ;;  %v4734_v62 = vpop.f32.mrb[101].mxu1  ;;  %v2535_v28 = vpop.f32.mrb[102].mxu0 }
 0x1f3   : > { %v2779_v38 = vadd.f32 %v6096_v55, %v2730_v63  ;;  %v2731_v24 = vmul.f32 %v6089_v29, %v2535_v28  ;;  %v3162_v48 = vpop.f32.mrb[102].mxu1  ;;  %v4633_v37 = vpop.f32.mrb[103].mxu0  ;;  %v6759_v63 = vmax.f32 %v5509_v47, %v5515_v49 }
 0x1f4   : > { %v3406_v46 = vadd.f32 %v6096_v55, %v3357_v50  ;;  %v3358_v19 = vmul.f32 %v6089_v29, %v3162_v48  ;;  %v4735_v26 = vpop.f32.mrb[103].mxu1 }
 0x1f5   : > { %v2828_v9 = vmax.f32 %v6758_v4, %v2779_v38  ;;  %v2780_v18 = vadd.f32 %v6096_v55, %v2731_v24 }
 0x1f6   : > { %v3407_v28 = vadd.f32 %v6096_v55, %v3358_v19 }
 0x1f7   : > { %v3455_v62 = vmax.f32 %v2828_v9, %v3406_v46  ;;  %v2829_v15 = vmax.f32 %v6759_v63, %v2780_v18 }
 0x1f8   : > { %v2540_v37 = vpop.f32.mrb[104].mxu0 }
 0x1f9   : > { %v3504_v32 = vmax.f32 %v3455_v62, 0.0  ;;  %v3456_v50 = vmax.f32 %v2829_v15, %v3407_v28  ;;  %v2732_v48 = vmul.f32 %v6089_v29, %v2540_v37  ;;  %v3167_v26 = vpop.f32.mrb[104].mxu1  ;;  %v4636_v6 = vpop.f32.mrb[105].mxu0  ;;  %v6760_v62 = vmax.f32 %v5529_v60, %v5533_v0 }
 0x1fa   : > { %v3359_v40 = vmul.f32 %v6089_v29, %v3167_v26  ;;  %v4738_v44 = vpop.f32.mrb[105].mxu1  ;;  %v2543_v47 = vpop.f32.mrb[106].mxu0  ;;  %v6761_v37 = vmax.f32 %v5537_v3, %v5543_v5 }
 0x1fb   : > { %v4271_v49 = vpack.c.bf16 %v3504_v32, %v3504_v32  ;;  %v3505_v46 = vmax.f32 %v3456_v50, 0.0  ;;  %v2781_v15 = vadd.f32 %v6096_v55, %v2732_v48  ;;  %v2733_v19 = vmul.f32 %v6089_v29, %v2543_v47  ;;  %v3170_v38 = vpop.f32.mrb[106].mxu1  ;;  %v4637_v6 = vpop.f32.mrb[107].mxu0 }
 0x1fc   : > { %v3408_v24 = vadd.f32 %v6096_v55, %v3359_v40  ;;  %v3360_v4 = vmul.f32 %v6089_v29, %v3170_v38  ;;  %v4739_v9 = vpop.f32.mrb[107].mxu1 }
 0x1fd   : > { %3751 = vst.msk [vmem:[%s6196_s24] sm:$0xf] %vm3750_vm2, %v4271_v49  ;;  %v4272_v18 = vpack.c.bf16 %v3505_v46, %v3505_v46  ;;  %v2830_v63 = vmax.f32 %v6760_v62, %v2781_v15  ;;  %v2782_v32 = vadd.f32 %v6096_v55, %v2733_v19 }
 0x1fe   : > { %v3409_v48 = vadd.f32 %v6096_v55, %v3360_v4 }
 0x1ff   : > { %3752 = vst.msk [vmem:[%s6196_s24 + $0x4] sm:$0xf] %vm3750_vm2, %v4272_v18  ;;  %v3457_v28 = vmax.f32 %v2830_v63, %v3408_v24  ;;  %v2831_v50 = vmax.f32 %v6761_v37, %v2782_v32  ;;  %v6762_v63 = vmax.f32 %v5557_v16, %v5561_v20 }
 0x200   : > { %v2548_v26 = vpop.f32.mrb[108].mxu0 }
 0x201   : > { %v3506_v40 = vmax.f32 %v3457_v28, 0.0  ;;  %v3458_v44 = vmax.f32 %v2831_v50, %v3409_v48  ;;  %v2734_v47 = vmul.f32 %v6089_v29, %v2548_v26  ;;  %v3175_v49 = vpop.f32.mrb[108].mxu1  ;;  %v4640_v60 = vpop.f32.mrb[109].mxu0  ;;  %v6763_v50 = vmax.f32 %v5565_v23, %v5571_v25 }
 0x202   : > { %v3361_v0 = vmul.f32 %v6089_v29, %v3175_v49  ;;  %v4742_v46 = vpop.f32.mrb[109].mxu1  ;;  %v2551_v15 = vpop.f32.mrb[110].mxu0 }
 0x203   : > { %v4273_v19 = vpack.c.bf16 %v3506_v40, %v3506_v40  ;;  %v3507_v38 = vmax.f32 %v3458_v44, 0.0  ;;  %v2783_v3 = vadd.f32 %v6096_v55, %v2734_v47  ;;  %v2735_v5 = vmul.f32 %v6089_v29, %v2551_v15  ;;  %v3178_v6 = vpop.f32.mrb[110].mxu1  ;;  %v4641_v24 = vpop.f32.mrb[111].mxu0 }
 0x204   : > { %v3410_v4 = vadd.f32 %v6096_v55, %v3361_v0  ;;  %v3362_v9 = vmul.f32 %v6089_v29, %v3178_v6  ;;  %v4743_v18 = vpop.f32.mrb[111].mxu1 }
 0x205   : > { %3753 = vst.msk [vmem:[%s6196_s24 + $0x8] sm:$0xf] %vm3750_vm2, %v4273_v19  ;;  %v4274_v62 = vpack.c.bf16 %v3507_v38, %v3507_v38  ;;  %v2832_v32 = vmax.f32 %v6762_v63, %v2783_v3  ;;  %v2784_v28 = vadd.f32 %v6096_v55, %v2735_v5 }
 0x206   : > { %v3411_v26 = vadd.f32 %v6096_v55, %v3362_v9  ;;  %v6764_v9 = vmax.f32 %v5585_v39, %v5589_v45 }
 0x207   : > { %3754 = vst.msk [vmem:[%s6196_s24 + $0xc] sm:$0xf] %vm3750_vm2, %v4274_v62  ;;  %v3459_v37 = vmax.f32 %v2832_v32, %v3410_v4  ;;  %v2833_v48 = vmax.f32 %v6763_v50, %v2784_v28  ;;  %v6765_v32 = vmax.f32 %v5593_v52, %v5599_v54 }
 0x208   : > { %v2556_v40 = vpop.f32.mrb[112].mxu0 }
 0x209   : > { %v3508_v44 = vmax.f32 %v3459_v37, 0.0  ;;  %v3460_v47 = vmax.f32 %v2833_v48, %v3411_v26  ;;  %v2736_v49 = vmul.f32 %v6089_v29, %v2556_v40  ;;  %v3183_v60 = vpop.f32.mrb[112].mxu1  ;;  %v4644_v16 = vpop.f32.mrb[113].mxu0 }
 0x20a   : > { %v3363_v20 = vmul.f32 %v6089_v29, %v3183_v60  ;;  %v4746_v0 = vpop.f32.mrb[113].mxu1  ;;  %v2559_v46 = vpop.f32.mrb[114].mxu0 }
 0x20b   : > { %v4275_v15 = vpack.c.bf16 %v3508_v44, %v3508_v44  ;;  %v3509_v19 = vmax.f32 %v3460_v47, 0.0  ;;  %v2785_v23 = vadd.f32 %v6096_v55, %v2736_v49  ;;  %v2737_v25 = vmul.f32 %v6089_v29, %v2559_v46  ;;  %v3186_v38 = vpop.f32.mrb[114].mxu1  ;;  %v4645_v3 = vpop.f32.mrb[115].mxu0 }
 0x20c   : > { %v3412_v5 = vadd.f32 %v6096_v55, %v3363_v20  ;;  %v3364_v6 = vmul.f32 %v6089_v29, %v3186_v38  ;;  %v4747_v24 = vpop.f32.mrb[115].mxu1 }
 0x20d   : > { %3755 = vst.msk [vmem:[%s6196_s24 + $0x10] sm:$0xf] %vm3750_vm2, %v4275_v15  ;;  %v4276_v4 = vpack.c.bf16 %v3509_v19, %v3509_v19  ;;  %v2834_v18 = vmax.f32 %v6764_v9, %v2785_v23  ;;  %v2786_v62 = vadd.f32 %v6096_v55, %v2737_v25  ;;  %v6766_v25 = vmax.f32 %v5613_v7, %v5617_v11 }
 0x20e   : > { %v3413_v37 = vadd.f32 %v6096_v55, %v3364_v6  ;;  %v6767_v6 = vmax.f32 %v5621_v14, %v5627_v17 }
 0x20f   : > { %3756 = vst.msk [vmem:[%s6196_s24 + $0x14] sm:$0xf] %vm3750_vm2, %v4276_v4  ;;  %v3461_v63 = vmax.f32 %v2834_v18, %v3412_v5  ;;  %v2835_v28 = vmax.f32 %v6765_v32, %v2786_v62 }
 0x210   : > { %v2564_v50 = vpop.f32.mrb[116].mxu0 }
 0x211   : > { %v3510_v48 = vmax.f32 %v3461_v63, 0.0  ;;  %v3462_v26 = vmax.f32 %v2835_v28, %v3413_v37  ;;  %v2738_v40 = vmul.f32 %v6089_v29, %v2564_v50  ;;  %v3191_v44 = vpop.f32.mrb[116].mxu1  ;;  %v4648_v39 = vpop.f32.mrb[117].mxu0 }
 0x212   : > { %v3365_v45 = vmul.f32 %v6089_v29, %v3191_v44  ;;  %v4750_v47 = vpop.f32.mrb[117].mxu1  ;;  %v2567_v49 = vpop.f32.mrb[118].mxu0 }
 0x213   : > { %v4277_v60 = vpack.c.bf16 %v3510_v48, %v3510_v48  ;;  %v3511_v16 = vmax.f32 %v3462_v26, 0.0  ;;  %v2787_v52 = vadd.f32 %v6096_v55, %v2738_v40  ;;  %v2739_v54 = vmul.f32 %v6089_v29, %v2567_v49  ;;  %v3194_v20 = vpop.f32.mrb[118].mxu1  ;;  %v4649_v0 = vpop.f32.mrb[119].mxu0 }
 0x214   : > { %v3414_v46 = vadd.f32 %v6096_v55, %v3365_v45  ;;  %v3366_v15 = vmul.f32 %v6089_v29, %v3194_v20  ;;  %v4751_v19 = vpop.f32.mrb[119].mxu1  ;;  %v6768_v49 = vmax.f32 %v5641_v35, %v5645_v42 }
 0x215   : > { %3757 = vst.msk [vmem:[%s6196_s24 + $0x18] sm:$0xf] %vm3750_vm2, %v4277_v60  ;;  %v4278_v23 = vpack.c.bf16 %v3511_v16, %v3511_v16  ;;  %v2836_v38 = vmax.f32 %v6766_v25, %v2787_v52  ;;  %v2788_v3 = vadd.f32 %v6096_v55, %v2739_v54  ;;  %v6769_v54 = vmax.f32 %v5649_v51, %v5655_v57 }
 0x216   : > { %v3415_v4 = vadd.f32 %v6096_v55, %v3366_v15 }
 0x217   : > { %3758 = vst.msk [vmem:[%s6196_s24 + $0x1c] sm:$0xf] %vm3750_vm2, %v4278_v23  ;;  %v3463_v5 = vmax.f32 %v2836_v38, %v3414_v46  ;;  %v2837_v24 = vmax.f32 %v6767_v6, %v2788_v3 }
 0x218   : > { %v2572_v9 = vpop.f32.mrb[120].mxu0 }
 0x219   : > { %v3512_v18 = vmax.f32 %v3463_v5, 0.0  ;;  %v3464_v62 = vmax.f32 %v2837_v24, %v3415_v4  ;;  %v2740_v63 = vmul.f32 %v6089_v29, %v2572_v9  ;;  %v3199_v32 = vpop.f32.mrb[120].mxu1  ;;  %v4652_v7 = vpop.f32.mrb[121].mxu0 }
 0x21a   : > { %v3367_v11 = vmul.f32 %v6089_v29, %v3199_v32  ;;  %v4754_v28 = vpop.f32.mrb[121].mxu1  ;;  %v2575_v37 = vpop.f32.mrb[122].mxu0  ;;  %v6770_v32 = vmax.f32 %v5669_v12, %v5673_v22 }
 0x21b   : > { %v4279_v50 = vpack.c.bf16 %v3512_v18, %v3512_v18  ;;  %v3513_v48 = vmax.f32 %v3464_v62, 0.0  ;;  %v2789_v14 = vadd.f32 %v6096_v55, %v2740_v63  ;;  %v2741_v17 = vmul.f32 %v6089_v29, %v2575_v37  ;;  %v3202_v26 = vpop.f32.mrb[122].mxu1  ;;  %v4653_v40 = vpop.f32.mrb[123].mxu0 }
 0x21c   : > { %v3416_v44 = vadd.f32 %v6096_v55, %v3367_v11  ;;  %v3368_v39 = vmul.f32 %v6089_v29, %v3202_v26  ;;  %v4755_v45 = vpop.f32.mrb[123].mxu1  ;;  %v6771_v37 = vmax.f32 %v5677_v31, %v5683_v33 }
 0x21d   : > { %3759 = vst.msk [vmem:[%s6196_s24 + $0x20] sm:$0xf] %vm3750_vm2, %v4279_v50  ;;  %v4280_v47 = vpack.c.bf16 %v3513_v48, %v3513_v48  ;;  %v2838_v60 = vmax.f32 %v6768_v49, %v2789_v14  ;;  %v2790_v16 = vadd.f32 %v6096_v55, %v2741_v17 }
 0x21e   : > { %v3417_v0 = vadd.f32 %v6096_v55, %v3368_v39 }
 0x21f   : > { %3760 = vst.msk [vmem:[%s6196_s24 + $0x24] sm:$0xf] %vm3750_vm2, %v4280_v47  ;;  %v3465_v52 = vmax.f32 %v2838_v60, %v3416_v44  ;;  %v2839_v20 = vmax.f32 %v6769_v54, %v2790_v16 }
 0x220   : > { %v2580_v46 = vpop.f32.mrb[124].mxu0 }
 0x221   : > { %v3514_v15 = vmax.f32 %v3465_v52, 0.0  ;;  %v3466_v19 = vmax.f32 %v2839_v20, %v3417_v0  ;;  %v2742_v23 = vmul.f32 %v6089_v29, %v2580_v46  ;;  %v3207_v25 = vpop.f32.mrb[124].mxu1  ;;  %v4656_v35 = vpop.f32.mrb[125].mxu0  ;;  %v6772_v46 = vmax.f32 %v5697_v1, %v5701_v10 }
 0x222   : > { %v3369_v42 = vmul.f32 %v6089_v29, %v3207_v25  ;;  %v4758_v38 = vpop.f32.mrb[125].mxu1  ;;  %v2583_v3 = vpop.f32.mrb[126].mxu0  ;;  %v6773_v25 = vmax.f32 %v5705_v21, %v5711_v30 }
 0x223   : > { %v4281_v5 = vpack.c.bf16 %v3514_v15, %v3514_v15  ;;  %v3515_v6 = vmax.f32 %v3466_v19, 0.0  ;;  %v2791_v51 = vadd.f32 %v6096_v55, %v2742_v23  ;;  %v2743_v57 = vmul.f32 %v6089_v29, %v2583_v3  ;;  %v3210_v24 = vpop.f32.mrb[126].mxu1  ;;  %v4657_v4 = vpop.f32.mrb[127].mxu0 }
 0x224   : > { %v3418_v9 = vadd.f32 %v6096_v55, %v3369_v42  ;;  %v3370_v18 = vmul.f32 %v6089_v29, %v3210_v24  ;;  %v4759_v62 = vpop.f32.mrb[127].mxu1 }
 0x225   : > { %3761 = vst.msk [vmem:[%s6196_s24 + $0x28] sm:$0xf] %vm3750_vm2, %v4281_v5  ;;  %v4282_v63 = vpack.c.bf16 %v3515_v6, %v3515_v6  ;;  %v2840_v7 = vmax.f32 %v6770_v32, %v2791_v51  ;;  %v2792_v11 = vadd.f32 %v6096_v55, %v2743_v57 }
 0x226   : > { %v3419_v48 = vadd.f32 %v6096_v55, %v3370_v18 }
 0x227   : > { %3762 = vst.msk [vmem:[%s6196_s24 + $0x2c] sm:$0xf] %vm3750_vm2, %v4282_v63  ;;  %v3467_v28 = vmax.f32 %v2840_v7, %v3418_v9  ;;  %v2841_v50 = vmax.f32 %v6771_v37, %v2792_v11 }
 0x228   : > { %v2588_v14 = vpop.f32.mrb[128].mxu0 }
 0x229   : > { %v3516_v17 = vmax.f32 %v3467_v28, 0.0  ;;  %v3468_v26 = vmax.f32 %v2841_v50, %v3419_v48  ;;  %v2744_v40 = vmul.f32 %v6089_v29, %v2588_v14  ;;  %v3215_v44 = vpop.f32.mrb[128].mxu1  ;;  %v4660_v12 = vpop.f32.mrb[129].mxu0  ;;  %v6774_v28 = vmax.f32 %v5725_v8, %v5729_v36 }
 0x22a   : > { %v3371_v22 = vmul.f32 %v6089_v29, %v3215_v44  ;;  %v4762_v39 = vpop.f32.mrb[129].mxu1  ;;  %v2591_v45 = vpop.f32.mrb[130].mxu0  ;;  %v6775_v14 = vmax.f32 %v5733_v27, %v5739_v43 }
 0x22b   : > { %v4283_v47 = vpack.c.bf16 %v3516_v17, %v3516_v17  ;;  %v3517_v49 = vmax.f32 %v3468_v26, 0.0  ;;  %v2793_v31 = vadd.f32 %v6096_v55, %v2744_v40  ;;  %v2745_v33 = vmul.f32 %v6089_v29, %v2591_v45  ;;  %v3218_v60 = vpop.f32.mrb[130].mxu1  ;;  %v4661_v16 = vpop.f32.mrb[131].mxu0 }
 0x22c   : > { %v3420_v52 = vadd.f32 %v6096_v55, %v3371_v22  ;;  %v3372_v54 = vmul.f32 %v6089_v29, %v3218_v60  ;;  %v4763_v20 = vpop.f32.mrb[131].mxu1 }
 0x22d   : > { %3763 = vst.msk [vmem:[%s6196_s24 + $0x30] sm:$0xf] %vm3750_vm2, %v4283_v47  ;;  %v4284_v0 = vpack.c.bf16 %v3517_v49, %v3517_v49  ;;  %v2842_v15 = vmax.f32 %v6772_v46, %v2793_v31  ;;  %v2794_v19 = vadd.f32 %v6096_v55, %v2745_v33 }
 0x22e   : > { %v3421_v42 = vadd.f32 %v6096_v55, %v3372_v54 }
 0x22f   : > { %3764 = vst.msk [vmem:[%s6196_s24 + $0x34] sm:$0xf] %vm3750_vm2, %v4284_v0  ;;  %v3469_v23 = vmax.f32 %v2842_v15, %v3420_v52  ;;  %v2843_v35 = vmax.f32 %v6773_v25, %v2794_v19  ;;  %v6776_v0 = vmax.f32 %v5753_v41, %v5757_v61 }
 0x230   : > { %v2596_v38 = vpop.f32.mrb[132].mxu0 }
 0x231   : > { %v3518_v3 = vmax.f32 %v3469_v23, 0.0  ;;  %v3470_v5 = vmax.f32 %v2843_v35, %v3421_v42  ;;  %v2746_v6 = vmul.f32 %v6089_v29, %v2596_v38  ;;  %v3223_v51 = vpop.f32.mrb[132].mxu1  ;;  %v4664_v1 = vpop.f32.mrb[133].mxu0  ;;  %v6777_v23 = vmax.f32 %v5761_v56, %v5767_v2 }
 0x232   : > { %v3373_v10 = vmul.f32 %v6089_v29, %v3223_v51  ;;  %v4766_v57 = vpop.f32.mrb[133].mxu1  ;;  %v2599_v24 = vpop.f32.mrb[134].mxu0 }
 0x233   : > { %v4285_v4 = vpack.c.bf16 %v3518_v3, %v3518_v3  ;;  %v3519_v9 = vmax.f32 %v3470_v5, 0.0  ;;  %v2795_v21 = vadd.f32 %v6096_v55, %v2746_v6  ;;  %v2747_v30 = vmul.f32 %v6089_v29, %v2599_v24  ;;  %v3226_v18 = vpop.f32.mrb[134].mxu1  ;;  %v4665_v62 = vpop.f32.mrb[135].mxu0 }
 0x234   : > { %v3422_v63 = vadd.f32 %v6096_v55, %v3373_v10  ;;  %v3374_v32 = vmul.f32 %v6089_v29, %v3226_v18  ;;  %v4767_v7 = vpop.f32.mrb[135].mxu1  ;;  %v6778_v62 = vmax.f32 %v5781_v59, %v5785_v58 }
 0x235   : > { %3765 = vst.msk [vmem:[%s6196_s24 + $0x38] sm:$0xf] %vm3750_vm2, %v4285_v4  ;;  %v4286_v11 = vpack.c.bf16 %v3519_v9, %v3519_v9  ;;  %v2844_v37 = vmax.f32 %v6774_v28, %v2795_v21  ;;  %v2796_v50 = vadd.f32 %v6096_v55, %v2747_v30 }
 0x236   : > { %v3423_v26 = vadd.f32 %v6096_v55, %v3374_v32 }
 0x237   : > { %3766 = vst.msk [vmem:[%s6196_s24 + $0x3c] sm:$0xf] %vm3750_vm2, %v4286_v11  ;;  %v3471_v48 = vmax.f32 %v2844_v37, %v3422_v63  ;;  %v2845_v17 = vmax.f32 %v6775_v14, %v2796_v50  ;;  %v6779_v11 = vmax.f32 %v5789_v53, %v5795_v13 }
 0x238   : > { %v2604_v40 = vpop.f32.mrb[136].mxu0 }
 0x239   : > { %v3520_v44 = vmax.f32 %v3471_v48, 0.0  ;;  %v3472_v12 = vmax.f32 %v2845_v17, %v3423_v26  ;;  %v2748_v22 = vmul.f32 %v6089_v29, %v2604_v40  ;;  %v3231_v39 = vpop.f32.mrb[136].mxu1  ;;  %v4668_v36 = vpop.f32.mrb[137].mxu0 }
 0x23a   : > { %v3375_v8 = vmul.f32 %v6089_v29, %v3231_v39  ;;  %v4770_v45 = vpop.f32.mrb[137].mxu1  ;;  %v2607_v47 = vpop.f32.mrb[138].mxu0 }
 0x23b   : > { %v4287_v49 = vpack.c.bf16 %v3520_v44, %v3520_v44  ;;  %v3521_v31 = vmax.f32 %v3472_v12, 0.0  ;;  %v2797_v27 = vadd.f32 %v6096_v55, %v2748_v22  ;;  %v2749_v43 = vmul.f32 %v6089_v29, %v2607_v47  ;;  %v3234_v33 = vpop.f32.mrb[138].mxu1  ;;  %v4669_v60 = vpop.f32.mrb[139].mxu0 }
 0x23c   : > { %v3424_v16 = vadd.f32 %v6096_v55, %v3375_v8  ;;  %v3376_v52 = vmul.f32 %v6089_v29, %v3234_v33  ;;  %v4771_v54 = vpop.f32.mrb[139].mxu1 }
 0x23d   : > { %3767 = vst.msk [vmem:[%s6196_s24 + $0x40] sm:$0xf] %vm3750_vm2, %v4287_v49  ;;  %v4288_v20 = vpack.c.bf16 %v3521_v31, %v3521_v31  ;;  %v2846_v46 = vmax.f32 %v6776_v0, %v2797_v27  ;;  %v2798_v15 = vadd.f32 %v6096_v55, %v2749_v43  ;;  %v6780_v31 = vld [vmem:[#allocation3_spill] sm:$0xff] }
 0x23e   : > { %v3425_v35 = vadd.f32 %v6096_v55, %v3376_v52  ;;  %v6781_v27 = vmax.f32 %v5809_v34, %v6780_v31  ;;  %v6783_v52 = vld [vmem:[#allocation5_spill] sm:$0xff] }
 0x23f   : > { %3768 = vst.msk [vmem:[%s6196_s24 + $0x44] sm:$0xf] %vm3750_vm2, %v4288_v20  ;;  %v3473_v19 = vmax.f32 %v2846_v46, %v3424_v16  ;;  %v2847_v25 = vmax.f32 %v6777_v23, %v2798_v15  ;;  %v6782_v16 = vld [vmem:[#allocation4_spill] sm:$0xff] }
 0x240   : > { %v2612_v42 = vpop.f32.mrb[140].mxu0  ;;  %v6784_v54 = vmax.f32 %v6782_v16, %v6783_v52 }
 0x241   : > { %v3522_v38 = vmax.f32 %v3473_v19, 0.0  ;;  %v3474_v3 = vmax.f32 %v2847_v25, %v3425_v35  ;;  %v2750_v5 = vmul.f32 %v6089_v29, %v2612_v42  ;;  %v3239_v6 = vpop.f32.mrb[140].mxu1  ;;  %v4672_v41 = vpop.f32.mrb[141].mxu0 }
 0x242   : > { %v3377_v61 = vmul.f32 %v6089_v29, %v3239_v6  ;;  %v4774_v51 = vpop.f32.mrb[141].mxu1  ;;  %v2615_v1 = vpop.f32.mrb[142].mxu0 }
 0x243   : > { %v4289_v10 = vpack.c.bf16 %v3522_v38, %v3522_v38  ;;  %v3523_v57 = vmax.f32 %v3474_v3, 0.0  ;;  %v2799_v56 = vadd.f32 %v6096_v55, %v2750_v5  ;;  %v2751_v2 = vmul.f32 %v6089_v29, %v2615_v1  ;;  %v3242_v24 = vpop.f32.mrb[142].mxu1  ;;  %v4673_v4 = vpop.f32.mrb[143].mxu0 }
 0x244   : > { %v3426_v9 = vadd.f32 %v6096_v55, %v3377_v61  ;;  %v3378_v21 = vmul.f32 %v6089_v29, %v3242_v24  ;;  %v4775_v30 = vpop.f32.mrb[143].mxu1  ;;  %v6786_v24 = vld [vmem:[#allocation7_spill] sm:$0xff] }
 0x245   : > { %3769 = vst.msk [vmem:[%s6196_s24 + $0x48] sm:$0xf] %vm3750_vm2, %v4289_v10  ;;  %v4290_v18 = vpack.c.bf16 %v3523_v57, %v3523_v57  ;;  %v2848_v63 = vmax.f32 %v6778_v62, %v2799_v56  ;;  %v2800_v32 = vadd.f32 %v6096_v55, %v2751_v2  ;;  %v6785_v2 = vld [vmem:[#allocation6_spill] sm:$0xff]  ;;  %v6789_v62 = vld [vmem:[#allocation9_spill] sm:$0xff] }
 0x246   : > { %v3427_v37 = vadd.f32 %v6096_v55, %v3378_v21  ;;  %v6787_v4 = vmax.f32 %v6785_v2, %v6786_v24 }
 0x247   : > { %3770 = vst.msk [vmem:[%s6196_s24 + $0x4c] sm:$0xf] %vm3750_vm2, %v4290_v18  ;;  %v3475_v7 = vmax.f32 %v2848_v63, %v3426_v9  ;;  %v2849_v28 = vmax.f32 %v6779_v11, %v2800_v32  ;;  %v6788_v18 = vld [vmem:[#allocation8_spill] sm:$0xff] }
 0x248   : > { %v2620_v50 = vpop.f32.mrb[144].mxu0  ;;  %v6790_v63 = vmax.f32 %v6788_v18, %v6789_v62 }
 0x249   : > { %v3524_v48 = vmax.f32 %v3475_v7, 0.0  ;;  %v3476_v14 = vmax.f32 %v2849_v28, %v3427_v37  ;;  %v2752_v17 = vmul.f32 %v6089_v29, %v2620_v50  ;;  %v3247_v26 = vpop.f32.mrb[144].mxu1  ;;  %v4676_v59 = vpop.f32.mrb[145].mxu0 }
 0x24a   : > { %v3379_v58 = vmul.f32 %v6089_v29, %v3247_v26  ;;  %v4778_v40 = vpop.f32.mrb[145].mxu1  ;;  %v2623_v44 = vpop.f32.mrb[146].mxu0 }
 0x24b   : > { %v4291_v12 = vpack.c.bf16 %v3524_v48, %v3524_v48  ;;  %v3525_v22 = vmax.f32 %v3476_v14, 0.0  ;;  %v2801_v53 = vadd.f32 %v6096_v55, %v2752_v17  ;;  %v2753_v13 = vmul.f32 %v6089_v29, %v2623_v44  ;;  %v3250_v39 = vpop.f32.mrb[146].mxu1  ;;  %v4677_v36 = vpop.f32.mrb[147].mxu0 }
 0x24c   : > { %v3428_v8 = vadd.f32 %v6096_v55, %v3379_v58  ;;  %v3380_v45 = vmul.f32 %v6089_v29, %v3250_v39  ;;  %v4779_v47 = vpop.f32.mrb[147].mxu1 }
 0x24d   : > { %3771 = vst.msk [vmem:[%s6196_s24 + $0x50] sm:$0xf] %vm3750_vm2, %v4291_v12  ;;  %v4292_v49 = vpack.c.bf16 %v3525_v22, %v3525_v22  ;;  %v2850_v43 = vmax.f32 %v6781_v27, %v2801_v53  ;;  %v2802_v33 = vadd.f32 %v6096_v55, %v2753_v13  ;;  %v6792_v47 = vld [vmem:[#allocation11_spill] sm:$0xff] }
 0x24e   : > { %v3429_v0 = vadd.f32 %v6096_v55, %v3380_v45  ;;  %v6791_v45 = vld [vmem:[#allocation10_spill] sm:$0xff] }
 0x24f   : > { %3772 = vst.msk [vmem:[%s6196_s24 + $0x54] sm:$0xf] %vm3750_vm2, %v4292_v49  ;;  %v3477_v60 = vmax.f32 %v2850_v43, %v3428_v8  ;;  %v2851_v20 = vmax.f32 %v6784_v54, %v2802_v33  ;;  %v6793_v49 = vmax.f32 %v6791_v45, %v6792_v47  ;;  %v6794_v33 = vld [vmem:[#allocation12_spill] sm:$0xff] }
 0x250   : > { %v2628_v46 = vpop.f32.mrb[148].mxu0 }
 0x251   : > { %v3526_v15 = vmax.f32 %v3477_v60, 0.0  ;;  %v3478_v19 = vmax.f32 %v2851_v20, %v3429_v0  ;;  %v2754_v23 = vmul.f32 %v6089_v29, %v2628_v46  ;;  %v3255_v25 = vpop.f32.mrb[148].mxu1  ;;  %v4680_v34 = vpop.f32.mrb[149].mxu0  ;;  %v6795_v60 = vld [vmem:[#allocation13_spill] sm:$0xff] }
 0x252   : > { %v3381_v35 = vmul.f32 %v6089_v29, %v3255_v25  ;;  %v4782_v42 = vpop.f32.mrb[149].mxu1  ;;  %v2631_v38 = vpop.f32.mrb[150].mxu0  ;;  %v6796_v16 = vmax.f32 %v6794_v33, %v6795_v60 }
 0x253   : > { %v4293_v3 = vpack.c.bf16 %v3526_v15, %v3526_v15  ;;  %v3527_v5 = vmax.f32 %v3478_v19, 0.0  ;;  %v2803_v6 = vadd.f32 %v6096_v55, %v2754_v23  ;;  %v2755_v41 = vmul.f32 %v6089_v29, %v2631_v38  ;;  %v3258_v61 = vpop.f32.mrb[150].mxu1  ;;  %v4681_v51 = vpop.f32.mrb[151].mxu0 }
 0x254   : > { %v3430_v1 = vadd.f32 %v6096_v55, %v3381_v35  ;;  %v3382_v10 = vmul.f32 %v6089_v29, %v3258_v61  ;;  %v4783_v57 = vpop.f32.mrb[151].mxu1 }
 0x255   : > { %3773 = vst.msk [vmem:[%s6196_s24 + $0x58] sm:$0xf] %vm3750_vm2, %v4293_v3  ;;  %v4294_v56 = vpack.c.bf16 %v3527_v5, %v3527_v5  ;;  %v2852_v9 = vmax.f32 %v6787_v4, %v2803_v6  ;;  %v2804_v21 = vadd.f32 %v6096_v55, %v2755_v41  ;;  %v6797_v57 = vld [vmem:[#allocation14_spill] sm:$0xff] }
 0x256   : > { %v3431_v7 = vadd.f32 %v6096_v55, %v3382_v10 }
 0x257   : > { %3774 = vst.msk [vmem:[%s6196_s24 + $0x5c] sm:$0xf] %vm3750_vm2, %v4294_v56  ;;  %v3479_v30 = vmax.f32 %v2852_v9, %v3430_v1  ;;  %v2853_v32 = vmax.f32 %v6790_v63, %v2804_v21  ;;  %v6798_v56 = vld [vmem:[#allocation15_spill] sm:$0xff]  ;;  %v6800_v21 = vld [vmem:[#allocation16_spill] sm:$0xff] }
 0x258   : > { %v2636_v11 = vpop.f32.mrb[152].mxu0  ;;  %v6799_v2 = vmax.f32 %v6797_v57, %v6798_v56 }
 0x259   : > { %v3528_v28 = vmax.f32 %v3479_v30, 0.0  ;;  %v3480_v37 = vmax.f32 %v2853_v32, %v3431_v7  ;;  %v2756_v50 = vmul.f32 %v6089_v29, %v2636_v11  ;;  %v3263_v48 = vpop.f32.mrb[152].mxu1  ;;  %v4684_v14 = vpop.f32.mrb[153].mxu0  ;;  %v6801_v30 = vld [vmem:[#allocation17_spill] sm:$0xff] }
 0x25a   : > { %v3383_v17 = vmul.f32 %v6089_v29, %v3263_v48  ;;  %v4786_v26 = vpop.f32.mrb[153].mxu1  ;;  %v2639_v59 = vpop.f32.mrb[154].mxu0  ;;  %v6802_v18 = vmax.f32 %v6800_v21, %v6801_v30 }
 0x25b   : > { %v4295_v58 = vpack.c.bf16 %v3528_v28, %v3528_v28  ;;  %v3529_v40 = vmax.f32 %v3480_v37, 0.0  ;;  %v2805_v44 = vadd.f32 %v6096_v55, %v2756_v50  ;;  %v2757_v12 = vmul.f32 %v6089_v29, %v2639_v59  ;;  %v3266_v22 = vpop.f32.mrb[154].mxu1  ;;  %v4685_v53 = vpop.f32.mrb[155].mxu0 }
 0x25c   : > { %v3432_v13 = vadd.f32 %v6096_v55, %v3383_v17  ;;  %v3384_v39 = vmul.f32 %v6089_v29, %v3266_v22  ;;  %v4787_v36 = vpop.f32.mrb[155].mxu1 }
 0x25d   : > { %3775 = vst.msk [vmem:[%s6196_s24 + $0x60] sm:$0xf] %vm3750_vm2, %v4295_v58  ;;  %v4296_v8 = vpack.c.bf16 %v3529_v40, %v3529_v40  ;;  %v2854_v31 = vmax.f32 %v6793_v49, %v2805_v44  ;;  %v2806_v27 = vadd.f32 %v6096_v55, %v2757_v12  ;;  %v6803_v36 = vld [vmem:[#allocation18_spill] sm:$0xff] }
 0x25e   : > { %v3433_v54 = vadd.f32 %v6096_v55, %v3384_v39 }
 0x25f   : > { %3776 = vst.msk [vmem:[%s6196_s24 + $0x64] sm:$0xf] %vm3750_vm2, %v4296_v8  ;;  %v3481_v43 = vmax.f32 %v2854_v31, %v3432_v13  ;;  %v2855_v52 = vmax.f32 %v6796_v16, %v2806_v27  ;;  %v6804_v8 = vld [vmem:[#allocation19_spill] sm:$0xff]  ;;  %v6806_v27 = vld [vmem:[#allocation20_spill] sm:$0xff] }
 0x260   : > { %v2644_v20 = vpop.f32.mrb[156].mxu0  ;;  %v6805_v45 = vmax.f32 %v6803_v36, %v6804_v8 }
 0x261   : > { %v3530_v0 = vmax.f32 %v3481_v43, 0.0  ;;  %v3482_v46 = vmax.f32 %v2855_v52, %v3433_v54  ;;  %v2758_v15 = vmul.f32 %v6089_v29, %v2644_v20  ;;  %v3271_v19 = vpop.f32.mrb[156].mxu1  ;;  %v4688_v23 = vpop.f32.mrb[157].mxu0  ;;  %v6807_v43 = vld [vmem:[#allocation21_spill] sm:$0xff] }
 0x262   : > { %v3385_v25 = vmul.f32 %v6089_v29, %v3271_v19  ;;  %v4790_v34 = vpop.f32.mrb[157].mxu1  ;;  %v2647_v35 = vpop.f32.mrb[158].mxu0  ;;  %v6808_v33 = vmax.f32 %v6806_v27, %v6807_v43 }
 0x263   : > { %v4297_v42 = vpack.c.bf16 %v3530_v0, %v3530_v0  ;;  %v3531_v38 = vmax.f32 %v3482_v46, 0.0  ;;  %v2807_v3 = vadd.f32 %v6096_v55, %v2758_v15  ;;  %v2759_v5 = vmul.f32 %v6089_v29, %v2647_v35  ;;  %v3274_v6 = vpop.f32.mrb[158].mxu1  ;;  %v4689_v41 = vpop.f32.mrb[159].mxu0 }
 0x264   : > { %v3434_v61 = vadd.f32 %v6096_v55, %v3385_v25  ;;  %v3386_v51 = vmul.f32 %v6089_v29, %v3274_v6  ;;  %v4791_v1 = vpop.f32.mrb[159].mxu1 }
 0x265   : > { %3777 = vst.msk [vmem:[%s6196_s24 + $0x68] sm:$0xf] %vm3750_vm2, %v4297_v42  ;;  %v4298_v10 = vpack.c.bf16 %v3531_v38, %v3531_v38  ;;  %v2856_v24 = vmax.f32 %v6799_v2, %v2807_v3  ;;  %v2808_v4 = vadd.f32 %v6096_v55, %v2759_v5  ;;  %v6809_v1 = vld [vmem:[#allocation22_spill] sm:$0xff] }
 0x266   : > { %v3435_v63 = vadd.f32 %v6096_v55, %v3386_v51 }
 0x267   : > { %3778 = vst.msk [vmem:[%s6196_s24 + $0x6c] sm:$0xf] %vm3750_vm2, %v4298_v10  ;;  %v3483_v9 = vmax.f32 %v2856_v24, %v3434_v61  ;;  %v2857_v62 = vmax.f32 %v6802_v18, %v2808_v4  ;;  %v6810_v10 = vld [vmem:[#allocation23_spill] sm:$0xff]  ;;  %v6812_v4 = vld [vmem:[#allocation24_spill] sm:$0xff] }
 0x268   : > { %v2652_v32 = vpop.f32.mrb[160].mxu0  ;;  %v6811_v57 = vmax.f32 %v6809_v1, %v6810_v10 }
 0x269   : > { %v3532_v7 = vmax.f32 %v3483_v9, 0.0  ;;  %v3484_v11 = vmax.f32 %v2857_v62, %v3435_v63  ;;  %v2760_v28 = vmul.f32 %v6089_v29, %v2652_v32  ;;  %v3279_v37 = vpop.f32.mrb[160].mxu1  ;;  %v4692_v50 = vpop.f32.mrb[161].mxu0  ;;  %v6813_v9 = vld [vmem:[#allocation25_spill] sm:$0xff]  ;;  %v6488_v32 = vld [vmem:[%s6646_s2] ss:$0 sm:$0xff] }
 0x26a   : > { %v3387_v48 = vmul.f32 %v6089_v29, %v3279_v37  ;;  %v4794_v14 = vpop.f32.mrb[161].mxu1  ;;  %v2655_v17 = vpop.f32.mrb[162].mxu0  ;;  %v6814_v21 = vmax.f32 %v6812_v4, %v6813_v9 }
 0x26b   : > { %v4299_v26 = vpack.c.bf16 %v3532_v7, %v3532_v7  ;;  %v3533_v59 = vmax.f32 %v3484_v11, 0.0  ;;  %v2809_v58 = vadd.f32 %v6096_v55, %v2760_v28  ;;  %v2761_v40 = vmul.f32 %v6089_v29, %v2655_v17  ;;  %v3282_v44 = vpop.f32.mrb[162].mxu1  ;;  %v4693_v12 = vpop.f32.mrb[163].mxu0  ;;  %v6495_v17 = vld [vmem:[%s6647_s3] ss:$0 sm:$0xff] }
 0x26c   : > { %v3436_v22 = vadd.f32 %v6096_v55, %v3387_v48  ;;  %v3388_v53 = vmul.f32 %v6089_v29, %v3282_v44  ;;  %v4795_v13 = vpop.f32.mrb[163].mxu1 }
 0x26d   : > { %3779 = vst.msk [vmem:[%s6196_s24 + $0x70] sm:$0xf] %vm3750_vm2, %v4299_v26  ;;  %v4300_v39 = vpack.c.bf16 %v3533_v59, %v3533_v59  ;;  %v2858_v47 = vmax.f32 %v6805_v45, %v2809_v58  ;;  %v2810_v49 = vadd.f32 %v6096_v55, %v2761_v40  ;;  %v6815_v13 = vld [vmem:[#allocation26_spill] sm:$0xff] }
 0x26e   : > { %v3437_v16 = vadd.f32 %v6096_v55, %v3388_v53 }
 0x26f   : > { %3780 = vst.msk [vmem:[%s6196_s24 + $0x74] sm:$0xf] %vm3750_vm2, %v4300_v39  ;;  %v3485_v31 = vmax.f32 %v2858_v47, %v3436_v22  ;;  %v2859_v60 = vmax.f32 %v6808_v33, %v2810_v49  ;;  %v6816_v39 = vld [vmem:[#allocation27_spill] sm:$0xff]  ;;  %v6818_v49 = vld [vmem:[#allocation28_spill] sm:$0xff] }
 0x270   : > { %v2660_v52 = vpop.f32.mrb[164].mxu0  ;;  %v6817_v36 = vmax.f32 %v6815_v13, %v6816_v39 }
 0x271   : > { %v3534_v54 = vmax.f32 %v3485_v31, 0.0  ;;  %v3486_v20 = vmax.f32 %v2859_v60, %v3437_v16  ;;  %v2762_v0 = vmul.f32 %v6089_v29, %v2660_v52  ;;  %v3287_v46 = vpop.f32.mrb[164].mxu1  ;;  %v4696_v15 = vpop.f32.mrb[165].mxu0  ;;  %v6819_v31 = vld [vmem:[#allocation29_spill] sm:$0xff] }
 0x272   : > { %v3389_v19 = vmul.f32 %v6089_v29, %v3287_v46  ;;  %v4798_v23 = vpop.f32.mrb[165].mxu1  ;;  %v2663_v25 = vpop.f32.mrb[166].mxu0  ;;  %v6820_v27 = vmax.f32 %v6818_v49, %v6819_v31 }
 0x273   : > { %v4301_v34 = vpack.c.bf16 %v3534_v54, %v3534_v54  ;;  %v3535_v35 = vmax.f32 %v3486_v20, 0.0  ;;  %v2811_v42 = vadd.f32 %v6096_v55, %v2762_v0  ;;  %v2763_v38 = vmul.f32 %v6089_v29, %v2663_v25  ;;  %v3290_v3 = vpop.f32.mrb[166].mxu1  ;;  %v4697_v5 = vpop.f32.mrb[167].mxu0 }
 0x274   : > { %v3438_v6 = vadd.f32 %v6096_v55, %v3389_v19  ;;  %v3390_v41 = vmul.f32 %v6089_v29, %v3290_v3  ;;  %v4799_v61 = vpop.f32.mrb[167].mxu1 }
 0x275   : > { %3781 = vst.msk [vmem:[%s6196_s24 + $0x78] sm:$0xf] %vm3750_vm2, %v4301_v34  ;;  %v4302_v51 = vpack.c.bf16 %v3535_v35, %v3535_v35  ;;  %v2860_v56 = vmax.f32 %v6811_v57, %v2811_v42  ;;  %v2812_v2 = vadd.f32 %v6096_v55, %v2763_v38  ;;  %v6821_v61 = vld [vmem:[#allocation30_spill] sm:$0xff] }
 0x276   : > { %v3439_v18 = vadd.f32 %v6096_v55, %v3390_v41 }
 0x277   : > { %3782 = vst.msk [vmem:[%s6196_s24 + $0x7c] sm:$0xf] %vm3750_vm2, %v4302_v51  ;;  %v3487_v24 = vmax.f32 %v2860_v56, %v3438_v6  ;;  %v2861_v30 = vmax.f32 %v6814_v21, %v2812_v2  ;;  %v6822_v51 = vld [vmem:[#allocation31_spill] sm:$0xff]  ;;  %v6824_v2 = vld [vmem:[#allocation32_spill] sm:$0xff] }
 0x278   : > { %v2668_v29 = vpop.f32.mrb[168].mxu0  ;;  %v6823_v1 = vmax.f32 %v6821_v61, %v6822_v51 }
 0x279   : > { %v3536_v62 = vmax.f32 %v3487_v24, 0.0  ;;  %v3488_v63 = vmax.f32 %v2861_v30, %v3439_v18  ;;  %v2764_v7 = vmul.f32 %v6488_v32, %v2668_v29  ;;  %v3295_v11 = vpop.f32.mrb[168].mxu1  ;;  %v4700_v28 = vpop.f32.mrb[169].mxu0  ;;  %v6825_v24 = vld [vmem:[#allocation33_spill] sm:$0xff] }
 0x27a   : > { %v3391_v37 = vmul.f32 %v6488_v32, %v3295_v11  ;;  %v4802_v50 = vpop.f32.mrb[169].mxu1  ;;  %v2671_v48 = vpop.f32.mrb[170].mxu0  ;;  %v6826_v4 = vmax.f32 %v6824_v2, %v6825_v24 }
 0x27b   : > { %v4303_v14 = vpack.c.bf16 %v3536_v62, %v3536_v62  ;;  %v3537_v55 = vmax.f32 %v3488_v63, 0.0  ;;  %v2813_v26 = vadd.f32 %v6495_v17, %v2764_v7  ;;  %v2765_v59 = vmul.f32 %v6488_v32, %v2671_v48  ;;  %v3298_v58 = vpop.f32.mrb[170].mxu1  ;;  %v4701_v40 = vpop.f32.mrb[171].mxu0 }
 0x27c   : > { %v3440_v44 = vadd.f32 %v6495_v17, %v3391_v37  ;;  %v3392_v12 = vmul.f32 %v6488_v32, %v3298_v58  ;;  %v4803_v22 = vpop.f32.mrb[171].mxu1 }
 0x27d   : > { %3783 = vst.msk [vmem:[%s6196_s24 + $0x80] sm:$0xf] %vm3750_vm2, %v4303_v14  ;;  %v4304_v53 = vpack.c.bf16 %v3537_v55, %v3537_v55  ;;  %v2862_v8 = vmax.f32 %v6817_v36, %v2813_v26  ;;  %v2814_v45 = vadd.f32 %v6495_v17, %v2765_v59  ;;  %v6827_v22 = vld [vmem:[#allocation34_spill] sm:$0xff] }
 0x27e   : > { %v3441_v33 = vadd.f32 %v6495_v17, %v3392_v12 }
 0x27f   : > { %3784 = vst.msk [vmem:[%s6196_s24 + $0x84] sm:$0xf] %vm3750_vm2, %v4304_v53  ;;  %v3489_v47 = vmax.f32 %v2862_v8, %v3440_v44  ;;  %v2863_v43 = vmax.f32 %v6820_v27, %v2814_v45  ;;  %v6828_v53 = vld [vmem:[#allocation35_spill] sm:$0xff]  ;;  %v6830_v45 = vld [vmem:[#allocation36_spill] sm:$0xff] }
 0x280   : > { %v2676_v60 = vpop.f32.mrb[172].mxu0  ;;  %v6829_v13 = vmax.f32 %v6827_v22, %v6828_v53 }
 0x281   : > { %v3538_v16 = vmax.f32 %v3489_v47, 0.0  ;;  %v3490_v52 = vmax.f32 %v2863_v43, %v3441_v33  ;;  %v2766_v54 = vmul.f32 %v6488_v32, %v2676_v60  ;;  %v3303_v20 = vpop.f32.mrb[172].mxu1  ;;  %v4704_v0 = vpop.f32.mrb[173].mxu0  ;;  %v6831_v47 = vld [vmem:[#allocation37_spill] sm:$0xff] }
 0x282   : > { %v3393_v46 = vmul.f32 %v6488_v32, %v3303_v20  ;;  %v4806_v15 = vpop.f32.mrb[173].mxu1  ;;  %v2679_v19 = vpop.f32.mrb[174].mxu0  ;;  %v6832_v49 = vmax.f32 %v6830_v45, %v6831_v47 }
 0x283   : > { %v4305_v23 = vpack.c.bf16 %v3538_v16, %v3538_v16  ;;  %v3539_v25 = vmax.f32 %v3490_v52, 0.0  ;;  %v2815_v34 = vadd.f32 %v6495_v17, %v2766_v54  ;;  %v2767_v35 = vmul.f32 %v6488_v32, %v2679_v19  ;;  %v3306_v42 = vpop.f32.mrb[174].mxu1  ;;  %v4705_v38 = vpop.f32.mrb[175].mxu0 }
 0x284   : > { %v3442_v3 = vadd.f32 %v6495_v17, %v3393_v46  ;;  %v3394_v5 = vmul.f32 %v6488_v32, %v3306_v42  ;;  %v4807_v6 = vpop.f32.mrb[175].mxu1 }
 0x285   : > { %3785 = vst.msk [vmem:[%s6196_s24 + $0x88] sm:$0xf] %vm3750_vm2, %v4305_v23  ;;  %v4306_v41 = vpack.c.bf16 %v3539_v25, %v3539_v25  ;;  %v2864_v10 = vmax.f32 %v6823_v1, %v2815_v34  ;;  %v2816_v57 = vadd.f32 %v6495_v17, %v2767_v35  ;;  %v6833_v6 = vld [vmem:[#allocation38_spill] sm:$0xff] }
 0x286   : > { %v3443_v21 = vadd.f32 %v6495_v17, %v3394_v5 }
 0x287   : > { %3786 = vst.msk [vmem:[%s6196_s24 + $0x8c] sm:$0xf] %vm3750_vm2, %v4306_v41  ;;  %v3491_v56 = vmax.f32 %v2864_v10, %v3442_v3  ;;  %v2865_v9 = vmax.f32 %v6826_v4, %v2816_v57  ;;  %v6834_v41 = vld [vmem:[#allocation39_spill] sm:$0xff]  ;;  %v6836_v57 = vld [vmem:[#allocation40_spill] sm:$0xff] }
 0x288   : > { %v2684_v30 = vpop.f32.mrb[176].mxu0  ;;  %v6835_v61 = vmax.f32 %v6833_v6, %v6834_v41 }
 0x289   : > { %v3540_v18 = vmax.f32 %v3491_v56, 0.0  ;;  %v3492_v29 = vmax.f32 %v2865_v9, %v3443_v21  ;;  %v2768_v62 = vmul.f32 %v6488_v32, %v2684_v30  ;;  %v3311_v63 = vpop.f32.mrb[176].mxu1  ;;  %v4708_v7 = vpop.f32.mrb[177].mxu0  ;;  %v6837_v56 = vld [vmem:[#allocation41_spill] sm:$0xff] }
 0x28a   : > { %v3395_v11 = vmul.f32 %v6488_v32, %v3311_v63  ;;  %v4810_v28 = vpop.f32.mrb[177].mxu1  ;;  %v2687_v37 = vpop.f32.mrb[178].mxu0  ;;  %v6838_v2 = vmax.f32 %v6836_v57, %v6837_v56 }
 0x28b   : > { %v4307_v50 = vpack.c.bf16 %v3540_v18, %v3540_v18  ;;  %v3541_v48 = vmax.f32 %v3492_v29, 0.0  ;;  %v2817_v14 = vadd.f32 %v6495_v17, %v2768_v62  ;;  %v2769_v55 = vmul.f32 %v6488_v32, %v2687_v37  ;;  %v3314_v26 = vpop.f32.mrb[178].mxu1  ;;  %v4709_v59 = vpop.f32.mrb[179].mxu0 }
 0x28c   : > { %v3444_v58 = vadd.f32 %v6495_v17, %v3395_v11  ;;  %v3396_v40 = vmul.f32 %v6488_v32, %v3314_v26  ;;  %v4811_v44 = vpop.f32.mrb[179].mxu1 }
 0x28d   : > { %3787 = vst.msk [vmem:[%s6196_s24 + $0x90] sm:$0xf] %vm3750_vm2, %v4307_v50  ;;  %v4308_v12 = vpack.c.bf16 %v3541_v48, %v3541_v48  ;;  %v2866_v39 = vmax.f32 %v6829_v13, %v2817_v14  ;;  %v2818_v36 = vadd.f32 %v6495_v17, %v2769_v55  ;;  %v6839_v44 = vld [vmem:[#allocation42_spill] sm:$0xff] }
 0x28e   : > { %v3445_v27 = vadd.f32 %v6495_v17, %v3396_v40 }
 0x28f   : > { %3788 = vst.msk [vmem:[%s6196_s24 + $0x94] sm:$0xf] %vm3750_vm2, %v4308_v12  ;;  %v3493_v8 = vmax.f32 %v2866_v39, %v3444_v58  ;;  %v2867_v31 = vmax.f32 %v6832_v49, %v2818_v36  ;;  %v6840_v12 = vld [vmem:[#allocation43_spill] sm:$0xff]  ;;  %v6842_v36 = vld [vmem:[#allocation44_spill] sm:$0xff] }
 0x290   : > { %v2692_v43 = vpop.f32.mrb[180].mxu0  ;;  %v6841_v22 = vmax.f32 %v6839_v44, %v6840_v12 }
 0x291   : > { %v3542_v33 = vmax.f32 %v3493_v8, 0.0  ;;  %v3494_v60 = vmax.f32 %v2867_v31, %v3445_v27  ;;  %v2770_v16 = vmul.f32 %v6488_v32, %v2692_v43  ;;  %v3319_v52 = vpop.f32.mrb[180].mxu1  ;;  %v4712_v54 = vpop.f32.mrb[181].mxu0  ;;  %v6843_v8 = vld [vmem:[#allocation45_spill] sm:$0xff] }
 0x292   : > { %v3397_v20 = vmul.f32 %v6488_v32, %v3319_v52  ;;  %v4814_v0 = vpop.f32.mrb[181].mxu1  ;;  %v2695_v46 = vpop.f32.mrb[182].mxu0  ;;  %v6844_v45 = vmax.f32 %v6842_v36, %v6843_v8 }
 0x293   : > { %v4309_v15 = vpack.c.bf16 %v3542_v33, %v3542_v33  ;;  %v3543_v19 = vmax.f32 %v3494_v60, 0.0  ;;  %v2819_v23 = vadd.f32 %v6495_v17, %v2770_v16  ;;  %v2771_v25 = vmul.f32 %v6488_v32, %v2695_v46  ;;  %v3322_v34 = vpop.f32.mrb[182].mxu1  ;;  %v4713_v35 = vpop.f32.mrb[183].mxu0 }
 0x294   : > { %v3446_v42 = vadd.f32 %v6495_v17, %v3397_v20  ;;  %v3398_v38 = vmul.f32 %v6488_v32, %v3322_v34  ;;  %v4815_v3 = vpop.f32.mrb[183].mxu1 }
 0x295   : > { %3789 = vst.msk [vmem:[%s6196_s24 + $0x98] sm:$0xf] %vm3750_vm2, %v4309_v15  ;;  %v4310_v5 = vpack.c.bf16 %v3543_v19, %v3543_v19  ;;  %v2868_v51 = vmax.f32 %v6835_v61, %v2819_v23  ;;  %v2820_v1 = vadd.f32 %v6495_v17, %v2771_v25  ;;  %v6845_v3 = vld [vmem:[#allocation46_spill] sm:$0xff] }
 0x296   : > { %v3447_v4 = vadd.f32 %v6495_v17, %v3398_v38 }
 0x297   : > { %3790 = vst.msk [vmem:[%s6196_s24 + $0x9c] sm:$0xf] %vm3750_vm2, %v4310_v5  ;;  %v3495_v10 = vmax.f32 %v2868_v51, %v3446_v42  ;;  %v2869_v24 = vmax.f32 %v6838_v2, %v2820_v1  ;;  %v6846_v5 = vld [vmem:[#allocation47_spill] sm:$0xff]  ;;  %v6848_v1 = vld [vmem:[#allocation48_spill] sm:$0xff] }
 0x298   : > { %v2700_v9 = vpop.f32.mrb[184].mxu0  ;;  %v6847_v6 = vmax.f32 %v6845_v3, %v6846_v5 }
 0x299   : > { %v3544_v21 = vmax.f32 %v3495_v10, 0.0  ;;  %v3496_v30 = vmax.f32 %v2869_v24, %v3447_v4  ;;  %v2772_v18 = vmul.f32 %v6488_v32, %v2700_v9  ;;  %v3327_v29 = vpop.f32.mrb[184].mxu1  ;;  %v4716_v62 = vpop.f32.mrb[185].mxu0  ;;  %v6849_v10 = vld [vmem:[#allocation49_spill] sm:$0xff] }
 0x29a   : > { %v3399_v63 = vmul.f32 %v6488_v32, %v3327_v29  ;;  %v4818_v7 = vpop.f32.mrb[185].mxu1  ;;  %v2703_v11 = vpop.f32.mrb[186].mxu0  ;;  %v6850_v57 = vmax.f32 %v6848_v1, %v6849_v10 }
 0x29b   : > { %v4311_v28 = vpack.c.bf16 %v3544_v21, %v3544_v21  ;;  %v3545_v37 = vmax.f32 %v3496_v30, 0.0  ;;  %v2821_v50 = vadd.f32 %v6495_v17, %v2772_v18  ;;  %v2773_v48 = vmul.f32 %v6488_v32, %v2703_v11  ;;  %v3330_v14 = vpop.f32.mrb[186].mxu1  ;;  %v4717_v55 = vpop.f32.mrb[187].mxu0 }
 0x29c   : > { %v3448_v26 = vadd.f32 %v6495_v17, %v3399_v63  ;;  %v3400_v59 = vmul.f32 %v6488_v32, %v3330_v14  ;;  %v4819_v58 = vpop.f32.mrb[187].mxu1 }
 0x29d   : > { %3791 = vst.msk [vmem:[%s6196_s24 + $0xa0] sm:$0xf] %vm3750_vm2, %v4311_v28  ;;  %v4312_v40 = vpack.c.bf16 %v3545_v37, %v3545_v37  ;;  %v2870_v53 = vmax.f32 %v6841_v22, %v2821_v50  ;;  %v2822_v13 = vadd.f32 %v6495_v17, %v2773_v48  ;;  %v6851_v58 = vld [vmem:[#allocation50_spill] sm:$0xff] }
 0x29e   : > { %v3449_v49 = vadd.f32 %v6495_v17, %v3400_v59 }
 0x29f   : > { %3792 = vst.msk [vmem:[%s6196_s24 + $0xa4] sm:$0xf] %vm3750_vm2, %v4312_v40  ;;  %v3497_v39 = vmax.f32 %v2870_v53, %v3448_v26  ;;  %v2871_v47 = vmax.f32 %v6844_v45, %v2822_v13  ;;  %v6852_v40 = vld [vmem:[#allocation51_spill] sm:$0xff]  ;;  %v6854_v13 = vld [vmem:[#allocation52_spill] sm:$0xff] }
 0x2a0   : > { %v2708_v31 = vpop.f32.mrb[188].mxu0  ;;  %v6853_v44 = vmax.f32 %v6851_v58, %v6852_v40 }
 0x2a1   : > { %v3546_v27 = vmax.f32 %v3497_v39, 0.0  ;;  %v3498_v43 = vmax.f32 %v2871_v47, %v3449_v49  ;;  %v2774_v33 = vmul.f32 %v6488_v32, %v2708_v31  ;;  %v3335_v60 = vpop.f32.mrb[188].mxu1  ;;  %v4720_v16 = vpop.f32.mrb[189].mxu0  ;;  %v6855_v39 = vld [vmem:[#allocation53_spill] sm:$0xff] }
 0x2a2   : > { %v3401_v52 = vmul.f32 %v6488_v32, %v3335_v60  ;;  %v4822_v54 = vpop.f32.mrb[189].mxu1  ;;  %v2711_v20 = vpop.f32.mrb[190].mxu0  ;;  %v6856_v36 = vmax.f32 %v6854_v13, %v6855_v39 }
 0x2a3   : > { %v4313_v0 = vpack.c.bf16 %v3546_v27, %v3546_v27  ;;  %v3547_v46 = vmax.f32 %v3498_v43, 0.0  ;;  %v2823_v15 = vadd.f32 %v6495_v17, %v2774_v33  ;;  %v2775_v19 = vmul.f32 %v6488_v32, %v2711_v20  ;;  %v3338_v23 = vpop.f32.mrb[190].mxu1  ;;  %v4721_v25 = vpop.f32.mrb[191].mxu0 }
 0x2a4   : > { %v3450_v34 = vadd.f32 %v6495_v17, %v3401_v52  ;;  %v3402_v35 = vmul.f32 %v6488_v32, %v3338_v23  ;;  %v4823_v42 = vpop.f32.mrb[191].mxu1 }
 0x2a5   : > { %3793 = vst.msk [vmem:[%s6196_s24 + $0xa8] sm:$0xf] %vm3750_vm2, %v4313_v0  ;;  %v4314_v38 = vpack.c.bf16 %v3547_v46, %v3547_v46  ;;  %v2872_v41 = vmax.f32 %v6847_v6, %v2823_v15  ;;  %v2824_v61 = vadd.f32 %v6495_v17, %v2775_v19 }
 0x2a6   : > { %v3451_v2 = vadd.f32 %v6495_v17, %v3402_v35  ;;  %v6858_v35 = vld [vmem:[#allocation55_spill] sm:$0xff] }
 0x2a7   : > { %3794 = vst.msk [vmem:[%s6196_s24 + $0xac] sm:$0xf] %vm3750_vm2, %v4314_v38  ;;  %v3499_v51 = vmax.f32 %v2872_v41, %v3450_v34  ;;  %v2873_v56 = vmax.f32 %v6850_v57, %v2824_v61  ;;  %v6857_v34 = vld [vmem:[#allocation54_spill] sm:$0xff] }
 0x2a8   : > { %v2716_v24 = vpop.f32.mrb[192].mxu0  ;;  %v6859_v42 = vmax.f32 %v6857_v34, %v6858_v35 }
 0x2a9   : > { %v3548_v4 = vmax.f32 %v3499_v51, 0.0  ;;  %v3500_v9 = vmax.f32 %v2873_v56, %v3451_v2  ;;  %v2776_v21 = vmul.f32 %v6488_v32, %v2716_v24  ;;  %v3343_v30 = vpop.f32.mrb[192].mxu1  ;;  %v4724_v18 = vpop.f32.mrb[193].mxu0 }
 0x2aa   : > { %v3403_v29 = vmul.f32 %v6488_v32, %v3343_v30  ;;  %v4826_v62 = vpop.f32.mrb[193].mxu1  ;;  %v2719_v63 = vpop.f32.mrb[194].mxu0 }
 0x2ab   : > { %v4315_v7 = vpack.c.bf16 %v3548_v4, %v3548_v4  ;;  %v3549_v11 = vmax.f32 %v3500_v9, 0.0  ;;  %v2825_v28 = vadd.f32 %v6495_v17, %v2776_v21  ;;  %v2777_v37 = vmul.f32 %v6488_v32, %v2719_v63  ;;  %v3346_v50 = vpop.f32.mrb[194].mxu1  ;;  %v4725_v48 = vpop.f32.mrb[195].mxu0 }
 0x2ac   : > { %v3452_v14 = vadd.f32 %v6495_v17, %v3403_v29  ;;  %v3404_v55 = vmul.f32 %v6488_v32, %v3346_v50  ;;  %v4827_v26 = vpop.f32.mrb[195].mxu1 }
 0x2ad   : > { %3795 = vst.msk [vmem:[%s6196_s24 + $0xb0] sm:$0xf] %vm3750_vm2, %v4315_v7  ;;  %v4316_v59 = vpack.c.bf16 %v3549_v11, %v3549_v11  ;;  %v2874_v12 = vmax.f32 %v6853_v44, %v2825_v28  ;;  %v2826_v22 = vadd.f32 %v6495_v17, %v2777_v37 }
 0x2ae   : > { %v3453_v45 = vadd.f32 %v6495_v17, %v3404_v55 }
 0x2af   : > { %3796 = vst.msk [vmem:[%s6196_s24 + $0xb4] sm:$0xf] %vm3750_vm2, %v4316_v59  ;;  %v3501_v53 = vmax.f32 %v2874_v12, %v3452_v14  ;;  %v2875_v8 = vmax.f32 %v6856_v36, %v2826_v22 }
 0x2b0   : > { %v2724_v47 = vpop.f32.mrb[196].mxu0 }
 0x2b1   : > { %v3550_v49 = vmax.f32 %v3501_v53, 0.0  ;;  %v3502_v31 = vmax.f32 %v2875_v8, %v3453_v45  ;;  %v2778_v27 = vmul.f32 %v6488_v32, %v2724_v47  ;;  %v3351_v43 = vpop.f32.mrb[196].mxu1  ;;  %v4728_v33 = vpop.f32.mrb[197].mxu0 }
 0x2b2   : > { %v3405_v60 = vmul.f32 %v6488_v32, %v3351_v43  ;;  %v4830_v16 = vpop.f32.mrb[197].mxu1  ;;  %v2727_v52 = vpop.f32.mrb[198].mxu0 }
 0x2b3   : > { %v4317_v54 = vpack.c.bf16 %v3550_v49, %v3550_v49  ;;  %v3551_v20 = vmax.f32 %v3502_v31, 0.0  ;;  %v2827_v0 = vadd.f32 %v6495_v17, %v2778_v27  ;;  %v3354_v46 = vpop.f32.mrb[198].mxu1  ;;  %v4729_v15 = vpop.f32.mrb[199].mxu0 }
 0x2b4   : > { %v3454_v19 = vadd.f32 %v6495_v17, %v3405_v60  ;;  %v4831_v23 = vpop.f32.mrb[199].mxu1 }
 0x2b5   : > { %3797 = vst.msk [vmem:[%s6196_s24 + $0xb8] sm:$0xf] %vm3750_vm2, %v4317_v54  ;;  %v4318_v25 = vpack.c.bf16 %v3551_v20, %v3551_v20  ;;  %v2876_v38 = vmax.f32 %v6859_v42, %v2827_v0 }
 0x2b7   : > { %3798 = vst.msk [vmem:[%s6196_s24 + $0xbc] sm:$0xf] %vm3750_vm2, %v4318_v25  ;;  %v3503_v32 = vmax.f32 %v2876_v38, %v3454_v19 }
 0x2b9   : > { %v3552_v3 = vmax.f32 %v3503_v32, 0.0 }
 0x2bb   : > { %v4319_v5 = vpack.c.bf16 %v3552_v3, %v3552_v3 }
 0x2bd   : > { %3799 = vst.msk [vmem:[%s6196_s24 + $0xc0] sm:$0xf] %vm3750_vm2, %v4319_v5 }
 0x2be PF: > { %p11_p9 = scmp.ge.s32.totalorder %s5033_s19, 4   ;;  %s6860_s15 = smov %s4983_s16 }
 0x2bf   : > { %s6861_s16 = smov %s5042_s22  ;;  %s6862_s17 = smov %s5033_s19 }
 0x2c0   :  { %13 = sbr.rel (!%p11_p9) target bundleno = 2 (0x2), region = 115 }

// kernel: cnn_forward.4
= control target key start
LH: loop header
LB: loop body
LE: loop exit
PB: predicated region body
PF: predicated region fallthrough
CT: control target
= control target key end

     0   :  { %s2484_s15 = smov 0   ;;  %s2486_s16 = smov 0   ;;  %s3228_s0 = inlined_call_operand.vmem [shape: bf16[4,144,288], index: 0, kind: input, shape index: {}]   ;;  %s3229_s1 = inlined_call_operand.vmem [shape: bf16[288,64], index: 1, kind: input, shape index: {}]   ;;  %s3230_s2 = inlined_call_operand.vmem [shape: f32[1,64], index: 2, kind: input, shape index: {}]   ;;  %s3231_s3 = inlined_call_operand.vmem [shape: f32[1,64], index: 3, kind: input, shape index: {}]   ;;  %s3232_s4 = inlined_call_operand.vmem [shape: bf16[144,64], index: 4, kind: output, shape index: {}]  }
   0x1   :  { %s2488_s17 = smov 0  }
   0x2 LB: > { %s1744_s18 = sadd.s32 4294967295, %s2455_s17   ;;  %s2501_s19 = sadd.s32 1, %s2455_s17   ;;  %s2455_s17 = sphi %s2488_s17, %s3235_s17   ;;  %s2451_s16 = sphi %s2486_s16, %s3234_s16   ;;  %s2447_s15 = sphi %s2484_s15, %s3233_s15  }
   0x3   : > { %s18_s20 = ssub.s32 %s2455_s17, %s2501_s19  ;;  %s21_s21 = sadd.s32 1, %s2451_s16 }
   0x4   : > { %p19_p0 = scmp.eq.s32.totalorder %s18_s20, 0  ;;  %p28_p1 = scmp.ne.s32.totalorder %s2451_s16, %s2447_s15 }
   0x5   : > { %p29_p2 = scmp.eq.s32.totalorder %s2455_s17, 0  ;;  %p1747_p4 = scmp.ge.s32.totalorder %s2455_s17, 2 }
   0x6   : > { %s2510_s22 = scalar_select %p19_p0, %s2451_s16, %s21_s21  }
   0x7   : > { %p30_p3 = por %p29_p2, %p28_p1  ;;  %152 = sbr.rel (%p1747_p4) target bundleno = 62 (0x3e), region = 28 }
   0xe   : > { %155 = sbr.rel (!%p30_p3) target bundleno = 62 (0x3e), region = 32  ;;  %s157_s23 = sand.u32 (%p30_p3), 1, %s2451_s16  }
   0xf   : > { %s2309_s24 = smul.u32 (%p30_p3), 432, %s157_s23 }
  0x10   : > { %s2312_s25 = smul.u32 (%p30_p3), 108, %s2455_s17 }
  0x11   : > { %s2523_s29 = scalar_lea.vmem (%p30_p3), [#allocation2], %s2309_s24 }
  0x12   : > { %s2518_s28 = scalar_lea.vmem (%p30_p3), %s3228_s0, %s2312_s25 }
  0x13   : > { %v178_v0 = vld [vmem:[%s2518_s28] sm:$0xff] (%p30_p3)  ;;  %v180_v1 = vld [vmem:[%s2518_s28 + $0xc] sm:$0xff] (%p30_p3)  ;;  %v182_v2 = vld [vmem:[%s2518_s28 + $0x18] sm:$0xff] (%p30_p3) }
  0x14   : > { %179 = vst [vmem:[%s2523_s29] sm:$0xff] (%p30_p3), %v178_v0  ;;  %181 = vst [vmem:[%s2523_s29 + $0xc] sm:$0xff] (%p30_p3), %v180_v1  ;;  %v184_v3 = vld [vmem:[%s2518_s28 + $0x24] sm:$0xff] (%p30_p3)  ;;  %v186_v4 = vld [vmem:[%s2518_s28 + $0x30] sm:$0xff] (%p30_p3) }
  0x15   : > { %183 = vst [vmem:[%s2523_s29 + $0x18] sm:$0xff] %v182_v2  ;;  %v188_v5 = vld [vmem:[%s2518_s28 + $0x3c] sm:$0xff]  ;;  %185 = vst [vmem:[%s2523_s29 + $0x24] sm:$0xff] %v184_v3  ;;  %v190_v6 = vld [vmem:[%s2518_s28 + $0x48] sm:$0xff] }
  0x16   : > { %187 = vst [vmem:[%s2523_s29 + $0x30] sm:$0xff] %v186_v4  ;;  %189 = vst [vmem:[%s2523_s29 + $0x3c] sm:$0xff] %v188_v5  ;;  %v192_v7 = vld [vmem:[%s2518_s28 + $0x54] sm:$0xff]  ;;  %v194_v8 = vld [vmem:[%s2518_s28 + $0x60] sm:$0xff] }
  0x17   : > { %191 = vst [vmem:[%s2523_s29 + $0x48] sm:$0xff] %v190_v6  ;;  %193 = vst [vmem:[%s2523_s29 + $0x54] sm:$0xff] %v192_v7  ;;  %v196_v9 = vld [vmem:[%s2518_s28 + $0xd8] sm:$0xff]  ;;  %v198_v10 = vld [vmem:[%s2518_s28 + $0xe4] sm:$0xff] }
  0x18   : > { %195 = vst [vmem:[%s2523_s29 + $0x60] sm:$0xff] %v194_v8  ;;  %v200_v11 = vld [vmem:[%s2518_s28 + $0xf0] sm:$0xff]  ;;  %197 = vst [vmem:[%s2523_s29 + $0x6c] sm:$0xff] %v196_v9  ;;  %v202_v12 = vld [vmem:[%s2518_s28 + $0xfc] sm:$0xff] }
  0x19   : > { %199 = vst [vmem:[%s2523_s29 + $0x78] sm:$0xff] %v198_v10  ;;  %201 = vst [vmem:[%s2523_s29 + $0x84] sm:$0xff] %v200_v11  ;;  %v204_v13 = vld [vmem:[%s2518_s28 + $0x108] sm:$0xff]  ;;  %v206_v14 = vld [vmem:[%s2518_s28 + $0x114] sm:$0xff] }
  0x1a   : > { %203 = vst [vmem:[%s2523_s29 + $0x90] sm:$0xff] %v202_v12  ;;  %205 = vst [vmem:[%s2523_s29 + $0x9c] sm:$0xff] %v204_v13  ;;  %v208_v15 = vld [vmem:[%s2518_s28 + $0x120] sm:$0xff]  ;;  %v210_v16 = vld [vmem:[%s2518_s28 + $0x12c] sm:$0xff] }
  0x1b   : > { %207 = vst [vmem:[%s2523_s29 + $0xa8] sm:$0xff] %v206_v14  ;;  %v212_v17 = vld [vmem:[%s2518_s28 + $0x138] sm:$0xff]  ;;  %209 = vst [vmem:[%s2523_s29 + $0xb4] sm:$0xff] %v208_v15  ;;  %v214_v18 = vld [vmem:[%s2518_s28 + $0x1b0] sm:$0xff] }
  0x1c   : > { %211 = vst [vmem:[%s2523_s29 + $0xc0] sm:$0xff] %v210_v16  ;;  %213 = vst [vmem:[%s2523_s29 + $0xcc] sm:$0xff] %v212_v17  ;;  %v216_v19 = vld [vmem:[%s2518_s28 + $0x1bc] sm:$0xff]  ;;  %v218_v20 = vld [vmem:[%s2518_s28 + $0x1c8] sm:$0xff] }
  0x1d   : > { %215 = vst [vmem:[%s2523_s29 + $0xd8] sm:$0xff] %v214_v18  ;;  %217 = vst [vmem:[%s2523_s29 + $0xe4] sm:$0xff] %v216_v19  ;;  %v220_v21 = vld [vmem:[%s2518_s28 + $0x1d4] sm:$0xff]  ;;  %v222_v22 = vld [vmem:[%s2518_s28 + $0x1e0] sm:$0xff] }
  0x1e   : > { %219 = vst [vmem:[%s2523_s29 + $0xf0] sm:$0xff] %v218_v20  ;;  %v224_v23 = vld [vmem:[%s2518_s28 + $0x1ec] sm:$0xff]  ;;  %221 = vst [vmem:[%s2523_s29 + $0xfc] sm:$0xff] %v220_v21  ;;  %v226_v24 = vld [vmem:[%s2518_s28 + $0x1f8] sm:$0xff] }
  0x1f   : > { %223 = vst [vmem:[%s2523_s29 + $0x108] sm:$0xff] %v222_v22  ;;  %225 = vst [vmem:[%s2523_s29 + $0x114] sm:$0xff] %v224_v23  ;;  %v228_v25 = vld [vmem:[%s2518_s28 + $0x204] sm:$0xff]  ;;  %v230_v26 = vld [vmem:[%s2518_s28 + $0x210] sm:$0xff] }
  0x20   : > { %227 = vst [vmem:[%s2523_s29 + $0x120] sm:$0xff] %v226_v24  ;;  %229 = vst [vmem:[%s2523_s29 + $0x12c] sm:$0xff] %v228_v25  ;;  %v232_v27 = vld [vmem:[%s2518_s28 + $0x288] sm:$0xff]  ;;  %v234_v28 = vld [vmem:[%s2518_s28 + $0x294] sm:$0xff] }
  0x21   : > { %231 = vst [vmem:[%s2523_s29 + $0x138] sm:$0xff] %v230_v26  ;;  %v236_v29 = vld [vmem:[%s2518_s28 + $0x2a0] sm:$0xff]  ;;  %233 = vst [vmem:[%s2523_s29 + $0x144] sm:$0xff] %v232_v27  ;;  %v238_v30 = vld [vmem:[%s2518_s28 + $0x2ac] sm:$0xff] }
  0x22   : > { %235 = vst [vmem:[%s2523_s29 + $0x150] sm:$0xff] %v234_v28  ;;  %237 = vst [vmem:[%s2523_s29 + $0x15c] sm:$0xff] %v236_v29  ;;  %v240_v31 = vld [vmem:[%s2518_s28 + $0x2b8] sm:$0xff]  ;;  %v242_v32 = vld [vmem:[%s2518_s28 + $0x2c4] sm:$0xff] }
  0x23   : > { %239 = vst [vmem:[%s2523_s29 + $0x168] sm:$0xff] %v238_v30  ;;  %241 = vst [vmem:[%s2523_s29 + $0x174] sm:$0xff] %v240_v31  ;;  %v244_v33 = vld [vmem:[%s2518_s28 + $0x2d0] sm:$0xff]  ;;  %v246_v34 = vld [vmem:[%s2518_s28 + $0x2dc] sm:$0xff] }
  0x24   : > { %243 = vst [vmem:[%s2523_s29 + $0x180] sm:$0xff] %v242_v32  ;;  %v248_v35 = vld [vmem:[%s2518_s28 + $0x2e8] sm:$0xff]  ;;  %245 = vst [vmem:[%s2523_s29 + $0x18c] sm:$0xff] %v244_v33  ;;  %v1751_v37 = vld [vmem:[%s2518_s28 + $0x14] sm:$0xf] }
  0x25   : > { %247 = vst [vmem:[%s2523_s29 + $0x198] sm:$0xff] %v246_v34  ;;  %249 = vst [vmem:[%s2523_s29 + $0x1a4] sm:$0xff] %v248_v35  ;;  %v1749_v36 = vld [vmem:[%s2518_s28 + $0x8] sm:$0xf]  ;;  %v1753_v38 = vld [vmem:[%s2518_s28 + $0x20] sm:$0xf] }
  0x26   : > { %1750 = vst [vmem:[%s2523_s29 + $0x8] sm:$0xf] %v1749_v36  ;;  %1752 = vst [vmem:[%s2523_s29 + $0x14] sm:$0xf] %v1751_v37  ;;  %v1755_v39 = vld [vmem:[%s2518_s28 + $0x2c] sm:$0xf] }
  0x27   : > { %1754 = vst [vmem:[%s2523_s29 + $0x20] sm:$0xf] %v1753_v38  ;;  %v1757_v40 = vld [vmem:[%s2518_s28 + $0x38] sm:$0xf]  ;;  %v1759_v41 = vld [vmem:[%s2518_s28 + $0x44] sm:$0xf] }
  0x28   : > { %1756 = vst [vmem:[%s2523_s29 + $0x2c] sm:$0xf] %v1755_v39  ;;  %1758 = vst [vmem:[%s2523_s29 + $0x38] sm:$0xf] %v1757_v40  ;;  %v1761_v42 = vld [vmem:[%s2518_s28 + $0x50] sm:$0xf] }
  0x29   : > { %1760 = vst [vmem:[%s2523_s29 + $0x44] sm:$0xf] %v1759_v41  ;;  %v1763_v43 = vld [vmem:[%s2518_s28 + $0x5c] sm:$0xf]  ;;  %v1765_v44 = vld [vmem:[%s2518_s28 + $0x68] sm:$0xf] }
  0x2a   : > { %1762 = vst [vmem:[%s2523_s29 + $0x50] sm:$0xf] %v1761_v42  ;;  %1764 = vst [vmem:[%s2523_s29 + $0x5c] sm:$0xf] %v1763_v43  ;;  %v1767_v45 = vld [vmem:[%s2518_s28 + $0xe0] sm:$0xf] }
  0x2b   : > { %1766 = vst [vmem:[%s2523_s29 + $0x68] sm:$0xf] %v1765_v44  ;;  %v1769_v46 = vld [vmem:[%s2518_s28 + $0xec] sm:$0xf]  ;;  %v1771_v47 = vld [vmem:[%s2518_s28 + $0xf8] sm:$0xf] }
  0x2c   : > { %1768 = vst [vmem:[%s2523_s29 + $0x74] sm:$0xf] %v1767_v45  ;;  %1770 = vst [vmem:[%s2523_s29 + $0x80] sm:$0xf] %v1769_v46  ;;  %v1773_v48 = vld [vmem:[%s2518_s28 + $0x104] sm:$0xf] }
  0x2d   : > { %1772 = vst [vmem:[%s2523_s29 + $0x8c] sm:$0xf] %v1771_v47  ;;  %v1775_v49 = vld [vmem:[%s2518_s28 + $0x110] sm:$0xf]  ;;  %v1777_v50 = vld [vmem:[%s2518_s28 + $0x11c] sm:$0xf] }
  0x2e   : > { %1774 = vst [vmem:[%s2523_s29 + $0x98] sm:$0xf] %v1773_v48  ;;  %1776 = vst [vmem:[%s2523_s29 + $0xa4] sm:$0xf] %v1775_v49  ;;  %v1779_v51 = vld [vmem:[%s2518_s28 + $0x128] sm:$0xf] }
  0x2f   : > { %1778 = vst [vmem:[%s2523_s29 + $0xb0] sm:$0xf] %v1777_v50  ;;  %v1781_v52 = vld [vmem:[%s2518_s28 + $0x134] sm:$0xf]  ;;  %v1783_v53 = vld [vmem:[%s2518_s28 + $0x140] sm:$0xf] }
  0x30   : > { %1780 = vst [vmem:[%s2523_s29 + $0xbc] sm:$0xf] %v1779_v51  ;;  %1782 = vst [vmem:[%s2523_s29 + $0xc8] sm:$0xf] %v1781_v52  ;;  %v1785_v54 = vld [vmem:[%s2518_s28 + $0x1b8] sm:$0xf] }
  0x31   : > { %1784 = vst [vmem:[%s2523_s29 + $0xd4] sm:$0xf] %v1783_v53  ;;  %v1787_v55 = vld [vmem:[%s2518_s28 + $0x1c4] sm:$0xf]  ;;  %v1789_v56 = vld [vmem:[%s2518_s28 + $0x1d0] sm:$0xf] }
  0x32   : > { %1786 = vst [vmem:[%s2523_s29 + $0xe0] sm:$0xf] %v1785_v54  ;;  %1788 = vst [vmem:[%s2523_s29 + $0xec] sm:$0xf] %v1787_v55  ;;  %v1791_v57 = vld [vmem:[%s2518_s28 + $0x1dc] sm:$0xf] }
  0x33   : > { %1790 = vst [vmem:[%s2523_s29 + $0xf8] sm:$0xf] %v1789_v56  ;;  %v1793_v58 = vld [vmem:[%s2518_s28 + $0x1e8] sm:$0xf]  ;;  %v1795_v59 = vld [vmem:[%s2518_s28 + $0x1f4] sm:$0xf] }
  0x34   : > { %1792 = vst [vmem:[%s2523_s29 + $0x104] sm:$0xf] %v1791_v57  ;;  %1794 = vst [vmem:[%s2523_s29 + $0x110] sm:$0xf] %v1793_v58  ;;  %v1797_v60 = vld [vmem:[%s2518_s28 + $0x200] sm:$0xf] }
  0x35   : > { %1796 = vst [vmem:[%s2523_s29 + $0x11c] sm:$0xf] %v1795_v59  ;;  %v1799_v61 = vld [vmem:[%s2518_s28 + $0x20c] sm:$0xf]  ;;  %v1801_v62 = vld [vmem:[%s2518_s28 + $0x218] sm:$0xf] }
  0x36   : > { %1798 = vst [vmem:[%s2523_s29 + $0x128] sm:$0xf] %v1797_v60  ;;  %1800 = vst [vmem:[%s2523_s29 + $0x134] sm:$0xf] %v1799_v61  ;;  %v1803_v63 = vld [vmem:[%s2518_s28 + $0x290] sm:$0xf] }
  0x37   : > { %1802 = vst [vmem:[%s2523_s29 + $0x140] sm:$0xf] %v1801_v62  ;;  %v1805_v0 = vld [vmem:[%s2518_s28 + $0x29c] sm:$0xf]  ;;  %v1807_v1 = vld [vmem:[%s2518_s28 + $0x2a8] sm:$0xf] }
  0x38   : > { %1804 = vst [vmem:[%s2523_s29 + $0x14c] sm:$0xf] %v1803_v63  ;;  %1806 = vst [vmem:[%s2523_s29 + $0x158] sm:$0xf] %v1805_v0  ;;  %v1809_v2 = vld [vmem:[%s2518_s28 + $0x2b4] sm:$0xf] }
  0x39   : > { %1808 = vst [vmem:[%s2523_s29 + $0x164] sm:$0xf] %v1807_v1  ;;  %v1811_v3 = vld [vmem:[%s2518_s28 + $0x2c0] sm:$0xf]  ;;  %v1813_v4 = vld [vmem:[%s2518_s28 + $0x2cc] sm:$0xf] }
  0x3a   : > { %1810 = vst [vmem:[%s2523_s29 + $0x170] sm:$0xf] %v1809_v2  ;;  %1812 = vst [vmem:[%s2523_s29 + $0x17c] sm:$0xf] %v1811_v3  ;;  %v1815_v5 = vld [vmem:[%s2518_s28 + $0x2d8] sm:$0xf] }
  0x3b   : > { %1814 = vst [vmem:[%s2523_s29 + $0x188] sm:$0xf] %v1813_v4  ;;  %v1817_v6 = vld [vmem:[%s2518_s28 + $0x2e4] sm:$0xf]  ;;  %v1819_v7 = vld [vmem:[%s2518_s28 + $0x2f0] sm:$0xf] }
  0x3c   : > { %1816 = vst [vmem:[%s2523_s29 + $0x194] sm:$0xf] %v1815_v5  ;;  %1818 = vst [vmem:[%s2523_s29 + $0x1a0] sm:$0xf] %v1817_v6 }
  0x3d   : > { %1820 = vst [vmem:[%s2523_s29 + $0x1ac] sm:$0xf] %v1819_v7 }
  0x3e PF: > { %p1821_p5 = scmp.ge.s32.totalorder %s2455_s17, 1  ;;  %p333_p6 = scmp.lt.s32.totalorder %s2455_s17, 3 }
  0x40   : > { %p334_p7 = pnand %p1821_p5, %p333_p6 }
  0x41   : > { %v2671_v8 = vld [vmem:[%s3229_s1 + $0x40] sm:$0xff] (!%p334_p7)   ;;  %v2457_v9 = vmov (!%p334_p7), 0.0   ;;  %vm2458_vm0 = vmmov (!%p334_p7), 0   ;;  %s340_s10 = sand.u32 (!%p334_p7), 1, %s2447_s15   ;;  %v2692_v12 = vld [vmem:[%s3229_s1 + $0x48] sm:$0xff] (!%p334_p7)   ;;  %vm607_vm1 = vcmask (!%p334_p7), 261120  }
  0x42   : > { %337 = sbr.rel (%p334_p7) target bundleno = 470 (0x1d6), region = 58  ;;  %2209 = vmatprep.subr.bf16.mxu1 (!%p334_p7), %v2457_v9  ;;  %v2677_v10 = vld [vmem:[%s3229_s1 + $0x80] sm:$0xff] (!%p334_p7)   ;;  %1997 = vmatprep.subr.bf16.mxu0 (!%p334_p7), %v2671_v8  ;;  %v2699_v13 = vld [vmem:[%s3229_s1 + $0x88] sm:$0xff] (!%p334_p7)   ;;  %v2714_v16 = vld [vmem:[%s3229_s1 + $0x50] sm:$0xff] (!%p334_p7)   ;;  %vm1668_vm2 = vcmask (!%p334_p7), 519168  }
  0x43   : > { %v2683_v11 = vld [vmem:[%s3229_s1] sm:$0xff] (!%p334_p7)   ;;  %2213 = vmatprep.mubr.msk.bf16.mxu1 (!%p334_p7), %vm2458_vm0, %v2457_v9  ;;  %2210 = vmatpush3.bf16.msra.mxu1 (!%p334_p7), %v2677_v10  ;;  %s2311_s13 = smul.u32 (!%p334_p7), 432, %s340_s10  ;;  %v2705_v14 = vld [vmem:[%s3229_s1 + $0x8] sm:$0xff] (!%p334_p7)   ;;  %v2720_v17 = vld [vmem:[%s3229_s1 + $0x10] sm:$0xff] (!%p334_p7)  }
  0x44   : > { %1998 = vmatpush3.bf16.msra.mxu0 (!%p334_p7), %v2683_v11  ;;  %2211 = vmatprep.subr.bf16.mxu1 (!%p334_p7), %v2457_v9  ;;  %v2727_v18 = vld [vmem:[%s3229_s1 + $0x58] sm:$0xff] (!%p334_p7)   ;;  %v2744_v20 = vld [vmem:[%s3229_s1 + $0x60] sm:$0xff] (!%p334_p7)   ;;  %v2759_v23 = vld [vmem:[%s3229_s1 + $0x68] sm:$0xff] (!%p334_p7)   ;;  %s366_s5 = smul.u32 (!%p334_p7), 9, %s1744_s18 }
  0x45   : > { %1999 = vmatprep.subr.bf16.mxu0 (!%p334_p7), %v2692_v12  ;;  %s2707_s23 = scalar_lea.vmem (!%p334_p7), [#allocation2], %s2311_s13  ;;  %v2737_v19 = vld [vmem:[%s3229_s1 + $0x18] sm:$0xff] (!%p334_p7)   ;;  %v2752_v22 = vld [vmem:[%s3229_s1 + $0x20] sm:$0xff] (!%p334_p7)   ;;  %v2765_v24 = vld [vmem:[%s3229_s1 + $0x28] sm:$0xff] (!%p334_p7)  }
  0x46   : > { %v2345_v15 = vld [vmem:[%s2707_s23 + $0x8] ss:$12 sps:$4 sm:$0xff] (!%p334_p7)   ;;  %v2350_v21 = vld [vmem:[%s2707_s23 + $0x20] ss:$12 sps:$4 sm:$0xff] (!%p334_p7)   ;;  %v2355_v25 = vld [vmem:[%s2707_s23 + $0x38] ss:$12 sps:$4 sm:$0xff] (!%p334_p7)  }
  0x47   : > { %2212 = vmatpush3.bf16.msra.mxu1 (!%p334_p7), %v2699_v13  ;;  %v2777_v26 = vld [vmem:[%s3229_s1 + $0x70] sm:$0xff] (!%p334_p7)   ;;  %v2791_v29 = vld [vmem:[%s3229_s1 + $0x78] sm:$0xff] (!%p334_p7)   ;;  %p367_p8 = scmp.lt.s32.totalorder (!%p334_p7), %s366_s5, 17 }
  0x48   : > { %2000 = vmatpush3.bf16.msra.mxu0 (!%p334_p7), %v2705_v14  ;;  %2050 = vmatprep.subr.bf16.mxu1 (!%p334_p7), %v2671_v8  ;;  %v2362_v27 = vld [vmem:[%s2707_s23 + $0x4] ss:$12 sps:$4 sm:$0xff] (!%p334_p7)   ;;  %v2802_v30 = vld [vmem:[%s3229_s1 + $0x38] sm:$0xff] (!%p334_p7)   ;;  %v2371_v37 = vld [vmem:[%s2707_s23 + $0x34] ss:$12 sps:$4 sm:$0xff] (!%p334_p7)  }
  0x49   : > { %2001 = vmatprep.subr.bf16.mxu0 %v2714_v16  ;;  %v2785_v28 = vld [vmem:[%s3229_s1 + $0x30] sm:$0xff]   ;;  %655 = vmatprep.mubr.bf16.mxu0 %v2362_v27  ;;  %v2364_v33 = vld [vmem:[%s2707_s23 + $0x1c] ss:$12 sps:$4 sm:$0xff]   ;;  %v2368_v38 = vld [vmem:[%s2707_s23 + $0x6c] ss:$12 sps:$4 sm:$0xff]   ;;  %s3237_s5 = smov (!%p367_p8, %s366_s5), 17 }
  0x4a   : > { %2214 = vmatmul.mubr.msk.bf16.vlgmr.msra.gmra.mrb[0].mxu1 %vm607_vm1, %v2345_v15  ;;  %v2363_v31 = vld [vmem:[%s2707_s23 + $0x50] ss:$12 sps:$4 sm:$0xff]   ;;  %v2360_v32 = vld [vmem:[%s2707_s23] ss:$12 sps:$4 sm:$0xff]   ;;  %v2366_v34 = vld [vmem:[%s2707_s23 + $0x68] ss:$0 sps:$4 sm:$0xff]  }
  0x4b   : > { %2217 = vmatprep.mubr.msk.bf16.mxu1 %vm2458_vm0, %v2457_v9  ;;  %2051 = vmatpush3.bf16.msra.mxu1 %v2683_v11  ;;  %v2367_v35 = vld [vmem:[%s2707_s23 + $0x18] ss:$12 sps:$4 sm:$0xff]   ;;  %v2370_v36 = vld [vmem:[%s2707_s23 + $0x70] ss:$12 sps:$4 sm:$0xff]   ;;  %v2374_v40 = vld [vmem:[%s2707_s23 + $0x88] ss:$12 sps:$4 sm:$0xff]  }
  0x4c   : > { %2002 = vmatpush3.bf16.msra.mxu0 %v2720_v17  ;;  %2052 = vmatprep.subr.bf16.mxu1 %v2692_v12  ;;  %v2373_v39 = vld [vmem:[%s2707_s23 + $0x30] ss:$12 sps:$4 sm:$0xff]   ;;  %v2376_v41 = vld [vmem:[%s2707_s23 + $0x4c] ss:$12 sps:$4 sm:$0xff]   ;;  %v427_v42 = vld [vmem:[%s2707_s23 + $0x60] sm:$0xff]  ;;  %s1822_s17 = sshll.u32 %s3237_s5, 2 }
  0x4d   : > { %2003 = vmatprep.subr.bf16.mxu0 %v2727_v18  ;;  %v2378_v43 = vld [vmem:[%s2707_s23 + $0x84] ss:$12 sps:$4 sm:$0xff]   ;;  %v2379_v44 = vld [vmem:[%s2707_s23 + $0x48] ss:$12 sps:$4 sm:$0xff]   ;;  %v2380_v45 = vld [vmem:[%s2707_s23 + $0xa0] ss:$12 sps:$4 sm:$0xff]   ;;  %v1836_v46 = vcombine.high %v427_v42, %v427_v42  ;;  %v1835_v48 = vcombine.low %v427_v42, %v427_v42  ;;  %s3174_s7 = scalar_lea.vmem %s3232_s4, %s1822_s17 }
  0x4e   : > { %v2383_v47 = vld [vmem:[%s2707_s23 + $0x9c] ss:$12 sps:$4 sm:$0xff]   ;;  %v2385_v49 = vld [vmem:[%s2707_s23 + $0xb8] ss:$12 sps:$4 sm:$0xff]   ;;  %v1879_v50 = vld [vmem:[%s2707_s23 + $0xcc] sm:$0xff] }
  0x4f   : > { %2053 = vmatpush3.bf16.msra.mxu1 %v2705_v14  ;;  %v2387_v51 = vld [vmem:[%s2707_s23 + $0xb4] ss:$12 sps:$4 sm:$0xff]   ;;  %v1894_v53 = vcombine.high %v1879_v50, %v1879_v50  ;;  %v1893_v54 = vcombine.low %v1879_v50, %v1879_v50  ;;  %v2391_v55 = vld [vmem:[%s2707_s23 + $0x8c] ss:$12 sps:$4 sm:$0xff]   ;;  %v2394_v56 = vld [vmem:[%s2707_s23 + $0xdc] ss:$12 sps:$4 sm:$0xff]  }
  0x50   : > { %2004 = vmatpush3.bf16.msra.mxu0 %v2737_v19  ;;  %2054 = vmatprep.subr.bf16.mxu1 %v2714_v16  ;;  %v2388_v52 = vld [vmem:[%s2707_s23 + $0x74] ss:$12 sps:$4 sm:$0xff]   ;;  %v2392_v57 = vld [vmem:[%s2707_s23 + $0xd8] ss:$12 sps:$4 sm:$0xff]   ;;  %v2398_v60 = vld [vmem:[%s2707_s23 + $0xf0] ss:$12 sps:$4 sm:$0xff]  }
  0x51   : > { %2005 = vmatprep.subr.bf16.mxu0 %v2744_v20  ;;  %v2395_v58 = vld [vmem:[%s2707_s23 + $0xa4] ss:$12 sps:$4 sm:$0xff]   ;;  %v2396_v59 = vld [vmem:[%s2707_s23 + $0xf4] ss:$12 sps:$4 sm:$0xff]   ;;  %v2399_v61 = vld [vmem:[%s2707_s23 + $0xbc] ss:$12 sps:$4 sm:$0xff]  }
  0x52   : > { %2218 = vmatmul.mubr.msk.bf16.gmra.mrb[4].mxu1 %vm607_vm1, %v2350_v21  ;;  %v2400_v62 = vld [vmem:[%s2707_s23 + $0x10c] ss:$12 sps:$4 sm:$0xff]   ;;  %v2402_v63 = vld [vmem:[%s2707_s23 + $0x108] ss:$12 sps:$4 sm:$0xff]   ;;  %v2404_v1 = vld [vmem:[%s2707_s23 + $0x124] ss:$12 sps:$4 sm:$0xff]  }
  0x53   : > { %2221 = vmatprep.mubr.msk.bf16.mxu1 %vm2458_vm0, %v2457_v9  ;;  %2055 = vmatpush3.bf16.msra.mxu1 %v2720_v17  ;;  %v2403_v0 = vld [vmem:[%s2707_s23 + $0xd4] ss:$0 sps:$4 sm:$0xff]   ;;  %v1917_v2 = vld [vmem:[%s2707_s23 + $0x138] sm:$0xff]  ;;  %v2406_v3 = vld [vmem:[%s2707_s23 + $0x120] ss:$12 sps:$4 sm:$0xff]  }
  0x54   : > { %2006 = vmatpush3.bf16.msra.mxu0 %v2752_v22  ;;  %2056 = vmatprep.subr.bf16.mxu1 %v2727_v18  ;;  %v2407_v4 = vld [vmem:[%s2707_s23 + $0xe0] ss:$12 sps:$4 sm:$0xff]   ;;  %v1932_v5 = vcombine.high %v1917_v2, %v1917_v2  ;;  %v1931_v6 = vcombine.low %v1917_v2, %v1917_v2  ;;  %v2410_v7 = vld [vmem:[%s2707_s23 + $0xf8] ss:$12 sps:$4 sm:$0xff]   ;;  %v2417_v15 = vld [vmem:[%s2707_s23 + $0x15c] ss:$12 sps:$4 sm:$0xff]  }
  0x55   : > { %2007 = vmatprep.subr.bf16.mxu0 %v2759_v23  ;;  %v2426_v21 = vld [vmem:[%s2707_s23 + $0x14c] ss:$12 sps:$4 sm:$0xff]   ;;  %v2432_v27 = vld [vmem:[%s2707_s23 + $0x194] ss:$12 sps:$4 sm:$0xff]  }
  0x57   : > { %2057 = vmatpush3.bf16.msra.mxu1 %v2737_v19 }
  0x58   : > { %2008 = vmatpush3.bf16.msra.mxu0 %v2765_v24  ;;  %2058 = vmatprep.subr.bf16.mxu1 %v2744_v20 }
  0x59   : > { %2009 = vmatprep.subr.bf16.mxu0 %v2777_v26 }
  0x5a   : > { %2222 = vmatmul.mubr.msk.bf16.gmra.mrb[8].mxu1 %vm607_vm1, %v2355_v25  ;;  %v2430_v25 = vld [vmem:[%s2707_s23 + $0x1ac] ss:$0 sps:$4 sm:$0xff]  }
  0x5b   : > { %2225 = vmatprep.mubr.msk.bf16.mxu1 %vm2458_vm0, %v2457_v9  ;;  %2059 = vmatpush3.bf16.msra.mxu1 %v2752_v22 }
  0x5c   : > { %2010 = vmatpush3.bf16.msra.mxu0 %v2785_v28  ;;  %2060 = vmatprep.subr.bf16.mxu1 %v2759_v23 }
  0x5d   : > { %2011 = vmatprep.subr.bf16.mxu0 %v2791_v29 }
  0x5f   : > { %2061 = vmatpush3.bf16.msra.mxu1 %v2765_v24 }
  0x60   : > { %2012 = vmatpush3.bf16.msra.mxu0 %v2802_v30  ;;  %2062 = vmatprep.subr.bf16.mxu1 %v2777_v26 }
  0x61   : > { %2233 = vmatprep.subr.bf16.mxu0 %v2457_v9 }
  0x62   : > { %2226 = vmatmul.mubr.msk.bf16.gmra.mrb[12].mxu1 %vm607_vm1, %v2363_v31 }
  0x63   : > { %656 = vmatmul.mubr.bf16.vlgmr.msra.gmra.mrb[0].mxu0 %v2360_v32  ;;  %2229 = vmatprep.mubr.msk.bf16.mxu1 %vm2458_vm0, %v2457_v9 }
  0x64   : > { %2234 = vmatpush3.bf16.msra.mxu0 %v2677_v10  ;;  %663 = vmatprep.mubr.bf16.mxu0 %v2364_v33 }
  0x65   : > { %2063 = vmatpush3.bf16.msra.mxu1 %v2785_v28  ;;  %2235 = vmatprep.subr.bf16.mxu0 %v2457_v9 }
  0x66   : > { %2064 = vmatprep.subr.bf16.mxu1 %v2791_v29 }
  0x68   : > { %2236 = vmatpush3.bf16.msra.mxu0 %v2699_v13 }
  0x69   : > { %2065 = vmatpush3.bf16.msra.mxu1 %v2802_v30  ;;  %2257 = vmatprep.subr.bf16.mxu0 %v2457_v9 }
  0x6a   : > { %2230 = vmatmul.mubr.msk.bf16.gmra.mrb[16].mxu1 %vm607_vm1, %v2366_v34  ;;  %2103 = vmatprep.subr.bf16.mxu1 %v2671_v8 }
  0x6b   : > { %664 = vmatmul.mubr.bf16.gmra.mrb[4].mxu0 %v2367_v35  ;;  %933 = vmatprep.mubr.bf16.mxu1 %v2370_v36 }
  0x6c   : > { %671 = vmatprep.mubr.bf16.mxu0 %v2371_v37 }
  0x72   : > { %934 = vmatmul.mubr.bf16.vlgmr.msra.gmra.mrb[20].mxu1 %v2368_v38 }
  0x73   : > { %672 = vmatmul.mubr.bf16.gmra.mrb[8].mxu0 %v2373_v39  ;;  %941 = vmatprep.mubr.bf16.mxu1 %v2374_v40 }
  0x74   : > { %679 = vmatprep.mubr.bf16.mxu0 %v2376_v41  ;;  %2104 = vmatpush3.bf16.msra.mxu1 %v2683_v11 }
  0x75   : > { %2105 = vmatprep.subr.bf16.mxu1 %v2692_v12 }
  0x78   : > { %2106 = vmatpush3.bf16.msra.mxu1 %v2705_v14 }
  0x79   : > { %2107 = vmatprep.subr.bf16.mxu1 %v2714_v16 }
  0x7a   : > { %942 = vmatmul.mubr.bf16.gmra.mrb[24].mxu1 %v2378_v43 }
  0x7b   : > { %680 = vmatmul.mubr.bf16.gmra.mrb[12].mxu0 %v2379_v44  ;;  %949 = vmatprep.mubr.bf16.mxu1 %v2380_v45 }
  0x7c   : > { %687 = vmatprep.mubr.bf16.mxu0 %v1836_v46  ;;  %2108 = vmatpush3.bf16.msra.mxu1 %v2720_v17 }
  0x7d   : > { %2109 = vmatprep.subr.bf16.mxu1 %v2727_v18 }
  0x80   : > { %2110 = vmatpush3.bf16.msra.mxu1 %v2737_v19 }
  0x81   : > { %2111 = vmatprep.subr.bf16.mxu1 %v2744_v20 }
  0x82   : > { %950 = vmatmul.mubr.bf16.gmra.mrb[28].mxu1 %v2383_v47 }
  0x83   : > { %688 = vmatmul.mubr.bf16.gmra.mrb[16].mxu0 %v1835_v48  ;;  %957 = vmatprep.mubr.bf16.mxu1 %v2385_v49 }
  0x84   : > { %2237 = vmatprep.mubr.msk.bf16.mxu0 %vm2458_vm0, %v2457_v9  ;;  %2112 = vmatpush3.bf16.msra.mxu1 %v2752_v22 }
  0x85   : > { %2113 = vmatprep.subr.bf16.mxu1 %v2759_v23 }
  0x88   : > { %2114 = vmatpush3.bf16.msra.mxu1 %v2765_v24 }
  0x89   : > { %2115 = vmatprep.subr.bf16.mxu1 %v2777_v26 }
  0x8a   : > { %958 = vmatmul.mubr.bf16.gmra.mrb[32].mxu1 %v2387_v51 }
  0x8b   : > { %2238 = vmatmul.mubr.msk.bf16.vlgmr.msra.gmra.mrb[20].mxu0 %vm607_vm1, %v2388_v52  ;;  %965 = vmatprep.mubr.bf16.mxu1 %v1894_v53 }
  0x8c   : > { %2258 = vmatpush3.bf16.msra.mxu0 %v2677_v10  ;;  %2241 = vmatprep.mubr.msk.bf16.mxu0 %vm2458_vm0, %v2457_v9 }
  0x8d   : > { %2116 = vmatpush3.bf16.msra.mxu1 %v2785_v28  ;;  %2259 = vmatprep.subr.bf16.mxu0 %v2457_v9 }
  0x8e   : > { %2117 = vmatprep.subr.bf16.mxu1 %v2791_v29 }
  0x90   : > { %2260 = vmatpush3.bf16.msra.mxu0 %v2699_v13 }
  0x91   : > { %2118 = vmatpush3.bf16.msra.mxu1 %v2802_v30  ;;  %2281 = vmatprep.subr.bf16.mxu0 %v2457_v9 }
  0x92   : > { %966 = vmatmul.mubr.bf16.gmra.mrb[36].mxu1 %v1893_v54  ;;  %2156 = vmatprep.subr.bf16.mxu1 %v2671_v8  ;;  %v2413_v8 = vld [vmem:[%s2707_s23 + $0x148] ss:$12 sps:$4 sm:$0xff]  }
  0x93   : > { %2242 = vmatmul.mubr.msk.bf16.gmra.mrb[24].mxu0 %vm607_vm1, %v2391_v55  ;;  %1208 = vmatprep.mubr.bf16.mxu1 %v2394_v56 }
  0x94   : > { %2245 = vmatprep.mubr.msk.bf16.mxu0 %vm2458_vm0, %v2457_v9 }
  0x9a   : > { %1209 = vmatmul.mubr.bf16.vlgmr.msra.gmra.mrb[40].mxu1 %v2392_v57 }
  0x9b   : > { %2246 = vmatmul.mubr.msk.bf16.gmra.mrb[28].mxu0 %vm607_vm1, %v2395_v58  ;;  %1216 = vmatprep.mubr.bf16.mxu1 %v2396_v59 }
  0x9c   : > { %2249 = vmatprep.mubr.msk.bf16.mxu0 %vm2458_vm0, %v2457_v9  ;;  %2157 = vmatpush3.bf16.msra.mxu1 %v2683_v11  ;;  %v2411_v11 = vld [vmem:[%s2707_s23 + $0x144] ss:$12 sps:$4 sm:$0xff]  }
  0x9d   : > { %2158 = vmatprep.subr.bf16.mxu1 %v2692_v12  ;;  %v2414_v12 = vld [vmem:[%s2707_s23 + $0x110] ss:$12 sps:$4 sm:$0xff]  }
  0xa0   : > { %2159 = vmatpush3.bf16.msra.mxu1 %v2705_v14  ;;  %v2415_v14 = vld [vmem:[%s2707_s23 + $0x160] ss:$12 sps:$4 sm:$0xff]  }
  0xa1   : > { %2160 = vmatprep.subr.bf16.mxu1 %v2714_v16  ;;  %v2418_v16 = vld [vmem:[%s2707_s23 + $0x128] ss:$12 sps:$4 sm:$0xff]  }
  0xa2   : > { %1217 = vmatmul.mubr.bf16.gmra.mrb[44].mxu1 %v2398_v60 }
  0xa3   : > { %2250 = vmatmul.mubr.msk.bf16.gmra.mrb[32].mxu0 %vm607_vm1, %v2399_v61  ;;  %1224 = vmatprep.mubr.bf16.mxu1 %v2400_v62 }
  0xa4   : > { %2253 = vmatprep.mubr.msk.bf16.mxu0 %vm2458_vm0, %v2457_v9  ;;  %2161 = vmatpush3.bf16.msra.mxu1 %v2720_v17  ;;  %v2419_v17 = vld [vmem:[%s2707_s23 + $0x178] ss:$12 sps:$4 sm:$0xff]  }
  0xa5   : > { %2162 = vmatprep.subr.bf16.mxu1 %v2727_v18  ;;  %v2421_v18 = vld [vmem:[%s2707_s23 + $0x174] ss:$12 sps:$4 sm:$0xff]  }
  0xa8   : > { %2163 = vmatpush3.bf16.msra.mxu1 %v2737_v19  ;;  %v2423_v19 = vld [vmem:[%s2707_s23 + $0x190] ss:$12 sps:$4 sm:$0xff]  }
  0xa9   : > { %2164 = vmatprep.subr.bf16.mxu1 %v2744_v20  ;;  %v2425_v20 = vld [vmem:[%s2707_s23 + $0x18c] ss:$12 sps:$4 sm:$0xff]  }
  0xaa   : > { %1225 = vmatmul.mubr.bf16.gmra.mrb[48].mxu1 %v2402_v63 }
  0xab   : > { %2254 = vmatmul.mubr.msk.bf16.gmra.mrb[36].mxu0 %vm607_vm1, %v2403_v0  ;;  %1232 = vmatprep.mubr.bf16.mxu1 %v2404_v1 }
  0xac   : > { %2261 = vmatprep.mubr.msk.bf16.mxu0 %vm2458_vm0, %v2457_v9  ;;  %2165 = vmatpush3.bf16.msra.mxu1 %v2752_v22 }
  0xad   : > { %2166 = vmatprep.subr.bf16.mxu1 %v2759_v23 }
  0xb0   : > { %2167 = vmatpush3.bf16.msra.mxu1 %v2765_v24  ;;  %v2429_v24 = vld [vmem:[%s2707_s23 + $0x164] ss:$12 sps:$4 sm:$0xff]  }
  0xb1   : > { %2168 = vmatprep.subr.bf16.mxu1 %v2777_v26  ;;  %v2431_v26 = vld [vmem:[%s2707_s23 + $0x17c] ss:$12 sps:$4 sm:$0xff]  }
  0xb2   : > { %1233 = vmatmul.mubr.bf16.gmra.mrb[52].mxu1 %v2406_v3 }
  0xb3   : > { %2262 = vmatmul.mubr.msk.bf16.vlgmr.msra.gmra.mrb[40].mxu0 %vm607_vm1, %v2407_v4  ;;  %1240 = vmatprep.mubr.bf16.mxu1 %v1932_v5 }
  0xb4   : > { %2282 = vmatpush3.bf16.msra.mxu0 %v2677_v10  ;;  %2265 = vmatprep.mubr.msk.bf16.mxu0 %vm2458_vm0, %v2457_v9 }
  0xb5   : > { %2169 = vmatpush3.bf16.msra.mxu1 %v2785_v28  ;;  %2283 = vmatprep.subr.bf16.mxu0 %v2457_v9 }
  0xb6   : > { %2170 = vmatprep.subr.bf16.mxu1 %v2791_v29 }
  0xb8   : > { %2284 = vmatpush3.bf16.msra.mxu0 %v2699_v13 }
  0xb9   : > { %2171 = vmatpush3.bf16.msra.mxu1 %v2802_v30 }
  0xba   : > { %1241 = vmatmul.mubr.bf16.gmra.mrb[56].mxu1 %v1931_v6  ;;  %2305 = vmatprep.subr.bf16.mxu1 %v2457_v9 }
  0xbb   : > { %2266 = vmatmul.mubr.msk.bf16.gmra.mrb[44].mxu0 %vm607_vm1, %v2410_v7  ;;  %1483 = vmatprep.mubr.bf16.mxu1 %v2413_v8 }
  0xbc   : > { %2269 = vmatprep.mubr.msk.bf16.mxu0 %vm2458_vm0, %v2457_v9 }
  0xc2   : > { %1484 = vmatmul.mubr.bf16.vlgmr.msra.gmra.mrb[60].mxu1 %v2411_v11 }
  0xc3   : > { %2270 = vmatmul.mubr.msk.bf16.gmra.mrb[48].mxu0 %vm607_vm1, %v2414_v12  ;;  %1491 = vmatprep.mubr.bf16.mxu1 %v2415_v14 }
  0xc4   : > { %2273 = vmatprep.mubr.msk.bf16.mxu0 %vm2458_vm0, %v2457_v9  ;;  %2307 = vmatpush3.bf16.msra.mxu1 %v2677_v10  ;;  %v2422_v10 = vld [vmem:[%s2707_s23 + $0x140] ss:$0 sps:$4 sm:$0xff]  }
  0xc5   : > { %2306 = vmatprep.subr.bf16.mxu1 %v2457_v9 }
  0xc8   : > { %2308 = vmatpush3.bf16.msra.mxu1 %v2699_v13  ;;  %v1955_v13 = vld [vmem:[%s2707_s23 + $0x1a4] sm:$0xff] }
  0xc9   : > { %v1970_v22 = vcombine.high %v1955_v13, %v1955_v13  ;;  %v1969_v23 = vcombine.low %v1955_v13, %v1955_v13 }
  0xca   : > { %1492 = vmatmul.mubr.bf16.gmra.mrb[64].mxu1 %v2417_v15 }
  0xcb   : > { %2274 = vmatmul.mubr.msk.bf16.gmra.mrb[52].mxu0 %vm607_vm1, %v2418_v16  ;;  %1499 = vmatprep.mubr.bf16.mxu1 %v2419_v17 }
  0xcc   : > { %2277 = vmatprep.mubr.msk.bf16.mxu0 %vm2458_vm0, %v2457_v9 }
  0xd2   : > { %1500 = vmatmul.mubr.bf16.gmra.mrb[68].mxu1 %v2421_v18 }
  0xd3   : > { %2278 = vmatmul.mubr.msk.bf16.gmra.mrb[56].mxu0 %vm607_vm1, %v2422_v10  ;;  %1507 = vmatprep.mubr.bf16.mxu1 %v2423_v19 }
  0xd4   : > { %2285 = vmatprep.mubr.msk.bf16.mxu0 %vm2458_vm0, %v2457_v9 }
  0xda   : > { %1508 = vmatmul.mubr.bf16.gmra.mrb[72].mxu1 %v2425_v20 }
  0xdb   : > { %2286 = vmatmul.mubr.msk.bf16.vlgmr.msra.gmra.mrb[60].mxu0 %vm607_vm1, %v2426_v21  ;;  %1515 = vmatprep.mubr.bf16.mxu1 %v1970_v22 }
  0xdc   : > { %2289 = vmatprep.mubr.msk.bf16.mxu0 %vm2458_vm0, %v2457_v9 }
  0xe2   : > { %1516 = vmatmul.mubr.bf16.gmra.mrb[76].mxu1 %v1969_v23 }
  0xe3   : > { %2290 = vmatmul.mubr.msk.bf16.gmra.mrb[64].mxu0 %vm607_vm1, %v2429_v24  ;;  %2301 = vmatprep.mubr.msk.bf16.mxu1 %vm2458_vm0, %v2457_v9 }
  0xe4   : > { %2293 = vmatprep.mubr.msk.bf16.mxu0 %vm2458_vm0, %v2457_v9 }
  0xea   : > { %2302 = vmatmul.mubr.msk.bf16.vlgmr.msra.gmra.mrb[80].mxu1 %vm607_vm1, %v2430_v25 }
  0xeb   : > { %2294 = vmatmul.mubr.msk.bf16.gmra.mrb[68].mxu0 %vm607_vm1, %v2431_v26 }
  0xec   : > { %2297 = vmatprep.mubr.msk.bf16.mxu0 %vm2458_vm0, %v2457_v9 }
  0xf3   : > { %2298 = vmatmul.mubr.msk.bf16.gmra.mrb[72].mxu0 %vm607_vm1, %v2432_v27 }
 0x11d   : > { %v729_v28 = vpop.f32.mrb[0].mxu1 }
 0x11e   : > { %v2215_v29 = vpop.f32.mrb[1].mxu1 }
 0x11f   : > { %v732_v30 = vpop.f32.mrb[2].mxu1 }
 0x120   : > { %v2216_v31 = vpop.f32.mrb[3].mxu1 }
 0x125   : > { %v737_v32 = vpop.f32.mrb[4].mxu1 }
 0x126   : > { %v2219_v33 = vpop.f32.mrb[5].mxu1 }
 0x127   : > { %v740_v34 = vpop.f32.mrb[6].mxu1 }
 0x128   : > { %v2220_v35 = vpop.f32.mrb[7].mxu1 }
 0x12d   : > { %v745_v36 = vpop.f32.mrb[8].mxu1 }
 0x12e   : > { %v2223_v37 = vpop.f32.mrb[9].mxu1 }
 0x12f   : > { %v748_v38 = vpop.f32.mrb[10].mxu1 }
 0x130   : > { %v2224_v39 = vpop.f32.mrb[11].mxu1 }
 0x135   : > { %v753_v40 = vpop.f32.mrb[12].mxu1 }
 0x136   : > { %v2013_v41 = vpop.f32.mrb[0].mxu0  ;;  %v2227_v42 = vpop.f32.mrb[13].mxu1 }
 0x137   : > { %v2014_v43 = vpop.f32.mrb[1].mxu0  ;;  %v756_v9 = vpop.f32.mrb[14].mxu1 }
 0x138   : > { %v2015_v44 = vadd.f32 %v2014_v43, %v2013_v41  ;;  %v2016_v45 = vpop.f32.mrb[2].mxu0  ;;  %v2228_v46 = vpop.f32.mrb[15].mxu1 }
 0x139   : > { %v2017_v47 = vpop.f32.mrb[3].mxu0 }
 0x13a   : > { %v730_v48 = vadd.f32 %v2015_v44, %v729_v28  ;;  %v2018_v49 = vadd.f32 %v2017_v47, %v2016_v45 }
 0x13c   : > { %v2961_v50 = vadd.f32 %v2018_v49, %v732_v30  ;;  %v2988_v49 = vld [vmem:[%s3231_s3] ss:$0 sm:$0xff] }
 0x13d   : > { %v761_v51 = vpop.f32.mrb[16].mxu1 }
 0x13e   : > { %v2019_v52 = vpop.f32.mrb[4].mxu0  ;;  %v2231_v53 = vpop.f32.mrb[17].mxu1 }
 0x13f   : > { %v2020_v54 = vpop.f32.mrb[5].mxu0  ;;  %v764_v55 = vpop.f32.mrb[18].mxu1 }
 0x140   : > { %v2021_v56 = vadd.f32 %v2020_v54, %v2019_v52  ;;  %v2022_v57 = vpop.f32.mrb[6].mxu0  ;;  %v2232_v58 = vpop.f32.mrb[19].mxu1 }
 0x141   : > { %v2023_v59 = vpop.f32.mrb[7].mxu0 }
 0x142   : > { %v2963_v60 = vadd.f32 %v2021_v56, %v737_v32  ;;  %v2024_v61 = vadd.f32 %v2023_v59, %v2022_v57 }
 0x144   : > { %v2965_v62 = vadd.f32 %v2024_v61, %v740_v34 }
 0x145   : > { %v2066_v63 = vpop.f32.mrb[20].mxu1 }
 0x146   : > { %v2025_v0 = vpop.f32.mrb[8].mxu0  ;;  %v2067_v1 = vpop.f32.mrb[21].mxu1 }
 0x147   : > { %v2026_v2 = vpop.f32.mrb[9].mxu0  ;;  %v2068_v3 = vadd.f32 %v2067_v1, %v2066_v63  ;;  %v2069_v4 = vpop.f32.mrb[22].mxu1 }
 0x148   : > { %v2027_v5 = vadd.f32 %v2026_v2, %v2025_v0  ;;  %v2028_v6 = vpop.f32.mrb[10].mxu0  ;;  %v2070_v7 = vpop.f32.mrb[23].mxu1 }
 0x149   : > { %v2029_v8 = vpop.f32.mrb[11].mxu0  ;;  %v2071_v11 = vadd.f32 %v2070_v7, %v2069_v4 }
 0x14a   : > { %v2967_v12 = vadd.f32 %v2027_v5, %v745_v36  ;;  %v2030_v14 = vadd.f32 %v2029_v8, %v2028_v6 }
 0x14c   : > { %v2969_v15 = vadd.f32 %v2030_v14, %v748_v38 }
 0x14d   : > { %v2072_v16 = vpop.f32.mrb[24].mxu1 }
 0x14e   : > { %v2031_v17 = vpop.f32.mrb[12].mxu0  ;;  %v2073_v18 = vpop.f32.mrb[25].mxu1 }
 0x14f   : > { %v2032_v10 = vpop.f32.mrb[13].mxu0  ;;  %v2074_v19 = vadd.f32 %v2073_v18, %v2072_v16  ;;  %v2075_v13 = vpop.f32.mrb[26].mxu1 }
 0x150   : > { %v2033_v20 = vadd.f32 %v2032_v10, %v2031_v17  ;;  %v2034_v21 = vpop.f32.mrb[14].mxu0  ;;  %v2076_v22 = vpop.f32.mrb[27].mxu1 }
 0x151   : > { %v2035_v23 = vpop.f32.mrb[15].mxu0  ;;  %v2077_v24 = vadd.f32 %v2076_v22, %v2075_v13 }
 0x152   : > { %v2971_v25 = vadd.f32 %v2033_v20, %v753_v40  ;;  %v2036_v26 = vadd.f32 %v2035_v23, %v2034_v21  ;;  %v2980_v40 = vld [vmem:[%s3230_s2] ss:$0 sm:$0xff] }
 0x153   : > { %v774_v53 = vmul.f32 %v2980_v40, %v2961_v50  ;;  %v776_v16 = vmul.f32 %v2980_v40, %v2965_v62 }
 0x154   : > { %v2973_v27 = vadd.f32 %v2036_v26, %v756_v9  ;;  %v773_v9 = vmul.f32 %v2980_v40, %v730_v48  ;;  %v777_v26 = vmul.f32 %v2980_v40, %v2967_v12 }
 0x155   : > { %v2078_v28 = vpop.f32.mrb[28].mxu1  ;;  %v3003_v61 = vadd.f32 %v2988_v49, %v774_v53  ;;  %v3027_v20 = vadd.f32 %v2988_v49, %v776_v16 }
 0x156   : > { %v2037_v29 = vpop.f32.mrb[16].mxu0  ;;  %v2079_v30 = vpop.f32.mrb[29].mxu1  ;;  %v2996_v57 = vadd.f32 %v2988_v49, %v773_v9  ;;  %v3042_v9 = vadd.f32 %v2988_v49, %v777_v26 }
 0x157   : > { %v2038_v31 = vpop.f32.mrb[17].mxu0  ;;  %v2080_v32 = vadd.f32 %v2079_v30, %v2078_v28  ;;  %v2081_v33 = vpop.f32.mrb[30].mxu1 }
 0x158   : > { %v2039_v34 = vadd.f32 %v2038_v31, %v2037_v29  ;;  %v2040_v35 = vpop.f32.mrb[18].mxu0  ;;  %v2082_v36 = vpop.f32.mrb[31].mxu1 }
 0x159   : > { %v2041_v37 = vpop.f32.mrb[19].mxu0  ;;  %v2083_v38 = vadd.f32 %v2082_v36, %v2081_v33  ;;  %v778_v36 = vmul.f32 %v2980_v40, %v2969_v15 }
 0x15a   : > { %v2975_v39 = vadd.f32 %v2039_v34, %v761_v51 }
 0x15d   : > { %v2084_v41 = vpop.f32.mrb[32].mxu1 }
 0x15e   : > { %v1007_v42 = vpop.f32.mrb[20].mxu0  ;;  %v2085_v43 = vpop.f32.mrb[33].mxu1 }
 0x15f   : > { %v1008_v44 = vadd.f32 %v2068_v3, %v1007_v42  ;;  %v2239_v45 = vpop.f32.mrb[21].mxu0  ;;  %v2983_v46 = vadd.f32 %v2085_v43, %v2084_v41  ;;  %v2087_v47 = vpop.f32.mrb[34].mxu1  ;;  %v775_v3 = vmul.f32 %v2980_v40, %v2963_v60 }
 0x160   : > { %v1010_v51 = vpop.f32.mrb[22].mxu0  ;;  %v2088_v52 = vpop.f32.mrb[35].mxu1 }
 0x161   : > { %v1045_v54 = vmul.f32 %v2980_v40, %v1008_v44  ;;  %v1011_v55 = vadd.f32 %v2071_v11, %v1010_v51  ;;  %v2240_v56 = vpop.f32.mrb[23].mxu0  ;;  %v2993_v48 = vadd.f32 %v2088_v52, %v2087_v47  ;;  %v3020_v13 = vadd.f32 %v2988_v49, %v775_v3 }
 0x162   : > { %v3049_v44 = vadd.f32 %v2988_v49, %v778_v36  ;;  %v779_v52 = vmul.f32 %v2980_v40, %v2971_v25 }
 0x163   : > { %v2999_v58 = vadd.f32 %v2988_v49, %v1045_v54  ;;  %v1046_v59 = vmul.f32 %v2980_v40, %v1011_v55 }
 0x164   : > { %v3066_v25 = vadd.f32 %v2988_v49, %v779_v52 }
 0x165   : > { %v1063_v50 = vmax.f32 %v2996_v57, %v2999_v58  ;;  %v3008_v63 = vadd.f32 %v2988_v49, %v1046_v59  ;;  %v2090_v0 = vpop.f32.mrb[36].mxu1 }
 0x166   : > { %v1015_v1 = vpop.f32.mrb[24].mxu0  ;;  %v2091_v2 = vpop.f32.mrb[37].mxu1 }
 0x167   : > { %v1064_v4 = vmax.f32 %v3003_v61, %v3008_v63  ;;  %v1016_v5 = vadd.f32 %v2074_v19, %v1015_v1  ;;  %v2243_v6 = vpop.f32.mrb[25].mxu0  ;;  %v3014_v7 = vadd.f32 %v2091_v2, %v2090_v0  ;;  %v2093_v8 = vpop.f32.mrb[38].mxu1  ;;  %v780_v2 = vmul.f32 %v2980_v40, %v2973_v27 }
 0x168   : > { %v1018_v11 = vpop.f32.mrb[26].mxu0  ;;  %v2094_v14 = vpop.f32.mrb[39].mxu1 }
 0x169   : > { %v1047_v17 = vmul.f32 %v2980_v40, %v1016_v5  ;;  %v1019_v18 = vadd.f32 %v2077_v24, %v1018_v11  ;;  %v2244_v10 = vpop.f32.mrb[27].mxu0  ;;  %v3073_v14 = vadd.f32 %v2988_v49, %v780_v2 }
 0x16a   : > { %v781_v10 = vmul.f32 %v2980_v40, %v2975_v39 }
 0x16b   : > { %v3023_v60 = vadd.f32 %v2988_v49, %v1047_v17  ;;  %v1048_v19 = vmul.f32 %v2980_v40, %v1019_v18 }
 0x16c   : > { %v3087_v36 = vadd.f32 %v2988_v49, %v781_v10 }
 0x16d   : > { %v1065_v21 = vmax.f32 %v3020_v13, %v3023_v60  ;;  %v3032_v62 = vadd.f32 %v2988_v49, %v1048_v19  ;;  %v2119_v22 = vpop.f32.mrb[40].mxu1 }
 0x16e   : > { %v1023_v23 = vpop.f32.mrb[28].mxu0  ;;  %v2120_v24 = vpop.f32.mrb[41].mxu1 }
 0x16f   : > { %v1066_v28 = vmax.f32 %v3027_v20, %v3032_v62  ;;  %v1024_v29 = vadd.f32 %v2080_v32, %v1023_v23  ;;  %v2247_v30 = vpop.f32.mrb[29].mxu0  ;;  %v2121_v31 = vadd.f32 %v2120_v24, %v2119_v22  ;;  %v2122_v33 = vpop.f32.mrb[42].mxu1 }
 0x170   : > { %v1026_v34 = vpop.f32.mrb[30].mxu0  ;;  %v2123_v35 = vpop.f32.mrb[43].mxu1 }
 0x171   : > { %v1049_v37 = vmul.f32 %v2980_v40, %v1024_v29  ;;  %v1027_v41 = vadd.f32 %v2083_v38, %v1026_v34  ;;  %v2248_v42 = vpop.f32.mrb[31].mxu0  ;;  %v2124_v43 = vadd.f32 %v2123_v35, %v2122_v33 }
 0x173   : > { %v3045_v12 = vadd.f32 %v2988_v49, %v1049_v37  ;;  %v1050_v32 = vmul.f32 %v2980_v40, %v1027_v41 }
 0x175   : > { %v1067_v45 = vmax.f32 %v3042_v9, %v3045_v12  ;;  %v3054_v15 = vadd.f32 %v2988_v49, %v1050_v32  ;;  %v2125_v38 = vpop.f32.mrb[44].mxu1 }
 0x176   : > { %v1031_v47 = vpop.f32.mrb[32].mxu0  ;;  %v2126_v51 = vpop.f32.mrb[45].mxu1 }
 0x177   : > { %v1068_v53 = vmax.f32 %v3049_v44, %v3054_v15  ;;  %v1032_v54 = vadd.f32 %v2983_v46, %v1031_v47  ;;  %v2251_v55 = vpop.f32.mrb[33].mxu0  ;;  %v2127_v56 = vadd.f32 %v2126_v51, %v2125_v38  ;;  %v2128_v59 = vpop.f32.mrb[46].mxu1 }
 0x178   : > { %v1034_v0 = vpop.f32.mrb[34].mxu0  ;;  %v2129_v1 = vpop.f32.mrb[47].mxu1 }
 0x179   : > { %v1051_v3 = vmul.f32 %v2980_v40, %v1032_v54  ;;  %v1035_v5 = vadd.f32 %v2993_v48, %v1034_v0  ;;  %v2252_v6 = vpop.f32.mrb[35].mxu0  ;;  %v2130_v8 = vadd.f32 %v2129_v1, %v2128_v59 }
 0x17b   : > { %v3069_v11 = vadd.f32 %v2988_v49, %v1051_v3  ;;  %v1052_v46 = vmul.f32 %v2980_v40, %v1035_v5 }
 0x17d   : > { %v1069_v27 = vmax.f32 %v3066_v25, %v3069_v11  ;;  %v3078_v16 = vadd.f32 %v2988_v49, %v1052_v46  ;;  %v2131_v48 = vpop.f32.mrb[48].mxu1 }
 0x17e   : > { %v1039_v17 = vpop.f32.mrb[36].mxu0  ;;  %v2132_v18 = vpop.f32.mrb[49].mxu1 }
 0x17f   : > { %v1070_v19 = vmax.f32 %v3073_v14, %v3078_v16  ;;  %v1040_v22 = vadd.f32 %v3014_v7, %v1039_v17  ;;  %v2255_v23 = vpop.f32.mrb[37].mxu0  ;;  %v2133_v24 = vadd.f32 %v2132_v18, %v2131_v48  ;;  %v2134_v26 = vpop.f32.mrb[50].mxu1 }
 0x180   : > { %v1042_v29 = vpop.f32.mrb[38].mxu0  ;;  %v2135_v30 = vpop.f32.mrb[51].mxu1 }
 0x181   : > { %v1053_v33 = vmul.f32 %v2980_v40, %v1040_v22  ;;  %v2256_v34 = vpop.f32.mrb[39].mxu0  ;;  %v2136_v35 = vadd.f32 %v2135_v30, %v2134_v26 }
 0x183   : > { %v3090_v37 = vadd.f32 %v2988_v49, %v1053_v33 }
 0x185   : > { %v1071_v39 = vmax.f32 %v3087_v36, %v3090_v37  ;;  %v2137_v41 = vpop.f32.mrb[52].mxu1 }
 0x186   : > { %v1282_v7 = vpop.f32.mrb[40].mxu0  ;;  %v2138_v42 = vpop.f32.mrb[53].mxu1 }
 0x187   : > { %v1283_v32 = vadd.f32 %v2121_v31, %v1282_v7  ;;  %v2263_v38 = vpop.f32.mrb[41].mxu0  ;;  %v2139_v47 = vadd.f32 %v2138_v42, %v2137_v41  ;;  %v2140_v51 = vpop.f32.mrb[54].mxu1 }
 0x188   : > { %v1285_v52 = vpop.f32.mrb[42].mxu0  ;;  %v2141_v54 = vpop.f32.mrb[55].mxu1 }
 0x189   : > { %v1320_v55 = vmul.f32 %v2980_v40, %v1283_v32  ;;  %v1286_v59 = vadd.f32 %v2124_v43, %v1285_v52  ;;  %v2264_v0 = vpop.f32.mrb[43].mxu0  ;;  %v2142_v1 = vadd.f32 %v2141_v54, %v2140_v51 }
 0x18b   : > { %v1329_v2 = vadd.f32 %v2988_v49, %v1320_v55  ;;  %v1321_v3 = vmul.f32 %v2980_v40, %v1286_v59 }
 0x18d   : > { %v3100_v5 = vmax.f32 %v1063_v50, %v1329_v2  ;;  %v1330_v31 = vadd.f32 %v2988_v49, %v1321_v3  ;;  %v2143_v6 = vpop.f32.mrb[56].mxu1 }
 0x18e   : > { %v1290_v46 = vpop.f32.mrb[44].mxu0  ;;  %v2144_v48 = vpop.f32.mrb[57].mxu1 }
 0x18f   : > { %v3106_v43 = vmax.f32 %v1064_v4, %v1330_v31  ;;  %v1291_v17 = vadd.f32 %v2127_v56, %v1290_v46  ;;  %v2267_v18 = vpop.f32.mrb[45].mxu0  ;;  %v2145_v10 = vadd.f32 %v2144_v48, %v2143_v6  ;;  %v2146_v22 = vpop.f32.mrb[58].mxu1 }
 0x190   : > { %v1293_v23 = vpop.f32.mrb[46].mxu0  ;;  %v2147_v26 = vpop.f32.mrb[59].mxu1 }
 0x191   : > { %v1322_v57 = vmul.f32 %v2980_v40, %v1291_v17  ;;  %v1294_v58 = vadd.f32 %v2130_v8, %v1293_v23  ;;  %v2268_v50 = vpop.f32.mrb[47].mxu0 }
 0x193   : > { %v1331_v29 = vadd.f32 %v2988_v49, %v1322_v57  ;;  %v1323_v30 = vmul.f32 %v2980_v40, %v1294_v58 }
 0x195   : > { %v3114_v61 = vmax.f32 %v1065_v21, %v1331_v29  ;;  %v1332_v63 = vadd.f32 %v2988_v49, %v1323_v30  ;;  %v2172_v4 = vpop.f32.mrb[60].mxu1 }
 0x196   : > { %v1298_v56 = vpop.f32.mrb[48].mxu0  ;;  %v2173_v33 = vpop.f32.mrb[61].mxu1 }
 0x197   : > { %v3120_v34 = vmax.f32 %v1066_v28, %v1332_v63  ;;  %v1299_v8 = vadd.f32 %v2133_v24, %v1298_v56  ;;  %v2271_v41 = vpop.f32.mrb[49].mxu0  ;;  %v2174_v7 = vadd.f32 %v2173_v33, %v2172_v4  ;;  %v2175_v42 = vpop.f32.mrb[62].mxu1 }
 0x198   : > { %v1301_v32 = vpop.f32.mrb[50].mxu0  ;;  %v2176_v38 = vpop.f32.mrb[63].mxu1 }
 0x199   : > { %v1324_v13 = vmul.f32 %v2980_v40, %v1299_v8  ;;  %v1302_v60 = vadd.f32 %v2136_v35, %v1301_v32  ;;  %v2272_v21 = vpop.f32.mrb[51].mxu0  ;;  %v2177_v51 = vadd.f32 %v2176_v38, %v2175_v42 }
 0x19b   : > { %v1333_v52 = vadd.f32 %v2988_v49, %v1324_v13  ;;  %v1325_v54 = vmul.f32 %v2980_v40, %v1302_v60 }
 0x19d   : > { %v3128_v20 = vmax.f32 %v1067_v45, %v1333_v52  ;;  %v1334_v62 = vadd.f32 %v2988_v49, %v1325_v54  ;;  %v2178_v28 = vpop.f32.mrb[64].mxu1 }
 0x19e   : > { %v1306_v24 = vpop.f32.mrb[52].mxu0  ;;  %v2179_v55 = vpop.f32.mrb[65].mxu1 }
 0x19f   : > { %v3134_v35 = vmax.f32 %v1068_v53, %v1334_v62  ;;  %v1307_v59 = vadd.f32 %v2139_v47, %v1306_v24  ;;  %v2275_v0 = vpop.f32.mrb[53].mxu0  ;;  %v2180_v2 = vadd.f32 %v2179_v55, %v2178_v28  ;;  %v2181_v3 = vpop.f32.mrb[66].mxu1 }
 0x1a0   : > { %v1309_v31 = vpop.f32.mrb[54].mxu0  ;;  %v2182_v6 = vpop.f32.mrb[67].mxu1 }
 0x1a1   : > { %v1326_v9 = vmul.f32 %v2980_v40, %v1307_v59  ;;  %v1310_v12 = vadd.f32 %v2142_v1, %v1309_v31  ;;  %v2276_v45 = vpop.f32.mrb[55].mxu0  ;;  %v2183_v46 = vadd.f32 %v2182_v6, %v2181_v3 }
 0x1a3   : > { %v1335_v48 = vadd.f32 %v2988_v49, %v1326_v9  ;;  %v1327_v17 = vmul.f32 %v2980_v40, %v1310_v12 }
 0x1a5   : > { %v3142_v44 = vmax.f32 %v1069_v27, %v1335_v48  ;;  %v1336_v15 = vadd.f32 %v2988_v49, %v1327_v17  ;;  %v2184_v53 = vpop.f32.mrb[68].mxu1 }
 0x1a6   : > { %v1314_v47 = vpop.f32.mrb[56].mxu0  ;;  %v2185_v18 = vpop.f32.mrb[69].mxu1 }
 0x1a7   : > { %v3148_v1 = vmax.f32 %v1070_v19, %v1336_v15  ;;  %v1315_v22 = vadd.f32 %v2145_v10, %v1314_v47  ;;  %v2279_v23 = vpop.f32.mrb[57].mxu0  ;;  %v2186_v26 = vadd.f32 %v2185_v18, %v2184_v53  ;;  %v2187_v57 = vpop.f32.mrb[70].mxu1 }
 0x1a8   : > { %v1317_v58 = vpop.f32.mrb[58].mxu0  ;;  %v2188_v50 = vpop.f32.mrb[71].mxu1 }
 0x1a9   : > { %v1328_v25 = vmul.f32 %v2980_v40, %v1315_v22  ;;  %v2280_v11 = vpop.f32.mrb[59].mxu0  ;;  %v3153_v27 = vadd.f32 %v2188_v50, %v2187_v57 }
 0x1ab   : > { %v1337_v29 = vadd.f32 %v2988_v49, %v1328_v25 }
 0x1ad   : > { %v3159_v14 = vmax.f32 %v1071_v39, %v1337_v29  ;;  %v2190_v16 = vpop.f32.mrb[72].mxu1 }
 0x1ae   : > { %v1557_v19 = vpop.f32.mrb[60].mxu0  ;;  %v2191_v10 = vpop.f32.mrb[73].mxu1 }
 0x1af   : > { %v1558_v30 = vadd.f32 %v2174_v7, %v1557_v19  ;;  %v2287_v63 = vpop.f32.mrb[61].mxu0  ;;  %v3161_v4 = vadd.f32 %v2191_v10, %v2190_v16  ;;  %v2193_v56 = vpop.f32.mrb[74].mxu1 }
 0x1b0   : > { %v1560_v33 = vpop.f32.mrb[62].mxu0  ;;  %v2194_v8 = vpop.f32.mrb[75].mxu1 }
 0x1b1   : > { %v1595_v41 = vmul.f32 %v2980_v40, %v1558_v30  ;;  %v1561_v42 = vadd.f32 %v2177_v51, %v1560_v33  ;;  %v2288_v32 = vpop.f32.mrb[63].mxu0  ;;  %v3164_v38 = vadd.f32 %v2194_v8, %v2193_v56 }
 0x1b3   : > { %v1604_v36 = vadd.f32 %v2988_v49, %v1595_v41  ;;  %v1596_v37 = vmul.f32 %v2980_v40, %v1561_v42 }
 0x1b5   : > { %v1613_v39 = vmax.f32 %v3100_v5, %v1604_v36  ;;  %v1605_v7 = vadd.f32 %v2988_v49, %v1596_v37  ;;  %v2196_v13 = vpop.f32.mrb[76].mxu1 }
 0x1b6   : > { %v1565_v60 = vpop.f32.mrb[64].mxu0  ;;  %v2197_v21 = vpop.f32.mrb[77].mxu1 }
 0x1b7   : > { %v1622_v52 = vmax.f32 %v1613_v39, 0.0  ;;  %v1614_v54 = vmax.f32 %v3106_v43, %v1605_v7  ;;  %v1566_v62 = vadd.f32 %v2180_v2, %v1565_v60  ;;  %v2291_v51 = vpop.f32.mrb[65].mxu0  ;;  %v2198_v28 = vadd.f32 %v2197_v21, %v2196_v13  ;;  %v2199_v24 = vpop.f32.mrb[78].mxu1 }
 0x1b8   : > { %v1568_v5 = vpop.f32.mrb[66].mxu0  ;;  %v2200_v55 = vpop.f32.mrb[79].mxu1 }
 0x1b9   : > { %v1988_v59 = vpack.c.bf16 %v1622_v52, %v1622_v52  ;;  %v1623_v0 = vmax.f32 %v1614_v54, 0.0  ;;  %v1597_v3 = vmul.f32 %v2980_v40, %v1566_v62  ;;  %v1569_v31 = vadd.f32 %v2183_v46, %v1568_v5  ;;  %v2292_v43 = vpop.f32.mrb[67].mxu0 }
 0x1bb   : > { %1669 = vst.msk [vmem:[%s3174_s7] sm:$0xf] %vm1668_vm2, %v1988_v59  ;;  %v1989_v2 = vpack.c.bf16 %v1623_v0, %v1623_v0  ;;  %v1606_v6 = vadd.f32 %v2988_v49, %v1597_v3  ;;  %v1598_v9 = vmul.f32 %v2980_v40, %v1569_v31 }
 0x1bd   : > { %1670 = vst.msk [vmem:[%s3174_s7 + $0x4] sm:$0xf] %vm1668_vm2, %v1989_v2  ;;  %v1615_v12 = vmax.f32 %v3114_v61, %v1606_v6  ;;  %v1607_v45 = vadd.f32 %v2988_v49, %v1598_v9  ;;  %v1589_v48 = vpop.f32.mrb[80].mxu1 }
 0x1be   : > { %v1590_v17 = vadd.f32 %v2198_v28, %v1589_v48  ;;  %v1573_v15 = vpop.f32.mrb[68].mxu0  ;;  %v2303_v53 = vpop.f32.mrb[81].mxu1 }
 0x1bf   : > { %v1624_v46 = vmax.f32 %v1615_v12, 0.0  ;;  %v1616_v47 = vmax.f32 %v3120_v34, %v1607_v45  ;;  %v1574_v18 = vadd.f32 %v2186_v26, %v1573_v15  ;;  %v2295_v22 = vpop.f32.mrb[69].mxu0  ;;  %v1592_v23 = vpop.f32.mrb[82].mxu1 }
 0x1c0   : > { %v1603_v57 = vmul.f32 %v2980_v40, %v1590_v17  ;;  %v1576_v58 = vpop.f32.mrb[70].mxu0  ;;  %v2304_v50 = vpop.f32.mrb[83].mxu1 }
 0x1c1   : > { %v1990_v25 = vpack.c.bf16 %v1624_v46, %v1624_v46  ;;  %v1625_v61 = vmax.f32 %v1616_v47, 0.0  ;;  %v1599_v11 = vmul.f32 %v2980_v40, %v1574_v18  ;;  %v1577_v29 = vadd.f32 %v3153_v27, %v1576_v58  ;;  %v2296_v16 = vpop.f32.mrb[71].mxu0 }
 0x1c2   : > { %v1612_v19 = vadd.f32 %v2988_v49, %v1603_v57 }
 0x1c3   : > { %1671 = vst.msk [vmem:[%s3174_s7 + $0x8] sm:$0xf] %vm1668_vm2, %v1990_v25  ;;  %v1991_v34 = vpack.c.bf16 %v1625_v61, %v1625_v61  ;;  %v1608_v26 = vadd.f32 %v2988_v49, %v1599_v11  ;;  %v1600_v10 = vmul.f32 %v2980_v40, %v1577_v29 }
 0x1c4   : > { %v1621_v30 = vmax.f32 %v3159_v14, %v1612_v19 }
 0x1c5   : > { %1672 = vst.msk [vmem:[%s3174_s7 + $0xc] sm:$0xf] %vm1668_vm2, %v1991_v34  ;;  %v1617_v63 = vmax.f32 %v3128_v20, %v1608_v26  ;;  %v1609_v27 = vadd.f32 %v2988_v49, %v1600_v10 }
 0x1c6   : > { %v1630_v56 = vmax.f32 %v1621_v30, 0.0  ;;  %v1581_v33 = vpop.f32.mrb[72].mxu0 }
 0x1c7   : > { %v1626_v8 = vmax.f32 %v1617_v63, 0.0  ;;  %v1618_v41 = vmax.f32 %v3134_v35, %v1609_v27  ;;  %v1582_v42 = vadd.f32 %v3161_v4, %v1581_v33  ;;  %v2299_v32 = vpop.f32.mrb[73].mxu0 }
 0x1c8   : > { %v1996_v36 = vpack.c.bf16 %v1630_v56, %v1630_v56  ;;  %v1584_v37 = vpop.f32.mrb[74].mxu0 }
 0x1c9   : > { %v1992_v14 = vpack.c.bf16 %v1626_v8, %v1626_v8  ;;  %v1627_v39 = vmax.f32 %v1618_v41, 0.0  ;;  %v1601_v7 = vmul.f32 %v2980_v40, %v1582_v42  ;;  %v1585_v20 = vadd.f32 %v3164_v38, %v1584_v37  ;;  %v2300_v13 = vpop.f32.mrb[75].mxu0 }
 0x1ca   : > { %1677 = vst.msk [vmem:[%s3174_s7 + $0x20] sm:$0xf] %vm1668_vm2, %v1996_v36 }
 0x1cb   : > { %1673 = vst.msk [vmem:[%s3174_s7 + $0x10] sm:$0xf] %vm1668_vm2, %v1992_v14  ;;  %v1993_v60 = vpack.c.bf16 %v1627_v39, %v1627_v39  ;;  %v1610_v35 = vadd.f32 %v2988_v49, %v1601_v7  ;;  %v1602_v4 = vmul.f32 %v2980_v40, %v1585_v20 }
 0x1cd   : > { %1674 = vst.msk [vmem:[%s3174_s7 + $0x14] sm:$0xf] %vm1668_vm2, %v1993_v60  ;;  %v1619_v21 = vmax.f32 %v3142_v44, %v1610_v35  ;;  %v1611_v52 = vadd.f32 %v2988_v49, %v1602_v4 }
 0x1cf   : > { %v1628_v54 = vmax.f32 %v1619_v21, 0.0  ;;  %v1620_v38 = vmax.f32 %v3148_v1, %v1611_v52 }
 0x1d1   : > { %v1994_v62 = vpack.c.bf16 %v1628_v54, %v1628_v54  ;;  %v1629_v51 = vmax.f32 %v1620_v38, 0.0 }
 0x1d3   : > { %1675 = vst.msk [vmem:[%s3174_s7 + $0x18] sm:$0xf] %vm1668_vm2, %v1994_v62  ;;  %v1995_v28 = vpack.c.bf16 %v1629_v51, %v1629_v51 }
 0x1d5   : > { %1676 = vst.msk [vmem:[%s3174_s7 + $0x1c] sm:$0xf] %vm1668_vm2, %v1995_v28 }
 0x1d6 PF: > { %p11_p9 = scmp.ge.s32.totalorder %s2501_s19, 4   ;;  %s3233_s15 = smov %s2451_s16 }
 0x1d7   : > { %s3234_s16 = smov %s2510_s22  ;;  %s3235_s17 = smov %s2501_s19 }
 0x1d8   :  { %13 = sbr.rel (!%p11_p9) target bundleno = 2 (0x2), region = 106 }

// kernel: cnn_forward.5
= control target key start
LH: loop header
LB: loop body
LE: loop exit
PB: predicated region body
PF: predicated region fallthrough
CT: control target
= control target key end

     0   :  { %s13372_s24 = smov 0   ;;  %s16693_s0 = inlined_call_operand.vmem [shape: bf16[256,2304], index: 0, kind: input, shape index: {}]   ;;  %s16694_s1 = inlined_call_operand.vmem [shape: bf16[2304,640], index: 1, kind: input, shape index: {}]   ;;  %s16695_s2 = inlined_call_operand.vmem [shape: f32[1,640], index: 2, kind: input, shape index: {}]   ;;  %s16696_s3 = inlined_call_operand.vmem [shape: bf16[640,128], index: 3, kind: input, shape index: {}]   ;;  %s16697_s4 = inlined_call_operand.vmem [shape: f32[1,128], index: 4, kind: input, shape index: {}]   ;;  %s16698_s5 = inlined_call_operand.vmem [shape: bf16[128,128], index: 5, kind: input, shape index: {}]   ;;  %s16699_s6 = inlined_call_operand.vmem [shape: f32[1,128], index: 6, kind: input, shape index: {}]   ;;  %s16700_s7 = inlined_call_operand.vmem [shape: f32[256,128], index: 7, kind: output, shape index: {}]  }
   0x1 LB: > { %s9598_s25 = sadd.s32 4294967295, %s13330_s24   ;;  %p9602_p0 = scmp.ge.s32.totalorder %s13330_s24, 1  ;;  %s13330_s24 = sphi %s13372_s24, %s17_s24  }
   0x2   : > { %p239_p1 = scmp.lt.s32.totalorder %s13330_s24, 3 }
   0x4   : > { %p240_p2 = pnand %p9602_p0, %p239_p1 }
   0x6   : > { %243 = sbr.rel (%p240_p2) target bundleno = 1625 (0x659), region = 48 }
   0xd   : > { %v11908_v0 = vld [vmem:[%s16694_s1 + $0x4] ss:$20 sps:$4 sm:$0xff]   ;;  %v11910_v1 = vld [vmem:[%s16694_s1 + $0xc] ss:$20 sps:$4 sm:$0xff]   ;;  %v11913_v3 = vld [vmem:[%s16694_s1 + $0x8] ss:$20 sps:$4 sm:$0xff]  }
   0xe   : > { %5785 = vmatprep.subr.bf16.mxu0 %v11908_v0  ;;  %v11912_v2 = vld [vmem:[%s16694_s1] ss:$20 sps:$4 sm:$0xff]   ;;  %6802 = vmatprep.subr.bf16.mxu1 %v11910_v1  ;;  %v11918_v6 = vld [vmem:[%s16694_s1 + $0x28] ss:$20 sps:$4 sm:$0xff]   ;;  %v11919_v7 = vld [vmem:[%s16694_s1 + $0x30] ss:$20 sps:$4 sm:$0xff]  }
   0xf   : > { %v11914_v4 = vld [vmem:[%s16694_s1 + $0x2c] ss:$20 sps:$4 sm:$0xff]   ;;  %5786 = vmatpush1.bf16.msra.mxu0 %v11912_v2  ;;  %6803 = vmatpush1.bf16.msra.mxu1 %v11913_v3  ;;  %v11916_v5 = vld [vmem:[%s16694_s1 + $0x34] ss:$20 sps:$4 sm:$0xff]   ;;  %v11922_v9 = vld [vmem:[%s16694_s1 + $0x5c] ss:$20 sps:$4 sm:$0xff]  }
  0x10   : > { %5787 = vmatprep.subr.bf16.mxu0 %v11914_v4  ;;  %6804 = vmatprep.subr.bf16.mxu1 %v11916_v5  ;;  %v11920_v8 = vld [vmem:[%s16694_s1 + $0x54] ss:$20 sps:$4 sm:$0xff]   ;;  %v11924_v10 = vld [vmem:[%s16694_s1 + $0x50] ss:$20 sps:$4 sm:$0xff]   ;;  %v11925_v11 = vld [vmem:[%s16694_s1 + $0x58] ss:$20 sps:$4 sm:$0xff]  }
  0x11   : > { %v11926_v12 = vld [vmem:[%s16694_s1 + $0x7c] ss:$20 sps:$4 sm:$0xff]   ;;  %v11928_v13 = vld [vmem:[%s16694_s1 + $0x84] ss:$20 sps:$4 sm:$0xff]   ;;  %v11931_v15 = vld [vmem:[%s16694_s1 + $0x80] ss:$20 sps:$4 sm:$0xff]  }
  0x12   : > { %v11930_v14 = vld [vmem:[%s16694_s1 + $0x78] ss:$20 sps:$4 sm:$0xff]   ;;  %v11936_v18 = vld [vmem:[%s16694_s1 + $0xa0] ss:$20 sps:$4 sm:$0xff]   ;;  %v11937_v19 = vld [vmem:[%s16694_s1 + $0xa8] ss:$20 sps:$4 sm:$0xff]  }
  0x13   : > { %5788 = vmatpush1.bf16.msra.mxu0 %v11918_v6  ;;  %6805 = vmatpush1.bf16.msra.mxu1 %v11919_v7  ;;  %v11932_v16 = vld [vmem:[%s16694_s1 + $0xa4] ss:$20 sps:$4 sm:$0xff]   ;;  %v11934_v17 = vld [vmem:[%s16694_s1 + $0xac] ss:$20 sps:$4 sm:$0xff]   ;;  %v11940_v21 = vld [vmem:[%s16694_s1 + $0xd4] ss:$20 sps:$4 sm:$0xff]  }
  0x14   : > { %5789 = vmatprep.subr.bf16.mxu0 %v11920_v8  ;;  %6806 = vmatprep.subr.bf16.mxu1 %v11922_v9  ;;  %v11938_v20 = vld [vmem:[%s16694_s1 + $0xcc] ss:$20 sps:$4 sm:$0xff]   ;;  %v11942_v22 = vld [vmem:[%s16694_s1 + $0xc8] ss:$20 sps:$4 sm:$0xff]   ;;  %v11943_v23 = vld [vmem:[%s16694_s1 + $0xd0] ss:$20 sps:$4 sm:$0xff]  }
  0x15   : > { %v11944_v24 = vld [vmem:[%s16694_s1 + $0xf4] ss:$20 sps:$4 sm:$0xff]   ;;  %v11946_v25 = vld [vmem:[%s16694_s1 + $0xfc] ss:$20 sps:$4 sm:$0xff]   ;;  %v11949_v27 = vld [vmem:[%s16694_s1 + $0xf8] ss:$20 sps:$4 sm:$0xff]  }
  0x16   : > { %v11948_v26 = vld [vmem:[%s16694_s1 + $0xf0] ss:$20 sps:$4 sm:$0xff]   ;;  %s9603_s21 = sshll.u32 %s9598_s25, 4  ;;  %v11954_v30 = vld [vmem:[%s16694_s1 + $0x118] ss:$20 sps:$4 sm:$0xff]  }
  0x17   : > { %5790 = vmatpush1.bf16.msra.mxu0 %v11924_v10  ;;  %6807 = vmatpush1.bf16.msra.mxu1 %v11925_v11  ;;  %v11950_v28 = vld [vmem:[%s16694_s1 + $0x11c] ss:$20 sps:$4 sm:$0xff]   ;;  %v11952_v29 = vld [vmem:[%s16694_s1 + $0x124] ss:$20 sps:$4 sm:$0xff]   ;;  %v11955_v31 = vld [vmem:[%s16694_s1 + $0x120] ss:$20 sps:$4 sm:$0xff]  }
  0x18   : > { %5791 = vmatprep.subr.bf16.mxu0 %v11926_v12  ;;  %6808 = vmatprep.subr.bf16.mxu1 %v11928_v13  ;;  %v11956_v32 = vld [vmem:[%s16694_s1 + $0x144] ss:$20 sps:$4 sm:$0xff]   ;;  %p273_p3 = scmp.lt.s32.totalorder %s9603_s21, 31  ;;  %v11958_v33 = vld [vmem:[%s16694_s1 + $0x14c] ss:$20 sps:$4 sm:$0xff]  }
  0x19   : > { %v11960_v34 = vld [vmem:[%s16694_s1 + $0x140] ss:$20 sps:$4 sm:$0xff]   ;;  %v11961_v35 = vld [vmem:[%s16694_s1 + $0x148] ss:$20 sps:$4 sm:$0xff]   ;;  %v11967_v39 = vld [vmem:[%s16694_s1 + $0x170] ss:$20 sps:$4 sm:$0xff]  }
  0x1a   : > { %v11962_v36 = vld [vmem:[%s16694_s1 + $0x16c] ss:$20 sps:$4 sm:$0xff]   ;;  %s16812_s21 = smov (!%p273_p3, %s9603_s21), 31  ;;  %v11964_v37 = vld [vmem:[%s16694_s1 + $0x174] ss:$20 sps:$4 sm:$0xff]  }
  0x1b   : > { %5792 = vmatpush1.bf16.msra.mxu0 %v11930_v14  ;;  %6809 = vmatpush1.bf16.msra.mxu1 %v11931_v15  ;;  %v11966_v38 = vld [vmem:[%s16694_s1 + $0x168] ss:$20 sps:$4 sm:$0xff]   ;;  %s11899_s23 = smul.u32 72, %s16812_s21  ;;  %v11972_v42 = vld [vmem:[%s16694_s1 + $0x190] ss:$20 sps:$4 sm:$0xff]   ;;  %s9606_s22 = sshll.u32 %s16812_s21, 3 }
  0x1c   : > { %5793 = vmatprep.subr.bf16.mxu0 %v11932_v16  ;;  %6810 = vmatprep.subr.bf16.mxu1 %v11934_v17  ;;  %v11968_v40 = vld [vmem:[%s16694_s1 + $0x194] ss:$20 sps:$4 sm:$0xff]   ;;  %v11970_v41 = vld [vmem:[%s16694_s1 + $0x19c] ss:$20 sps:$4 sm:$0xff]   ;;  %v11973_v43 = vld [vmem:[%s16694_s1 + $0x198] ss:$20 sps:$4 sm:$0xff]   ;;  %s16672_s29 = scalar_lea.vmem %s16700_s7, %s9606_s22 }
  0x1d   : > { %v11974_v44 = vld [vmem:[%s16694_s1 + $0x1bc] ss:$20 sps:$4 sm:$0xff]   ;;  %s13523_s12 = scalar_lea.vmem %s16693_s0, %s11899_s23  ;;  %v11976_v45 = vld [vmem:[%s16694_s1 + $0x1c4] ss:$20 sps:$4 sm:$0xff]   ;;  %v11979_v47 = vld [vmem:[%s16694_s1 + $0x1c0] ss:$20 sps:$4 sm:$0xff]  }
  0x1e   : > { %v11978_v46 = vld [vmem:[%s16694_s1 + $0x1b8] ss:$20 sps:$4 sm:$0xff]   ;;  %v11984_v51 = vld [vmem:[%s16694_s1 + $0x1e0] ss:$20 sps:$4 sm:$0xff]   ;;  %v11985_v52 = vld [vmem:[%s16694_s1 + $0x1e8] ss:$20 sps:$4 sm:$0xff]  }
  0x1f   : > { %5794 = vmatpush1.bf16.msra.mxu0 %v11936_v18  ;;  %6811 = vmatpush1.bf16.msra.mxu1 %v11937_v19  ;;  %v12004_v48 = vld [vmem:[%s13523_s12 + $0x4] ss:$72 sps:$4 sm:$0xff]   ;;  %v11988_v54 = vld [vmem:[%s16694_s1 + $0x214] ss:$20 sps:$4 sm:$0xff]   ;;  %v11994_v58 = vld [vmem:[%s16694_s1 + $0x23c] ss:$20 sps:$4 sm:$0xff]  }
  0x20   : > { %5795 = vmatprep.subr.bf16.mxu0 %v11938_v20  ;;  %6812 = vmatprep.subr.bf16.mxu1 %v11940_v21  ;;  %v11980_v49 = vld [vmem:[%s16694_s1 + $0x1e4] ss:$20 sps:$4 sm:$0xff]   ;;  %v11982_v50 = vld [vmem:[%s16694_s1 + $0x1ec] ss:$20 sps:$4 sm:$0xff]   ;;  %v11990_v55 = vld [vmem:[%s16694_s1 + $0x208] ss:$20 sps:$4 sm:$0xff]  }
  0x21   : > { %5817 = vmatprep.mubr.bf16.mxu0 %v12004_v48  ;;  %6834 = vmatprep.mubr.bf16.mxu1 %v12004_v48  ;;  %v11986_v53 = vld [vmem:[%s16694_s1 + $0x20c] ss:$20 sps:$4 sm:$0xff]   ;;  %v11991_v56 = vld [vmem:[%s16694_s1 + $0x210] ss:$20 sps:$4 sm:$0xff]   ;;  %v11992_v57 = vld [vmem:[%s16694_s1 + $0x234] ss:$20 sps:$4 sm:$0xff]  }
  0x22   : > { %v11996_v59 = vld [vmem:[%s16694_s1 + $0x230] ss:$20 sps:$4 sm:$0xff]   ;;  %v11997_v60 = vld [vmem:[%s16694_s1 + $0x238] ss:$20 sps:$4 sm:$0xff]   ;;  %v12003_v0 = vld [vmem:[%s16694_s1 + $0x260] ss:$20 sps:$4 sm:$0xff]  }
  0x23   : > { %5796 = vmatpush1.bf16.msra.mxu0 %v11942_v22  ;;  %6813 = vmatpush1.bf16.msra.mxu1 %v11943_v23  ;;  %v11998_v61 = vld [vmem:[%s16694_s1 + $0x25c] ss:$20 sps:$4 sm:$0xff]   ;;  %v12000_v62 = vld [vmem:[%s16694_s1 + $0x264] ss:$20 sps:$4 sm:$0xff]   ;;  %v12012_v2 = vld [vmem:[%s16694_s1 + $0x28c] ss:$20 sps:$4 sm:$0xff]  }
  0x24   : > { %5797 = vmatprep.subr.bf16.mxu0 %v11944_v24  ;;  %6814 = vmatprep.subr.bf16.mxu1 %v11946_v25  ;;  %v12002_v63 = vld [vmem:[%s16694_s1 + $0x258] ss:$20 sps:$4 sm:$0xff]   ;;  %v12006_v3 = vld [vmem:[%s13523_s12] ss:$72 sps:$4 sm:$0xff]   ;;  %v12019_v8 = vld [vmem:[%s13523_s12 + $0x94] ss:$72 sps:$4 sm:$0xff]  }
  0x25   : > { %v12009_v1 = vld [vmem:[%s16694_s1 + $0x284] ss:$20 sps:$4 sm:$0xff]   ;;  %v12007_v4 = vld [vmem:[%s16694_s1 + $0x280] ss:$20 sps:$4 sm:$0xff]   ;;  %v12010_v5 = vld [vmem:[%s16694_s1 + $0x288] ss:$20 sps:$4 sm:$0xff]  }
  0x26   : > { %v12015_v6 = vld [vmem:[%s16694_s1 + $0x2ac] ss:$20 sps:$4 sm:$0xff]   ;;  %v12018_v7 = vld [vmem:[%s16694_s1 + $0x2b4] ss:$20 sps:$4 sm:$0xff]   ;;  %v12016_v10 = vld [vmem:[%s16694_s1 + $0x2b0] ss:$20 sps:$4 sm:$0xff]  }
  0x27   : > { %5798 = vmatpush1.bf16.msra.mxu0 %v11948_v26  ;;  %6815 = vmatpush1.bf16.msra.mxu1 %v11949_v27  ;;  %v12013_v9 = vld [vmem:[%s16694_s1 + $0x2a8] ss:$20 sps:$4 sm:$0xff]   ;;  %v12021_v13 = vld [vmem:[%s13523_s12 + $0x90] ss:$72 sps:$4 sm:$0xff]   ;;  %v12034_v18 = vld [vmem:[%s13523_s12 + $0x124] ss:$72 sps:$4 sm:$0xff]  }
  0x28   : > { %5799 = vmatprep.subr.bf16.mxu0 %v11950_v28  ;;  %6816 = vmatprep.subr.bf16.mxu1 %v11952_v29  ;;  %v12024_v11 = vld [vmem:[%s16694_s1 + $0x2d4] ss:$20 sps:$4 sm:$0xff]   ;;  %v12027_v12 = vld [vmem:[%s16694_s1 + $0x2dc] ss:$20 sps:$4 sm:$0xff]   ;;  %v12025_v15 = vld [vmem:[%s16694_s1 + $0x2d8] ss:$20 sps:$4 sm:$0xff]  }
  0x29   : > { %v12022_v14 = vld [vmem:[%s16694_s1 + $0x2d0] ss:$20 sps:$4 sm:$0xff]   ;;  %v12028_v19 = vld [vmem:[%s16694_s1 + $0x2f8] ss:$20 sps:$4 sm:$0xff]   ;;  %v12031_v20 = vld [vmem:[%s16694_s1 + $0x300] ss:$20 sps:$4 sm:$0xff]  }
  0x2a   : > { %v12030_v16 = vld [vmem:[%s16694_s1 + $0x2fc] ss:$20 sps:$4 sm:$0xff]   ;;  %v12033_v17 = vld [vmem:[%s16694_s1 + $0x304] ss:$20 sps:$4 sm:$0xff]   ;;  %v12042_v22 = vld [vmem:[%s16694_s1 + $0x32c] ss:$20 sps:$4 sm:$0xff]  }
  0x2b   : > { %5800 = vmatpush1.bf16.msra.mxu0 %v11954_v30  ;;  %6817 = vmatpush1.bf16.msra.mxu1 %v11955_v31  ;;  %v12039_v21 = vld [vmem:[%s16694_s1 + $0x324] ss:$20 sps:$4 sm:$0xff]   ;;  %v12036_v23 = vld [vmem:[%s13523_s12 + $0x120] ss:$72 sps:$4 sm:$0xff]   ;;  %v12049_v28 = vld [vmem:[%s13523_s12 + $0x1b4] ss:$72 sps:$4 sm:$0xff]  }
  0x2c   : > { %5801 = vmatprep.subr.bf16.mxu0 %v11956_v32  ;;  %6818 = vmatprep.subr.bf16.mxu1 %v11958_v33  ;;  %v12037_v24 = vld [vmem:[%s16694_s1 + $0x320] ss:$20 sps:$4 sm:$0xff]   ;;  %v12040_v25 = vld [vmem:[%s16694_s1 + $0x328] ss:$20 sps:$4 sm:$0xff]   ;;  %v12046_v30 = vld [vmem:[%s16694_s1 + $0x350] ss:$20 sps:$4 sm:$0xff]  }
  0x2d   : > { %v12045_v26 = vld [vmem:[%s16694_s1 + $0x34c] ss:$20 sps:$4 sm:$0xff]   ;;  %v12048_v27 = vld [vmem:[%s16694_s1 + $0x354] ss:$20 sps:$4 sm:$0xff]   ;;  %v12057_v32 = vld [vmem:[%s16694_s1 + $0x37c] ss:$20 sps:$4 sm:$0xff]  }
  0x2e   : > { %v12043_v29 = vld [vmem:[%s16694_s1 + $0x348] ss:$20 sps:$4 sm:$0xff]   ;;  %v12051_v33 = vld [vmem:[%s13523_s12 + $0x1b0] ss:$72 sps:$4 sm:$0xff]  }
  0x2f   : > { %5802 = vmatpush1.bf16.msra.mxu0 %v11960_v34  ;;  %6819 = vmatpush1.bf16.msra.mxu1 %v11961_v35  ;;  %v12054_v31 = vld [vmem:[%s16694_s1 + $0x374] ss:$20 sps:$4 sm:$0xff]   ;;  %v12052_v34 = vld [vmem:[%s16694_s1 + $0x370] ss:$20 sps:$4 sm:$0xff]   ;;  %v12055_v35 = vld [vmem:[%s16694_s1 + $0x378] ss:$20 sps:$4 sm:$0xff]  }
  0x30   : > { %5803 = vmatprep.subr.bf16.mxu0 %v11962_v36  ;;  %6820 = vmatprep.subr.bf16.mxu1 %v11964_v37  ;;  %v12060_v36 = vld [vmem:[%s16694_s1 + $0x39c] ss:$20 sps:$4 sm:$0xff]   ;;  %v12063_v37 = vld [vmem:[%s16694_s1 + $0x3a4] ss:$20 sps:$4 sm:$0xff]  }
  0x31   : > { %v12079_v48 = vld [vmem:[%s13523_s12 + $0x2d4] ss:$72 sps:$4 sm:$0xff]  }
  0x33   : > { %5804 = vmatpush1.bf16.msra.mxu0 %v11966_v38  ;;  %6821 = vmatpush1.bf16.msra.mxu1 %v11967_v39  ;;  %v12064_v38 = vld [vmem:[%s13523_s12 + $0x244] ss:$72 sps:$4 sm:$0xff]  }
  0x34   : > { %5805 = vmatprep.subr.bf16.mxu0 %v11968_v40  ;;  %6822 = vmatprep.subr.bf16.mxu1 %v11970_v41  ;;  %v12058_v39 = vld [vmem:[%s16694_s1 + $0x398] ss:$20 sps:$4 sm:$0xff]   ;;  %v12061_v40 = vld [vmem:[%s16694_s1 + $0x3a0] ss:$20 sps:$4 sm:$0xff]  }
  0x35   : > { %v12069_v41 = vld [vmem:[%s16694_s1 + $0x3c4] ss:$20 sps:$4 sm:$0xff]  }
  0x37   : > { %5806 = vmatpush1.bf16.msra.mxu0 %v11972_v42  ;;  %6823 = vmatpush1.bf16.msra.mxu1 %v11973_v43  ;;  %v12072_v42 = vld [vmem:[%s16694_s1 + $0x3cc] ss:$20 sps:$4 sm:$0xff]  }
  0x38   : > { %5807 = vmatprep.subr.bf16.mxu0 %v11974_v44  ;;  %6824 = vmatprep.subr.bf16.mxu1 %v11976_v45  ;;  %v12066_v43 = vld [vmem:[%s13523_s12 + $0x240] ss:$72 sps:$4 sm:$0xff]  }
  0x39   : > { %v12067_v44 = vld [vmem:[%s16694_s1 + $0x3c0] ss:$20 sps:$4 sm:$0xff]   ;;  %v12070_v45 = vld [vmem:[%s16694_s1 + $0x3c8] ss:$20 sps:$4 sm:$0xff]  }
  0x3b   : > { %5808 = vmatpush1.bf16.msra.mxu0 %v11978_v46  ;;  %6825 = vmatpush1.bf16.msra.mxu1 %v11979_v47  ;;  %v12075_v46 = vld [vmem:[%s16694_s1 + $0x3ec] ss:$20 sps:$4 sm:$0xff]   ;;  %v12078_v47 = vld [vmem:[%s16694_s1 + $0x3f4] ss:$20 sps:$4 sm:$0xff]  }
  0x3c   : > { %5809 = vmatprep.subr.bf16.mxu0 %v11980_v49  ;;  %6826 = vmatprep.subr.bf16.mxu1 %v11982_v50  ;;  %v12073_v49 = vld [vmem:[%s16694_s1 + $0x3e8] ss:$20 sps:$4 sm:$0xff]   ;;  %v12076_v50 = vld [vmem:[%s16694_s1 + $0x3f0] ss:$20 sps:$4 sm:$0xff]  }
  0x3f   : > { %5810 = vmatpush1.bf16.msra.mxu0 %v11984_v51  ;;  %6827 = vmatpush1.bf16.msra.mxu1 %v11985_v52  ;;  %v12084_v51 = vld [vmem:[%s16694_s1 + $0x414] ss:$20 sps:$4 sm:$0xff]   ;;  %v12087_v52 = vld [vmem:[%s16694_s1 + $0x41c] ss:$20 sps:$4 sm:$0xff]  }
  0x40   : > { %5811 = vmatprep.subr.bf16.mxu0 %v11986_v53  ;;  %6828 = vmatprep.subr.bf16.mxu1 %v11988_v54  ;;  %v12081_v53 = vld [vmem:[%s13523_s12 + $0x2d0] ss:$72 sps:$4 sm:$0xff]  }
  0x41   : > { %v12082_v54 = vld [vmem:[%s16694_s1 + $0x410] ss:$20 sps:$4 sm:$0xff]  }
  0x43   : > { %5812 = vmatpush1.bf16.msra.mxu0 %v11990_v55  ;;  %6829 = vmatpush1.bf16.msra.mxu1 %v11991_v56  ;;  %v12085_v55 = vld [vmem:[%s16694_s1 + $0x418] ss:$20 sps:$4 sm:$0xff]   ;;  %v12090_v56 = vld [vmem:[%s16694_s1 + $0x43c] ss:$20 sps:$4 sm:$0xff]  }
  0x44   : > { %5813 = vmatprep.subr.bf16.mxu0 %v11992_v57  ;;  %6830 = vmatprep.subr.bf16.mxu1 %v11994_v58  ;;  %v12093_v57 = vld [vmem:[%s16694_s1 + $0x444] ss:$20 sps:$4 sm:$0xff]  }
  0x45   : > { %v12094_v58 = vld [vmem:[%s13523_s12 + $0x364] ss:$72 sps:$4 sm:$0xff]  }
  0x47   : > { %5814 = vmatpush1.bf16.msra.mxu0 %v11996_v59  ;;  %6831 = vmatpush1.bf16.msra.mxu1 %v11997_v60  ;;  %v12088_v59 = vld [vmem:[%s16694_s1 + $0x438] ss:$20 sps:$4 sm:$0xff]   ;;  %v12091_v60 = vld [vmem:[%s16694_s1 + $0x440] ss:$20 sps:$4 sm:$0xff]  }
  0x48   : > { %5815 = vmatprep.subr.bf16.mxu0 %v11998_v61  ;;  %6832 = vmatprep.subr.bf16.mxu1 %v12000_v62  ;;  %v12099_v61 = vld [vmem:[%s16694_s1 + $0x464] ss:$20 sps:$4 sm:$0xff]   ;;  %v12102_v62 = vld [vmem:[%s16694_s1 + $0x46c] ss:$20 sps:$4 sm:$0xff]  }
  0x4b   : > { %5816 = vmatpush1.bf16.msra.mxu0 %v12002_v63  ;;  %6833 = vmatpush1.bf16.msra.mxu1 %v12003_v0  ;;  %v12096_v63 = vld [vmem:[%s13523_s12 + $0x360] ss:$72 sps:$4 sm:$0xff]  }
  0x4c   : > { %5898 = vmatprep.subr.bf16.mxu0 %v12009_v1  ;;  %6915 = vmatprep.subr.bf16.mxu1 %v12012_v2  ;;  %v12097_v0 = vld [vmem:[%s16694_s1 + $0x460] ss:$20 sps:$4 sm:$0xff]   ;;  %v12100_v1 = vld [vmem:[%s16694_s1 + $0x468] ss:$20 sps:$4 sm:$0xff]  }
  0x4d   : > { %v12105_v2 = vld [vmem:[%s16694_s1 + $0x48c] ss:$20 sps:$4 sm:$0xff]  }
  0x4e   : > { %5818 = vmatmul.mubr.bf16.vlgmr.msra.gmra.mrb[0].mxu0 %v12006_v3  ;;  %6835 = vmatmul.mubr.bf16.vlgmr.msra.gmra.mrb[0].mxu1 %v12006_v3  ;;  %v12108_v3 = vld [vmem:[%s16694_s1 + $0x494] ss:$20 sps:$4 sm:$0xff]  }
  0x4f   : > { %5899 = vmatpush1.bf16.msra.mxu0 %v12007_v4  ;;  %6916 = vmatpush1.bf16.msra.mxu1 %v12010_v5  ;;  %v12109_v4 = vld [vmem:[%s13523_s12 + $0x3f4] ss:$72 sps:$4 sm:$0xff]  }
  0x50   : > { %5900 = vmatprep.subr.bf16.mxu0 %v12015_v6  ;;  %6917 = vmatprep.subr.bf16.mxu1 %v12018_v7  ;;  %v12103_v5 = vld [vmem:[%s16694_s1 + $0x488] ss:$20 sps:$4 sm:$0xff]   ;;  %v12106_v6 = vld [vmem:[%s16694_s1 + $0x490] ss:$20 sps:$4 sm:$0xff]  }
  0x51   : > { %5827 = vmatprep.mubr.bf16.mxu0 %v12019_v8  ;;  %6844 = vmatprep.mubr.bf16.mxu1 %v12019_v8  ;;  %v12114_v7 = vld [vmem:[%s16694_s1 + $0x4b4] ss:$20 sps:$4 sm:$0xff]   ;;  %v12117_v8 = vld [vmem:[%s16694_s1 + $0x4bc] ss:$20 sps:$4 sm:$0xff]  }
  0x53   : > { %5901 = vmatpush1.bf16.msra.mxu0 %v12013_v9  ;;  %6918 = vmatpush1.bf16.msra.mxu1 %v12016_v10  ;;  %v12111_v9 = vld [vmem:[%s13523_s12 + $0x3f0] ss:$72 sps:$4 sm:$0xff]  }
  0x54   : > { %5902 = vmatprep.subr.bf16.mxu0 %v12024_v11  ;;  %6919 = vmatprep.subr.bf16.mxu1 %v12027_v12  ;;  %v12112_v10 = vld [vmem:[%s16694_s1 + $0x4b0] ss:$20 sps:$4 sm:$0xff]   ;;  %v12115_v11 = vld [vmem:[%s16694_s1 + $0x4b8] ss:$20 sps:$4 sm:$0xff]  }
  0x55   : > { %v12120_v12 = vld [vmem:[%s16694_s1 + $0x4dc] ss:$20 sps:$4 sm:$0xff]  }
  0x56   : > { %5828 = vmatmul.mubr.bf16.gmra.mrb[4].mxu0 %v12021_v13  ;;  %6845 = vmatmul.mubr.bf16.gmra.mrb[4].mxu1 %v12021_v13  ;;  %v12123_v13 = vld [vmem:[%s16694_s1 + $0x4e4] ss:$20 sps:$4 sm:$0xff]  }
  0x57   : > { %5903 = vmatpush1.bf16.msra.mxu0 %v12022_v14  ;;  %6920 = vmatpush1.bf16.msra.mxu1 %v12025_v15  ;;  %v12126_v14 = vld [vmem:[%s13523_s12 + $0xc] ss:$72 sps:$4 sm:$0xff]  }
  0x58   : > { %5904 = vmatprep.subr.bf16.mxu0 %v12030_v16  ;;  %6921 = vmatprep.subr.bf16.mxu1 %v12033_v17  ;;  %v12118_v15 = vld [vmem:[%s16694_s1 + $0x4d8] ss:$20 sps:$4 sm:$0xff]   ;;  %v12121_v16 = vld [vmem:[%s16694_s1 + $0x4e0] ss:$20 sps:$4 sm:$0xff]  }
  0x59   : > { %5837 = vmatprep.mubr.bf16.mxu0 %v12034_v18  ;;  %6854 = vmatprep.mubr.bf16.mxu1 %v12034_v18  ;;  %v12129_v17 = vld [vmem:[%s16694_s1 + $0x504] ss:$20 sps:$4 sm:$0xff]   ;;  %v12132_v18 = vld [vmem:[%s16694_s1 + $0x50c] ss:$20 sps:$4 sm:$0xff]  }
  0x5b   : > { %5905 = vmatpush1.bf16.msra.mxu0 %v12028_v19  ;;  %6922 = vmatpush1.bf16.msra.mxu1 %v12031_v20  ;;  %v12124_v19 = vld [vmem:[%s13523_s12 + $0x8] ss:$72 sps:$4 sm:$0xff]   ;;  %v12127_v20 = vld [vmem:[%s16694_s1 + $0x500] ss:$20 sps:$4 sm:$0xff]  }
  0x5c   : > { %5906 = vmatprep.subr.bf16.mxu0 %v12039_v21  ;;  %6923 = vmatprep.subr.bf16.mxu1 %v12042_v22  ;;  %v12130_v21 = vld [vmem:[%s16694_s1 + $0x508] ss:$20 sps:$4 sm:$0xff]   ;;  %v12135_v22 = vld [vmem:[%s16694_s1 + $0x52c] ss:$20 sps:$4 sm:$0xff]  }
  0x5e   : > { %5838 = vmatmul.mubr.bf16.gmra.mrb[8].mxu0 %v12036_v23  ;;  %6855 = vmatmul.mubr.bf16.gmra.mrb[8].mxu1 %v12036_v23  ;;  %v12138_v23 = vld [vmem:[%s16694_s1 + $0x534] ss:$20 sps:$4 sm:$0xff]  }
  0x5f   : > { %5907 = vmatpush1.bf16.msra.mxu0 %v12037_v24  ;;  %6924 = vmatpush1.bf16.msra.mxu1 %v12040_v25  ;;  %v12139_v24 = vld [vmem:[%s13523_s12 + $0x9c] ss:$72 sps:$4 sm:$0xff]  }
  0x60   : > { %5908 = vmatprep.subr.bf16.mxu0 %v12045_v26  ;;  %6925 = vmatprep.subr.bf16.mxu1 %v12048_v27  ;;  %v12133_v25 = vld [vmem:[%s16694_s1 + $0x528] ss:$20 sps:$4 sm:$0xff]   ;;  %v12136_v26 = vld [vmem:[%s16694_s1 + $0x530] ss:$20 sps:$4 sm:$0xff]  }
  0x61   : > { %5847 = vmatprep.mubr.bf16.mxu0 %v12049_v28  ;;  %6864 = vmatprep.mubr.bf16.mxu1 %v12049_v28  ;;  %v12144_v27 = vld [vmem:[%s16694_s1 + $0x554] ss:$20 sps:$4 sm:$0xff]   ;;  %v12147_v28 = vld [vmem:[%s16694_s1 + $0x55c] ss:$20 sps:$4 sm:$0xff]  }
  0x63   : > { %5909 = vmatpush1.bf16.msra.mxu0 %v12043_v29  ;;  %6926 = vmatpush1.bf16.msra.mxu1 %v12046_v30  ;;  %v12141_v29 = vld [vmem:[%s13523_s12 + $0x98] ss:$72 sps:$4 sm:$0xff]   ;;  %v12142_v30 = vld [vmem:[%s16694_s1 + $0x550] ss:$20 sps:$4 sm:$0xff]  }
  0x64   : > { %5910 = vmatprep.subr.bf16.mxu0 %v12054_v31  ;;  %6927 = vmatprep.subr.bf16.mxu1 %v12057_v32  ;;  %v12145_v31 = vld [vmem:[%s16694_s1 + $0x558] ss:$20 sps:$4 sm:$0xff]   ;;  %v12150_v32 = vld [vmem:[%s16694_s1 + $0x57c] ss:$20 sps:$4 sm:$0xff]  }
  0x66   : > { %5848 = vmatmul.mubr.bf16.gmra.mrb[12].mxu0 %v12051_v33  ;;  %6865 = vmatmul.mubr.bf16.gmra.mrb[12].mxu1 %v12051_v33  ;;  %v12153_v33 = vld [vmem:[%s16694_s1 + $0x584] ss:$20 sps:$4 sm:$0xff]  }
  0x67   : > { %5911 = vmatpush1.bf16.msra.mxu0 %v12052_v34  ;;  %6928 = vmatpush1.bf16.msra.mxu1 %v12055_v35  ;;  %v12154_v34 = vld [vmem:[%s13523_s12 + $0x12c] ss:$72 sps:$4 sm:$0xff]  }
  0x68   : > { %5912 = vmatprep.subr.bf16.mxu0 %v12060_v36  ;;  %6929 = vmatprep.subr.bf16.mxu1 %v12063_v37  ;;  %v12148_v35 = vld [vmem:[%s16694_s1 + $0x578] ss:$20 sps:$4 sm:$0xff]   ;;  %v12151_v36 = vld [vmem:[%s16694_s1 + $0x580] ss:$20 sps:$4 sm:$0xff]  }
  0x69   : > { %5857 = vmatprep.mubr.bf16.mxu0 %v12064_v38  ;;  %6874 = vmatprep.mubr.bf16.mxu1 %v12064_v38  ;;  %v12159_v37 = vld [vmem:[%s16694_s1 + $0x5a4] ss:$20 sps:$4 sm:$0xff]   ;;  %v12162_v38 = vld [vmem:[%s16694_s1 + $0x5ac] ss:$20 sps:$4 sm:$0xff]  }
  0x6b   : > { %5913 = vmatpush1.bf16.msra.mxu0 %v12058_v39  ;;  %6930 = vmatpush1.bf16.msra.mxu1 %v12061_v40  ;;  %v12156_v39 = vld [vmem:[%s13523_s12 + $0x128] ss:$72 sps:$4 sm:$0xff]   ;;  %v12157_v40 = vld [vmem:[%s16694_s1 + $0x5a0] ss:$20 sps:$4 sm:$0xff]  }
  0x6c   : > { %5914 = vmatprep.subr.bf16.mxu0 %v12069_v41  ;;  %6931 = vmatprep.subr.bf16.mxu1 %v12072_v42  ;;  %v12160_v41 = vld [vmem:[%s16694_s1 + $0x5a8] ss:$20 sps:$4 sm:$0xff]   ;;  %v12165_v42 = vld [vmem:[%s16694_s1 + $0x5cc] ss:$20 sps:$4 sm:$0xff]  }
  0x6e   : > { %5858 = vmatmul.mubr.bf16.gmra.mrb[16].mxu0 %v12066_v43  ;;  %6875 = vmatmul.mubr.bf16.gmra.mrb[16].mxu1 %v12066_v43  ;;  %v12168_v43 = vld [vmem:[%s16694_s1 + $0x5d4] ss:$20 sps:$4 sm:$0xff]  }
  0x6f   : > { %5915 = vmatpush1.bf16.msra.mxu0 %v12067_v44  ;;  %6932 = vmatpush1.bf16.msra.mxu1 %v12070_v45  ;;  %v12169_v44 = vld [vmem:[%s13523_s12 + $0x1bc] ss:$72 sps:$4 sm:$0xff]  }
  0x70   : > { %5916 = vmatprep.subr.bf16.mxu0 %v12075_v46  ;;  %6933 = vmatprep.subr.bf16.mxu1 %v12078_v47  ;;  %v12163_v45 = vld [vmem:[%s16694_s1 + $0x5c8] ss:$20 sps:$4 sm:$0xff]   ;;  %v12166_v46 = vld [vmem:[%s16694_s1 + $0x5d0] ss:$20 sps:$4 sm:$0xff]  }
  0x71   : > { %5867 = vmatprep.mubr.bf16.mxu0 %v12079_v48  ;;  %6884 = vmatprep.mubr.bf16.mxu1 %v12079_v48  ;;  %v12174_v47 = vld [vmem:[%s16694_s1 + $0x5f4] ss:$20 sps:$4 sm:$0xff]   ;;  %v12177_v48 = vld [vmem:[%s16694_s1 + $0x5fc] ss:$20 sps:$4 sm:$0xff]  }
  0x73   : > { %5917 = vmatpush1.bf16.msra.mxu0 %v12073_v49  ;;  %6934 = vmatpush1.bf16.msra.mxu1 %v12076_v50  ;;  %v12171_v49 = vld [vmem:[%s13523_s12 + $0x1b8] ss:$72 sps:$4 sm:$0xff]   ;;  %v12172_v50 = vld [vmem:[%s16694_s1 + $0x5f0] ss:$20 sps:$4 sm:$0xff]  }
  0x74   : > { %5918 = vmatprep.subr.bf16.mxu0 %v12084_v51  ;;  %6935 = vmatprep.subr.bf16.mxu1 %v12087_v52  ;;  %v12175_v51 = vld [vmem:[%s16694_s1 + $0x5f8] ss:$20 sps:$4 sm:$0xff]   ;;  %v12180_v52 = vld [vmem:[%s16694_s1 + $0x61c] ss:$20 sps:$4 sm:$0xff]  }
  0x76   : > { %5868 = vmatmul.mubr.bf16.gmra.mrb[20].mxu0 %v12081_v53  ;;  %6885 = vmatmul.mubr.bf16.gmra.mrb[20].mxu1 %v12081_v53  ;;  %v12183_v53 = vld [vmem:[%s16694_s1 + $0x624] ss:$20 sps:$4 sm:$0xff]  }
  0x77   : > { %5919 = vmatpush1.bf16.msra.mxu0 %v12082_v54  ;;  %6936 = vmatpush1.bf16.msra.mxu1 %v12085_v55  ;;  %v12184_v54 = vld [vmem:[%s13523_s12 + $0x24c] ss:$72 sps:$4 sm:$0xff]  }
  0x78   : > { %5920 = vmatprep.subr.bf16.mxu0 %v12090_v56  ;;  %6937 = vmatprep.subr.bf16.mxu1 %v12093_v57  ;;  %v12178_v55 = vld [vmem:[%s16694_s1 + $0x618] ss:$20 sps:$4 sm:$0xff]   ;;  %v12181_v56 = vld [vmem:[%s16694_s1 + $0x620] ss:$20 sps:$4 sm:$0xff]  }
  0x79   : > { %5877 = vmatprep.mubr.bf16.mxu0 %v12094_v58  ;;  %6894 = vmatprep.mubr.bf16.mxu1 %v12094_v58  ;;  %v12189_v57 = vld [vmem:[%s16694_s1 + $0x644] ss:$20 sps:$4 sm:$0xff]   ;;  %v12192_v58 = vld [vmem:[%s16694_s1 + $0x64c] ss:$20 sps:$4 sm:$0xff]  }
  0x7b   : > { %5921 = vmatpush1.bf16.msra.mxu0 %v12088_v59  ;;  %6938 = vmatpush1.bf16.msra.mxu1 %v12091_v60  ;;  %v12186_v59 = vld [vmem:[%s13523_s12 + $0x248] ss:$72 sps:$4 sm:$0xff]   ;;  %v12187_v60 = vld [vmem:[%s16694_s1 + $0x640] ss:$20 sps:$4 sm:$0xff]  }
  0x7c   : > { %5922 = vmatprep.subr.bf16.mxu0 %v12099_v61  ;;  %6939 = vmatprep.subr.bf16.mxu1 %v12102_v62  ;;  %v12190_v61 = vld [vmem:[%s16694_s1 + $0x648] ss:$20 sps:$4 sm:$0xff]   ;;  %v12195_v62 = vld [vmem:[%s16694_s1 + $0x66c] ss:$20 sps:$4 sm:$0xff]  }
  0x7e   : > { %5878 = vmatmul.mubr.bf16.gmra.mrb[24].mxu0 %v12096_v63  ;;  %6895 = vmatmul.mubr.bf16.gmra.mrb[24].mxu1 %v12096_v63  ;;  %v12198_v63 = vld [vmem:[%s16694_s1 + $0x674] ss:$20 sps:$4 sm:$0xff]  }
  0x7f   : > { %5923 = vmatpush1.bf16.msra.mxu0 %v12097_v0  ;;  %6940 = vmatpush1.bf16.msra.mxu1 %v12100_v1  ;;  %v12199_v0 = vld [vmem:[%s13523_s12 + $0x2dc] ss:$72 sps:$4 sm:$0xff]  }
  0x80   : > { %5924 = vmatprep.subr.bf16.mxu0 %v12105_v2  ;;  %6941 = vmatprep.subr.bf16.mxu1 %v12108_v3  ;;  %v12193_v1 = vld [vmem:[%s16694_s1 + $0x668] ss:$20 sps:$4 sm:$0xff]   ;;  %v12196_v2 = vld [vmem:[%s16694_s1 + $0x670] ss:$20 sps:$4 sm:$0xff]  }
  0x81   : > { %5887 = vmatprep.mubr.bf16.mxu0 %v12109_v4  ;;  %6904 = vmatprep.mubr.bf16.mxu1 %v12109_v4  ;;  %v12204_v3 = vld [vmem:[%s16694_s1 + $0x694] ss:$20 sps:$4 sm:$0xff]   ;;  %v12207_v4 = vld [vmem:[%s16694_s1 + $0x69c] ss:$20 sps:$4 sm:$0xff]  }
  0x83   : > { %5925 = vmatpush1.bf16.msra.mxu0 %v12103_v5  ;;  %6942 = vmatpush1.bf16.msra.mxu1 %v12106_v6  ;;  %v12201_v5 = vld [vmem:[%s13523_s12 + $0x2d8] ss:$72 sps:$4 sm:$0xff]   ;;  %v12202_v6 = vld [vmem:[%s16694_s1 + $0x690] ss:$20 sps:$4 sm:$0xff]  }
  0x84   : > { %5926 = vmatprep.subr.bf16.mxu0 %v12114_v7  ;;  %6943 = vmatprep.subr.bf16.mxu1 %v12117_v8  ;;  %v12205_v7 = vld [vmem:[%s16694_s1 + $0x698] ss:$20 sps:$4 sm:$0xff]   ;;  %v12210_v8 = vld [vmem:[%s16694_s1 + $0x6bc] ss:$20 sps:$4 sm:$0xff]  }
  0x86   : > { %5888 = vmatmul.mubr.bf16.gmra.mrb[28].mxu0 %v12111_v9  ;;  %6905 = vmatmul.mubr.bf16.gmra.mrb[28].mxu1 %v12111_v9  ;;  %v12213_v9 = vld [vmem:[%s16694_s1 + $0x6c4] ss:$20 sps:$4 sm:$0xff]  }
  0x87   : > { %5927 = vmatpush1.bf16.msra.mxu0 %v12112_v10  ;;  %6944 = vmatpush1.bf16.msra.mxu1 %v12115_v11  ;;  %v12214_v10 = vld [vmem:[%s13523_s12 + $0x36c] ss:$72 sps:$4 sm:$0xff]  }
  0x88   : > { %5928 = vmatprep.subr.bf16.mxu0 %v12120_v12  ;;  %6945 = vmatprep.subr.bf16.mxu1 %v12123_v13  ;;  %v12208_v11 = vld [vmem:[%s16694_s1 + $0x6b8] ss:$20 sps:$4 sm:$0xff]   ;;  %v12211_v12 = vld [vmem:[%s16694_s1 + $0x6c0] ss:$20 sps:$4 sm:$0xff]  }
  0x89   : > { %5930 = vmatprep.mubr.bf16.mxu0 %v12126_v14  ;;  %6947 = vmatprep.mubr.bf16.mxu1 %v12126_v14  ;;  %v12219_v13 = vld [vmem:[%s16694_s1 + $0x6e4] ss:$20 sps:$4 sm:$0xff]   ;;  %v12222_v14 = vld [vmem:[%s16694_s1 + $0x6ec] ss:$20 sps:$4 sm:$0xff]  }
  0x8b   : > { %5929 = vmatpush1.bf16.msra.mxu0 %v12118_v15  ;;  %6946 = vmatpush1.bf16.msra.mxu1 %v12121_v16  ;;  %v12216_v15 = vld [vmem:[%s13523_s12 + $0x368] ss:$72 sps:$4 sm:$0xff]   ;;  %v12217_v16 = vld [vmem:[%s16694_s1 + $0x6e0] ss:$20 sps:$4 sm:$0xff]  }
  0x8c   : > { %6011 = vmatprep.subr.bf16.mxu0 %v12129_v17  ;;  %7028 = vmatprep.subr.bf16.mxu1 %v12132_v18  ;;  %v12220_v17 = vld [vmem:[%s16694_s1 + $0x6e8] ss:$20 sps:$4 sm:$0xff]   ;;  %v12225_v18 = vld [vmem:[%s16694_s1 + $0x70c] ss:$20 sps:$4 sm:$0xff]  }
  0x8e   : > { %5931 = vmatmul.mubr.bf16.vlgmr.msra.gmra.mrb[0].mxu0 %v12124_v19  ;;  %6948 = vmatmul.mubr.bf16.vlgmr.msra.gmra.mrb[0].mxu1 %v12124_v19  ;;  %v12228_v19 = vld [vmem:[%s16694_s1 + $0x714] ss:$20 sps:$4 sm:$0xff]  }
  0x8f   : > { %6012 = vmatpush1.bf16.msra.mxu0 %v12127_v20  ;;  %7029 = vmatpush1.bf16.msra.mxu1 %v12130_v21  ;;  %v12229_v20 = vld [vmem:[%s13523_s12 + $0x3fc] ss:$72 sps:$4 sm:$0xff]  }
  0x90   : > { %6013 = vmatprep.subr.bf16.mxu0 %v12135_v22  ;;  %7030 = vmatprep.subr.bf16.mxu1 %v12138_v23  ;;  %v12223_v21 = vld [vmem:[%s16694_s1 + $0x708] ss:$20 sps:$4 sm:$0xff]   ;;  %v12226_v22 = vld [vmem:[%s16694_s1 + $0x710] ss:$20 sps:$4 sm:$0xff]  }
  0x91   : > { %5940 = vmatprep.mubr.bf16.mxu0 %v12139_v24  ;;  %6957 = vmatprep.mubr.bf16.mxu1 %v12139_v24  ;;  %v12234_v23 = vld [vmem:[%s16694_s1 + $0x734] ss:$20 sps:$4 sm:$0xff]   ;;  %v12237_v24 = vld [vmem:[%s16694_s1 + $0x73c] ss:$20 sps:$4 sm:$0xff]  }
  0x93   : > { %6014 = vmatpush1.bf16.msra.mxu0 %v12133_v25  ;;  %7031 = vmatpush1.bf16.msra.mxu1 %v12136_v26  ;;  %v12231_v25 = vld [vmem:[%s13523_s12 + $0x3f8] ss:$72 sps:$4 sm:$0xff]   ;;  %v12232_v26 = vld [vmem:[%s16694_s1 + $0x730] ss:$20 sps:$4 sm:$0xff]  }
  0x94   : > { %6015 = vmatprep.subr.bf16.mxu0 %v12144_v27  ;;  %7032 = vmatprep.subr.bf16.mxu1 %v12147_v28  ;;  %v12235_v27 = vld [vmem:[%s16694_s1 + $0x738] ss:$20 sps:$4 sm:$0xff]   ;;  %v12240_v28 = vld [vmem:[%s16694_s1 + $0x75c] ss:$20 sps:$4 sm:$0xff]  }
  0x96   : > { %5941 = vmatmul.mubr.bf16.gmra.mrb[4].mxu0 %v12141_v29  ;;  %6958 = vmatmul.mubr.bf16.gmra.mrb[4].mxu1 %v12141_v29  ;;  %v12243_v29 = vld [vmem:[%s16694_s1 + $0x764] ss:$20 sps:$4 sm:$0xff]  }
  0x97   : > { %6016 = vmatpush1.bf16.msra.mxu0 %v12142_v30  ;;  %7033 = vmatpush1.bf16.msra.mxu1 %v12145_v31  ;;  %v12246_v30 = vld [vmem:[%s13523_s12 + $0x14] ss:$72 sps:$4 sm:$0xff]   ;;  %v12238_v31 = vld [vmem:[%s16694_s1 + $0x758] ss:$20 sps:$4 sm:$0xff]  }
  0x98   : > { %6017 = vmatprep.subr.bf16.mxu0 %v12150_v32  ;;  %7034 = vmatprep.subr.bf16.mxu1 %v12153_v33  ;;  %v12241_v32 = vld [vmem:[%s16694_s1 + $0x760] ss:$20 sps:$4 sm:$0xff]   ;;  %v12249_v33 = vld [vmem:[%s16694_s1 + $0x784] ss:$20 sps:$4 sm:$0xff]  }
  0x99   : > { %5950 = vmatprep.mubr.bf16.mxu0 %v12154_v34  ;;  %6967 = vmatprep.mubr.bf16.mxu1 %v12154_v34  ;;  %v12252_v34 = vld [vmem:[%s16694_s1 + $0x78c] ss:$20 sps:$4 sm:$0xff]  }
  0x9b   : > { %6018 = vmatpush1.bf16.msra.mxu0 %v12148_v35  ;;  %7035 = vmatpush1.bf16.msra.mxu1 %v12151_v36  ;;  %v12244_v35 = vld [vmem:[%s13523_s12 + $0x10] ss:$72 sps:$4 sm:$0xff]   ;;  %v12247_v36 = vld [vmem:[%s16694_s1 + $0x780] ss:$20 sps:$4 sm:$0xff]  }
  0x9c   : > { %6019 = vmatprep.subr.bf16.mxu0 %v12159_v37  ;;  %7036 = vmatprep.subr.bf16.mxu1 %v12162_v38  ;;  %v12250_v37 = vld [vmem:[%s16694_s1 + $0x788] ss:$20 sps:$4 sm:$0xff]   ;;  %v12255_v38 = vld [vmem:[%s16694_s1 + $0x7ac] ss:$20 sps:$4 sm:$0xff]  }
  0x9e   : > { %5951 = vmatmul.mubr.bf16.gmra.mrb[8].mxu0 %v12156_v39  ;;  %6968 = vmatmul.mubr.bf16.gmra.mrb[8].mxu1 %v12156_v39  ;;  %v12258_v39 = vld [vmem:[%s16694_s1 + $0x7b4] ss:$20 sps:$4 sm:$0xff]  }
  0x9f   : > { %6020 = vmatpush1.bf16.msra.mxu0 %v12157_v40  ;;  %7037 = vmatpush1.bf16.msra.mxu1 %v12160_v41  ;;  %v12259_v40 = vld [vmem:[%s13523_s12 + $0xa4] ss:$72 sps:$4 sm:$0xff]   ;;  %v12253_v41 = vld [vmem:[%s16694_s1 + $0x7a8] ss:$20 sps:$4 sm:$0xff]  }
  0xa0   : > { %6021 = vmatprep.subr.bf16.mxu0 %v12165_v42  ;;  %7038 = vmatprep.subr.bf16.mxu1 %v12168_v43  ;;  %v12256_v42 = vld [vmem:[%s16694_s1 + $0x7b0] ss:$20 sps:$4 sm:$0xff]   ;;  %v12264_v43 = vld [vmem:[%s16694_s1 + $0x7d4] ss:$20 sps:$4 sm:$0xff]  }
  0xa1   : > { %5960 = vmatprep.mubr.bf16.mxu0 %v12169_v44  ;;  %6977 = vmatprep.mubr.bf16.mxu1 %v12169_v44  ;;  %v12267_v44 = vld [vmem:[%s16694_s1 + $0x7dc] ss:$20 sps:$4 sm:$0xff]  }
  0xa3   : > { %6022 = vmatpush1.bf16.msra.mxu0 %v12163_v45  ;;  %7039 = vmatpush1.bf16.msra.mxu1 %v12166_v46  ;;  %v12261_v45 = vld [vmem:[%s13523_s12 + $0xa0] ss:$72 sps:$4 sm:$0xff]   ;;  %v12262_v46 = vld [vmem:[%s16694_s1 + $0x7d0] ss:$20 sps:$4 sm:$0xff]  }
  0xa4   : > { %6023 = vmatprep.subr.bf16.mxu0 %v12174_v47  ;;  %7040 = vmatprep.subr.bf16.mxu1 %v12177_v48  ;;  %v12265_v47 = vld [vmem:[%s16694_s1 + $0x7d8] ss:$20 sps:$4 sm:$0xff]   ;;  %v12270_v48 = vld [vmem:[%s16694_s1 + $0x7fc] ss:$20 sps:$4 sm:$0xff]  }
  0xa6   : > { %5961 = vmatmul.mubr.bf16.gmra.mrb[12].mxu0 %v12171_v49  ;;  %6978 = vmatmul.mubr.bf16.gmra.mrb[12].mxu1 %v12171_v49  ;;  %v12273_v49 = vld [vmem:[%s16694_s1 + $0x804] ss:$20 sps:$4 sm:$0xff]  }
  0xa7   : > { %6024 = vmatpush1.bf16.msra.mxu0 %v12172_v50  ;;  %7041 = vmatpush1.bf16.msra.mxu1 %v12175_v51  ;;  %v12274_v50 = vld [vmem:[%s13523_s12 + $0x134] ss:$72 sps:$4 sm:$0xff]   ;;  %v12268_v51 = vld [vmem:[%s16694_s1 + $0x7f8] ss:$20 sps:$4 sm:$0xff]  }
  0xa8   : > { %6025 = vmatprep.subr.bf16.mxu0 %v12180_v52  ;;  %7042 = vmatprep.subr.bf16.mxu1 %v12183_v53  ;;  %v12271_v52 = vld [vmem:[%s16694_s1 + $0x800] ss:$20 sps:$4 sm:$0xff]   ;;  %v12279_v53 = vld [vmem:[%s16694_s1 + $0x824] ss:$20 sps:$4 sm:$0xff]  }
  0xa9   : > { %5970 = vmatprep.mubr.bf16.mxu0 %v12184_v54  ;;  %6987 = vmatprep.mubr.bf16.mxu1 %v12184_v54  ;;  %v12282_v54 = vld [vmem:[%s16694_s1 + $0x82c] ss:$20 sps:$4 sm:$0xff]  }
  0xab   : > { %6026 = vmatpush1.bf16.msra.mxu0 %v12178_v55  ;;  %7043 = vmatpush1.bf16.msra.mxu1 %v12181_v56  ;;  %v12276_v55 = vld [vmem:[%s13523_s12 + $0x130] ss:$72 sps:$4 sm:$0xff]   ;;  %v12277_v56 = vld [vmem:[%s16694_s1 + $0x820] ss:$20 sps:$4 sm:$0xff]  }
  0xac   : > { %6027 = vmatprep.subr.bf16.mxu0 %v12189_v57  ;;  %7044 = vmatprep.subr.bf16.mxu1 %v12192_v58  ;;  %v12280_v57 = vld [vmem:[%s16694_s1 + $0x828] ss:$20 sps:$4 sm:$0xff]   ;;  %v12285_v58 = vld [vmem:[%s16694_s1 + $0x84c] ss:$20 sps:$4 sm:$0xff]  }
  0xae   : > { %5971 = vmatmul.mubr.bf16.gmra.mrb[16].mxu0 %v12186_v59  ;;  %6988 = vmatmul.mubr.bf16.gmra.mrb[16].mxu1 %v12186_v59  ;;  %v12288_v59 = vld [vmem:[%s16694_s1 + $0x854] ss:$20 sps:$4 sm:$0xff]  }
  0xaf   : > { %6028 = vmatpush1.bf16.msra.mxu0 %v12187_v60  ;;  %7045 = vmatpush1.bf16.msra.mxu1 %v12190_v61  ;;  %v12289_v60 = vld [vmem:[%s13523_s12 + $0x1c4] ss:$72 sps:$4 sm:$0xff]   ;;  %v12283_v61 = vld [vmem:[%s16694_s1 + $0x848] ss:$20 sps:$4 sm:$0xff]  }
  0xb0   : > { %6029 = vmatprep.subr.bf16.mxu0 %v12195_v62  ;;  %7046 = vmatprep.subr.bf16.mxu1 %v12198_v63  ;;  %v12286_v62 = vld [vmem:[%s16694_s1 + $0x850] ss:$20 sps:$4 sm:$0xff]   ;;  %v12294_v63 = vld [vmem:[%s16694_s1 + $0x874] ss:$20 sps:$4 sm:$0xff]  }
  0xb1   : > { %5980 = vmatprep.mubr.bf16.mxu0 %v12199_v0  ;;  %6997 = vmatprep.mubr.bf16.mxu1 %v12199_v0  ;;  %v12297_v0 = vld [vmem:[%s16694_s1 + $0x87c] ss:$20 sps:$4 sm:$0xff]  }
  0xb3   : > { %6030 = vmatpush1.bf16.msra.mxu0 %v12193_v1  ;;  %7047 = vmatpush1.bf16.msra.mxu1 %v12196_v2  ;;  %v12291_v1 = vld [vmem:[%s13523_s12 + $0x1c0] ss:$72 sps:$4 sm:$0xff]   ;;  %v12292_v2 = vld [vmem:[%s16694_s1 + $0x870] ss:$20 sps:$4 sm:$0xff]  }
  0xb4   : > { %6031 = vmatprep.subr.bf16.mxu0 %v12204_v3  ;;  %7048 = vmatprep.subr.bf16.mxu1 %v12207_v4  ;;  %v12295_v3 = vld [vmem:[%s16694_s1 + $0x878] ss:$20 sps:$4 sm:$0xff]   ;;  %v12300_v4 = vld [vmem:[%s16694_s1 + $0x89c] ss:$20 sps:$4 sm:$0xff]  }
  0xb6   : > { %5981 = vmatmul.mubr.bf16.gmra.mrb[20].mxu0 %v12201_v5  ;;  %6998 = vmatmul.mubr.bf16.gmra.mrb[20].mxu1 %v12201_v5  ;;  %v12303_v5 = vld [vmem:[%s16694_s1 + $0x8a4] ss:$20 sps:$4 sm:$0xff]  }
  0xb7   : > { %6032 = vmatpush1.bf16.msra.mxu0 %v12202_v6  ;;  %7049 = vmatpush1.bf16.msra.mxu1 %v12205_v7  ;;  %v12304_v6 = vld [vmem:[%s13523_s12 + $0x254] ss:$72 sps:$4 sm:$0xff]   ;;  %v12298_v7 = vld [vmem:[%s16694_s1 + $0x898] ss:$20 sps:$4 sm:$0xff]  }
  0xb8   : > { %6033 = vmatprep.subr.bf16.mxu0 %v12210_v8  ;;  %7050 = vmatprep.subr.bf16.mxu1 %v12213_v9  ;;  %v12301_v8 = vld [vmem:[%s16694_s1 + $0x8a0] ss:$20 sps:$4 sm:$0xff]   ;;  %v12309_v9 = vld [vmem:[%s16694_s1 + $0x8c4] ss:$20 sps:$4 sm:$0xff]  }
  0xb9   : > { %5990 = vmatprep.mubr.bf16.mxu0 %v12214_v10  ;;  %7007 = vmatprep.mubr.bf16.mxu1 %v12214_v10  ;;  %v12312_v10 = vld [vmem:[%s16694_s1 + $0x8cc] ss:$20 sps:$4 sm:$0xff]  }
  0xbb   : > { %6034 = vmatpush1.bf16.msra.mxu0 %v12208_v11  ;;  %7051 = vmatpush1.bf16.msra.mxu1 %v12211_v12  ;;  %v12306_v11 = vld [vmem:[%s13523_s12 + $0x250] ss:$72 sps:$4 sm:$0xff]   ;;  %v12307_v12 = vld [vmem:[%s16694_s1 + $0x8c0] ss:$20 sps:$4 sm:$0xff]  }
  0xbc   : > { %6035 = vmatprep.subr.bf16.mxu0 %v12219_v13  ;;  %7052 = vmatprep.subr.bf16.mxu1 %v12222_v14  ;;  %v12310_v13 = vld [vmem:[%s16694_s1 + $0x8c8] ss:$20 sps:$4 sm:$0xff]   ;;  %v12315_v14 = vld [vmem:[%s16694_s1 + $0x8ec] ss:$20 sps:$4 sm:$0xff]  }
  0xbe   : > { %5991 = vmatmul.mubr.bf16.gmra.mrb[24].mxu0 %v12216_v15  ;;  %7008 = vmatmul.mubr.bf16.gmra.mrb[24].mxu1 %v12216_v15  ;;  %v12318_v15 = vld [vmem:[%s16694_s1 + $0x8f4] ss:$20 sps:$4 sm:$0xff]  }
  0xbf   : > { %6036 = vmatpush1.bf16.msra.mxu0 %v12217_v16  ;;  %7053 = vmatpush1.bf16.msra.mxu1 %v12220_v17  ;;  %v12319_v16 = vld [vmem:[%s13523_s12 + $0x2e4] ss:$72 sps:$4 sm:$0xff]   ;;  %v12313_v17 = vld [vmem:[%s16694_s1 + $0x8e8] ss:$20 sps:$4 sm:$0xff]  }
  0xc0   : > { %6037 = vmatprep.subr.bf16.mxu0 %v12225_v18  ;;  %7054 = vmatprep.subr.bf16.mxu1 %v12228_v19  ;;  %v12316_v18 = vld [vmem:[%s16694_s1 + $0x8f0] ss:$20 sps:$4 sm:$0xff]   ;;  %v12324_v19 = vld [vmem:[%s16694_s1 + $0x914] ss:$20 sps:$4 sm:$0xff]  }
  0xc1   : > { %6000 = vmatprep.mubr.bf16.mxu0 %v12229_v20  ;;  %7017 = vmatprep.mubr.bf16.mxu1 %v12229_v20  ;;  %v12327_v20 = vld [vmem:[%s16694_s1 + $0x91c] ss:$20 sps:$4 sm:$0xff]  }
  0xc3   : > { %6038 = vmatpush1.bf16.msra.mxu0 %v12223_v21  ;;  %7055 = vmatpush1.bf16.msra.mxu1 %v12226_v22  ;;  %v12321_v21 = vld [vmem:[%s13523_s12 + $0x2e0] ss:$72 sps:$4 sm:$0xff]   ;;  %v12322_v22 = vld [vmem:[%s16694_s1 + $0x910] ss:$20 sps:$4 sm:$0xff]  }
  0xc4   : > { %6039 = vmatprep.subr.bf16.mxu0 %v12234_v23  ;;  %7056 = vmatprep.subr.bf16.mxu1 %v12237_v24  ;;  %v12325_v23 = vld [vmem:[%s16694_s1 + $0x918] ss:$20 sps:$4 sm:$0xff]   ;;  %v12330_v24 = vld [vmem:[%s16694_s1 + $0x93c] ss:$20 sps:$4 sm:$0xff]  }
  0xc6   : > { %6001 = vmatmul.mubr.bf16.gmra.mrb[28].mxu0 %v12231_v25  ;;  %7018 = vmatmul.mubr.bf16.gmra.mrb[28].mxu1 %v12231_v25  ;;  %v12333_v25 = vld [vmem:[%s16694_s1 + $0x944] ss:$20 sps:$4 sm:$0xff]  }
  0xc7   : > { %6040 = vmatpush1.bf16.msra.mxu0 %v12232_v26  ;;  %7057 = vmatpush1.bf16.msra.mxu1 %v12235_v27  ;;  %v12334_v26 = vld [vmem:[%s13523_s12 + $0x374] ss:$72 sps:$4 sm:$0xff]   ;;  %v12328_v27 = vld [vmem:[%s16694_s1 + $0x938] ss:$20 sps:$4 sm:$0xff]  }
  0xc8   : > { %6041 = vmatprep.subr.bf16.mxu0 %v12240_v28  ;;  %7058 = vmatprep.subr.bf16.mxu1 %v12243_v29  ;;  %v12331_v28 = vld [vmem:[%s16694_s1 + $0x940] ss:$20 sps:$4 sm:$0xff]   ;;  %v12339_v29 = vld [vmem:[%s16694_s1 + $0x964] ss:$20 sps:$4 sm:$0xff]  }
  0xc9   : > { %6043 = vmatprep.mubr.bf16.mxu0 %v12246_v30  ;;  %7060 = vmatprep.mubr.bf16.mxu1 %v12246_v30  ;;  %v12342_v30 = vld [vmem:[%s16694_s1 + $0x96c] ss:$20 sps:$4 sm:$0xff]  }
  0xcb   : > { %6042 = vmatpush1.bf16.msra.mxu0 %v12238_v31  ;;  %7059 = vmatpush1.bf16.msra.mxu1 %v12241_v32  ;;  %v12336_v31 = vld [vmem:[%s13523_s12 + $0x370] ss:$72 sps:$4 sm:$0xff]   ;;  %v12337_v32 = vld [vmem:[%s16694_s1 + $0x960] ss:$20 sps:$4 sm:$0xff]  }
  0xcc   : > { %6124 = vmatprep.subr.bf16.mxu0 %v12249_v33  ;;  %7141 = vmatprep.subr.bf16.mxu1 %v12252_v34  ;;  %v12340_v33 = vld [vmem:[%s16694_s1 + $0x968] ss:$20 sps:$4 sm:$0xff]   ;;  %v12345_v34 = vld [vmem:[%s16694_s1 + $0x98c] ss:$20 sps:$4 sm:$0xff]  }
  0xce   : > { %6044 = vmatmul.mubr.bf16.vlgmr.msra.gmra.mrb[0].mxu0 %v12244_v35  ;;  %7061 = vmatmul.mubr.bf16.vlgmr.msra.gmra.mrb[0].mxu1 %v12244_v35  ;;  %v12348_v35 = vld [vmem:[%s16694_s1 + $0x994] ss:$20 sps:$4 sm:$0xff]  }
  0xcf   : > { %6125 = vmatpush1.bf16.msra.mxu0 %v12247_v36  ;;  %7142 = vmatpush1.bf16.msra.mxu1 %v12250_v37  ;;  %v12349_v36 = vld [vmem:[%s13523_s12 + $0x404] ss:$72 sps:$4 sm:$0xff]   ;;  %v12343_v37 = vld [vmem:[%s16694_s1 + $0x988] ss:$20 sps:$4 sm:$0xff]  }
  0xd0   : > { %6126 = vmatprep.subr.bf16.mxu0 %v12255_v38  ;;  %7143 = vmatprep.subr.bf16.mxu1 %v12258_v39  ;;  %v12346_v38 = vld [vmem:[%s16694_s1 + $0x990] ss:$20 sps:$4 sm:$0xff]   ;;  %v12354_v39 = vld [vmem:[%s16694_s1 + $0x9b4] ss:$20 sps:$4 sm:$0xff]  }
  0xd1   : > { %6053 = vmatprep.mubr.bf16.mxu0 %v12259_v40  ;;  %7070 = vmatprep.mubr.bf16.mxu1 %v12259_v40  ;;  %v12357_v40 = vld [vmem:[%s16694_s1 + $0x9bc] ss:$20 sps:$4 sm:$0xff]  }
  0xd3   : > { %6127 = vmatpush1.bf16.msra.mxu0 %v12253_v41  ;;  %7144 = vmatpush1.bf16.msra.mxu1 %v12256_v42  ;;  %v12351_v41 = vld [vmem:[%s13523_s12 + $0x400] ss:$72 sps:$4 sm:$0xff]   ;;  %v12352_v42 = vld [vmem:[%s16694_s1 + $0x9b0] ss:$20 sps:$4 sm:$0xff]  }
  0xd4   : > { %6128 = vmatprep.subr.bf16.mxu0 %v12264_v43  ;;  %7145 = vmatprep.subr.bf16.mxu1 %v12267_v44  ;;  %v12355_v43 = vld [vmem:[%s16694_s1 + $0x9b8] ss:$20 sps:$4 sm:$0xff]   ;;  %v12360_v44 = vld [vmem:[%s16694_s1 + $0x9dc] ss:$20 sps:$4 sm:$0xff]  }
  0xd6   : > { %6054 = vmatmul.mubr.bf16.gmra.mrb[4].mxu0 %v12261_v45  ;;  %7071 = vmatmul.mubr.bf16.gmra.mrb[4].mxu1 %v12261_v45  ;;  %v12363_v45 = vld [vmem:[%s16694_s1 + $0x9e4] ss:$20 sps:$4 sm:$0xff]  }
  0xd7   : > { %6129 = vmatpush1.bf16.msra.mxu0 %v12262_v46  ;;  %7146 = vmatpush1.bf16.msra.mxu1 %v12265_v47  ;;  %v12366_v46 = vld [vmem:[%s13523_s12 + $0x1c] ss:$72 sps:$4 sm:$0xff]   ;;  %v12358_v47 = vld [vmem:[%s16694_s1 + $0x9d8] ss:$20 sps:$4 sm:$0xff]  }
  0xd8   : > { %6130 = vmatprep.subr.bf16.mxu0 %v12270_v48  ;;  %7147 = vmatprep.subr.bf16.mxu1 %v12273_v49  ;;  %v12361_v48 = vld [vmem:[%s16694_s1 + $0x9e0] ss:$20 sps:$4 sm:$0xff]   ;;  %v12369_v49 = vld [vmem:[%s16694_s1 + $0xa04] ss:$20 sps:$4 sm:$0xff]  }
  0xd9   : > { %6063 = vmatprep.mubr.bf16.mxu0 %v12274_v50  ;;  %7080 = vmatprep.mubr.bf16.mxu1 %v12274_v50  ;;  %v12372_v50 = vld [vmem:[%s16694_s1 + $0xa0c] ss:$20 sps:$4 sm:$0xff]  }
  0xdb   : > { %6131 = vmatpush1.bf16.msra.mxu0 %v12268_v51  ;;  %7148 = vmatpush1.bf16.msra.mxu1 %v12271_v52  ;;  %v12364_v51 = vld [vmem:[%s13523_s12 + $0x18] ss:$72 sps:$4 sm:$0xff]  }
  0xdc   : > { %6132 = vmatprep.subr.bf16.mxu0 %v12279_v53  ;;  %7149 = vmatprep.subr.bf16.mxu1 %v12282_v54  ;;  %v12367_v52 = vld [vmem:[%s16694_s1 + $0xa00] ss:$20 sps:$4 sm:$0xff]   ;;  %v12370_v53 = vld [vmem:[%s16694_s1 + $0xa08] ss:$20 sps:$4 sm:$0xff]  }
  0xdd   : > { %v12375_v54 = vld [vmem:[%s16694_s1 + $0xa2c] ss:$20 sps:$4 sm:$0xff]  }
  0xde   : > { %6064 = vmatmul.mubr.bf16.gmra.mrb[8].mxu0 %v12276_v55  ;;  %7081 = vmatmul.mubr.bf16.gmra.mrb[8].mxu1 %v12276_v55  ;;  %v12378_v55 = vld [vmem:[%s16694_s1 + $0xa34] ss:$20 sps:$4 sm:$0xff]  }
  0xdf   : > { %6133 = vmatpush1.bf16.msra.mxu0 %v12277_v56  ;;  %7150 = vmatpush1.bf16.msra.mxu1 %v12280_v57  ;;  %v12379_v56 = vld [vmem:[%s13523_s12 + $0xac] ss:$72 sps:$4 sm:$0xff]   ;;  %v12373_v57 = vld [vmem:[%s16694_s1 + $0xa28] ss:$20 sps:$4 sm:$0xff]  }
  0xe0   : > { %6134 = vmatprep.subr.bf16.mxu0 %v12285_v58  ;;  %7151 = vmatprep.subr.bf16.mxu1 %v12288_v59  ;;  %v12376_v58 = vld [vmem:[%s16694_s1 + $0xa30] ss:$20 sps:$4 sm:$0xff]   ;;  %v12384_v59 = vld [vmem:[%s16694_s1 + $0xa54] ss:$20 sps:$4 sm:$0xff]  }
  0xe1   : > { %6073 = vmatprep.mubr.bf16.mxu0 %v12289_v60  ;;  %7090 = vmatprep.mubr.bf16.mxu1 %v12289_v60  ;;  %v12387_v60 = vld [vmem:[%s16694_s1 + $0xa5c] ss:$20 sps:$4 sm:$0xff]  }
  0xe3   : > { %6135 = vmatpush1.bf16.msra.mxu0 %v12283_v61  ;;  %7152 = vmatpush1.bf16.msra.mxu1 %v12286_v62  ;;  %v12381_v61 = vld [vmem:[%s13523_s12 + $0xa8] ss:$72 sps:$4 sm:$0xff]  }
  0xe4   : > { %6136 = vmatprep.subr.bf16.mxu0 %v12294_v63  ;;  %7153 = vmatprep.subr.bf16.mxu1 %v12297_v0  ;;  %v12382_v62 = vld [vmem:[%s16694_s1 + $0xa50] ss:$20 sps:$4 sm:$0xff]   ;;  %v12385_v63 = vld [vmem:[%s16694_s1 + $0xa58] ss:$20 sps:$4 sm:$0xff]  }
  0xe5   : > { %v12390_v0 = vld [vmem:[%s16694_s1 + $0xa7c] ss:$20 sps:$4 sm:$0xff]  }
  0xe6   : > { %6074 = vmatmul.mubr.bf16.gmra.mrb[12].mxu0 %v12291_v1  ;;  %7091 = vmatmul.mubr.bf16.gmra.mrb[12].mxu1 %v12291_v1  ;;  %v12393_v1 = vld [vmem:[%s16694_s1 + $0xa84] ss:$20 sps:$4 sm:$0xff]  }
  0xe7   : > { %6137 = vmatpush1.bf16.msra.mxu0 %v12292_v2  ;;  %7154 = vmatpush1.bf16.msra.mxu1 %v12295_v3  ;;  %v12394_v2 = vld [vmem:[%s13523_s12 + $0x13c] ss:$72 sps:$4 sm:$0xff]   ;;  %v12388_v3 = vld [vmem:[%s16694_s1 + $0xa78] ss:$20 sps:$4 sm:$0xff]  }
  0xe8   : > { %6138 = vmatprep.subr.bf16.mxu0 %v12300_v4  ;;  %7155 = vmatprep.subr.bf16.mxu1 %v12303_v5  ;;  %v12391_v4 = vld [vmem:[%s16694_s1 + $0xa80] ss:$20 sps:$4 sm:$0xff]   ;;  %v12399_v5 = vld [vmem:[%s16694_s1 + $0xaa4] ss:$20 sps:$4 sm:$0xff]  }
  0xe9   : > { %6083 = vmatprep.mubr.bf16.mxu0 %v12304_v6  ;;  %7100 = vmatprep.mubr.bf16.mxu1 %v12304_v6  ;;  %v12402_v6 = vld [vmem:[%s16694_s1 + $0xaac] ss:$20 sps:$4 sm:$0xff]  }
  0xeb   : > { %6139 = vmatpush1.bf16.msra.mxu0 %v12298_v7  ;;  %7156 = vmatpush1.bf16.msra.mxu1 %v12301_v8  ;;  %v12396_v7 = vld [vmem:[%s13523_s12 + $0x138] ss:$72 sps:$4 sm:$0xff]  }
  0xec   : > { %6140 = vmatprep.subr.bf16.mxu0 %v12309_v9  ;;  %7157 = vmatprep.subr.bf16.mxu1 %v12312_v10  ;;  %v12397_v8 = vld [vmem:[%s16694_s1 + $0xaa0] ss:$20 sps:$4 sm:$0xff]   ;;  %v12400_v9 = vld [vmem:[%s16694_s1 + $0xaa8] ss:$20 sps:$4 sm:$0xff]  }
  0xed   : > { %v12405_v10 = vld [vmem:[%s16694_s1 + $0xacc] ss:$20 sps:$4 sm:$0xff]  }
  0xee   : > { %6084 = vmatmul.mubr.bf16.gmra.mrb[16].mxu0 %v12306_v11  ;;  %7101 = vmatmul.mubr.bf16.gmra.mrb[16].mxu1 %v12306_v11  ;;  %v12408_v11 = vld [vmem:[%s16694_s1 + $0xad4] ss:$20 sps:$4 sm:$0xff]  }
  0xef   : > { %6141 = vmatpush1.bf16.msra.mxu0 %v12307_v12  ;;  %7158 = vmatpush1.bf16.msra.mxu1 %v12310_v13  ;;  %v12409_v12 = vld [vmem:[%s13523_s12 + $0x1cc] ss:$72 sps:$4 sm:$0xff]   ;;  %v12403_v13 = vld [vmem:[%s16694_s1 + $0xac8] ss:$20 sps:$4 sm:$0xff]  }
  0xf0   : > { %6142 = vmatprep.subr.bf16.mxu0 %v12315_v14  ;;  %7159 = vmatprep.subr.bf16.mxu1 %v12318_v15  ;;  %v12406_v14 = vld [vmem:[%s16694_s1 + $0xad0] ss:$20 sps:$4 sm:$0xff]   ;;  %v12414_v15 = vld [vmem:[%s16694_s1 + $0xaf4] ss:$20 sps:$4 sm:$0xff]  }
  0xf1   : > { %6093 = vmatprep.mubr.bf16.mxu0 %v12319_v16  ;;  %7110 = vmatprep.mubr.bf16.mxu1 %v12319_v16  ;;  %v12417_v16 = vld [vmem:[%s16694_s1 + $0xafc] ss:$20 sps:$4 sm:$0xff]  }
  0xf3   : > { %6143 = vmatpush1.bf16.msra.mxu0 %v12313_v17  ;;  %7160 = vmatpush1.bf16.msra.mxu1 %v12316_v18  ;;  %v12411_v17 = vld [vmem:[%s13523_s12 + $0x1c8] ss:$72 sps:$4 sm:$0xff]  }
  0xf4   : > { %6144 = vmatprep.subr.bf16.mxu0 %v12324_v19  ;;  %7161 = vmatprep.subr.bf16.mxu1 %v12327_v20  ;;  %v12412_v18 = vld [vmem:[%s16694_s1 + $0xaf0] ss:$20 sps:$4 sm:$0xff]   ;;  %v12415_v19 = vld [vmem:[%s16694_s1 + $0xaf8] ss:$20 sps:$4 sm:$0xff]  }
  0xf5   : > { %v12420_v20 = vld [vmem:[%s16694_s1 + $0xb1c] ss:$20 sps:$4 sm:$0xff]  }
  0xf6   : > { %6094 = vmatmul.mubr.bf16.gmra.mrb[20].mxu0 %v12321_v21  ;;  %7111 = vmatmul.mubr.bf16.gmra.mrb[20].mxu1 %v12321_v21  ;;  %v12423_v21 = vld [vmem:[%s16694_s1 + $0xb24] ss:$20 sps:$4 sm:$0xff]  }
  0xf7   : > { %6145 = vmatpush1.bf16.msra.mxu0 %v12322_v22  ;;  %7162 = vmatpush1.bf16.msra.mxu1 %v12325_v23  ;;  %v12424_v22 = vld [vmem:[%s13523_s12 + $0x25c] ss:$72 sps:$4 sm:$0xff]   ;;  %v12418_v23 = vld [vmem:[%s16694_s1 + $0xb18] ss:$20 sps:$4 sm:$0xff]  }
  0xf8   : > { %6146 = vmatprep.subr.bf16.mxu0 %v12330_v24  ;;  %7163 = vmatprep.subr.bf16.mxu1 %v12333_v25  ;;  %v12421_v24 = vld [vmem:[%s16694_s1 + $0xb20] ss:$20 sps:$4 sm:$0xff]   ;;  %v12429_v25 = vld [vmem:[%s16694_s1 + $0xb44] ss:$20 sps:$4 sm:$0xff]  }
  0xf9   : > { %6103 = vmatprep.mubr.bf16.mxu0 %v12334_v26  ;;  %7120 = vmatprep.mubr.bf16.mxu1 %v12334_v26  ;;  %v12432_v26 = vld [vmem:[%s16694_s1 + $0xb4c] ss:$20 sps:$4 sm:$0xff]  }
  0xfb   : > { %6147 = vmatpush1.bf16.msra.mxu0 %v12328_v27  ;;  %7164 = vmatpush1.bf16.msra.mxu1 %v12331_v28  ;;  %v12426_v27 = vld [vmem:[%s13523_s12 + $0x258] ss:$72 sps:$4 sm:$0xff]  }
  0xfc   : > { %6148 = vmatprep.subr.bf16.mxu0 %v12339_v29  ;;  %7165 = vmatprep.subr.bf16.mxu1 %v12342_v30  ;;  %v12427_v28 = vld [vmem:[%s16694_s1 + $0xb40] ss:$20 sps:$4 sm:$0xff]   ;;  %v12430_v29 = vld [vmem:[%s16694_s1 + $0xb48] ss:$20 sps:$4 sm:$0xff]  }
  0xfd   : > { %v12435_v30 = vld [vmem:[%s16694_s1 + $0xb6c] ss:$20 sps:$4 sm:$0xff]  }
  0xfe   : > { %6104 = vmatmul.mubr.bf16.gmra.mrb[24].mxu0 %v12336_v31  ;;  %7121 = vmatmul.mubr.bf16.gmra.mrb[24].mxu1 %v12336_v31  ;;  %v12438_v31 = vld [vmem:[%s16694_s1 + $0xb74] ss:$20 sps:$4 sm:$0xff]  }
  0xff   : > { %6149 = vmatpush1.bf16.msra.mxu0 %v12337_v32  ;;  %7166 = vmatpush1.bf16.msra.mxu1 %v12340_v33  ;;  %v12439_v32 = vld [vmem:[%s13523_s12 + $0x2ec] ss:$72 sps:$4 sm:$0xff]   ;;  %v12433_v33 = vld [vmem:[%s16694_s1 + $0xb68] ss:$20 sps:$4 sm:$0xff]  }
 0x100   : > { %6150 = vmatprep.subr.bf16.mxu0 %v12345_v34  ;;  %7167 = vmatprep.subr.bf16.mxu1 %v12348_v35  ;;  %v12436_v34 = vld [vmem:[%s16694_s1 + $0xb70] ss:$20 sps:$4 sm:$0xff]   ;;  %v12444_v35 = vld [vmem:[%s16694_s1 + $0xb94] ss:$20 sps:$4 sm:$0xff]  }
 0x101   : > { %6113 = vmatprep.mubr.bf16.mxu0 %v12349_v36  ;;  %7130 = vmatprep.mubr.bf16.mxu1 %v12349_v36  ;;  %v12447_v36 = vld [vmem:[%s16694_s1 + $0xb9c] ss:$20 sps:$4 sm:$0xff]  }
 0x103   : > { %6151 = vmatpush1.bf16.msra.mxu0 %v12343_v37  ;;  %7168 = vmatpush1.bf16.msra.mxu1 %v12346_v38  ;;  %v12441_v37 = vld [vmem:[%s13523_s12 + $0x2e8] ss:$72 sps:$4 sm:$0xff]  }
 0x104   : > { %6152 = vmatprep.subr.bf16.mxu0 %v12354_v39  ;;  %7169 = vmatprep.subr.bf16.mxu1 %v12357_v40  ;;  %v12442_v38 = vld [vmem:[%s16694_s1 + $0xb90] ss:$20 sps:$4 sm:$0xff]   ;;  %v12445_v39 = vld [vmem:[%s16694_s1 + $0xb98] ss:$20 sps:$4 sm:$0xff]  }
 0x105   : > { %v12450_v40 = vld [vmem:[%s16694_s1 + $0xbbc] ss:$20 sps:$4 sm:$0xff]  }
 0x106   : > { %6114 = vmatmul.mubr.bf16.gmra.mrb[28].mxu0 %v12351_v41  ;;  %7131 = vmatmul.mubr.bf16.gmra.mrb[28].mxu1 %v12351_v41  ;;  %v12453_v41 = vld [vmem:[%s16694_s1 + $0xbc4] ss:$20 sps:$4 sm:$0xff]  }
 0x107   : > { %6153 = vmatpush1.bf16.msra.mxu0 %v12352_v42  ;;  %7170 = vmatpush1.bf16.msra.mxu1 %v12355_v43  ;;  %v12454_v42 = vld [vmem:[%s13523_s12 + $0x37c] ss:$72 sps:$4 sm:$0xff]   ;;  %v12448_v43 = vld [vmem:[%s16694_s1 + $0xbb8] ss:$20 sps:$4 sm:$0xff]  }
 0x108   : > { %6154 = vmatprep.subr.bf16.mxu0 %v12360_v44  ;;  %7171 = vmatprep.subr.bf16.mxu1 %v12363_v45  ;;  %v12451_v44 = vld [vmem:[%s16694_s1 + $0xbc0] ss:$20 sps:$4 sm:$0xff]   ;;  %v12459_v45 = vld [vmem:[%s16694_s1 + $0xbe4] ss:$20 sps:$4 sm:$0xff]  }
 0x109   : > { %6156 = vmatprep.mubr.bf16.mxu0 %v12366_v46  ;;  %7173 = vmatprep.mubr.bf16.mxu1 %v12366_v46  ;;  %v12462_v46 = vld [vmem:[%s16694_s1 + $0xbec] ss:$20 sps:$4 sm:$0xff]  }
 0x10b   : > { %6155 = vmatpush1.bf16.msra.mxu0 %v12358_v47  ;;  %7172 = vmatpush1.bf16.msra.mxu1 %v12361_v48  ;;  %v12456_v47 = vld [vmem:[%s13523_s12 + $0x378] ss:$72 sps:$4 sm:$0xff]  }
 0x10c   : > { %6237 = vmatprep.subr.bf16.mxu0 %v12369_v49  ;;  %7254 = vmatprep.subr.bf16.mxu1 %v12372_v50  ;;  %v12457_v48 = vld [vmem:[%s16694_s1 + $0xbe0] ss:$20 sps:$4 sm:$0xff]   ;;  %v12460_v49 = vld [vmem:[%s16694_s1 + $0xbe8] ss:$20 sps:$4 sm:$0xff]  }
 0x10d   : > { %v12465_v50 = vld [vmem:[%s16694_s1 + $0xc0c] ss:$20 sps:$4 sm:$0xff]  }
 0x10e   : > { %6157 = vmatmul.mubr.bf16.vlgmr.msra.gmra.mrb[0].mxu0 %v12364_v51  ;;  %7174 = vmatmul.mubr.bf16.vlgmr.msra.gmra.mrb[0].mxu1 %v12364_v51  ;;  %v12468_v51 = vld [vmem:[%s16694_s1 + $0xc14] ss:$20 sps:$4 sm:$0xff]  }
 0x10f   : > { %6238 = vmatpush1.bf16.msra.mxu0 %v12367_v52  ;;  %7255 = vmatpush1.bf16.msra.mxu1 %v12370_v53  ;;  %v12469_v52 = vld [vmem:[%s13523_s12 + $0x40c] ss:$72 sps:$4 sm:$0xff]   ;;  %v12463_v53 = vld [vmem:[%s16694_s1 + $0xc08] ss:$20 sps:$4 sm:$0xff]  }
 0x110   : > { %6239 = vmatprep.subr.bf16.mxu0 %v12375_v54  ;;  %7256 = vmatprep.subr.bf16.mxu1 %v12378_v55  ;;  %v12466_v54 = vld [vmem:[%s16694_s1 + $0xc10] ss:$20 sps:$4 sm:$0xff]   ;;  %v12474_v55 = vld [vmem:[%s16694_s1 + $0xc34] ss:$20 sps:$4 sm:$0xff]  }
 0x111   : > { %6166 = vmatprep.mubr.bf16.mxu0 %v12379_v56  ;;  %7183 = vmatprep.mubr.bf16.mxu1 %v12379_v56  ;;  %v12477_v56 = vld [vmem:[%s16694_s1 + $0xc3c] ss:$20 sps:$4 sm:$0xff]  }
 0x113   : > { %6240 = vmatpush1.bf16.msra.mxu0 %v12373_v57  ;;  %7257 = vmatpush1.bf16.msra.mxu1 %v12376_v58  ;;  %v12471_v57 = vld [vmem:[%s13523_s12 + $0x408] ss:$72 sps:$4 sm:$0xff]  }
 0x114   : > { %6241 = vmatprep.subr.bf16.mxu0 %v12384_v59  ;;  %7258 = vmatprep.subr.bf16.mxu1 %v12387_v60  ;;  %v12472_v58 = vld [vmem:[%s16694_s1 + $0xc30] ss:$20 sps:$4 sm:$0xff]   ;;  %v12475_v59 = vld [vmem:[%s16694_s1 + $0xc38] ss:$20 sps:$4 sm:$0xff]  }
 0x115   : > { %v12480_v60 = vld [vmem:[%s16694_s1 + $0xc5c] ss:$20 sps:$4 sm:$0xff]  }
 0x116   : > { %6167 = vmatmul.mubr.bf16.gmra.mrb[4].mxu0 %v12381_v61  ;;  %7184 = vmatmul.mubr.bf16.gmra.mrb[4].mxu1 %v12381_v61  ;;  %v12483_v61 = vld [vmem:[%s16694_s1 + $0xc64] ss:$20 sps:$4 sm:$0xff]  }
 0x117   : > { %6242 = vmatpush1.bf16.msra.mxu0 %v12382_v62  ;;  %7259 = vmatpush1.bf16.msra.mxu1 %v12385_v63  ;;  %v12486_v62 = vld [vmem:[%s13523_s12 + $0x24] ss:$72 sps:$4 sm:$0xff]  }
 0x118   : > { %6243 = vmatprep.subr.bf16.mxu0 %v12390_v0  ;;  %7260 = vmatprep.subr.bf16.mxu1 %v12393_v1  ;;  %v12478_v63 = vld [vmem:[%s16694_s1 + $0xc58] ss:$20 sps:$4 sm:$0xff]   ;;  %v12481_v0 = vld [vmem:[%s16694_s1 + $0xc60] ss:$20 sps:$4 sm:$0xff]  }
 0x119   : > { %6176 = vmatprep.mubr.bf16.mxu0 %v12394_v2  ;;  %7193 = vmatprep.mubr.bf16.mxu1 %v12394_v2  ;;  %v12489_v1 = vld [vmem:[%s16694_s1 + $0xc84] ss:$20 sps:$4 sm:$0xff]   ;;  %v12492_v2 = vld [vmem:[%s16694_s1 + $0xc8c] ss:$20 sps:$4 sm:$0xff]  }
 0x11b   : > { %6244 = vmatpush1.bf16.msra.mxu0 %v12388_v3  ;;  %7261 = vmatpush1.bf16.msra.mxu1 %v12391_v4  ;;  %v12484_v3 = vld [vmem:[%s13523_s12 + $0x20] ss:$72 sps:$4 sm:$0xff]  }
 0x11c   : > { %6245 = vmatprep.subr.bf16.mxu0 %v12399_v5  ;;  %7262 = vmatprep.subr.bf16.mxu1 %v12402_v6  ;;  %v12487_v4 = vld [vmem:[%s16694_s1 + $0xc80] ss:$20 sps:$4 sm:$0xff]   ;;  %v12490_v5 = vld [vmem:[%s16694_s1 + $0xc88] ss:$20 sps:$4 sm:$0xff]  }
 0x11d   : > { %v12495_v6 = vld [vmem:[%s16694_s1 + $0xcac] ss:$20 sps:$4 sm:$0xff]  }
 0x11e   : > { %6177 = vmatmul.mubr.bf16.gmra.mrb[8].mxu0 %v12396_v7  ;;  %7194 = vmatmul.mubr.bf16.gmra.mrb[8].mxu1 %v12396_v7  ;;  %v12498_v7 = vld [vmem:[%s16694_s1 + $0xcb4] ss:$20 sps:$4 sm:$0xff]  }
 0x11f   : > { %6246 = vmatpush1.bf16.msra.mxu0 %v12397_v8  ;;  %7263 = vmatpush1.bf16.msra.mxu1 %v12400_v9  ;;  %v12499_v8 = vld [vmem:[%s13523_s12 + $0xb4] ss:$72 sps:$4 sm:$0xff]  }
 0x120   : > { %6247 = vmatprep.subr.bf16.mxu0 %v12405_v10  ;;  %7264 = vmatprep.subr.bf16.mxu1 %v12408_v11  ;;  %v12493_v9 = vld [vmem:[%s16694_s1 + $0xca8] ss:$20 sps:$4 sm:$0xff]   ;;  %v12496_v10 = vld [vmem:[%s16694_s1 + $0xcb0] ss:$20 sps:$4 sm:$0xff]  }
 0x121   : > { %6186 = vmatprep.mubr.bf16.mxu0 %v12409_v12  ;;  %7203 = vmatprep.mubr.bf16.mxu1 %v12409_v12  ;;  %v12504_v11 = vld [vmem:[%s16694_s1 + $0xcd4] ss:$20 sps:$4 sm:$0xff]   ;;  %v12507_v12 = vld [vmem:[%s16694_s1 + $0xcdc] ss:$20 sps:$4 sm:$0xff]  }
 0x123   : > { %6248 = vmatpush1.bf16.msra.mxu0 %v12403_v13  ;;  %7265 = vmatpush1.bf16.msra.mxu1 %v12406_v14  ;;  %v12501_v13 = vld [vmem:[%s13523_s12 + $0xb0] ss:$72 sps:$4 sm:$0xff]  }
 0x124   : > { %6249 = vmatprep.subr.bf16.mxu0 %v12414_v15  ;;  %7266 = vmatprep.subr.bf16.mxu1 %v12417_v16  ;;  %v12502_v14 = vld [vmem:[%s16694_s1 + $0xcd0] ss:$20 sps:$4 sm:$0xff]   ;;  %v12505_v15 = vld [vmem:[%s16694_s1 + $0xcd8] ss:$20 sps:$4 sm:$0xff]  }
 0x125   : > { %v12510_v16 = vld [vmem:[%s16694_s1 + $0xcfc] ss:$20 sps:$4 sm:$0xff]  }
 0x126   : > { %6187 = vmatmul.mubr.bf16.gmra.mrb[12].mxu0 %v12411_v17  ;;  %7204 = vmatmul.mubr.bf16.gmra.mrb[12].mxu1 %v12411_v17  ;;  %v12513_v17 = vld [vmem:[%s16694_s1 + $0xd04] ss:$20 sps:$4 sm:$0xff]  }
 0x127   : > { %6250 = vmatpush1.bf16.msra.mxu0 %v12412_v18  ;;  %7267 = vmatpush1.bf16.msra.mxu1 %v12415_v19  ;;  %v12514_v18 = vld [vmem:[%s13523_s12 + $0x144] ss:$72 sps:$4 sm:$0xff]  }
 0x128   : > { %6251 = vmatprep.subr.bf16.mxu0 %v12420_v20  ;;  %7268 = vmatprep.subr.bf16.mxu1 %v12423_v21  ;;  %v12508_v19 = vld [vmem:[%s16694_s1 + $0xcf8] ss:$20 sps:$4 sm:$0xff]   ;;  %v12511_v20 = vld [vmem:[%s16694_s1 + $0xd00] ss:$20 sps:$4 sm:$0xff]  }
 0x129   : > { %6196 = vmatprep.mubr.bf16.mxu0 %v12424_v22  ;;  %7213 = vmatprep.mubr.bf16.mxu1 %v12424_v22  ;;  %v12519_v21 = vld [vmem:[%s16694_s1 + $0xd24] ss:$20 sps:$4 sm:$0xff]   ;;  %v12522_v22 = vld [vmem:[%s16694_s1 + $0xd2c] ss:$20 sps:$4 sm:$0xff]  }
 0x12b   : > { %6252 = vmatpush1.bf16.msra.mxu0 %v12418_v23  ;;  %7269 = vmatpush1.bf16.msra.mxu1 %v12421_v24  ;;  %v12516_v23 = vld [vmem:[%s13523_s12 + $0x140] ss:$72 sps:$4 sm:$0xff]  }
 0x12c   : > { %6253 = vmatprep.subr.bf16.mxu0 %v12429_v25  ;;  %7270 = vmatprep.subr.bf16.mxu1 %v12432_v26  ;;  %v12517_v24 = vld [vmem:[%s16694_s1 + $0xd20] ss:$20 sps:$4 sm:$0xff]   ;;  %v12520_v25 = vld [vmem:[%s16694_s1 + $0xd28] ss:$20 sps:$4 sm:$0xff]  }
 0x12d   : > { %v12525_v26 = vld [vmem:[%s16694_s1 + $0xd4c] ss:$20 sps:$4 sm:$0xff]  }
 0x12e   : > { %6197 = vmatmul.mubr.bf16.gmra.mrb[16].mxu0 %v12426_v27  ;;  %7214 = vmatmul.mubr.bf16.gmra.mrb[16].mxu1 %v12426_v27  ;;  %v12528_v27 = vld [vmem:[%s16694_s1 + $0xd54] ss:$20 sps:$4 sm:$0xff]  }
 0x12f   : > { %6254 = vmatpush1.bf16.msra.mxu0 %v12427_v28  ;;  %7271 = vmatpush1.bf16.msra.mxu1 %v12430_v29  ;;  %v12529_v28 = vld [vmem:[%s13523_s12 + $0x1d4] ss:$72 sps:$4 sm:$0xff]  }
 0x130   : > { %6255 = vmatprep.subr.bf16.mxu0 %v12435_v30  ;;  %7272 = vmatprep.subr.bf16.mxu1 %v12438_v31  ;;  %v12523_v29 = vld [vmem:[%s16694_s1 + $0xd48] ss:$20 sps:$4 sm:$0xff]   ;;  %v12526_v30 = vld [vmem:[%s16694_s1 + $0xd50] ss:$20 sps:$4 sm:$0xff]  }
 0x131   : > { %6206 = vmatprep.mubr.bf16.mxu0 %v12439_v32  ;;  %7223 = vmatprep.mubr.bf16.mxu1 %v12439_v32  ;;  %v12534_v31 = vld [vmem:[%s16694_s1 + $0xd74] ss:$20 sps:$4 sm:$0xff]   ;;  %v12537_v32 = vld [vmem:[%s16694_s1 + $0xd7c] ss:$20 sps:$4 sm:$0xff]  }
 0x133   : > { %6256 = vmatpush1.bf16.msra.mxu0 %v12433_v33  ;;  %7273 = vmatpush1.bf16.msra.mxu1 %v12436_v34  ;;  %v12531_v33 = vld [vmem:[%s13523_s12 + $0x1d0] ss:$72 sps:$4 sm:$0xff]  }
 0x134   : > { %6257 = vmatprep.subr.bf16.mxu0 %v12444_v35  ;;  %7274 = vmatprep.subr.bf16.mxu1 %v12447_v36  ;;  %v12532_v34 = vld [vmem:[%s16694_s1 + $0xd70] ss:$20 sps:$4 sm:$0xff]   ;;  %v12535_v35 = vld [vmem:[%s16694_s1 + $0xd78] ss:$20 sps:$4 sm:$0xff]  }
 0x135   : > { %v12540_v36 = vld [vmem:[%s16694_s1 + $0xd9c] ss:$20 sps:$4 sm:$0xff]  }
 0x136   : > { %6207 = vmatmul.mubr.bf16.gmra.mrb[20].mxu0 %v12441_v37  ;;  %7224 = vmatmul.mubr.bf16.gmra.mrb[20].mxu1 %v12441_v37  ;;  %v12543_v37 = vld [vmem:[%s16694_s1 + $0xda4] ss:$20 sps:$4 sm:$0xff]  }
 0x137   : > { %6258 = vmatpush1.bf16.msra.mxu0 %v12442_v38  ;;  %7275 = vmatpush1.bf16.msra.mxu1 %v12445_v39  ;;  %v12544_v38 = vld [vmem:[%s13523_s12 + $0x264] ss:$72 sps:$4 sm:$0xff]  }
 0x138   : > { %6259 = vmatprep.subr.bf16.mxu0 %v12450_v40  ;;  %7276 = vmatprep.subr.bf16.mxu1 %v12453_v41  ;;  %v12538_v39 = vld [vmem:[%s16694_s1 + $0xd98] ss:$20 sps:$4 sm:$0xff]   ;;  %v12541_v40 = vld [vmem:[%s16694_s1 + $0xda0] ss:$20 sps:$4 sm:$0xff]  }
 0x139   : > { %6216 = vmatprep.mubr.bf16.mxu0 %v12454_v42  ;;  %7233 = vmatprep.mubr.bf16.mxu1 %v12454_v42  ;;  %v12549_v41 = vld [vmem:[%s16694_s1 + $0xdc4] ss:$20 sps:$4 sm:$0xff]   ;;  %v12552_v42 = vld [vmem:[%s16694_s1 + $0xdcc] ss:$20 sps:$4 sm:$0xff]  }
 0x13b   : > { %6260 = vmatpush1.bf16.msra.mxu0 %v12448_v43  ;;  %7277 = vmatpush1.bf16.msra.mxu1 %v12451_v44  ;;  %v12546_v43 = vld [vmem:[%s13523_s12 + $0x260] ss:$72 sps:$4 sm:$0xff]  }
 0x13c   : > { %6261 = vmatprep.subr.bf16.mxu0 %v12459_v45  ;;  %7278 = vmatprep.subr.bf16.mxu1 %v12462_v46  ;;  %v12547_v44 = vld [vmem:[%s16694_s1 + $0xdc0] ss:$20 sps:$4 sm:$0xff]   ;;  %v12550_v45 = vld [vmem:[%s16694_s1 + $0xdc8] ss:$20 sps:$4 sm:$0xff]  }
 0x13d   : > { %v12555_v46 = vld [vmem:[%s16694_s1 + $0xdec] ss:$20 sps:$4 sm:$0xff]  }
 0x13e   : > { %6217 = vmatmul.mubr.bf16.gmra.mrb[24].mxu0 %v12456_v47  ;;  %7234 = vmatmul.mubr.bf16.gmra.mrb[24].mxu1 %v12456_v47  ;;  %v12558_v47 = vld [vmem:[%s16694_s1 + $0xdf4] ss:$20 sps:$4 sm:$0xff]  }
 0x13f   : > { %6262 = vmatpush1.bf16.msra.mxu0 %v12457_v48  ;;  %7279 = vmatpush1.bf16.msra.mxu1 %v12460_v49  ;;  %v12559_v48 = vld [vmem:[%s13523_s12 + $0x2f4] ss:$72 sps:$4 sm:$0xff]  }
 0x140   : > { %6263 = vmatprep.subr.bf16.mxu0 %v12465_v50  ;;  %7280 = vmatprep.subr.bf16.mxu1 %v12468_v51  ;;  %v12553_v49 = vld [vmem:[%s16694_s1 + $0xde8] ss:$20 sps:$4 sm:$0xff]   ;;  %v12556_v50 = vld [vmem:[%s16694_s1 + $0xdf0] ss:$20 sps:$4 sm:$0xff]  }
 0x141   : > { %6226 = vmatprep.mubr.bf16.mxu0 %v12469_v52  ;;  %7243 = vmatprep.mubr.bf16.mxu1 %v12469_v52  ;;  %v12564_v51 = vld [vmem:[%s16694_s1 + $0xe14] ss:$20 sps:$4 sm:$0xff]   ;;  %v12567_v52 = vld [vmem:[%s16694_s1 + $0xe1c] ss:$20 sps:$4 sm:$0xff]  }
 0x143   : > { %6264 = vmatpush1.bf16.msra.mxu0 %v12463_v53  ;;  %7281 = vmatpush1.bf16.msra.mxu1 %v12466_v54  ;;  %v12561_v53 = vld [vmem:[%s13523_s12 + $0x2f0] ss:$72 sps:$4 sm:$0xff]  }
 0x144   : > { %6265 = vmatprep.subr.bf16.mxu0 %v12474_v55  ;;  %7282 = vmatprep.subr.bf16.mxu1 %v12477_v56  ;;  %v12562_v54 = vld [vmem:[%s16694_s1 + $0xe10] ss:$20 sps:$4 sm:$0xff]   ;;  %v12565_v55 = vld [vmem:[%s16694_s1 + $0xe18] ss:$20 sps:$4 sm:$0xff]  }
 0x145   : > { %v12570_v56 = vld [vmem:[%s16694_s1 + $0xe3c] ss:$20 sps:$4 sm:$0xff]  }
 0x146   : > { %6227 = vmatmul.mubr.bf16.gmra.mrb[28].mxu0 %v12471_v57  ;;  %7244 = vmatmul.mubr.bf16.gmra.mrb[28].mxu1 %v12471_v57  ;;  %v12573_v57 = vld [vmem:[%s16694_s1 + $0xe44] ss:$20 sps:$4 sm:$0xff]  }
 0x147   : > { %6266 = vmatpush1.bf16.msra.mxu0 %v12472_v58  ;;  %7283 = vmatpush1.bf16.msra.mxu1 %v12475_v59  ;;  %v12574_v58 = vld [vmem:[%s13523_s12 + $0x384] ss:$72 sps:$4 sm:$0xff]  }
 0x148   : > { %6267 = vmatprep.subr.bf16.mxu0 %v12480_v60  ;;  %7284 = vmatprep.subr.bf16.mxu1 %v12483_v61  ;;  %v12568_v59 = vld [vmem:[%s16694_s1 + $0xe38] ss:$20 sps:$4 sm:$0xff]   ;;  %v12571_v60 = vld [vmem:[%s16694_s1 + $0xe40] ss:$20 sps:$4 sm:$0xff]  }
 0x149   : > { %6269 = vmatprep.mubr.bf16.mxu0 %v12486_v62  ;;  %7286 = vmatprep.mubr.bf16.mxu1 %v12486_v62  ;;  %v12579_v61 = vld [vmem:[%s16694_s1 + $0xe64] ss:$20 sps:$4 sm:$0xff]   ;;  %v12582_v62 = vld [vmem:[%s16694_s1 + $0xe6c] ss:$20 sps:$4 sm:$0xff]  }
 0x14b   : > { %6268 = vmatpush1.bf16.msra.mxu0 %v12478_v63  ;;  %7285 = vmatpush1.bf16.msra.mxu1 %v12481_v0  ;;  %v12576_v63 = vld [vmem:[%s13523_s12 + $0x380] ss:$72 sps:$4 sm:$0xff]  }
 0x14c   : > { %6350 = vmatprep.subr.bf16.mxu0 %v12489_v1  ;;  %7367 = vmatprep.subr.bf16.mxu1 %v12492_v2  ;;  %v12577_v0 = vld [vmem:[%s16694_s1 + $0xe60] ss:$20 sps:$4 sm:$0xff]   ;;  %v12580_v1 = vld [vmem:[%s16694_s1 + $0xe68] ss:$20 sps:$4 sm:$0xff]  }
 0x14d   : > { %v12585_v2 = vld [vmem:[%s16694_s1 + $0xe8c] ss:$20 sps:$4 sm:$0xff]  }
 0x14e   : > { %6270 = vmatmul.mubr.bf16.vlgmr.msra.gmra.mrb[0].mxu0 %v12484_v3  ;;  %7287 = vmatmul.mubr.bf16.vlgmr.msra.gmra.mrb[0].mxu1 %v12484_v3  ;;  %v12588_v3 = vld [vmem:[%s16694_s1 + $0xe94] ss:$20 sps:$4 sm:$0xff]  }
 0x14f   : > { %6351 = vmatpush1.bf16.msra.mxu0 %v12487_v4  ;;  %7368 = vmatpush1.bf16.msra.mxu1 %v12490_v5  ;;  %v12589_v4 = vld [vmem:[%s13523_s12 + $0x414] ss:$72 sps:$4 sm:$0xff]  }
 0x150   : > { %6352 = vmatprep.subr.bf16.mxu0 %v12495_v6  ;;  %7369 = vmatprep.subr.bf16.mxu1 %v12498_v7  ;;  %v12583_v5 = vld [vmem:[%s16694_s1 + $0xe88] ss:$20 sps:$4 sm:$0xff]   ;;  %v12586_v6 = vld [vmem:[%s16694_s1 + $0xe90] ss:$20 sps:$4 sm:$0xff]  }
 0x151   : > { %6279 = vmatprep.mubr.bf16.mxu0 %v12499_v8  ;;  %7296 = vmatprep.mubr.bf16.mxu1 %v12499_v8  ;;  %v12594_v7 = vld [vmem:[%s16694_s1 + $0xeb4] ss:$20 sps:$4 sm:$0xff]   ;;  %v12597_v8 = vld [vmem:[%s16694_s1 + $0xebc] ss:$20 sps:$4 sm:$0xff]  }
 0x153   : > { %6353 = vmatpush1.bf16.msra.mxu0 %v12493_v9  ;;  %7370 = vmatpush1.bf16.msra.mxu1 %v12496_v10  ;;  %v12591_v9 = vld [vmem:[%s13523_s12 + $0x410] ss:$72 sps:$4 sm:$0xff]  }
 0x154   : > { %6354 = vmatprep.subr.bf16.mxu0 %v12504_v11  ;;  %7371 = vmatprep.subr.bf16.mxu1 %v12507_v12  ;;  %v12592_v10 = vld [vmem:[%s16694_s1 + $0xeb0] ss:$20 sps:$4 sm:$0xff]   ;;  %v12595_v11 = vld [vmem:[%s16694_s1 + $0xeb8] ss:$20 sps:$4 sm:$0xff]  }
 0x155   : > { %v12600_v12 = vld [vmem:[%s16694_s1 + $0xedc] ss:$20 sps:$4 sm:$0xff]  }
 0x156   : > { %6280 = vmatmul.mubr.bf16.gmra.mrb[4].mxu0 %v12501_v13  ;;  %7297 = vmatmul.mubr.bf16.gmra.mrb[4].mxu1 %v12501_v13  ;;  %v12603_v13 = vld [vmem:[%s16694_s1 + $0xee4] ss:$20 sps:$4 sm:$0xff]  }
 0x157   : > { %6355 = vmatpush1.bf16.msra.mxu0 %v12502_v14  ;;  %7372 = vmatpush1.bf16.msra.mxu1 %v12505_v15  ;;  %v12606_v14 = vld [vmem:[%s13523_s12 + $0x2c] ss:$72 sps:$4 sm:$0xff]  }
 0x158   : > { %6356 = vmatprep.subr.bf16.mxu0 %v12510_v16  ;;  %7373 = vmatprep.subr.bf16.mxu1 %v12513_v17  ;;  %v12598_v15 = vld [vmem:[%s16694_s1 + $0xed8] ss:$20 sps:$4 sm:$0xff]   ;;  %v12601_v16 = vld [vmem:[%s16694_s1 + $0xee0] ss:$20 sps:$4 sm:$0xff]  }
 0x159   : > { %6289 = vmatprep.mubr.bf16.mxu0 %v12514_v18  ;;  %7306 = vmatprep.mubr.bf16.mxu1 %v12514_v18  ;;  %v12609_v17 = vld [vmem:[%s16694_s1 + $0xf04] ss:$20 sps:$4 sm:$0xff]   ;;  %v12612_v18 = vld [vmem:[%s16694_s1 + $0xf0c] ss:$20 sps:$4 sm:$0xff]  }
 0x15b   : > { %6357 = vmatpush1.bf16.msra.mxu0 %v12508_v19  ;;  %7374 = vmatpush1.bf16.msra.mxu1 %v12511_v20  ;;  %v12604_v19 = vld [vmem:[%s13523_s12 + $0x28] ss:$72 sps:$4 sm:$0xff]   ;;  %v12607_v20 = vld [vmem:[%s16694_s1 + $0xf00] ss:$20 sps:$4 sm:$0xff]  }
 0x15c   : > { %6358 = vmatprep.subr.bf16.mxu0 %v12519_v21  ;;  %7375 = vmatprep.subr.bf16.mxu1 %v12522_v22  ;;  %v12610_v21 = vld [vmem:[%s16694_s1 + $0xf08] ss:$20 sps:$4 sm:$0xff]   ;;  %v12615_v22 = vld [vmem:[%s16694_s1 + $0xf2c] ss:$20 sps:$4 sm:$0xff]  }
 0x15e   : > { %6290 = vmatmul.mubr.bf16.gmra.mrb[8].mxu0 %v12516_v23  ;;  %7307 = vmatmul.mubr.bf16.gmra.mrb[8].mxu1 %v12516_v23  ;;  %v12618_v23 = vld [vmem:[%s16694_s1 + $0xf34] ss:$20 sps:$4 sm:$0xff]  }
 0x15f   : > { %6359 = vmatpush1.bf16.msra.mxu0 %v12517_v24  ;;  %7376 = vmatpush1.bf16.msra.mxu1 %v12520_v25  ;;  %v12619_v24 = vld [vmem:[%s13523_s12 + $0xbc] ss:$72 sps:$4 sm:$0xff]  }
 0x160   : > { %6360 = vmatprep.subr.bf16.mxu0 %v12525_v26  ;;  %7377 = vmatprep.subr.bf16.mxu1 %v12528_v27  ;;  %v12613_v25 = vld [vmem:[%s16694_s1 + $0xf28] ss:$20 sps:$4 sm:$0xff]   ;;  %v12616_v26 = vld [vmem:[%s16694_s1 + $0xf30] ss:$20 sps:$4 sm:$0xff]  }
 0x161   : > { %6299 = vmatprep.mubr.bf16.mxu0 %v12529_v28  ;;  %7316 = vmatprep.mubr.bf16.mxu1 %v12529_v28  ;;  %v12624_v27 = vld [vmem:[%s16694_s1 + $0xf54] ss:$20 sps:$4 sm:$0xff]   ;;  %v12627_v28 = vld [vmem:[%s16694_s1 + $0xf5c] ss:$20 sps:$4 sm:$0xff]  }
 0x163   : > { %6361 = vmatpush1.bf16.msra.mxu0 %v12523_v29  ;;  %7378 = vmatpush1.bf16.msra.mxu1 %v12526_v30  ;;  %v12621_v29 = vld [vmem:[%s13523_s12 + $0xb8] ss:$72 sps:$4 sm:$0xff]   ;;  %v12622_v30 = vld [vmem:[%s16694_s1 + $0xf50] ss:$20 sps:$4 sm:$0xff]  }
 0x164   : > { %6362 = vmatprep.subr.bf16.mxu0 %v12534_v31  ;;  %7379 = vmatprep.subr.bf16.mxu1 %v12537_v32  ;;  %v12625_v31 = vld [vmem:[%s16694_s1 + $0xf58] ss:$20 sps:$4 sm:$0xff]   ;;  %v12630_v32 = vld [vmem:[%s16694_s1 + $0xf7c] ss:$20 sps:$4 sm:$0xff]  }
 0x166   : > { %6300 = vmatmul.mubr.bf16.gmra.mrb[12].mxu0 %v12531_v33  ;;  %7317 = vmatmul.mubr.bf16.gmra.mrb[12].mxu1 %v12531_v33  ;;  %v12633_v33 = vld [vmem:[%s16694_s1 + $0xf84] ss:$20 sps:$4 sm:$0xff]  }
 0x167   : > { %6363 = vmatpush1.bf16.msra.mxu0 %v12532_v34  ;;  %7380 = vmatpush1.bf16.msra.mxu1 %v12535_v35  ;;  %v12634_v34 = vld [vmem:[%s13523_s12 + $0x14c] ss:$72 sps:$4 sm:$0xff]  }
 0x168   : > { %6364 = vmatprep.subr.bf16.mxu0 %v12540_v36  ;;  %7381 = vmatprep.subr.bf16.mxu1 %v12543_v37  ;;  %v12628_v35 = vld [vmem:[%s16694_s1 + $0xf78] ss:$20 sps:$4 sm:$0xff]   ;;  %v12631_v36 = vld [vmem:[%s16694_s1 + $0xf80] ss:$20 sps:$4 sm:$0xff]  }
 0x169   : > { %6309 = vmatprep.mubr.bf16.mxu0 %v12544_v38  ;;  %7326 = vmatprep.mubr.bf16.mxu1 %v12544_v38  ;;  %v12639_v37 = vld [vmem:[%s16694_s1 + $0xfa4] ss:$20 sps:$4 sm:$0xff]   ;;  %v12642_v38 = vld [vmem:[%s16694_s1 + $0xfac] ss:$20 sps:$4 sm:$0xff]  }
 0x16b   : > { %6365 = vmatpush1.bf16.msra.mxu0 %v12538_v39  ;;  %7382 = vmatpush1.bf16.msra.mxu1 %v12541_v40  ;;  %v12636_v39 = vld [vmem:[%s13523_s12 + $0x148] ss:$72 sps:$4 sm:$0xff]   ;;  %v12637_v40 = vld [vmem:[%s16694_s1 + $0xfa0] ss:$20 sps:$4 sm:$0xff]  }
 0x16c   : > { %6366 = vmatprep.subr.bf16.mxu0 %v12549_v41  ;;  %7383 = vmatprep.subr.bf16.mxu1 %v12552_v42  ;;  %v12640_v41 = vld [vmem:[%s16694_s1 + $0xfa8] ss:$20 sps:$4 sm:$0xff]   ;;  %v12645_v42 = vld [vmem:[%s16694_s1 + $0xfcc] ss:$20 sps:$4 sm:$0xff]  }
 0x16e   : > { %6310 = vmatmul.mubr.bf16.gmra.mrb[16].mxu0 %v12546_v43  ;;  %7327 = vmatmul.mubr.bf16.gmra.mrb[16].mxu1 %v12546_v43  ;;  %v12648_v43 = vld [vmem:[%s16694_s1 + $0xfd4] ss:$20 sps:$4 sm:$0xff]  }
 0x16f   : > { %6367 = vmatpush1.bf16.msra.mxu0 %v12547_v44  ;;  %7384 = vmatpush1.bf16.msra.mxu1 %v12550_v45  ;;  %v12649_v44 = vld [vmem:[%s13523_s12 + $0x1dc] ss:$72 sps:$4 sm:$0xff]  }
 0x170   : > { %6368 = vmatprep.subr.bf16.mxu0 %v12555_v46  ;;  %7385 = vmatprep.subr.bf16.mxu1 %v12558_v47  ;;  %v12643_v45 = vld [vmem:[%s16694_s1 + $0xfc8] ss:$20 sps:$4 sm:$0xff]   ;;  %v12646_v46 = vld [vmem:[%s16694_s1 + $0xfd0] ss:$20 sps:$4 sm:$0xff]  }
 0x171   : > { %6319 = vmatprep.mubr.bf16.mxu0 %v12559_v48  ;;  %7336 = vmatprep.mubr.bf16.mxu1 %v12559_v48  ;;  %v12654_v47 = vld [vmem:[%s16694_s1 + $0xff4] ss:$20 sps:$4 sm:$0xff]   ;;  %v12657_v48 = vld [vmem:[%s16694_s1 + $0xffc] ss:$20 sps:$4 sm:$0xff]  }
 0x173   : > { %6369 = vmatpush1.bf16.msra.mxu0 %v12553_v49  ;;  %7386 = vmatpush1.bf16.msra.mxu1 %v12556_v50  ;;  %v12651_v49 = vld [vmem:[%s13523_s12 + $0x1d8] ss:$72 sps:$4 sm:$0xff]   ;;  %v12652_v50 = vld [vmem:[%s16694_s1 + $0xff0] ss:$20 sps:$4 sm:$0xff]  }
 0x174   : > { %6370 = vmatprep.subr.bf16.mxu0 %v12564_v51  ;;  %7387 = vmatprep.subr.bf16.mxu1 %v12567_v52  ;;  %v12655_v51 = vld [vmem:[%s16694_s1 + $0xff8] ss:$20 sps:$4 sm:$0xff]   ;;  %v12660_v52 = vld [vmem:[%s16694_s1 + $0x101c] ss:$20 sps:$4 sm:$0xff]  }
 0x176   : > { %6320 = vmatmul.mubr.bf16.gmra.mrb[20].mxu0 %v12561_v53  ;;  %7337 = vmatmul.mubr.bf16.gmra.mrb[20].mxu1 %v12561_v53  ;;  %v12663_v53 = vld [vmem:[%s16694_s1 + $0x1024] ss:$20 sps:$4 sm:$0xff]  }
 0x177   : > { %6371 = vmatpush1.bf16.msra.mxu0 %v12562_v54  ;;  %7388 = vmatpush1.bf16.msra.mxu1 %v12565_v55  ;;  %v12664_v54 = vld [vmem:[%s13523_s12 + $0x26c] ss:$72 sps:$4 sm:$0xff]  }
 0x178   : > { %6372 = vmatprep.subr.bf16.mxu0 %v12570_v56  ;;  %7389 = vmatprep.subr.bf16.mxu1 %v12573_v57  ;;  %v12658_v55 = vld [vmem:[%s16694_s1 + $0x1018] ss:$20 sps:$4 sm:$0xff]   ;;  %v12661_v56 = vld [vmem:[%s16694_s1 + $0x1020] ss:$20 sps:$4 sm:$0xff]  }
 0x179   : > { %6329 = vmatprep.mubr.bf16.mxu0 %v12574_v58  ;;  %7346 = vmatprep.mubr.bf16.mxu1 %v12574_v58  ;;  %v12669_v57 = vld [vmem:[%s16694_s1 + $0x1044] ss:$20 sps:$4 sm:$0xff]   ;;  %v12672_v58 = vld [vmem:[%s16694_s1 + $0x104c] ss:$20 sps:$4 sm:$0xff]  }
 0x17b   : > { %6373 = vmatpush1.bf16.msra.mxu0 %v12568_v59  ;;  %7390 = vmatpush1.bf16.msra.mxu1 %v12571_v60  ;;  %v12666_v59 = vld [vmem:[%s13523_s12 + $0x268] ss:$72 sps:$4 sm:$0xff]   ;;  %v12667_v60 = vld [vmem:[%s16694_s1 + $0x1040] ss:$20 sps:$4 sm:$0xff]  }
 0x17c   : > { %6374 = vmatprep.subr.bf16.mxu0 %v12579_v61  ;;  %7391 = vmatprep.subr.bf16.mxu1 %v12582_v62  ;;  %v12670_v61 = vld [vmem:[%s16694_s1 + $0x1048] ss:$20 sps:$4 sm:$0xff]   ;;  %v12675_v62 = vld [vmem:[%s16694_s1 + $0x106c] ss:$20 sps:$4 sm:$0xff]  }
 0x17e   : > { %6330 = vmatmul.mubr.bf16.gmra.mrb[24].mxu0 %v12576_v63  ;;  %7347 = vmatmul.mubr.bf16.gmra.mrb[24].mxu1 %v12576_v63  ;;  %v12678_v63 = vld [vmem:[%s16694_s1 + $0x1074] ss:$20 sps:$4 sm:$0xff]  }
 0x17f   : > { %6375 = vmatpush1.bf16.msra.mxu0 %v12577_v0  ;;  %7392 = vmatpush1.bf16.msra.mxu1 %v12580_v1  ;;  %v12679_v0 = vld [vmem:[%s13523_s12 + $0x2fc] ss:$72 sps:$4 sm:$0xff]  }
 0x180   : > { %6376 = vmatprep.subr.bf16.mxu0 %v12585_v2  ;;  %7393 = vmatprep.subr.bf16.mxu1 %v12588_v3  ;;  %v12673_v1 = vld [vmem:[%s16694_s1 + $0x1068] ss:$20 sps:$4 sm:$0xff]   ;;  %v12676_v2 = vld [vmem:[%s16694_s1 + $0x1070] ss:$20 sps:$4 sm:$0xff]  }
 0x181   : > { %6339 = vmatprep.mubr.bf16.mxu0 %v12589_v4  ;;  %7356 = vmatprep.mubr.bf16.mxu1 %v12589_v4  ;;  %v12684_v3 = vld [vmem:[%s16694_s1 + $0x1094] ss:$20 sps:$4 sm:$0xff]   ;;  %v12687_v4 = vld [vmem:[%s16694_s1 + $0x109c] ss:$20 sps:$4 sm:$0xff]  }
 0x183   : > { %6377 = vmatpush1.bf16.msra.mxu0 %v12583_v5  ;;  %7394 = vmatpush1.bf16.msra.mxu1 %v12586_v6  ;;  %v12681_v5 = vld [vmem:[%s13523_s12 + $0x2f8] ss:$72 sps:$4 sm:$0xff]   ;;  %v12682_v6 = vld [vmem:[%s16694_s1 + $0x1090] ss:$20 sps:$4 sm:$0xff]  }
 0x184   : > { %6378 = vmatprep.subr.bf16.mxu0 %v12594_v7  ;;  %7395 = vmatprep.subr.bf16.mxu1 %v12597_v8  ;;  %v12685_v7 = vld [vmem:[%s16694_s1 + $0x1098] ss:$20 sps:$4 sm:$0xff]   ;;  %v12690_v8 = vld [vmem:[%s16694_s1 + $0x10bc] ss:$20 sps:$4 sm:$0xff]  }
 0x186   : > { %6340 = vmatmul.mubr.bf16.gmra.mrb[28].mxu0 %v12591_v9  ;;  %7357 = vmatmul.mubr.bf16.gmra.mrb[28].mxu1 %v12591_v9  ;;  %v12693_v9 = vld [vmem:[%s16694_s1 + $0x10c4] ss:$20 sps:$4 sm:$0xff]  }
 0x187   : > { %6379 = vmatpush1.bf16.msra.mxu0 %v12592_v10  ;;  %7396 = vmatpush1.bf16.msra.mxu1 %v12595_v11  ;;  %v12694_v10 = vld [vmem:[%s13523_s12 + $0x38c] ss:$72 sps:$4 sm:$0xff]  }
 0x188   : > { %6380 = vmatprep.subr.bf16.mxu0 %v12600_v12  ;;  %7397 = vmatprep.subr.bf16.mxu1 %v12603_v13  ;;  %v12688_v11 = vld [vmem:[%s16694_s1 + $0x10b8] ss:$20 sps:$4 sm:$0xff]   ;;  %v12691_v12 = vld [vmem:[%s16694_s1 + $0x10c0] ss:$20 sps:$4 sm:$0xff]  }
 0x189   : > { %6382 = vmatprep.mubr.bf16.mxu0 %v12606_v14  ;;  %7399 = vmatprep.mubr.bf16.mxu1 %v12606_v14  ;;  %v12699_v13 = vld [vmem:[%s16694_s1 + $0x10e4] ss:$20 sps:$4 sm:$0xff]   ;;  %v12702_v14 = vld [vmem:[%s16694_s1 + $0x10ec] ss:$20 sps:$4 sm:$0xff]  }
 0x18b   : > { %6381 = vmatpush1.bf16.msra.mxu0 %v12598_v15  ;;  %7398 = vmatpush1.bf16.msra.mxu1 %v12601_v16  ;;  %v12696_v15 = vld [vmem:[%s13523_s12 + $0x388] ss:$72 sps:$4 sm:$0xff]   ;;  %v12697_v16 = vld [vmem:[%s16694_s1 + $0x10e0] ss:$20 sps:$4 sm:$0xff]  }
 0x18c   : > { %6463 = vmatprep.subr.bf16.mxu0 %v12609_v17  ;;  %7480 = vmatprep.subr.bf16.mxu1 %v12612_v18  ;;  %v12700_v17 = vld [vmem:[%s16694_s1 + $0x10e8] ss:$20 sps:$4 sm:$0xff]   ;;  %v12705_v18 = vld [vmem:[%s16694_s1 + $0x110c] ss:$20 sps:$4 sm:$0xff]  }
 0x18e   : > { %6383 = vmatmul.mubr.bf16.vlgmr.msra.gmra.mrb[0].mxu0 %v12604_v19  ;;  %7400 = vmatmul.mubr.bf16.vlgmr.msra.gmra.mrb[0].mxu1 %v12604_v19  ;;  %v12708_v19 = vld [vmem:[%s16694_s1 + $0x1114] ss:$20 sps:$4 sm:$0xff]  }
 0x18f   : > { %6464 = vmatpush1.bf16.msra.mxu0 %v12607_v20  ;;  %7481 = vmatpush1.bf16.msra.mxu1 %v12610_v21  ;;  %v12709_v20 = vld [vmem:[%s13523_s12 + $0x41c] ss:$72 sps:$4 sm:$0xff]  }
 0x190   : > { %6465 = vmatprep.subr.bf16.mxu0 %v12615_v22  ;;  %7482 = vmatprep.subr.bf16.mxu1 %v12618_v23  ;;  %v12703_v21 = vld [vmem:[%s16694_s1 + $0x1108] ss:$20 sps:$4 sm:$0xff]   ;;  %v12706_v22 = vld [vmem:[%s16694_s1 + $0x1110] ss:$20 sps:$4 sm:$0xff]  }
 0x191   : > { %6392 = vmatprep.mubr.bf16.mxu0 %v12619_v24  ;;  %7409 = vmatprep.mubr.bf16.mxu1 %v12619_v24  ;;  %v12714_v23 = vld [vmem:[%s16694_s1 + $0x1134] ss:$20 sps:$4 sm:$0xff]   ;;  %v12717_v24 = vld [vmem:[%s16694_s1 + $0x113c] ss:$20 sps:$4 sm:$0xff]  }
 0x193   : > { %6466 = vmatpush1.bf16.msra.mxu0 %v12613_v25  ;;  %7483 = vmatpush1.bf16.msra.mxu1 %v12616_v26  ;;  %v12711_v25 = vld [vmem:[%s13523_s12 + $0x418] ss:$72 sps:$4 sm:$0xff]   ;;  %v12712_v26 = vld [vmem:[%s16694_s1 + $0x1130] ss:$20 sps:$4 sm:$0xff]  }
 0x194   : > { %6467 = vmatprep.subr.bf16.mxu0 %v12624_v27  ;;  %7484 = vmatprep.subr.bf16.mxu1 %v12627_v28  ;;  %v12715_v27 = vld [vmem:[%s16694_s1 + $0x1138] ss:$20 sps:$4 sm:$0xff]   ;;  %v12720_v28 = vld [vmem:[%s16694_s1 + $0x115c] ss:$20 sps:$4 sm:$0xff]  }
 0x196   : > { %6393 = vmatmul.mubr.bf16.gmra.mrb[4].mxu0 %v12621_v29  ;;  %7410 = vmatmul.mubr.bf16.gmra.mrb[4].mxu1 %v12621_v29  ;;  %v12723_v29 = vld [vmem:[%s16694_s1 + $0x1164] ss:$20 sps:$4 sm:$0xff]  }
 0x197   : > { %6468 = vmatpush1.bf16.msra.mxu0 %v12622_v30  ;;  %7485 = vmatpush1.bf16.msra.mxu1 %v12625_v31  ;;  %v12726_v30 = vld [vmem:[%s13523_s12 + $0x34] ss:$72 sps:$4 sm:$0xff]   ;;  %v12718_v31 = vld [vmem:[%s16694_s1 + $0x1158] ss:$20 sps:$4 sm:$0xff]  }
 0x198   : > { %6469 = vmatprep.subr.bf16.mxu0 %v12630_v32  ;;  %7486 = vmatprep.subr.bf16.mxu1 %v12633_v33  ;;  %v12721_v32 = vld [vmem:[%s16694_s1 + $0x1160] ss:$20 sps:$4 sm:$0xff]   ;;  %v12729_v33 = vld [vmem:[%s16694_s1 + $0x1184] ss:$20 sps:$4 sm:$0xff]  }
 0x199   : > { %6402 = vmatprep.mubr.bf16.mxu0 %v12634_v34  ;;  %7419 = vmatprep.mubr.bf16.mxu1 %v12634_v34  ;;  %v12732_v34 = vld [vmem:[%s16694_s1 + $0x118c] ss:$20 sps:$4 sm:$0xff]  }
 0x19b   : > { %6470 = vmatpush1.bf16.msra.mxu0 %v12628_v35  ;;  %7487 = vmatpush1.bf16.msra.mxu1 %v12631_v36  ;;  %v12724_v35 = vld [vmem:[%s13523_s12 + $0x30] ss:$72 sps:$4 sm:$0xff]   ;;  %v12727_v36 = vld [vmem:[%s16694_s1 + $0x1180] ss:$20 sps:$4 sm:$0xff]  }
 0x19c   : > { %6471 = vmatprep.subr.bf16.mxu0 %v12639_v37  ;;  %7488 = vmatprep.subr.bf16.mxu1 %v12642_v38  ;;  %v12730_v37 = vld [vmem:[%s16694_s1 + $0x1188] ss:$20 sps:$4 sm:$0xff]   ;;  %v12735_v38 = vld [vmem:[%s16694_s1 + $0x11ac] ss:$20 sps:$4 sm:$0xff]  }
 0x19e   : > { %6403 = vmatmul.mubr.bf16.gmra.mrb[8].mxu0 %v12636_v39  ;;  %7420 = vmatmul.mubr.bf16.gmra.mrb[8].mxu1 %v12636_v39  ;;  %v12738_v39 = vld [vmem:[%s16694_s1 + $0x11b4] ss:$20 sps:$4 sm:$0xff]  }
 0x19f   : > { %6472 = vmatpush1.bf16.msra.mxu0 %v12637_v40  ;;  %7489 = vmatpush1.bf16.msra.mxu1 %v12640_v41  ;;  %v12739_v40 = vld [vmem:[%s13523_s12 + $0xc4] ss:$72 sps:$4 sm:$0xff]   ;;  %v12733_v41 = vld [vmem:[%s16694_s1 + $0x11a8] ss:$20 sps:$4 sm:$0xff]  }
 0x1a0   : > { %6473 = vmatprep.subr.bf16.mxu0 %v12645_v42  ;;  %7490 = vmatprep.subr.bf16.mxu1 %v12648_v43  ;;  %v12736_v42 = vld [vmem:[%s16694_s1 + $0x11b0] ss:$20 sps:$4 sm:$0xff]   ;;  %v12744_v43 = vld [vmem:[%s16694_s1 + $0x11d4] ss:$20 sps:$4 sm:$0xff]  }
 0x1a1   : > { %6412 = vmatprep.mubr.bf16.mxu0 %v12649_v44  ;;  %7429 = vmatprep.mubr.bf16.mxu1 %v12649_v44  ;;  %v12747_v44 = vld [vmem:[%s16694_s1 + $0x11dc] ss:$20 sps:$4 sm:$0xff]  }
 0x1a3   : > { %6474 = vmatpush1.bf16.msra.mxu0 %v12643_v45  ;;  %7491 = vmatpush1.bf16.msra.mxu1 %v12646_v46  ;;  %v12741_v45 = vld [vmem:[%s13523_s12 + $0xc0] ss:$72 sps:$4 sm:$0xff]   ;;  %v12742_v46 = vld [vmem:[%s16694_s1 + $0x11d0] ss:$20 sps:$4 sm:$0xff]  }
 0x1a4   : > { %6475 = vmatprep.subr.bf16.mxu0 %v12654_v47  ;;  %7492 = vmatprep.subr.bf16.mxu1 %v12657_v48  ;;  %v12745_v47 = vld [vmem:[%s16694_s1 + $0x11d8] ss:$20 sps:$4 sm:$0xff]   ;;  %v12750_v48 = vld [vmem:[%s16694_s1 + $0x11fc] ss:$20 sps:$4 sm:$0xff]  }
 0x1a6   : > { %6413 = vmatmul.mubr.bf16.gmra.mrb[12].mxu0 %v12651_v49  ;;  %7430 = vmatmul.mubr.bf16.gmra.mrb[12].mxu1 %v12651_v49  ;;  %v12753_v49 = vld [vmem:[%s16694_s1 + $0x1204] ss:$20 sps:$4 sm:$0xff]  }
 0x1a7   : > { %6476 = vmatpush1.bf16.msra.mxu0 %v12652_v50  ;;  %7493 = vmatpush1.bf16.msra.mxu1 %v12655_v51  ;;  %v12754_v50 = vld [vmem:[%s13523_s12 + $0x154] ss:$72 sps:$4 sm:$0xff]   ;;  %v12748_v51 = vld [vmem:[%s16694_s1 + $0x11f8] ss:$20 sps:$4 sm:$0xff]  }
 0x1a8   : > { %6477 = vmatprep.subr.bf16.mxu0 %v12660_v52  ;;  %7494 = vmatprep.subr.bf16.mxu1 %v12663_v53  ;;  %v12751_v52 = vld [vmem:[%s16694_s1 + $0x1200] ss:$20 sps:$4 sm:$0xff]   ;;  %v12759_v53 = vld [vmem:[%s16694_s1 + $0x1224] ss:$20 sps:$4 sm:$0xff]  }
 0x1a9   : > { %6422 = vmatprep.mubr.bf16.mxu0 %v12664_v54  ;;  %7439 = vmatprep.mubr.bf16.mxu1 %v12664_v54  ;;  %v12762_v54 = vld [vmem:[%s16694_s1 + $0x122c] ss:$20 sps:$4 sm:$0xff]  }
 0x1ab   : > { %6478 = vmatpush1.bf16.msra.mxu0 %v12658_v55  ;;  %7495 = vmatpush1.bf16.msra.mxu1 %v12661_v56  ;;  %v12756_v55 = vld [vmem:[%s13523_s12 + $0x150] ss:$72 sps:$4 sm:$0xff]   ;;  %v12757_v56 = vld [vmem:[%s16694_s1 + $0x1220] ss:$20 sps:$4 sm:$0xff]  }
 0x1ac   : > { %6479 = vmatprep.subr.bf16.mxu0 %v12669_v57  ;;  %7496 = vmatprep.subr.bf16.mxu1 %v12672_v58  ;;  %v12760_v57 = vld [vmem:[%s16694_s1 + $0x1228] ss:$20 sps:$4 sm:$0xff]   ;;  %v12765_v58 = vld [vmem:[%s16694_s1 + $0x124c] ss:$20 sps:$4 sm:$0xff]  }
 0x1ae   : > { %6423 = vmatmul.mubr.bf16.gmra.mrb[16].mxu0 %v12666_v59  ;;  %7440 = vmatmul.mubr.bf16.gmra.mrb[16].mxu1 %v12666_v59  ;;  %v12768_v59 = vld [vmem:[%s16694_s1 + $0x1254] ss:$20 sps:$4 sm:$0xff]  }
 0x1af   : > { %6480 = vmatpush1.bf16.msra.mxu0 %v12667_v60  ;;  %7497 = vmatpush1.bf16.msra.mxu1 %v12670_v61  ;;  %v12769_v60 = vld [vmem:[%s13523_s12 + $0x1e4] ss:$72 sps:$4 sm:$0xff]   ;;  %v12763_v61 = vld [vmem:[%s16694_s1 + $0x1248] ss:$20 sps:$4 sm:$0xff]  }
 0x1b0   : > { %6481 = vmatprep.subr.bf16.mxu0 %v12675_v62  ;;  %7498 = vmatprep.subr.bf16.mxu1 %v12678_v63  ;;  %v12766_v62 = vld [vmem:[%s16694_s1 + $0x1250] ss:$20 sps:$4 sm:$0xff]   ;;  %v12774_v63 = vld [vmem:[%s16694_s1 + $0x1274] ss:$20 sps:$4 sm:$0xff]  }
 0x1b1   : > { %6432 = vmatprep.mubr.bf16.mxu0 %v12679_v0  ;;  %7449 = vmatprep.mubr.bf16.mxu1 %v12679_v0  ;;  %v12777_v0 = vld [vmem:[%s16694_s1 + $0x127c] ss:$20 sps:$4 sm:$0xff]  }
 0x1b3   : > { %6482 = vmatpush1.bf16.msra.mxu0 %v12673_v1  ;;  %7499 = vmatpush1.bf16.msra.mxu1 %v12676_v2  ;;  %v12771_v1 = vld [vmem:[%s13523_s12 + $0x1e0] ss:$72 sps:$4 sm:$0xff]   ;;  %v12772_v2 = vld [vmem:[%s16694_s1 + $0x1270] ss:$20 sps:$4 sm:$0xff]  }
 0x1b4   : > { %6483 = vmatprep.subr.bf16.mxu0 %v12684_v3  ;;  %7500 = vmatprep.subr.bf16.mxu1 %v12687_v4  ;;  %v12775_v3 = vld [vmem:[%s16694_s1 + $0x1278] ss:$20 sps:$4 sm:$0xff]   ;;  %v12780_v4 = vld [vmem:[%s16694_s1 + $0x129c] ss:$20 sps:$4 sm:$0xff]  }
 0x1b6   : > { %6433 = vmatmul.mubr.bf16.gmra.mrb[20].mxu0 %v12681_v5  ;;  %7450 = vmatmul.mubr.bf16.gmra.mrb[20].mxu1 %v12681_v5  ;;  %v12783_v5 = vld [vmem:[%s16694_s1 + $0x12a4] ss:$20 sps:$4 sm:$0xff]  }
 0x1b7   : > { %6484 = vmatpush1.bf16.msra.mxu0 %v12682_v6  ;;  %7501 = vmatpush1.bf16.msra.mxu1 %v12685_v7  ;;  %v12778_v6 = vld [vmem:[%s16694_s1 + $0x1298] ss:$20 sps:$4 sm:$0xff]   ;;  %v12784_v7 = vld [vmem:[%s13523_s12 + $0x274] ss:$72 sps:$4 sm:$0xff]  }
 0x1b8   : > { %6485 = vmatprep.subr.bf16.mxu0 %v12690_v8  ;;  %7502 = vmatprep.subr.bf16.mxu1 %v12693_v9  ;;  %v12781_v8 = vld [vmem:[%s16694_s1 + $0x12a0] ss:$20 sps:$4 sm:$0xff]   ;;  %v12789_v9 = vld [vmem:[%s16694_s1 + $0x12c4] ss:$20 sps:$4 sm:$0xff]  }
 0x1b9   : > { %6442 = vmatprep.mubr.bf16.mxu0 %v12694_v10  ;;  %7459 = vmatprep.mubr.bf16.mxu1 %v12694_v10  ;;  %v12792_v10 = vld [vmem:[%s16694_s1 + $0x12cc] ss:$20 sps:$4 sm:$0xff]  }
 0x1bb   : > { %6486 = vmatpush1.bf16.msra.mxu0 %v12688_v11  ;;  %7503 = vmatpush1.bf16.msra.mxu1 %v12691_v12  ;;  %v12786_v11 = vld [vmem:[%s13523_s12 + $0x270] ss:$72 sps:$4 sm:$0xff]   ;;  %v12787_v12 = vld [vmem:[%s16694_s1 + $0x12c0] ss:$20 sps:$4 sm:$0xff]  }
 0x1bc   : > { %6487 = vmatprep.subr.bf16.mxu0 %v12699_v13  ;;  %7504 = vmatprep.subr.bf16.mxu1 %v12702_v14  ;;  %v12790_v13 = vld [vmem:[%s16694_s1 + $0x12c8] ss:$20 sps:$4 sm:$0xff]   ;;  %v12795_v14 = vld [vmem:[%s16694_s1 + $0x12ec] ss:$20 sps:$4 sm:$0xff]  }
 0x1be   : > { %6443 = vmatmul.mubr.bf16.gmra.mrb[24].mxu0 %v12696_v15  ;;  %7460 = vmatmul.mubr.bf16.gmra.mrb[24].mxu1 %v12696_v15  ;;  %v12798_v15 = vld [vmem:[%s16694_s1 + $0x12f4] ss:$20 sps:$4 sm:$0xff]  }
 0x1bf   : > { %6488 = vmatpush1.bf16.msra.mxu0 %v12697_v16  ;;  %7505 = vmatpush1.bf16.msra.mxu1 %v12700_v17  ;;  %v12799_v16 = vld [vmem:[%s13523_s12 + $0x304] ss:$72 sps:$4 sm:$0xff]   ;;  %v12793_v17 = vld [vmem:[%s16694_s1 + $0x12e8] ss:$20 sps:$4 sm:$0xff]  }
 0x1c0   : > { %6489 = vmatprep.subr.bf16.mxu0 %v12705_v18  ;;  %7506 = vmatprep.subr.bf16.mxu1 %v12708_v19  ;;  %v12796_v18 = vld [vmem:[%s16694_s1 + $0x12f0] ss:$20 sps:$4 sm:$0xff]   ;;  %v12804_v19 = vld [vmem:[%s16694_s1 + $0x1314] ss:$20 sps:$4 sm:$0xff]  }
 0x1c1   : > { %6452 = vmatprep.mubr.bf16.mxu0 %v12709_v20  ;;  %7469 = vmatprep.mubr.bf16.mxu1 %v12709_v20  ;;  %v12801_v20 = vld [vmem:[%s13523_s12 + $0x300] ss:$72 sps:$4 sm:$0xff]  }
 0x1c3   : > { %6490 = vmatpush1.bf16.msra.mxu0 %v12703_v21  ;;  %7507 = vmatpush1.bf16.msra.mxu1 %v12706_v22  ;;  %v12807_v21 = vld [vmem:[%s16694_s1 + $0x131c] ss:$20 sps:$4 sm:$0xff]  }
 0x1c4   : > { %6491 = vmatprep.subr.bf16.mxu0 %v12714_v23  ;;  %7508 = vmatprep.subr.bf16.mxu1 %v12717_v24  ;;  %v12802_v22 = vld [vmem:[%s16694_s1 + $0x1310] ss:$20 sps:$4 sm:$0xff]   ;;  %v12805_v23 = vld [vmem:[%s16694_s1 + $0x1318] ss:$20 sps:$4 sm:$0xff]  }
 0x1c5   : > { %v12810_v24 = vld [vmem:[%s16694_s1 + $0x133c] ss:$20 sps:$4 sm:$0xff]  }
 0x1c6   : > { %6453 = vmatmul.mubr.bf16.gmra.mrb[28].mxu0 %v12711_v25  ;;  %7470 = vmatmul.mubr.bf16.gmra.mrb[28].mxu1 %v12711_v25  ;;  %v12813_v25 = vld [vmem:[%s16694_s1 + $0x1344] ss:$20 sps:$4 sm:$0xff]  }
 0x1c7   : > { %6492 = vmatpush1.bf16.msra.mxu0 %v12712_v26  ;;  %7509 = vmatpush1.bf16.msra.mxu1 %v12715_v27  ;;  %v12808_v26 = vld [vmem:[%s16694_s1 + $0x1338] ss:$20 sps:$4 sm:$0xff]   ;;  %v12814_v27 = vld [vmem:[%s13523_s12 + $0x394] ss:$72 sps:$4 sm:$0xff]  }
 0x1c8   : > { %6493 = vmatprep.subr.bf16.mxu0 %v12720_v28  ;;  %7510 = vmatprep.subr.bf16.mxu1 %v12723_v29  ;;  %v12811_v28 = vld [vmem:[%s16694_s1 + $0x1340] ss:$20 sps:$4 sm:$0xff]   ;;  %v12819_v29 = vld [vmem:[%s16694_s1 + $0x1364] ss:$20 sps:$4 sm:$0xff]  }
 0x1c9   : > { %6495 = vmatprep.mubr.bf16.mxu0 %v12726_v30  ;;  %7512 = vmatprep.mubr.bf16.mxu1 %v12726_v30  ;;  %v12816_v30 = vld [vmem:[%s13523_s12 + $0x390] ss:$72 sps:$4 sm:$0xff]  }
 0x1cb   : > { %6494 = vmatpush1.bf16.msra.mxu0 %v12718_v31  ;;  %7511 = vmatpush1.bf16.msra.mxu1 %v12721_v32  ;;  %v12822_v31 = vld [vmem:[%s16694_s1 + $0x136c] ss:$20 sps:$4 sm:$0xff]  }
 0x1cc   : > { %6576 = vmatprep.subr.bf16.mxu0 %v12729_v33  ;;  %7593 = vmatprep.subr.bf16.mxu1 %v12732_v34  ;;  %v12817_v32 = vld [vmem:[%s16694_s1 + $0x1360] ss:$20 sps:$4 sm:$0xff]   ;;  %v12820_v33 = vld [vmem:[%s16694_s1 + $0x1368] ss:$20 sps:$4 sm:$0xff]  }
 0x1cd   : > { %v12825_v34 = vld [vmem:[%s16694_s1 + $0x138c] ss:$20 sps:$4 sm:$0xff]  }
 0x1ce   : > { %6496 = vmatmul.mubr.bf16.vlgmr.msra.gmra.mrb[0].mxu0 %v12724_v35  ;;  %7513 = vmatmul.mubr.bf16.vlgmr.msra.gmra.mrb[0].mxu1 %v12724_v35  ;;  %v12828_v35 = vld [vmem:[%s16694_s1 + $0x1394] ss:$20 sps:$4 sm:$0xff]  }
 0x1cf   : > { %6577 = vmatpush1.bf16.msra.mxu0 %v12727_v36  ;;  %7594 = vmatpush1.bf16.msra.mxu1 %v12730_v37  ;;  %v12823_v36 = vld [vmem:[%s16694_s1 + $0x1388] ss:$20 sps:$4 sm:$0xff]   ;;  %v12829_v37 = vld [vmem:[%s13523_s12 + $0x424] ss:$72 sps:$4 sm:$0xff]  }
 0x1d0   : > { %6578 = vmatprep.subr.bf16.mxu0 %v12735_v38  ;;  %7595 = vmatprep.subr.bf16.mxu1 %v12738_v39  ;;  %v12826_v38 = vld [vmem:[%s16694_s1 + $0x1390] ss:$20 sps:$4 sm:$0xff]   ;;  %v12834_v39 = vld [vmem:[%s16694_s1 + $0x13b4] ss:$20 sps:$4 sm:$0xff]  }
 0x1d1   : > { %6505 = vmatprep.mubr.bf16.mxu0 %v12739_v40  ;;  %7522 = vmatprep.mubr.bf16.mxu1 %v12739_v40  ;;  %v12831_v40 = vld [vmem:[%s13523_s12 + $0x420] ss:$72 sps:$4 sm:$0xff]  }
 0x1d3   : > { %6579 = vmatpush1.bf16.msra.mxu0 %v12733_v41  ;;  %7596 = vmatpush1.bf16.msra.mxu1 %v12736_v42  ;;  %v12837_v41 = vld [vmem:[%s16694_s1 + $0x13bc] ss:$20 sps:$4 sm:$0xff]  }
 0x1d4   : > { %6580 = vmatprep.subr.bf16.mxu0 %v12744_v43  ;;  %7597 = vmatprep.subr.bf16.mxu1 %v12747_v44  ;;  %v12832_v42 = vld [vmem:[%s16694_s1 + $0x13b0] ss:$20 sps:$4 sm:$0xff]   ;;  %v12835_v43 = vld [vmem:[%s16694_s1 + $0x13b8] ss:$20 sps:$4 sm:$0xff]  }
 0x1d5   : > { %v12840_v44 = vld [vmem:[%s16694_s1 + $0x13dc] ss:$20 sps:$4 sm:$0xff]  }
 0x1d6   : > { %6506 = vmatmul.mubr.bf16.gmra.mrb[4].mxu0 %v12741_v45  ;;  %7523 = vmatmul.mubr.bf16.gmra.mrb[4].mxu1 %v12741_v45  ;;  %v12843_v45 = vld [vmem:[%s16694_s1 + $0x13e4] ss:$20 sps:$4 sm:$0xff]  }
 0x1d7   : > { %6581 = vmatpush1.bf16.msra.mxu0 %v12742_v46  ;;  %7598 = vmatpush1.bf16.msra.mxu1 %v12745_v47  ;;  %v12846_v46 = vld [vmem:[%s13523_s12 + $0x3c] ss:$72 sps:$4 sm:$0xff]   ;;  %v12838_v47 = vld [vmem:[%s16694_s1 + $0x13d8] ss:$20 sps:$4 sm:$0xff]  }
 0x1d8   : > { %6582 = vmatprep.subr.bf16.mxu0 %v12750_v48  ;;  %7599 = vmatprep.subr.bf16.mxu1 %v12753_v49  ;;  %v12841_v48 = vld [vmem:[%s16694_s1 + $0x13e0] ss:$20 sps:$4 sm:$0xff]   ;;  %v12849_v49 = vld [vmem:[%s16694_s1 + $0x1404] ss:$20 sps:$4 sm:$0xff]  }
 0x1d9   : > { %6515 = vmatprep.mubr.bf16.mxu0 %v12754_v50  ;;  %7532 = vmatprep.mubr.bf16.mxu1 %v12754_v50  ;;  %v12844_v50 = vld [vmem:[%s13523_s12 + $0x38] ss:$72 sps:$4 sm:$0xff]  }
 0x1db   : > { %6583 = vmatpush1.bf16.msra.mxu0 %v12748_v51  ;;  %7600 = vmatpush1.bf16.msra.mxu1 %v12751_v52  ;;  %v12852_v51 = vld [vmem:[%s16694_s1 + $0x140c] ss:$20 sps:$4 sm:$0xff]  }
 0x1dc   : > { %6584 = vmatprep.subr.bf16.mxu0 %v12759_v53  ;;  %7601 = vmatprep.subr.bf16.mxu1 %v12762_v54  ;;  %v12847_v52 = vld [vmem:[%s16694_s1 + $0x1400] ss:$20 sps:$4 sm:$0xff]   ;;  %v12850_v53 = vld [vmem:[%s16694_s1 + $0x1408] ss:$20 sps:$4 sm:$0xff]  }
 0x1dd   : > { %v12855_v54 = vld [vmem:[%s16694_s1 + $0x142c] ss:$20 sps:$4 sm:$0xff]  }
 0x1de   : > { %6516 = vmatmul.mubr.bf16.gmra.mrb[8].mxu0 %v12756_v55  ;;  %7533 = vmatmul.mubr.bf16.gmra.mrb[8].mxu1 %v12756_v55  ;;  %v12858_v55 = vld [vmem:[%s16694_s1 + $0x1434] ss:$20 sps:$4 sm:$0xff]  }
 0x1df   : > { %6585 = vmatpush1.bf16.msra.mxu0 %v12757_v56  ;;  %7602 = vmatpush1.bf16.msra.mxu1 %v12760_v57  ;;  %v12859_v56 = vld [vmem:[%s13523_s12 + $0xcc] ss:$72 sps:$4 sm:$0xff]   ;;  %v12853_v57 = vld [vmem:[%s16694_s1 + $0x1428] ss:$20 sps:$4 sm:$0xff]  }
 0x1e0   : > { %6586 = vmatprep.subr.bf16.mxu0 %v12765_v58  ;;  %7603 = vmatprep.subr.bf16.mxu1 %v12768_v59  ;;  %v12856_v58 = vld [vmem:[%s16694_s1 + $0x1430] ss:$20 sps:$4 sm:$0xff]   ;;  %v12864_v59 = vld [vmem:[%s16694_s1 + $0x1454] ss:$20 sps:$4 sm:$0xff]  }
 0x1e1   : > { %6525 = vmatprep.mubr.bf16.mxu0 %v12769_v60  ;;  %7542 = vmatprep.mubr.bf16.mxu1 %v12769_v60  ;;  %v12867_v60 = vld [vmem:[%s16694_s1 + $0x145c] ss:$20 sps:$4 sm:$0xff]  }
 0x1e3   : > { %6587 = vmatpush1.bf16.msra.mxu0 %v12763_v61  ;;  %7604 = vmatpush1.bf16.msra.mxu1 %v12766_v62  ;;  %v12861_v61 = vld [vmem:[%s13523_s12 + $0xc8] ss:$72 sps:$4 sm:$0xff]  }
 0x1e4   : > { %6588 = vmatprep.subr.bf16.mxu0 %v12774_v63  ;;  %7605 = vmatprep.subr.bf16.mxu1 %v12777_v0  ;;  %v12862_v62 = vld [vmem:[%s16694_s1 + $0x1450] ss:$20 sps:$4 sm:$0xff]   ;;  %v12865_v63 = vld [vmem:[%s16694_s1 + $0x1458] ss:$20 sps:$4 sm:$0xff]  }
 0x1e5   : > { %v12870_v0 = vld [vmem:[%s16694_s1 + $0x147c] ss:$20 sps:$4 sm:$0xff]  }
 0x1e6   : > { %6526 = vmatmul.mubr.bf16.gmra.mrb[12].mxu0 %v12771_v1  ;;  %7543 = vmatmul.mubr.bf16.gmra.mrb[12].mxu1 %v12771_v1  ;;  %v12873_v1 = vld [vmem:[%s16694_s1 + $0x1484] ss:$20 sps:$4 sm:$0xff]  }
 0x1e7   : > { %6589 = vmatpush1.bf16.msra.mxu0 %v12772_v2  ;;  %7606 = vmatpush1.bf16.msra.mxu1 %v12775_v3  ;;  %v12874_v2 = vld [vmem:[%s13523_s12 + $0x15c] ss:$72 sps:$4 sm:$0xff]   ;;  %v12868_v3 = vld [vmem:[%s16694_s1 + $0x1478] ss:$20 sps:$4 sm:$0xff]  }
 0x1e8   : > { %6590 = vmatprep.subr.bf16.mxu0 %v12780_v4  ;;  %7607 = vmatprep.subr.bf16.mxu1 %v12783_v5  ;;  %v12871_v4 = vld [vmem:[%s16694_s1 + $0x1480] ss:$20 sps:$4 sm:$0xff]   ;;  %v12879_v5 = vld [vmem:[%s16694_s1 + $0x14a4] ss:$20 sps:$4 sm:$0xff]  }
 0x1e9   : > { %6535 = vmatprep.mubr.bf16.mxu0 %v12784_v7  ;;  %7552 = vmatprep.mubr.bf16.mxu1 %v12784_v7  ;;  %v12876_v7 = vld [vmem:[%s13523_s12 + $0x158] ss:$72 sps:$4 sm:$0xff]  }
 0x1eb   : > { %6591 = vmatpush1.bf16.msra.mxu0 %v12778_v6  ;;  %7608 = vmatpush1.bf16.msra.mxu1 %v12781_v8  ;;  %v12882_v6 = vld [vmem:[%s16694_s1 + $0x14ac] ss:$20 sps:$4 sm:$0xff]  }
 0x1ec   : > { %6592 = vmatprep.subr.bf16.mxu0 %v12789_v9  ;;  %7609 = vmatprep.subr.bf16.mxu1 %v12792_v10  ;;  %v12877_v8 = vld [vmem:[%s16694_s1 + $0x14a0] ss:$20 sps:$4 sm:$0xff]   ;;  %v12880_v9 = vld [vmem:[%s16694_s1 + $0x14a8] ss:$20 sps:$4 sm:$0xff]  }
 0x1ed   : > { %v12885_v10 = vld [vmem:[%s16694_s1 + $0x14cc] ss:$20 sps:$4 sm:$0xff]  }
 0x1ee   : > { %6536 = vmatmul.mubr.bf16.gmra.mrb[16].mxu0 %v12786_v11  ;;  %7553 = vmatmul.mubr.bf16.gmra.mrb[16].mxu1 %v12786_v11  ;;  %v12888_v11 = vld [vmem:[%s16694_s1 + $0x14d4] ss:$20 sps:$4 sm:$0xff]  }
 0x1ef   : > { %6593 = vmatpush1.bf16.msra.mxu0 %v12787_v12  ;;  %7610 = vmatpush1.bf16.msra.mxu1 %v12790_v13  ;;  %v12889_v12 = vld [vmem:[%s13523_s12 + $0x1ec] ss:$72 sps:$4 sm:$0xff]   ;;  %v12883_v13 = vld [vmem:[%s16694_s1 + $0x14c8] ss:$20 sps:$4 sm:$0xff]  }
 0x1f0   : > { %6594 = vmatprep.subr.bf16.mxu0 %v12795_v14  ;;  %7611 = vmatprep.subr.bf16.mxu1 %v12798_v15  ;;  %v12886_v14 = vld [vmem:[%s16694_s1 + $0x14d0] ss:$20 sps:$4 sm:$0xff]   ;;  %v12894_v15 = vld [vmem:[%s16694_s1 + $0x14f4] ss:$20 sps:$4 sm:$0xff]  }
 0x1f1   : > { %6545 = vmatprep.mubr.bf16.mxu0 %v12799_v16  ;;  %7562 = vmatprep.mubr.bf16.mxu1 %v12799_v16  ;;  %v12897_v16 = vld [vmem:[%s16694_s1 + $0x14fc] ss:$20 sps:$4 sm:$0xff]  }
 0x1f3   : > { %6595 = vmatpush1.bf16.msra.mxu0 %v12793_v17  ;;  %7612 = vmatpush1.bf16.msra.mxu1 %v12796_v18  ;;  %v12891_v17 = vld [vmem:[%s13523_s12 + $0x1e8] ss:$72 sps:$4 sm:$0xff]  }
 0x1f4   : > { %6596 = vmatprep.subr.bf16.mxu0 %v12804_v19  ;;  %7613 = vmatprep.subr.bf16.mxu1 %v12807_v21  ;;  %v12892_v18 = vld [vmem:[%s16694_s1 + $0x14f0] ss:$20 sps:$4 sm:$0xff]   ;;  %v12895_v19 = vld [vmem:[%s16694_s1 + $0x14f8] ss:$20 sps:$4 sm:$0xff]  }
 0x1f5   : > { %v12903_v21 = vld [vmem:[%s16694_s1 + $0x1524] ss:$20 sps:$4 sm:$0xff]  }
 0x1f6   : > { %6546 = vmatmul.mubr.bf16.gmra.mrb[20].mxu0 %v12801_v20  ;;  %7563 = vmatmul.mubr.bf16.gmra.mrb[20].mxu1 %v12801_v20  ;;  %v12900_v20 = vld [vmem:[%s16694_s1 + $0x151c] ss:$20 sps:$4 sm:$0xff]  }
 0x1f7   : > { %6597 = vmatpush1.bf16.msra.mxu0 %v12802_v22  ;;  %7614 = vmatpush1.bf16.msra.mxu1 %v12805_v23  ;;  %v12904_v22 = vld [vmem:[%s13523_s12 + $0x27c] ss:$72 sps:$4 sm:$0xff]   ;;  %v12898_v23 = vld [vmem:[%s16694_s1 + $0x1518] ss:$20 sps:$4 sm:$0xff]  }
 0x1f8   : > { %6598 = vmatprep.subr.bf16.mxu0 %v12810_v24  ;;  %7615 = vmatprep.subr.bf16.mxu1 %v12813_v25  ;;  %v12901_v24 = vld [vmem:[%s16694_s1 + $0x1520] ss:$20 sps:$4 sm:$0xff]   ;;  %v12909_v25 = vld [vmem:[%s16694_s1 + $0x1544] ss:$20 sps:$4 sm:$0xff]  }
 0x1f9   : > { %6555 = vmatprep.mubr.bf16.mxu0 %v12814_v27  ;;  %7572 = vmatprep.mubr.bf16.mxu1 %v12814_v27  ;;  %v12906_v27 = vld [vmem:[%s13523_s12 + $0x278] ss:$72 sps:$4 sm:$0xff]  }
 0x1fb   : > { %6599 = vmatpush1.bf16.msra.mxu0 %v12808_v26  ;;  %7616 = vmatpush1.bf16.msra.mxu1 %v12811_v28  ;;  %v12912_v26 = vld [vmem:[%s16694_s1 + $0x154c] ss:$20 sps:$4 sm:$0xff]  }
 0x1fc   : > { %6600 = vmatprep.subr.bf16.mxu0 %v12819_v29  ;;  %7617 = vmatprep.subr.bf16.mxu1 %v12822_v31  ;;  %v12907_v28 = vld [vmem:[%s16694_s1 + $0x1540] ss:$20 sps:$4 sm:$0xff]   ;;  %v12910_v29 = vld [vmem:[%s16694_s1 + $0x1548] ss:$20 sps:$4 sm:$0xff]  }
 0x1fd   : > { %v12918_v31 = vld [vmem:[%s16694_s1 + $0x1574] ss:$20 sps:$4 sm:$0xff]  }
 0x1fe   : > { %6556 = vmatmul.mubr.bf16.gmra.mrb[24].mxu0 %v12816_v30  ;;  %7573 = vmatmul.mubr.bf16.gmra.mrb[24].mxu1 %v12816_v30  ;;  %v12915_v30 = vld [vmem:[%s16694_s1 + $0x156c] ss:$20 sps:$4 sm:$0xff]  }
 0x1ff   : > { %6601 = vmatpush1.bf16.msra.mxu0 %v12817_v32  ;;  %7618 = vmatpush1.bf16.msra.mxu1 %v12820_v33  ;;  %v12919_v32 = vld [vmem:[%s13523_s12 + $0x30c] ss:$72 sps:$4 sm:$0xff]   ;;  %v12913_v33 = vld [vmem:[%s16694_s1 + $0x1568] ss:$20 sps:$4 sm:$0xff]  }
 0x200   : > { %6602 = vmatprep.subr.bf16.mxu0 %v12825_v34  ;;  %7619 = vmatprep.subr.bf16.mxu1 %v12828_v35  ;;  %v12916_v34 = vld [vmem:[%s16694_s1 + $0x1570] ss:$20 sps:$4 sm:$0xff]   ;;  %v12924_v35 = vld [vmem:[%s16694_s1 + $0x1594] ss:$20 sps:$4 sm:$0xff]  }
 0x201   : > { %6565 = vmatprep.mubr.bf16.mxu0 %v12829_v37  ;;  %7582 = vmatprep.mubr.bf16.mxu1 %v12829_v37  ;;  %v12921_v37 = vld [vmem:[%s13523_s12 + $0x308] ss:$72 sps:$4 sm:$0xff]  }
 0x203   : > { %6603 = vmatpush1.bf16.msra.mxu0 %v12823_v36  ;;  %7620 = vmatpush1.bf16.msra.mxu1 %v12826_v38  ;;  %v12927_v36 = vld [vmem:[%s16694_s1 + $0x159c] ss:$20 sps:$4 sm:$0xff]  }
 0x204   : > { %6604 = vmatprep.subr.bf16.mxu0 %v12834_v39  ;;  %7621 = vmatprep.subr.bf16.mxu1 %v12837_v41  ;;  %v12922_v38 = vld [vmem:[%s16694_s1 + $0x1590] ss:$20 sps:$4 sm:$0xff]   ;;  %v12925_v39 = vld [vmem:[%s16694_s1 + $0x1598] ss:$20 sps:$4 sm:$0xff]  }
 0x205   : > { %v12933_v41 = vld [vmem:[%s16694_s1 + $0x15c4] ss:$20 sps:$4 sm:$0xff]  }
 0x206   : > { %6566 = vmatmul.mubr.bf16.gmra.mrb[28].mxu0 %v12831_v40  ;;  %7583 = vmatmul.mubr.bf16.gmra.mrb[28].mxu1 %v12831_v40  ;;  %v12930_v40 = vld [vmem:[%s16694_s1 + $0x15bc] ss:$20 sps:$4 sm:$0xff]  }
 0x207   : > { %6605 = vmatpush1.bf16.msra.mxu0 %v12832_v42  ;;  %7622 = vmatpush1.bf16.msra.mxu1 %v12835_v43  ;;  %v12934_v42 = vld [vmem:[%s13523_s12 + $0x39c] ss:$72 sps:$4 sm:$0xff]   ;;  %v12928_v43 = vld [vmem:[%s16694_s1 + $0x15b8] ss:$20 sps:$4 sm:$0xff]  }
 0x208   : > { %6606 = vmatprep.subr.bf16.mxu0 %v12840_v44  ;;  %7623 = vmatprep.subr.bf16.mxu1 %v12843_v45  ;;  %v12931_v44 = vld [vmem:[%s16694_s1 + $0x15c0] ss:$20 sps:$4 sm:$0xff]   ;;  %v12939_v45 = vld [vmem:[%s16694_s1 + $0x15e4] ss:$20 sps:$4 sm:$0xff]  }
 0x209   : > { %6608 = vmatprep.mubr.bf16.mxu0 %v12846_v46  ;;  %7625 = vmatprep.mubr.bf16.mxu1 %v12846_v46  ;;  %v12942_v46 = vld [vmem:[%s16694_s1 + $0x15ec] ss:$20 sps:$4 sm:$0xff]  }
 0x20b   : > { %6607 = vmatpush1.bf16.msra.mxu0 %v12838_v47  ;;  %7624 = vmatpush1.bf16.msra.mxu1 %v12841_v48  ;;  %v12936_v47 = vld [vmem:[%s13523_s12 + $0x398] ss:$72 sps:$4 sm:$0xff]  }
 0x20c   : > { %6689 = vmatprep.subr.bf16.mxu0 %v12849_v49  ;;  %7706 = vmatprep.subr.bf16.mxu1 %v12852_v51  ;;  %v12937_v48 = vld [vmem:[%s16694_s1 + $0x15e0] ss:$20 sps:$4 sm:$0xff]   ;;  %v12940_v49 = vld [vmem:[%s16694_s1 + $0x15e8] ss:$20 sps:$4 sm:$0xff]  }
 0x20d   : > { %v12948_v51 = vld [vmem:[%s16694_s1 + $0x1614] ss:$20 sps:$4 sm:$0xff]  }
 0x20e   : > { %6609 = vmatmul.mubr.bf16.vlgmr.msra.gmra.mrb[0].mxu0 %v12844_v50  ;;  %7626 = vmatmul.mubr.bf16.vlgmr.msra.gmra.mrb[0].mxu1 %v12844_v50  ;;  %v12945_v50 = vld [vmem:[%s16694_s1 + $0x160c] ss:$20 sps:$4 sm:$0xff]  }
 0x20f   : > { %6690 = vmatpush1.bf16.msra.mxu0 %v12847_v52  ;;  %7707 = vmatpush1.bf16.msra.mxu1 %v12850_v53  ;;  %v12949_v52 = vld [vmem:[%s13523_s12 + $0x42c] ss:$72 sps:$4 sm:$0xff]   ;;  %v12943_v53 = vld [vmem:[%s16694_s1 + $0x1608] ss:$20 sps:$4 sm:$0xff]  }
 0x210   : > { %6691 = vmatprep.subr.bf16.mxu0 %v12855_v54  ;;  %7708 = vmatprep.subr.bf16.mxu1 %v12858_v55  ;;  %v12946_v54 = vld [vmem:[%s16694_s1 + $0x1610] ss:$20 sps:$4 sm:$0xff]   ;;  %v12954_v55 = vld [vmem:[%s16694_s1 + $0x1634] ss:$20 sps:$4 sm:$0xff]  }
 0x211   : > { %6618 = vmatprep.mubr.bf16.mxu0 %v12859_v56  ;;  %7635 = vmatprep.mubr.bf16.mxu1 %v12859_v56  ;;  %v12957_v56 = vld [vmem:[%s16694_s1 + $0x163c] ss:$20 sps:$4 sm:$0xff]  }
 0x213   : > { %6692 = vmatpush1.bf16.msra.mxu0 %v12853_v57  ;;  %7709 = vmatpush1.bf16.msra.mxu1 %v12856_v58  ;;  %v12951_v57 = vld [vmem:[%s13523_s12 + $0x428] ss:$72 sps:$4 sm:$0xff]  }
 0x214   : > { %6693 = vmatprep.subr.bf16.mxu0 %v12864_v59  ;;  %7710 = vmatprep.subr.bf16.mxu1 %v12867_v60  ;;  %v12952_v58 = vld [vmem:[%s16694_s1 + $0x1630] ss:$20 sps:$4 sm:$0xff]   ;;  %v12955_v59 = vld [vmem:[%s16694_s1 + $0x1638] ss:$20 sps:$4 sm:$0xff]  }
 0x215   : > { %v12960_v60 = vld [vmem:[%s16694_s1 + $0x165c] ss:$20 sps:$4 sm:$0xff]  }
 0x216   : > { %6619 = vmatmul.mubr.bf16.gmra.mrb[4].mxu0 %v12861_v61  ;;  %7636 = vmatmul.mubr.bf16.gmra.mrb[4].mxu1 %v12861_v61  ;;  %v12963_v61 = vld [vmem:[%s16694_s1 + $0x1664] ss:$20 sps:$4 sm:$0xff]  }
 0x217   : > { %6694 = vmatpush1.bf16.msra.mxu0 %v12862_v62  ;;  %7711 = vmatpush1.bf16.msra.mxu1 %v12865_v63  ;;  %v12966_v62 = vld [vmem:[%s13523_s12 + $0x44] ss:$72 sps:$4 sm:$0xff]  }
 0x218   : > { %6695 = vmatprep.subr.bf16.mxu0 %v12870_v0  ;;  %7712 = vmatprep.subr.bf16.mxu1 %v12873_v1  ;;  %v12958_v63 = vld [vmem:[%s16694_s1 + $0x1658] ss:$20 sps:$4 sm:$0xff]   ;;  %v12961_v0 = vld [vmem:[%s16694_s1 + $0x1660] ss:$20 sps:$4 sm:$0xff]   ;;  %v12967_v1 = vld [vmem:[%s16694_s1 + $0x150] ss:$20 sps:$4 sm:$0xff]  }
 0x219   : > { %6628 = vmatprep.mubr.bf16.mxu0 %v12874_v2  ;;  %7645 = vmatprep.mubr.bf16.mxu1 %v12874_v2  ;;  %v12988_v2 = vld [vmem:[%s16694_s1 + $0x3d0] ss:$20 sps:$4 sm:$0xff]  }
 0x21b   : > { %6696 = vmatpush1.bf16.msra.mxu0 %v12868_v3  ;;  %7713 = vmatpush1.bf16.msra.mxu1 %v12871_v4  ;;  %v12964_v3 = vld [vmem:[%s13523_s12 + $0x40] ss:$72 sps:$4 sm:$0xff]   ;;  %v12968_v4 = vld [vmem:[%s16694_s1 + $0x10] ss:$20 sps:$4 sm:$0xff]  }
 0x21c   : > { %6697 = vmatprep.subr.bf16.mxu0 %v12879_v5  ;;  %7714 = vmatprep.subr.bf16.mxu1 %v12882_v6  ;;  %v12969_v5 = vld [vmem:[%s13523_s12 + $0xd4] ss:$72 sps:$4 sm:$0xff]   ;;  %v12972_v6 = vld [vmem:[%s16694_s1 + $0x178] ss:$20 sps:$4 sm:$0xff]  }
 0x21e   : > { %6629 = vmatmul.mubr.bf16.gmra.mrb[8].mxu0 %v12876_v7  ;;  %7646 = vmatmul.mubr.bf16.gmra.mrb[8].mxu1 %v12876_v7  ;;  %v12990_v7 = vld [vmem:[%s16694_s1 + $0x290] ss:$20 sps:$4 sm:$0xff]  }
 0x21f   : > { %6698 = vmatpush1.bf16.msra.mxu0 %v12877_v8  ;;  %7715 = vmatpush1.bf16.msra.mxu1 %v12880_v9  ;;  %v12973_v8 = vld [vmem:[%s16694_s1 + $0x38] ss:$20 sps:$4 sm:$0xff]   ;;  %v12977_v9 = vld [vmem:[%s16694_s1 + $0x1a0] ss:$20 sps:$4 sm:$0xff]  }
 0x220   : > { %6699 = vmatprep.subr.bf16.mxu0 %v12885_v10  ;;  %7716 = vmatprep.subr.bf16.mxu1 %v12888_v11  ;;  %v12991_v10 = vld [vmem:[%s16694_s1 + $0x3f8] ss:$20 sps:$4 sm:$0xff]  }
 0x221   : > { %6638 = vmatprep.mubr.bf16.mxu0 %v12889_v12  ;;  %7655 = vmatprep.mubr.bf16.mxu1 %v12889_v12  ;;  %v12992_v11 = vld [vmem:[%s16694_s1 + $0x2b8] ss:$20 sps:$4 sm:$0xff]  }
 0x222   : > { %v12971_v12 = vld [vmem:[%s13523_s12 + $0xd0] ss:$72 sps:$4 sm:$0xff]  }
 0x223   : > { %6700 = vmatpush1.bf16.msra.mxu0 %v12883_v13  ;;  %7717 = vmatpush1.bf16.msra.mxu1 %v12886_v14  ;;  %v12974_v13 = vld [vmem:[%s13523_s12 + $0x164] ss:$72 sps:$4 sm:$0xff]   ;;  %v12978_v14 = vld [vmem:[%s16694_s1 + $0x60] ss:$20 sps:$4 sm:$0xff]  }
 0x224   : > { %6701 = vmatprep.subr.bf16.mxu0 %v12894_v15  ;;  %7718 = vmatprep.subr.bf16.mxu1 %v12897_v16  ;;  %v12997_v15 = vld [vmem:[%s16694_s1 + $0x420] ss:$20 sps:$4 sm:$0xff]   ;;  %v12982_v16 = vld [vmem:[%s16694_s1 + $0x1c8] ss:$20 sps:$4 sm:$0xff]  }
 0x226   : > { %6639 = vmatmul.mubr.bf16.gmra.mrb[12].mxu0 %v12891_v17  ;;  %7656 = vmatmul.mubr.bf16.gmra.mrb[12].mxu1 %v12891_v17  ;;  %v12999_v17 = vld [vmem:[%s16694_s1 + $0x2e0] ss:$20 sps:$4 sm:$0xff]  }
 0x227   : > { %6702 = vmatpush1.bf16.msra.mxu0 %v12892_v18  ;;  %7719 = vmatpush1.bf16.msra.mxu1 %v12895_v19  ;;  %v12983_v18 = vld [vmem:[%s16694_s1 + $0x88] ss:$20 sps:$4 sm:$0xff]  }
 0x228   : > { %6703 = vmatprep.subr.bf16.mxu0 %v12900_v20  ;;  %7720 = vmatprep.subr.bf16.mxu1 %v12903_v21  ;;  %v13000_v19 = vld [vmem:[%s16694_s1 + $0x448] ss:$20 sps:$4 sm:$0xff]   ;;  %v12987_v20 = vld [vmem:[%s16694_s1 + $0x1f0] ss:$20 sps:$4 sm:$0xff]  }
 0x229   : > { %6648 = vmatprep.mubr.bf16.mxu0 %v12904_v22  ;;  %7665 = vmatprep.mubr.bf16.mxu1 %v12904_v22  ;;  %v13001_v21 = vld [vmem:[%s16694_s1 + $0x308] ss:$20 sps:$4 sm:$0xff]  }
 0x22a   : > { %v12976_v22 = vld [vmem:[%s13523_s12 + $0x160] ss:$72 sps:$4 sm:$0xff]  }
 0x22b   : > { %6704 = vmatpush1.bf16.msra.mxu0 %v12898_v23  ;;  %7721 = vmatpush1.bf16.msra.mxu1 %v12901_v24  ;;  %v12979_v23 = vld [vmem:[%s13523_s12 + $0x1f4] ss:$72 sps:$4 sm:$0xff]   ;;  %v12989_v24 = vld [vmem:[%s16694_s1 + $0xb0] ss:$20 sps:$4 sm:$0xff]  }
 0x22c   : > { %6705 = vmatprep.subr.bf16.mxu0 %v12909_v25  ;;  %7722 = vmatprep.subr.bf16.mxu1 %v12912_v26  ;;  %v13006_v25 = vld [vmem:[%s16694_s1 + $0x470] ss:$20 sps:$4 sm:$0xff]   ;;  %v12996_v26 = vld [vmem:[%s16694_s1 + $0x218] ss:$20 sps:$4 sm:$0xff]  }
 0x22e   : > { %6649 = vmatmul.mubr.bf16.gmra.mrb[16].mxu0 %v12906_v27  ;;  %7666 = vmatmul.mubr.bf16.gmra.mrb[16].mxu1 %v12906_v27  ;;  %v13008_v27 = vld [vmem:[%s16694_s1 + $0x330] ss:$20 sps:$4 sm:$0xff]  }
 0x22f   : > { %6706 = vmatpush1.bf16.msra.mxu0 %v12907_v28  ;;  %7723 = vmatpush1.bf16.msra.mxu1 %v12910_v29  ;;  %v12998_v28 = vld [vmem:[%s16694_s1 + $0xd8] ss:$20 sps:$4 sm:$0xff]  }
 0x230   : > { %6707 = vmatprep.subr.bf16.mxu0 %v12915_v30  ;;  %7724 = vmatprep.subr.bf16.mxu1 %v12918_v31  ;;  %v13009_v29 = vld [vmem:[%s16694_s1 + $0x498] ss:$20 sps:$4 sm:$0xff]   ;;  %v13005_v30 = vld [vmem:[%s16694_s1 + $0x240] ss:$20 sps:$4 sm:$0xff]  }
 0x231   : > { %6658 = vmatprep.mubr.bf16.mxu0 %v12919_v32  ;;  %7675 = vmatprep.mubr.bf16.mxu1 %v12919_v32  ;;  %v13010_v31 = vld [vmem:[%s16694_s1 + $0x358] ss:$20 sps:$4 sm:$0xff]  }
 0x232   : > { %v12981_v32 = vld [vmem:[%s13523_s12 + $0x1f0] ss:$72 sps:$4 sm:$0xff]  }
 0x233   : > { %6708 = vmatpush1.bf16.msra.mxu0 %v12913_v33  ;;  %7725 = vmatpush1.bf16.msra.mxu1 %v12916_v34  ;;  %v12984_v33 = vld [vmem:[%s13523_s12 + $0x284] ss:$72 sps:$4 sm:$0xff]   ;;  %v13007_v34 = vld [vmem:[%s16694_s1 + $0x100] ss:$20 sps:$4 sm:$0xff]  }
 0x234   : > { %6709 = vmatprep.subr.bf16.mxu0 %v12924_v35  ;;  %7726 = vmatprep.subr.bf16.mxu1 %v12927_v36  ;;  %v13015_v35 = vld [vmem:[%s16694_s1 + $0x4c0] ss:$20 sps:$4 sm:$0xff]   ;;  %v13014_v36 = vld [vmem:[%s16694_s1 + $0x268] ss:$20 sps:$4 sm:$0xff]  }
 0x236   : > { %6659 = vmatmul.mubr.bf16.gmra.mrb[20].mxu0 %v12921_v37  ;;  %7676 = vmatmul.mubr.bf16.gmra.mrb[20].mxu1 %v12921_v37  ;;  %v13017_v37 = vld [vmem:[%s16694_s1 + $0x380] ss:$20 sps:$4 sm:$0xff]  }
 0x237   : > { %6710 = vmatpush1.bf16.msra.mxu0 %v12922_v38  ;;  %7727 = vmatpush1.bf16.msra.mxu1 %v12925_v39  ;;  %v13016_v38 = vld [vmem:[%s16694_s1 + $0x128] ss:$20 sps:$4 sm:$0xff]  }
 0x238   : > { %6711 = vmatprep.subr.bf16.mxu0 %v12930_v40  ;;  %7728 = vmatprep.subr.bf16.mxu1 %v12933_v41  ;;  %v13018_v39 = vld [vmem:[%s16694_s1 + $0x4e8] ss:$20 sps:$4 sm:$0xff]   ;;  %v13020_v41 = vld [vmem:[%s16694_s1 + $0x650] ss:$20 sps:$4 sm:$0xff]  }
 0x239   : > { %6668 = vmatprep.mubr.bf16.mxu0 %v12934_v42  ;;  %7685 = vmatprep.mubr.bf16.mxu1 %v12934_v42  ;;  %v13019_v40 = vld [vmem:[%s16694_s1 + $0x3a8] ss:$20 sps:$4 sm:$0xff]  }
 0x23a   : > { %v12986_v42 = vld [vmem:[%s13523_s12 + $0x280] ss:$72 sps:$4 sm:$0xff]  }
 0x23b   : > { %6712 = vmatpush1.bf16.msra.mxu0 %v12928_v43  ;;  %7729 = vmatpush1.bf16.msra.mxu1 %v12931_v44  ;;  %v12993_v43 = vld [vmem:[%s13523_s12 + $0x314] ss:$72 sps:$4 sm:$0xff]   ;;  %v13029_v44 = vld [vmem:[%s16694_s1 + $0x8d0] ss:$20 sps:$4 sm:$0xff]  }
 0x23c   : > { %6713 = vmatprep.subr.bf16.mxu0 %v12939_v45  ;;  %7730 = vmatprep.subr.bf16.mxu1 %v12942_v46  ;;  %v12995_v45 = vld [vmem:[%s13523_s12 + $0x310] ss:$72 sps:$4 sm:$0xff]   ;;  %v13002_v46 = vld [vmem:[%s13523_s12 + $0x3a4] ss:$72 sps:$4 sm:$0xff]  }
 0x23e   : > { %6669 = vmatmul.mubr.bf16.gmra.mrb[24].mxu0 %v12936_v47  ;;  %7686 = vmatmul.mubr.bf16.gmra.mrb[24].mxu1 %v12936_v47  ;;  %v13004_v47 = vld [vmem:[%s13523_s12 + $0x3a0] ss:$72 sps:$4 sm:$0xff]  }
 0x23f   : > { %6714 = vmatpush1.bf16.msra.mxu0 %v12937_v48  ;;  %7731 = vmatpush1.bf16.msra.mxu1 %v12940_v49  ;;  %v13011_v48 = vld [vmem:[%s13523_s12 + $0x434] ss:$72 sps:$4 sm:$0xff]   ;;  %v13013_v49 = vld [vmem:[%s13523_s12 + $0x430] ss:$72 sps:$4 sm:$0xff]  }
 0x240   : > { %6715 = vmatprep.subr.bf16.mxu0 %v12945_v50  ;;  %7732 = vmatprep.subr.bf16.mxu1 %v12948_v51  ;;  %v13180_v50 = vld [vmem:[%s13523_s12 + $0x4] ss:$72 sps:$4 sm:$0xff]  }
 0x241   : > { %6678 = vmatprep.mubr.bf16.mxu0 %v12949_v52  ;;  %7695 = vmatprep.mubr.bf16.mxu1 %v12949_v52  ;;  %v13181_v51 = vld [vmem:[%s13523_s12 + $0xc] ss:$72 sps:$4 sm:$0xff]   ;;  %v13021_v52 = vld [vmem:[%s16694_s1 + $0x510] ss:$20 sps:$4 sm:$0xff]  }
 0x243   : > { %6716 = vmatpush1.bf16.msra.mxu0 %v12943_v53  ;;  %7733 = vmatpush1.bf16.msra.mxu1 %v12946_v54  ;;  %v13022_v53 = vld [vmem:[%s16694_s1 + $0x678] ss:$20 sps:$4 sm:$0xff]   ;;  %v13031_v54 = vld [vmem:[%s16694_s1 + $0x790] ss:$20 sps:$4 sm:$0xff]  }
 0x244   : > { %6717 = vmatprep.subr.bf16.mxu0 %v12954_v55  ;;  %7734 = vmatprep.subr.bf16.mxu1 %v12957_v56  ;;  %v13182_v55 = vld [vmem:[%s13523_s12] ss:$72 sps:$4 sm:$0xff]  }
 0x245   : > { %v13183_v56 = vld [vmem:[%s13523_s12 + $0x8] ss:$72 sps:$4 sm:$0xff]  }
 0x246   : > { %6679 = vmatmul.mubr.bf16.gmra.mrb[28].mxu0 %v12951_v57  ;;  %7696 = vmatmul.mubr.bf16.gmra.mrb[28].mxu1 %v12951_v57  ;;  %v13032_v57 = vld [vmem:[%s16694_s1 + $0x8f8] ss:$20 sps:$4 sm:$0xff]  }
 0x247   : > { %6718 = vmatpush1.bf16.msra.mxu0 %v12952_v58  ;;  %7735 = vmatpush1.bf16.msra.mxu1 %v12955_v59  ;;  %v13184_v58 = vld [vmem:[%s13523_s12 + $0x94] ss:$72 sps:$4 sm:$0xff]   ;;  %v13023_v59 = vld [vmem:[%s16694_s1 + $0x538] ss:$20 sps:$4 sm:$0xff]  }
 0x248   : > { %6719 = vmatprep.subr.bf16.mxu0 %v12960_v60  ;;  %7736 = vmatprep.subr.bf16.mxu1 %v12963_v61  ;;  %v13185_v60 = vld [vmem:[%s13523_s12 + $0x9c] ss:$72 sps:$4 sm:$0xff]   ;;  %v13024_v61 = vld [vmem:[%s16694_s1 + $0x6a0] ss:$20 sps:$4 sm:$0xff]  }
 0x249   : > { %6721 = vmatprep.mubr.bf16.mxu0 %v12966_v62  ;;  %7738 = vmatprep.mubr.bf16.mxu1 %v12966_v62  ;;  %v13033_v62 = vld [vmem:[%s16694_s1 + $0x7b8] ss:$20 sps:$4 sm:$0xff]  }
 0x24b   : > { %6720 = vmatpush1.bf16.msra.mxu0 %v12958_v63  ;;  %7737 = vmatpush1.bf16.msra.mxu1 %v12961_v0  ;;  %v13025_v63 = vld [vmem:[%s16694_s1 + $0x560] ss:$20 sps:$4 sm:$0xff]  }
 0x24c   : > { %10523 = vmatprep.subr.bf16.mxu0 %v12967_v1  ;;  %10587 = vmatprep.subr.bf16.mxu1 %v12988_v2  ;;  %v13035_v0 = vld [vmem:[%s16694_s1 + $0x920] ss:$20 sps:$4 sm:$0xff]   ;;  %v13026_v1 = vld [vmem:[%s16694_s1 + $0x6c8] ss:$20 sps:$4 sm:$0xff]  }
 0x24d   : > { %v13037_v2 = vld [vmem:[%s16694_s1 + $0x7e0] ss:$20 sps:$4 sm:$0xff]  }
 0x24e   : > { %6722 = vmatmul.mubr.bf16.vlgmr.msra.gmra.mrb[0].mxu0 %v12964_v3  ;;  %7739 = vmatmul.mubr.bf16.vlgmr.msra.gmra.mrb[0].mxu1 %v12964_v3  ;;  %v13186_v3 = vld [vmem:[%s13523_s12 + $0x90] ss:$72 sps:$4 sm:$0xff]  }
 0x24f   : > { %10524 = vmatpush3.bf16.msra.mxu0 %v12968_v4  ;;  %6731 = vmatprep.mubr.bf16.mxu0 %v12969_v5  ;;  %v13187_v4 = vld [vmem:[%s13523_s12 + $0x98] ss:$72 sps:$4 sm:$0xff]  }
 0x250   : > { %7748 = vmatprep.mubr.bf16.mxu1 %v12969_v5  ;;  %10525 = vmatprep.subr.bf16.mxu0 %v12972_v6  ;;  %v13038_v5 = vld [vmem:[%s16694_s1 + $0x948] ss:$20 sps:$4 sm:$0xff]   ;;  %v13188_v6 = vld [vmem:[%s13523_s12 + $0x124] ss:$72 sps:$4 sm:$0xff]  }
 0x251   : > { %10588 = vmatpush3.bf16.msra.mxu1 %v12990_v7  ;;  %v13189_v7 = vld [vmem:[%s13523_s12 + $0x12c] ss:$72 sps:$4 sm:$0xff]  }
 0x252   : > { %10589 = vmatprep.subr.bf16.mxu1 %v12991_v10  ;;  %v13039_v10 = vld [vmem:[%s16694_s1 + $0x808] ss:$20 sps:$4 sm:$0xff]  }
 0x253   : > { %10526 = vmatpush3.bf16.msra.mxu0 %v12973_v8  ;;  %v13027_v8 = vld [vmem:[%s16694_s1 + $0x588] ss:$20 sps:$4 sm:$0xff]  }
 0x254   : > { %10527 = vmatprep.subr.bf16.mxu0 %v12977_v9  ;;  %v13028_v9 = vld [vmem:[%s16694_s1 + $0x6f0] ss:$20 sps:$4 sm:$0xff]  }
 0x255   : > { %10590 = vmatpush3.bf16.msra.mxu1 %v12992_v11  ;;  %v13030_v11 = vld [vmem:[%s16694_s1 + $0x5b0] ss:$20 sps:$4 sm:$0xff]  }
 0x256   : > { %6732 = vmatmul.mubr.bf16.gmra.mrb[4].mxu0 %v12971_v12  ;;  %7749 = vmatmul.mubr.bf16.gmra.mrb[4].mxu1 %v12971_v12  ;;  %v13041_v12 = vld [vmem:[%s16694_s1 + $0x970] ss:$20 sps:$4 sm:$0xff]  }
 0x257   : > { %6741 = vmatprep.mubr.bf16.mxu0 %v12974_v13  ;;  %7758 = vmatprep.mubr.bf16.mxu1 %v12974_v13  ;;  %v13034_v13 = vld [vmem:[%s16694_s1 + $0x718] ss:$20 sps:$4 sm:$0xff]  }
 0x258   : > { %10528 = vmatpush3.bf16.msra.mxu0 %v12978_v14  ;;  %10591 = vmatprep.subr.bf16.mxu1 %v12997_v15  ;;  %v13043_v14 = vld [vmem:[%s16694_s1 + $0x830] ss:$20 sps:$4 sm:$0xff]   ;;  %v13190_v15 = vld [vmem:[%s13523_s12 + $0x120] ss:$72 sps:$4 sm:$0xff]  }
 0x259   : > { %10529 = vmatprep.subr.bf16.mxu0 %v12982_v16  ;;  %10592 = vmatpush3.bf16.msra.mxu1 %v12999_v17  ;;  %v13191_v16 = vld [vmem:[%s13523_s12 + $0x128] ss:$72 sps:$4 sm:$0xff]   ;;  %v13044_v17 = vld [vmem:[%s16694_s1 + $0x998] ss:$20 sps:$4 sm:$0xff]  }
 0x25a   : > { %10593 = vmatprep.subr.bf16.mxu1 %v13000_v19  ;;  %v13193_v19 = vld [vmem:[%s13523_s12 + $0x1bc] ss:$72 sps:$4 sm:$0xff]  }
 0x25c   : > { %10530 = vmatpush3.bf16.msra.mxu0 %v12983_v18  ;;  %v13192_v18 = vld [vmem:[%s13523_s12 + $0x1b4] ss:$72 sps:$4 sm:$0xff]  }
 0x25d   : > { %10531 = vmatprep.subr.bf16.mxu0 %v12987_v20  ;;  %10594 = vmatpush3.bf16.msra.mxu1 %v13001_v21  ;;  %v13036_v20 = vld [vmem:[%s16694_s1 + $0x5d8] ss:$20 sps:$4 sm:$0xff]   ;;  %v13040_v21 = vld [vmem:[%s16694_s1 + $0x740] ss:$20 sps:$4 sm:$0xff]  }
 0x25e   : > { %6742 = vmatmul.mubr.bf16.gmra.mrb[8].mxu0 %v12976_v22  ;;  %7759 = vmatmul.mubr.bf16.gmra.mrb[8].mxu1 %v12976_v22  ;;  %v13045_v22 = vld [vmem:[%s16694_s1 + $0x858] ss:$20 sps:$4 sm:$0xff]  }
 0x25f   : > { %6751 = vmatprep.mubr.bf16.mxu0 %v12979_v23  ;;  %7768 = vmatprep.mubr.bf16.mxu1 %v12979_v23  ;;  %v13042_v23 = vld [vmem:[%s16694_s1 + $0x600] ss:$20 sps:$4 sm:$0xff]  }
 0x260   : > { %10532 = vmatpush3.bf16.msra.mxu0 %v12989_v24  ;;  %10595 = vmatprep.subr.bf16.mxu1 %v13006_v25  ;;  %v13047_v24 = vld [vmem:[%s16694_s1 + $0x9c0] ss:$20 sps:$4 sm:$0xff]   ;;  %v13046_v25 = vld [vmem:[%s16694_s1 + $0x768] ss:$20 sps:$4 sm:$0xff]  }
 0x261   : > { %10533 = vmatprep.subr.bf16.mxu0 %v12996_v26  ;;  %10596 = vmatpush3.bf16.msra.mxu1 %v13008_v27  ;;  %v13049_v26 = vld [vmem:[%s16694_s1 + $0x880] ss:$20 sps:$4 sm:$0xff]   ;;  %v13194_v27 = vld [vmem:[%s13523_s12 + $0x1b0] ss:$72 sps:$4 sm:$0xff]  }
 0x262   : > { %10597 = vmatprep.subr.bf16.mxu1 %v13009_v29  ;;  %v13050_v29 = vld [vmem:[%s16694_s1 + $0x9e8] ss:$20 sps:$4 sm:$0xff]  }
 0x264   : > { %10534 = vmatpush3.bf16.msra.mxu0 %v12998_v28  ;;  %v13195_v28 = vld [vmem:[%s13523_s12 + $0x1b8] ss:$72 sps:$4 sm:$0xff]  }
 0x265   : > { %10535 = vmatprep.subr.bf16.mxu0 %v13005_v30  ;;  %10598 = vmatpush3.bf16.msra.mxu1 %v13010_v31  ;;  %v13196_v30 = vld [vmem:[%s13523_s12 + $0x244] ss:$72 sps:$4 sm:$0xff]  }
 0x266   : > { %6752 = vmatmul.mubr.bf16.gmra.mrb[12].mxu0 %v12981_v32  ;;  %7769 = vmatmul.mubr.bf16.gmra.mrb[12].mxu1 %v12981_v32  ;;  %v13197_v31 = vld [vmem:[%s13523_s12 + $0x24c] ss:$72 sps:$4 sm:$0xff]   ;;  %v13048_v32 = vld [vmem:[%s16694_s1 + $0x628] ss:$20 sps:$4 sm:$0xff]  }
 0x267   : > { %6761 = vmatprep.mubr.bf16.mxu0 %v12984_v33  ;;  %7778 = vmatprep.mubr.bf16.mxu1 %v12984_v33  ;;  %v13051_v33 = vld [vmem:[%s16694_s1 + $0x8a8] ss:$20 sps:$4 sm:$0xff]  }
 0x268   : > { %10536 = vmatpush3.bf16.msra.mxu0 %v13007_v34  ;;  %10599 = vmatprep.subr.bf16.mxu1 %v13015_v35  ;;  %v13052_v34 = vld [vmem:[%s16694_s1 + $0xb50] ss:$20 sps:$4 sm:$0xff]  }
 0x269   : > { %10537 = vmatprep.subr.bf16.mxu0 %v13014_v36  ;;  %10600 = vmatpush3.bf16.msra.mxu1 %v13017_v37  ;;  %v13061_v35 = vld [vmem:[%s16694_s1 + $0xdd0] ss:$20 sps:$4 sm:$0xff]   ;;  %v13198_v36 = vld [vmem:[%s13523_s12 + $0x240] ss:$72 sps:$4 sm:$0xff]  }
 0x26a   : > { %10601 = vmatprep.subr.bf16.mxu1 %v13018_v39  ;;  %v13199_v37 = vld [vmem:[%s13523_s12 + $0x248] ss:$72 sps:$4 sm:$0xff]   ;;  %v13201_v39 = vld [vmem:[%s13523_s12 + $0x2dc] ss:$72 sps:$4 sm:$0xff]  }
 0x26c   : > { %10538 = vmatpush3.bf16.msra.mxu0 %v13016_v38  ;;  %v13200_v38 = vld [vmem:[%s13523_s12 + $0x2d4] ss:$72 sps:$4 sm:$0xff]  }
 0x26d   : > { %10602 = vmatpush3.bf16.msra.mxu1 %v13019_v40  ;;  %10651 = vmatprep.subr.bf16.mxu0 %v13020_v41  ;;  %v13202_v40 = vld [vmem:[%s13523_s12 + $0x2d0] ss:$72 sps:$4 sm:$0xff]  }
 0x26e   : > { %6762 = vmatmul.mubr.bf16.gmra.mrb[16].mxu0 %v12986_v42  ;;  %7779 = vmatmul.mubr.bf16.gmra.mrb[16].mxu1 %v12986_v42  ;;  %v13203_v41 = vld [vmem:[%s13523_s12 + $0x2d8] ss:$72 sps:$4 sm:$0xff]   ;;  %v13204_v42 = vld [vmem:[%s13523_s12 + $0x364] ss:$72 sps:$4 sm:$0xff]  }
 0x26f   : > { %6771 = vmatprep.mubr.bf16.mxu0 %v12993_v43  ;;  %7788 = vmatprep.mubr.bf16.mxu1 %v12993_v43  ;;  %v13205_v43 = vld [vmem:[%s13523_s12 + $0x36c] ss:$72 sps:$4 sm:$0xff]  }
 0x270   : > { %10715 = vmatprep.subr.bf16.mxu1 %v13029_v44  ;;  %v13206_v44 = vld [vmem:[%s13523_s12 + $0x360] ss:$72 sps:$4 sm:$0xff]  }
 0x276   : > { %6772 = vmatmul.mubr.bf16.gmra.mrb[20].mxu0 %v12995_v45  ;;  %7789 = vmatmul.mubr.bf16.gmra.mrb[20].mxu1 %v12995_v45  ;;  %v13207_v45 = vld [vmem:[%s13523_s12 + $0x368] ss:$72 sps:$4 sm:$0xff]  }
 0x277   : > { %6781 = vmatprep.mubr.bf16.mxu0 %v13002_v46  ;;  %7798 = vmatprep.mubr.bf16.mxu1 %v13002_v46  ;;  %v13208_v46 = vld [vmem:[%s13523_s12 + $0x3f4] ss:$72 sps:$4 sm:$0xff]  }
 0x27e   : > { %6782 = vmatmul.mubr.bf16.gmra.mrb[24].mxu0 %v13004_v47  ;;  %7799 = vmatmul.mubr.bf16.gmra.mrb[24].mxu1 %v13004_v47  ;;  %v13209_v47 = vld [vmem:[%s13523_s12 + $0x3fc] ss:$72 sps:$4 sm:$0xff]  }
 0x27f   : > { %6791 = vmatprep.mubr.bf16.mxu0 %v13011_v48  ;;  %7808 = vmatprep.mubr.bf16.mxu1 %v13011_v48  ;;  %v13210_v48 = vld [vmem:[%s13523_s12 + $0x3f0] ss:$72 sps:$4 sm:$0xff]  }
 0x286   : > { %6792 = vmatmul.mubr.bf16.gmra.mrb[28].mxu0 %v13013_v49  ;;  %7809 = vmatmul.mubr.bf16.gmra.mrb[28].mxu1 %v13013_v49  ;;  %v13211_v49 = vld [vmem:[%s13523_s12 + $0x3f8] ss:$72 sps:$4 sm:$0xff]  }
 0x287   : > { %7851 = vmatprep.mubr.bf16.mxu0 %v13180_v50  ;;  %7948 = vmatprep.mubr.bf16.mxu1 %v13181_v51  ;;  %v13212_v50 = vld [vmem:[%s13523_s12 + $0x14] ss:$72 sps:$4 sm:$0xff]  }
 0x288   : > { %v13213_v51 = vld [vmem:[%s13523_s12 + $0x1c] ss:$72 sps:$4 sm:$0xff]  }
 0x28e   : > { %7852 = vmatmul.mubr.bf16.vlgmr.msra.gmra.mrb[32].mxu0 %v13182_v55  ;;  %7949 = vmatmul.mubr.bf16.vlgmr.msra.gmra.mrb[32].mxu1 %v13183_v56  ;;  %v13214_v55 = vld [vmem:[%s13523_s12 + $0x10] ss:$72 sps:$4 sm:$0xff]  }
 0x28f   : > { %10652 = vmatpush3.bf16.msra.mxu0 %v13021_v52  ;;  %7859 = vmatprep.mubr.bf16.mxu0 %v13184_v58  ;;  %v13053_v52 = vld [vmem:[%s16694_s1 + $0xa10] ss:$20 sps:$4 sm:$0xff]   ;;  %v13215_v56 = vld [vmem:[%s13523_s12 + $0x18] ss:$72 sps:$4 sm:$0xff]  }
 0x290   : > { %7956 = vmatprep.mubr.bf16.mxu1 %v13185_v60  ;;  %10653 = vmatprep.subr.bf16.mxu0 %v13022_v53  ;;  %v13054_v53 = vld [vmem:[%s16694_s1 + $0xb78] ss:$20 sps:$4 sm:$0xff]  }
 0x291   : > { %10716 = vmatpush3.bf16.msra.mxu1 %v13031_v54  ;;  %v13063_v54 = vld [vmem:[%s16694_s1 + $0xc90] ss:$20 sps:$4 sm:$0xff]   ;;  %v13217_v60 = vld [vmem:[%s13523_s12 + $0xac] ss:$72 sps:$4 sm:$0xff]  }
 0x292   : > { %10717 = vmatprep.subr.bf16.mxu1 %v13032_v57  ;;  %v13064_v57 = vld [vmem:[%s16694_s1 + $0xdf8] ss:$20 sps:$4 sm:$0xff]  }
 0x293   : > { %10654 = vmatpush3.bf16.msra.mxu0 %v13023_v59  ;;  %v13216_v58 = vld [vmem:[%s13523_s12 + $0xa4] ss:$72 sps:$4 sm:$0xff]  }
 0x294   : > { %10655 = vmatprep.subr.bf16.mxu0 %v13024_v61  ;;  %v13055_v59 = vld [vmem:[%s16694_s1 + $0xa38] ss:$20 sps:$4 sm:$0xff]   ;;  %v13056_v61 = vld [vmem:[%s16694_s1 + $0xba0] ss:$20 sps:$4 sm:$0xff]  }
 0x295   : > { %10718 = vmatpush3.bf16.msra.mxu1 %v13033_v62  ;;  %v13065_v62 = vld [vmem:[%s16694_s1 + $0xcb8] ss:$20 sps:$4 sm:$0xff]  }
 0x296   : > { %7860 = vmatmul.mubr.bf16.gmra.mrb[36].mxu0 %v13186_v3  ;;  %7957 = vmatmul.mubr.bf16.gmra.mrb[36].mxu1 %v13187_v4  ;;  %v13218_v3 = vld [vmem:[%s13523_s12 + $0xa0] ss:$72 sps:$4 sm:$0xff]  }
 0x297   : > { %7867 = vmatprep.mubr.bf16.mxu0 %v13188_v6  ;;  %7964 = vmatprep.mubr.bf16.mxu1 %v13189_v7  ;;  %v13219_v4 = vld [vmem:[%s13523_s12 + $0xa8] ss:$72 sps:$4 sm:$0xff]   ;;  %v13220_v6 = vld [vmem:[%s13523_s12 + $0x134] ss:$72 sps:$4 sm:$0xff]  }
 0x298   : > { %10656 = vmatpush3.bf16.msra.mxu0 %v13025_v63  ;;  %10719 = vmatprep.subr.bf16.mxu1 %v13035_v0  ;;  %v13057_v63 = vld [vmem:[%s16694_s1 + $0xa60] ss:$20 sps:$4 sm:$0xff]   ;;  %v13221_v7 = vld [vmem:[%s13523_s12 + $0x13c] ss:$72 sps:$4 sm:$0xff]  }
 0x299   : > { %10657 = vmatprep.subr.bf16.mxu0 %v13026_v1  ;;  %10720 = vmatpush3.bf16.msra.mxu1 %v13037_v2  ;;  %v13067_v0 = vld [vmem:[%s16694_s1 + $0xe20] ss:$20 sps:$4 sm:$0xff]   ;;  %v13058_v1 = vld [vmem:[%s16694_s1 + $0xbc8] ss:$20 sps:$4 sm:$0xff]  }
 0x29a   : > { %10721 = vmatprep.subr.bf16.mxu1 %v13038_v5  ;;  %v13069_v2 = vld [vmem:[%s16694_s1 + $0xce0] ss:$20 sps:$4 sm:$0xff]   ;;  %v13070_v5 = vld [vmem:[%s16694_s1 + $0xe48] ss:$20 sps:$4 sm:$0xff]  }
 0x29c   : > { %10658 = vmatpush3.bf16.msra.mxu0 %v13027_v8  ;;  %v13059_v8 = vld [vmem:[%s16694_s1 + $0xa88] ss:$20 sps:$4 sm:$0xff]  }
 0x29d   : > { %10659 = vmatprep.subr.bf16.mxu0 %v13028_v9  ;;  %10722 = vmatpush3.bf16.msra.mxu1 %v13039_v10  ;;  %v13060_v9 = vld [vmem:[%s16694_s1 + $0xbf0] ss:$20 sps:$4 sm:$0xff]   ;;  %v13071_v10 = vld [vmem:[%s16694_s1 + $0xd08] ss:$20 sps:$4 sm:$0xff]  }
 0x29e   : > { %7868 = vmatmul.mubr.bf16.gmra.mrb[40].mxu0 %v13190_v15  ;;  %7965 = vmatmul.mubr.bf16.gmra.mrb[40].mxu1 %v13191_v16  ;;  %v13222_v15 = vld [vmem:[%s13523_s12 + $0x130] ss:$72 sps:$4 sm:$0xff]  }
 0x29f   : > { %7875 = vmatprep.mubr.bf16.mxu0 %v13192_v18  ;;  %7972 = vmatprep.mubr.bf16.mxu1 %v13193_v19  ;;  %v13223_v16 = vld [vmem:[%s13523_s12 + $0x138] ss:$72 sps:$4 sm:$0xff]   ;;  %v13224_v18 = vld [vmem:[%s13523_s12 + $0x1c4] ss:$72 sps:$4 sm:$0xff]  }
 0x2a0   : > { %10660 = vmatpush3.bf16.msra.mxu0 %v13030_v11  ;;  %10723 = vmatprep.subr.bf16.mxu1 %v13041_v12  ;;  %v13062_v11 = vld [vmem:[%s16694_s1 + $0xab0] ss:$20 sps:$4 sm:$0xff]   ;;  %v13225_v19 = vld [vmem:[%s13523_s12 + $0x1cc] ss:$72 sps:$4 sm:$0xff]  }
 0x2a1   : > { %10661 = vmatprep.subr.bf16.mxu0 %v13034_v13  ;;  %10724 = vmatpush3.bf16.msra.mxu1 %v13043_v14  ;;  %v13073_v12 = vld [vmem:[%s16694_s1 + $0xe70] ss:$20 sps:$4 sm:$0xff]   ;;  %v13066_v13 = vld [vmem:[%s16694_s1 + $0xc18] ss:$20 sps:$4 sm:$0xff]  }
 0x2a2   : > { %10725 = vmatprep.subr.bf16.mxu1 %v13044_v17  ;;  %v13075_v14 = vld [vmem:[%s16694_s1 + $0xd30] ss:$20 sps:$4 sm:$0xff]   ;;  %v13076_v17 = vld [vmem:[%s16694_s1 + $0xe98] ss:$20 sps:$4 sm:$0xff]  }
 0x2a4   : > { %10662 = vmatpush3.bf16.msra.mxu0 %v13036_v20  ;;  %v13068_v20 = vld [vmem:[%s16694_s1 + $0xad8] ss:$20 sps:$4 sm:$0xff]  }
 0x2a5   : > { %10663 = vmatprep.subr.bf16.mxu0 %v13040_v21  ;;  %10726 = vmatpush3.bf16.msra.mxu1 %v13045_v22  ;;  %v13072_v21 = vld [vmem:[%s16694_s1 + $0xc40] ss:$20 sps:$4 sm:$0xff]   ;;  %v13077_v22 = vld [vmem:[%s16694_s1 + $0xd58] ss:$20 sps:$4 sm:$0xff]  }
 0x2a6   : > { %7876 = vmatmul.mubr.bf16.gmra.mrb[44].mxu0 %v13194_v27  ;;  %7973 = vmatmul.mubr.bf16.gmra.mrb[44].mxu1 %v13195_v28  ;;  %v13226_v27 = vld [vmem:[%s13523_s12 + $0x1c0] ss:$72 sps:$4 sm:$0xff]  }
 0x2a7   : > { %7883 = vmatprep.mubr.bf16.mxu0 %v13196_v30  ;;  %7980 = vmatprep.mubr.bf16.mxu1 %v13197_v31  ;;  %v13227_v28 = vld [vmem:[%s13523_s12 + $0x1c8] ss:$72 sps:$4 sm:$0xff]   ;;  %v13228_v30 = vld [vmem:[%s13523_s12 + $0x254] ss:$72 sps:$4 sm:$0xff]  }
 0x2a8   : > { %10664 = vmatpush3.bf16.msra.mxu0 %v13042_v23  ;;  %10727 = vmatprep.subr.bf16.mxu1 %v13047_v24  ;;  %v13074_v23 = vld [vmem:[%s16694_s1 + $0xb00] ss:$20 sps:$4 sm:$0xff]   ;;  %v13229_v31 = vld [vmem:[%s13523_s12 + $0x25c] ss:$72 sps:$4 sm:$0xff]  }
 0x2a9   : > { %10665 = vmatprep.subr.bf16.mxu0 %v13046_v25  ;;  %10728 = vmatpush3.bf16.msra.mxu1 %v13049_v26  ;;  %v13079_v24 = vld [vmem:[%s16694_s1 + $0xec0] ss:$20 sps:$4 sm:$0xff]   ;;  %v13078_v25 = vld [vmem:[%s16694_s1 + $0xc68] ss:$20 sps:$4 sm:$0xff]  }
 0x2aa   : > { %10729 = vmatprep.subr.bf16.mxu1 %v13050_v29  ;;  %v13081_v26 = vld [vmem:[%s16694_s1 + $0xd80] ss:$20 sps:$4 sm:$0xff]   ;;  %v13082_v29 = vld [vmem:[%s16694_s1 + $0xee8] ss:$20 sps:$4 sm:$0xff]  }
 0x2ac   : > { %10666 = vmatpush3.bf16.msra.mxu0 %v13048_v32  ;;  %v13080_v32 = vld [vmem:[%s16694_s1 + $0xb28] ss:$20 sps:$4 sm:$0xff]  }
 0x2ad   : > { %10730 = vmatpush3.bf16.msra.mxu1 %v13051_v33  ;;  %10779 = vmatprep.subr.bf16.mxu0 %v13052_v34  ;;  %v13083_v33 = vld [vmem:[%s16694_s1 + $0xda8] ss:$20 sps:$4 sm:$0xff]   ;;  %v13084_v34 = vld [vmem:[%s16694_s1 + $0x1050] ss:$20 sps:$4 sm:$0xff]  }
 0x2ae   : > { %7884 = vmatmul.mubr.bf16.gmra.mrb[48].mxu0 %v13198_v36  ;;  %7981 = vmatmul.mubr.bf16.gmra.mrb[48].mxu1 %v13199_v37  ;;  %v13230_v36 = vld [vmem:[%s13523_s12 + $0x250] ss:$72 sps:$4 sm:$0xff]  }
 0x2af   : > { %7891 = vmatprep.mubr.bf16.mxu0 %v13200_v38  ;;  %7988 = vmatprep.mubr.bf16.mxu1 %v13201_v39  ;;  %v13231_v37 = vld [vmem:[%s13523_s12 + $0x258] ss:$72 sps:$4 sm:$0xff]   ;;  %v13232_v38 = vld [vmem:[%s13523_s12 + $0x2e4] ss:$72 sps:$4 sm:$0xff]  }
 0x2b0   : > { %10843 = vmatprep.subr.bf16.mxu1 %v13061_v35  ;;  %v13093_v35 = vld [vmem:[%s16694_s1 + $0x12d0] ss:$20 sps:$4 sm:$0xff]   ;;  %v13233_v39 = vld [vmem:[%s13523_s12 + $0x2ec] ss:$72 sps:$4 sm:$0xff]  }
 0x2b6   : > { %7892 = vmatmul.mubr.bf16.gmra.mrb[52].mxu0 %v13202_v40  ;;  %7989 = vmatmul.mubr.bf16.gmra.mrb[52].mxu1 %v13203_v41  ;;  %v13234_v40 = vld [vmem:[%s13523_s12 + $0x2e0] ss:$72 sps:$4 sm:$0xff]  }
 0x2b7   : > { %7899 = vmatprep.mubr.bf16.mxu0 %v13204_v42  ;;  %7996 = vmatprep.mubr.bf16.mxu1 %v13205_v43  ;;  %v13235_v41 = vld [vmem:[%s13523_s12 + $0x2e8] ss:$72 sps:$4 sm:$0xff]   ;;  %v13236_v42 = vld [vmem:[%s13523_s12 + $0x374] ss:$72 sps:$4 sm:$0xff]  }
 0x2b8   : > { %v13237_v43 = vld [vmem:[%s13523_s12 + $0x37c] ss:$72 sps:$4 sm:$0xff]  }
 0x2be   : > { %7900 = vmatmul.mubr.bf16.gmra.mrb[56].mxu0 %v13206_v44  ;;  %7997 = vmatmul.mubr.bf16.gmra.mrb[56].mxu1 %v13207_v45  ;;  %v13238_v44 = vld [vmem:[%s13523_s12 + $0x370] ss:$72 sps:$4 sm:$0xff]  }
 0x2bf   : > { %7907 = vmatprep.mubr.bf16.mxu0 %v13208_v46  ;;  %8004 = vmatprep.mubr.bf16.mxu1 %v13209_v47  ;;  %v13239_v45 = vld [vmem:[%s13523_s12 + $0x378] ss:$72 sps:$4 sm:$0xff]   ;;  %v13240_v46 = vld [vmem:[%s13523_s12 + $0x404] ss:$72 sps:$4 sm:$0xff]  }
 0x2c0   : > { %v13241_v47 = vld [vmem:[%s13523_s12 + $0x40c] ss:$72 sps:$4 sm:$0xff]  }
 0x2c6   : > { %7908 = vmatmul.mubr.bf16.gmra.mrb[60].mxu0 %v13210_v48  ;;  %8005 = vmatmul.mubr.bf16.gmra.mrb[60].mxu1 %v13211_v49  ;;  %v13242_v48 = vld [vmem:[%s13523_s12 + $0x400] ss:$72 sps:$4 sm:$0xff]  }
 0x2c7   : > { %8045 = vmatprep.mubr.bf16.mxu0 %v13212_v50  ;;  %8142 = vmatprep.mubr.bf16.mxu1 %v13213_v51  ;;  %v13243_v49 = vld [vmem:[%s13523_s12 + $0x408] ss:$72 sps:$4 sm:$0xff]   ;;  %v13244_v50 = vld [vmem:[%s13523_s12 + $0x24] ss:$72 sps:$4 sm:$0xff]  }
 0x2c8   : > { %v13245_v51 = vld [vmem:[%s13523_s12 + $0x2c] ss:$72 sps:$4 sm:$0xff]  }
 0x2ce   : > { %8046 = vmatmul.mubr.bf16.vlgmr.msra.gmra.mrb[64].mxu0 %v13214_v55  ;;  %8143 = vmatmul.mubr.bf16.vlgmr.msra.gmra.mrb[64].mxu1 %v13215_v56  ;;  %v13246_v55 = vld [vmem:[%s13523_s12 + $0x20] ss:$72 sps:$4 sm:$0xff]  }
 0x2cf   : > { %10780 = vmatpush3.bf16.msra.mxu0 %v13053_v52  ;;  %8053 = vmatprep.mubr.bf16.mxu0 %v13216_v58  ;;  %v13085_v52 = vld [vmem:[%s16694_s1 + $0xf10] ss:$20 sps:$4 sm:$0xff]   ;;  %v13248_v58 = vld [vmem:[%s13523_s12 + $0xb4] ss:$72 sps:$4 sm:$0xff]  }
 0x2d0   : > { %8150 = vmatprep.mubr.bf16.mxu1 %v13217_v60  ;;  %10781 = vmatprep.subr.bf16.mxu0 %v13054_v53  ;;  %v13086_v53 = vld [vmem:[%s16694_s1 + $0x1078] ss:$20 sps:$4 sm:$0xff]   ;;  %v13247_v56 = vld [vmem:[%s13523_s12 + $0x28] ss:$72 sps:$4 sm:$0xff]   ;;  %v13249_v60 = vld [vmem:[%s13523_s12 + $0xbc] ss:$72 sps:$4 sm:$0xff]  }
 0x2d1   : > { %10844 = vmatpush3.bf16.msra.mxu1 %v13063_v54  ;;  %v13095_v54 = vld [vmem:[%s16694_s1 + $0x1190] ss:$20 sps:$4 sm:$0xff]  }
 0x2d2   : > { %10845 = vmatprep.subr.bf16.mxu1 %v13064_v57  ;;  %v13096_v57 = vld [vmem:[%s16694_s1 + $0x12f8] ss:$20 sps:$4 sm:$0xff]  }
 0x2d3   : > { %10782 = vmatpush3.bf16.msra.mxu0 %v13055_v59  ;;  %v13087_v59 = vld [vmem:[%s16694_s1 + $0xf38] ss:$20 sps:$4 sm:$0xff]  }
 0x2d4   : > { %10783 = vmatprep.subr.bf16.mxu0 %v13056_v61  ;;  %v13088_v61 = vld [vmem:[%s16694_s1 + $0x10a0] ss:$20 sps:$4 sm:$0xff]  }
 0x2d5   : > { %10846 = vmatpush3.bf16.msra.mxu1 %v13065_v62  ;;  %v13097_v62 = vld [vmem:[%s16694_s1 + $0x11b8] ss:$20 sps:$4 sm:$0xff]  }
 0x2d6   : > { %8054 = vmatmul.mubr.bf16.gmra.mrb[68].mxu0 %v13218_v3  ;;  %8151 = vmatmul.mubr.bf16.gmra.mrb[68].mxu1 %v13219_v4  ;;  %v13101_v3 = vld [vmem:[%s16694_s1 + $0x11e0] ss:$20 sps:$4 sm:$0xff]   ;;  %v13250_v4 = vld [vmem:[%s13523_s12 + $0xb0] ss:$72 sps:$4 sm:$0xff]  }
 0x2d7   : > { %8061 = vmatprep.mubr.bf16.mxu0 %v13220_v6  ;;  %8158 = vmatprep.mubr.bf16.mxu1 %v13221_v7  ;;  %v13102_v6 = vld [vmem:[%s16694_s1 + $0x1348] ss:$20 sps:$4 sm:$0xff]   ;;  %v13252_v7 = vld [vmem:[%s13523_s12 + $0x144] ss:$72 sps:$4 sm:$0xff]  }
 0x2d8   : > { %10784 = vmatpush3.bf16.msra.mxu0 %v13057_v63  ;;  %10847 = vmatprep.subr.bf16.mxu1 %v13067_v0  ;;  %v1296_v63 = vlaneseq  ;;  %v13089_v0 = vld [vmem:[%s16694_s1 + $0xf60] ss:$20 sps:$4 sm:$0xff]  }
 0x2d9   : > { %10785 = vmatprep.subr.bf16.mxu0 %v13058_v1  ;;  %10848 = vmatpush3.bf16.msra.mxu1 %v13069_v2  ;;  %v13099_v1 = vld [vmem:[%s16694_s1 + $0x1320] ss:$20 sps:$4 sm:$0xff]   ;;  %v13090_v2 = vld [vmem:[%s16694_s1 + $0x10c8] ss:$20 sps:$4 sm:$0xff]  }
 0x2da   : > { %10849 = vmatprep.subr.bf16.mxu1 %v13070_v5  ;;  %v13251_v5 = vld [vmem:[%s13523_s12 + $0xb8] ss:$72 sps:$4 sm:$0xff]  }
 0x2dc   : > { %10786 = vmatpush3.bf16.msra.mxu0 %v13059_v8  ;;  %v13253_v8 = vld [vmem:[%s13523_s12 + $0x14c] ss:$72 sps:$4 sm:$0xff]  }
 0x2dd   : > { %10787 = vmatprep.subr.bf16.mxu0 %v13060_v9  ;;  %10850 = vmatpush3.bf16.msra.mxu1 %v13071_v10  ;;  %v15666_v9 = vshrl.u32 %v1296_v63, 7  ;;  %v13091_v10 = vld [vmem:[%s16694_s1 + $0xf88] ss:$20 sps:$4 sm:$0xff]  }
 0x2de   : > { %8062 = vmatmul.mubr.bf16.gmra.mrb[72].mxu0 %v13222_v15  ;;  %8159 = vmatmul.mubr.bf16.gmra.mrb[72].mxu1 %v13223_v16  ;;  %v13112_v63 = vld [vmem:[%s16694_s1 + $0x1028] ss:$20 sps:$4 sm:$0xff]  }
 0x2df   : > { %8069 = vmatprep.mubr.bf16.mxu0 %v13224_v18  ;;  %8166 = vmatprep.mubr.bf16.mxu1 %v13225_v19  ;;  %v1306_v15 = vsub.s32 2, %v15666_v9  ;;  %v1302_v16 = vsub.s32 1, %v15666_v9  ;;  %v13105_v18 = vld [vmem:[%s16694_s1 + $0x1370] ss:$20 sps:$4 sm:$0xff]   ;;  %v1310_v19 = vsub.s32 3, %v15666_v9 }
 0x2e0   : > { %10788 = vmatpush3.bf16.msra.mxu0 %v13062_v11  ;;  %10851 = vmatprep.subr.bf16.mxu1 %v13073_v12  ;;  %v13092_v11 = vld [vmem:[%s16694_s1 + $0x10f0] ss:$20 sps:$4 sm:$0xff]   ;;  %v13103_v12 = vld [vmem:[%s16694_s1 + $0x1208] ss:$20 sps:$4 sm:$0xff]  }
 0x2e1   : > { %10789 = vmatprep.subr.bf16.mxu0 %v13066_v13  ;;  %10852 = vmatpush3.bf16.msra.mxu1 %v13075_v14  ;;  %v15680_v13 = vld [vmem:[%s16695_s2] sm:$0x1f]  ;;  %v1298_v14 = vsub.s32 0, %v15666_v9 }
 0x2e2   : > { %10853 = vmatprep.subr.bf16.mxu1 %v13076_v17  ;;  %v13094_v17 = vld [vmem:[%s16694_s1 + $0xfb0] ss:$20 sps:$4 sm:$0xff]  }
 0x2e4   : > { %10790 = vmatpush3.bf16.msra.mxu0 %v13068_v20  ;;  %v13098_v20 = vld [vmem:[%s16694_s1 + $0x1118] ss:$20 sps:$4 sm:$0xff]  }
 0x2e5   : > { %10791 = vmatprep.subr.bf16.mxu0 %v13072_v21  ;;  %10854 = vmatpush3.bf16.msra.mxu1 %v13077_v22  ;;  %v13107_v21 = vld [vmem:[%s16694_s1 + $0x1230] ss:$20 sps:$4 sm:$0xff]   ;;  %v13254_v22 = vld [vmem:[%s13523_s12 + $0x140] ss:$72 sps:$4 sm:$0xff]  }
 0x2e6   : > { %8070 = vmatmul.mubr.bf16.gmra.mrb[76].mxu0 %v13226_v27  ;;  %8167 = vmatmul.mubr.bf16.gmra.mrb[76].mxu1 %v13227_v28  ;;  %v13257_v27 = vld [vmem:[%s13523_s12 + $0x1dc] ss:$72 sps:$4 sm:$0xff]   ;;  %v15709_v28 = vrot.slane %v15680_v13, %v1306_v15 }
 0x2e7   : > { %8077 = vmatprep.mubr.bf16.mxu0 %v13228_v30  ;;  %8174 = vmatprep.mubr.bf16.mxu1 %v13229_v31  ;;  %v13100_v30 = vld [vmem:[%s16694_s1 + $0xfd8] ss:$20 sps:$4 sm:$0xff]  }
 0x2e8   : > { %10792 = vmatpush3.bf16.msra.mxu0 %v13074_v23  ;;  %10855 = vmatprep.subr.bf16.mxu1 %v13079_v24  ;;  %v13255_v23 = vld [vmem:[%s13523_s12 + $0x148] ss:$72 sps:$4 sm:$0xff]   ;;  %v13108_v24 = vld [vmem:[%s16694_s1 + $0x1398] ss:$20 sps:$4 sm:$0xff]  }
 0x2e9   : > { %10793 = vmatprep.subr.bf16.mxu0 %v13078_v25  ;;  %10856 = vmatpush3.bf16.msra.mxu1 %v13081_v26  ;;  %v15704_v25 = vrot.slane %v15680_v13, %v1298_v14  ;;  %v13256_v26 = vld [vmem:[%s13523_s12 + $0x1d4] ss:$72 sps:$4 sm:$0xff]  }
 0x2ea   : > { %10857 = vmatprep.subr.bf16.mxu1 %v13082_v29  ;;  %v15712_v29 = vrot.slane %v15680_v13, %v1302_v16 }
 0x2ec   : > { %10794 = vmatpush3.bf16.msra.mxu0 %v13080_v32 }
 0x2ed   : > { %10858 = vmatpush3.bf16.msra.mxu1 %v13083_v33  ;;  %10907 = vmatprep.subr.bf16.mxu0 %v13084_v34  ;;  %v15718_v33 = vrot.slane %v15680_v13, %v1310_v19  ;;  %v13104_v34 = vld [vmem:[%s16694_s1 + $0x1140] ss:$20 sps:$4 sm:$0xff]  }
 0x2ee   : > { %8078 = vmatmul.mubr.bf16.gmra.mrb[80].mxu0 %v13230_v36  ;;  %8175 = vmatmul.mubr.bf16.gmra.mrb[80].mxu1 %v13231_v37 }
 0x2ef   : > { %8085 = vmatprep.mubr.bf16.mxu0 %v13232_v38  ;;  %8182 = vmatprep.mubr.bf16.mxu1 %v13233_v39 }
 0x2f0   : > { %10971 = vmatprep.subr.bf16.mxu1 %v13093_v35  ;;  %v13109_v35 = vld [vmem:[%s16694_s1 + $0x1258] ss:$20 sps:$4 sm:$0xff]  }
 0x2f6   : > { %8086 = vmatmul.mubr.bf16.gmra.mrb[84].mxu0 %v13234_v40  ;;  %8183 = vmatmul.mubr.bf16.gmra.mrb[84].mxu1 %v13235_v41 }
 0x2f7   : > { %8093 = vmatprep.mubr.bf16.mxu0 %v13236_v42  ;;  %8190 = vmatprep.mubr.bf16.mxu1 %v13237_v43 }
 0x2fe   : > { %8094 = vmatmul.mubr.bf16.gmra.mrb[88].mxu0 %v13238_v44  ;;  %8191 = vmatmul.mubr.bf16.gmra.mrb[88].mxu1 %v13239_v45 }
 0x2ff   : > { %8101 = vmatprep.mubr.bf16.mxu0 %v13240_v46  ;;  %8198 = vmatprep.mubr.bf16.mxu1 %v13241_v47  ;;  %v13106_v47 = vld [vmem:[%s16694_s1 + $0x1000] ss:$20 sps:$4 sm:$0xff]  }
 0x306   : > { %8102 = vmatmul.mubr.bf16.gmra.mrb[92].mxu0 %v13242_v48  ;;  %8199 = vmatmul.mubr.bf16.gmra.mrb[92].mxu1 %v13243_v49  ;;  %v13111_v48 = vld [vmem:[%s16694_s1 + $0x13c0] ss:$20 sps:$4 sm:$0xff]  }
 0x307   : > { %8239 = vmatprep.mubr.bf16.mxu0 %v13244_v50  ;;  %8336 = vmatprep.mubr.bf16.mxu1 %v13245_v51 }
 0x30e   : > { %8240 = vmatmul.mubr.bf16.vlgmr.msra.gmra.mrb[96].mxu0 %v13246_v55  ;;  %8337 = vmatmul.mubr.bf16.vlgmr.msra.gmra.mrb[96].mxu1 %v13247_v56  ;;  %v13258_v56 = vld [vmem:[%s13523_s12 + $0x1d0] ss:$72 sps:$4 sm:$0xff]  }
 0x30f   : > { %10908 = vmatpush3.bf16.msra.mxu0 %v13085_v52  ;;  %8247 = vmatprep.mubr.bf16.mxu0 %v13248_v58  ;;  %v13110_v52 = vld [vmem:[%s16694_s1 + $0x1168] ss:$20 sps:$4 sm:$0xff]  }
 0x310   : > { %8344 = vmatprep.mubr.bf16.mxu1 %v13249_v60  ;;  %10909 = vmatprep.subr.bf16.mxu0 %v13086_v53  ;;  %v13113_v53 = vld [vmem:[%s16694_s1 + $0x1280] ss:$20 sps:$4 sm:$0xff]   ;;  %v13114_v58 = vld [vmem:[%s16694_s1 + $0x13e8] ss:$20 sps:$4 sm:$0xff]  }
 0x311   : > { %10972 = vmatpush3.bf16.msra.mxu1 %v13095_v54  ;;  %v13278_v54 = vld [vmem:[%s13523_s12 + $0x30] ss:$72 sps:$4 sm:$0xff]  }
 0x312   : > { %10973 = vmatprep.subr.bf16.mxu1 %v13096_v57  ;;  %v13259_v57 = vld [vmem:[%s13523_s12 + $0x1d8] ss:$72 sps:$4 sm:$0xff]  }
 0x313   : > { %10910 = vmatpush3.bf16.msra.mxu0 %v13087_v59 }
 0x314   : > { %10911 = vmatprep.subr.bf16.mxu0 %v13088_v61  ;;  %v13260_v61 = vld [vmem:[%s13523_s12 + $0x264] ss:$72 sps:$4 sm:$0xff]  }
 0x315   : > { %10974 = vmatpush3.bf16.msra.mxu1 %v13097_v62  ;;  %v13261_v62 = vld [vmem:[%s13523_s12 + $0x26c] ss:$72 sps:$4 sm:$0xff]  }
 0x316   : > { %8248 = vmatmul.mubr.bf16.gmra.mrb[100].mxu0 %v13250_v4  ;;  %8345 = vmatmul.mubr.bf16.gmra.mrb[100].mxu1 %v13251_v5 }
 0x317   : > { %8255 = vmatprep.mubr.bf16.mxu0 %v13252_v7  ;;  %8352 = vmatprep.mubr.bf16.mxu1 %v13253_v8 }
 0x318   : > { %10912 = vmatpush3.bf16.msra.mxu0 %v13089_v0  ;;  %10975 = vmatprep.subr.bf16.mxu1 %v13099_v1 }
 0x319   : > { %10913 = vmatprep.subr.bf16.mxu0 %v13090_v2  ;;  %10976 = vmatpush3.bf16.msra.mxu1 %v13101_v3  ;;  %v13115_v2 = vld [vmem:[%s16694_s1 + $0x12a8] ss:$20 sps:$4 sm:$0xff]   ;;  %v13116_v3 = vld [vmem:[%s16694_s1 + $0x1550] ss:$20 sps:$4 sm:$0xff]  }
 0x31a   : > { %10977 = vmatprep.subr.bf16.mxu1 %v13102_v6 }
 0x31c   : > { %10914 = vmatpush3.bf16.msra.mxu0 %v13091_v10 }
 0x31d   : > { %10915 = vmatprep.subr.bf16.mxu0 %v13092_v11  ;;  %10978 = vmatpush3.bf16.msra.mxu1 %v13103_v12 }
 0x31e   : > { %8256 = vmatmul.mubr.bf16.gmra.mrb[104].mxu0 %v13254_v22  ;;  %8353 = vmatmul.mubr.bf16.gmra.mrb[104].mxu1 %v13255_v23  ;;  %v13262_v23 = vld [vmem:[%s13523_s12 + $0x260] ss:$72 sps:$4 sm:$0xff]   ;;  %v13274_v22 = vld [vmem:[%s13523_s12 + $0x410] ss:$72 sps:$4 sm:$0xff]  }
 0x31f   : > { %8263 = vmatprep.mubr.bf16.mxu0 %v13256_v26  ;;  %8360 = vmatprep.mubr.bf16.mxu1 %v13257_v27  ;;  %v13275_v27 = vld [vmem:[%s13523_s12 + $0x418] ss:$72 sps:$4 sm:$0xff]  }
 0x320   : > { %10916 = vmatpush3.bf16.msra.mxu0 %v13094_v17  ;;  %10979 = vmatprep.subr.bf16.mxu1 %v13105_v18  ;;  %v13125_v17 = vld [vmem:[%s16696_s3 + $0x40] sm:$0xff]  }
 0x321   : > { %v6723_v31 = vpop.f32.mrb[0].mxu0  ;;  %v7740_v32 = vpop.f32.mrb[0].mxu1  ;;  %10917 = vmatprep.subr.bf16.mxu0 %v13098_v20  ;;  %10980 = vmatpush3.bf16.msra.mxu1 %v13107_v21 }
 0x322   : > { %v6725_v36 = vpop.f32.mrb[1].mxu0  ;;  %v7742_v37 = vpop.f32.mrb[1].mxu1  ;;  %10981 = vmatprep.subr.bf16.mxu1 %v13108_v24  ;;  %v15727_v38 = vadd.f32 %v6723_v31, %v15704_v25  ;;  %v15730_v41 = vadd.f32 %v7740_v32, %v15709_v28  ;;  %v13263_v24 = vld [vmem:[%s13523_s12 + $0x268] ss:$72 sps:$4 sm:$0xff]   ;;  %v13265_v31 = vld [vmem:[%s13523_s12 + $0x2fc] ss:$72 sps:$4 sm:$0xff]  }
 0x323   : > { %v6727_v39 = vpop.f32.mrb[2].mxu0  ;;  %v7744_v40 = vpop.f32.mrb[2].mxu1  ;;  %v15733_v42 = vadd.f32 %v6725_v36, %v15712_v29  ;;  %v15748_v49 = vadd.f32 %v7742_v37, %v15718_v33 }
 0x324   : > { %v15736_v43 = vadd.f32 %v6727_v39, %v15704_v25  ;;  %v15739_v44 = vadd.f32 %v7744_v40, %v15709_v28  ;;  %v6729_v45 = vpop.f32.mrb[3].mxu0  ;;  %v7746_v46 = vpop.f32.mrb[3].mxu1  ;;  %10918 = vmatpush3.bf16.msra.mxu0 %v13100_v30  ;;  %v13264_v30 = vld [vmem:[%s13523_s12 + $0x2f4] ss:$72 sps:$4 sm:$0xff]  }
 0x325   : > { %v15751_v50 = vadd.f32 %v6729_v45, %v15712_v29  ;;  %v15754_v51 = vadd.f32 %v7746_v46, %v15718_v33  ;;  %10919 = vmatprep.subr.bf16.mxu0 %v13104_v34  ;;  %10982 = vmatpush3.bf16.msra.mxu1 %v13109_v35 }
 0x326   : > { %8264 = vmatmul.mubr.bf16.gmra.mrb[108].mxu0 %v13258_v56  ;;  %8361 = vmatmul.mubr.bf16.gmra.mrb[108].mxu1 %v13259_v57 }
 0x327   : > { %8271 = vmatprep.mubr.bf16.mxu0 %v13260_v61  ;;  %8368 = vmatprep.mubr.bf16.mxu1 %v13261_v62 }
 0x328   : > { %10920 = vmatpush3.bf16.msra.mxu0 %v13106_v47  ;;  %10983 = vmatprep.subr.bf16.mxu1 %v13111_v48 }
 0x329   : > { %v6733_v0 = vpop.f32.mrb[4].mxu0  ;;  %v7750_v1 = vpop.f32.mrb[4].mxu1  ;;  %10921 = vmatprep.subr.bf16.mxu0 %v13110_v52  ;;  %10984 = vmatpush3.bf16.msra.mxu1 %v13113_v53 }
 0x32a   : > { %v6735_v4 = vpop.f32.mrb[5].mxu0  ;;  %v7752_v5 = vpop.f32.mrb[5].mxu1  ;;  %10985 = vmatprep.subr.bf16.mxu1 %v13114_v58  ;;  %v15787_v6 = vadd.f32 %v6733_v0, %v15704_v25  ;;  %v15790_v10 = vadd.f32 %v7750_v1, %v15709_v28  ;;  %v13267_v0 = vld [vmem:[%s13523_s12 + $0x2f8] ss:$72 sps:$4 sm:$0xff]  }
 0x32b   : > { %v6737_v7 = vpop.f32.mrb[6].mxu0  ;;  %v7754_v8 = vpop.f32.mrb[6].mxu1  ;;  %v15793_v11 = vadd.f32 %v6735_v4, %v15712_v29  ;;  %v15805_v18 = vadd.f32 %v7752_v5, %v15718_v33  ;;  %v13269_v4 = vld [vmem:[%s13523_s12 + $0x38c] ss:$72 sps:$4 sm:$0xff]  }
 0x32c   : > { %16727 = vst [vmem:[#allocation2_spill] sm:$0xff] %v15790_v10  ;;  %v15796_v12 = vadd.f32 %v6737_v7, %v15704_v25  ;;  %v15799_v14 = vadd.f32 %v7754_v8, %v15709_v28  ;;  %v6739_v15 = vpop.f32.mrb[7].mxu0  ;;  %v7756_v16 = vpop.f32.mrb[7].mxu1  ;;  %10922 = vmatpush3.bf16.msra.mxu0 %v13112_v63  ;;  %v13266_v63 = vld [vmem:[%s13523_s12 + $0x2f0] ss:$72 sps:$4 sm:$0xff]  }
 0x32d   : > { %v15808_v19 = vadd.f32 %v6739_v15, %v15712_v29  ;;  %v15811_v20 = vadd.f32 %v7756_v16, %v15718_v33  ;;  %10986 = vmatpush3.bf16.msra.mxu1 %v13115_v2  ;;  %11035 = vmatprep.subr.bf16.mxu0 %v13116_v3  ;;  %v13268_v3 = vld [vmem:[%s13523_s12 + $0x384] ss:$72 sps:$4 sm:$0xff]  }
 0x32e   : > { %16728 = vst [vmem:[#allocation3_spill] sm:$0xff] %v15799_v14  ;;  %8272 = vmatmul.mubr.bf16.gmra.mrb[112].mxu0 %v13262_v23  ;;  %8369 = vmatmul.mubr.bf16.gmra.mrb[112].mxu1 %v13263_v24  ;;  %v13118_v1 = vld [vmem:[%s16694_s1 + $0x1578] ss:$20 sps:$4 sm:$0xff]   ;;  %v13306_v14 = vld [vmem:[%s13523_s12 + $0x420] ss:$72 sps:$4 sm:$0xff]  }
 0x32f   : > { %8279 = vmatprep.mubr.bf16.mxu0 %v13264_v30  ;;  %8376 = vmatprep.mubr.bf16.mxu1 %v13265_v31  ;;  %v13304_v10 = vld [vmem:[%s13523_s12 + $0x424] ss:$72 sps:$4 sm:$0xff]  }
 0x330   : > { %11099 = vmatprep.subr.bf16.mxu1 %v13125_v17 }
 0x331   : > { %v6743_v32 = vpop.f32.mrb[8].mxu0  ;;  %v7760_v34 = vpop.f32.mrb[8].mxu1 }
 0x332   : > { %v6745_v35 = vpop.f32.mrb[9].mxu0  ;;  %v7762_v36 = vpop.f32.mrb[9].mxu1  ;;  %v15826_v40 = vadd.f32 %v6743_v32, %v15704_v25  ;;  %v15829_v45 = vadd.f32 %v7760_v34, %v15709_v28 }
 0x333   : > { %v6747_v37 = vpop.f32.mrb[10].mxu0  ;;  %v7764_v39 = vpop.f32.mrb[10].mxu1  ;;  %v15838_v53 = vadd.f32 %v6745_v35, %v15712_v29  ;;  %v15841_v56 = vadd.f32 %v7762_v36, %v15718_v33 }
 0x334   : > { %16729 = vst [vmem:[#allocation4_spill] sm:$0xff] %v15829_v45  ;;  %v15832_v46 = vadd.f32 %v6747_v37, %v15704_v25  ;;  %v15835_v47 = vadd.f32 %v7764_v39, %v15709_v28  ;;  %v6749_v48 = vpop.f32.mrb[11].mxu0  ;;  %v7766_v52 = vpop.f32.mrb[11].mxu1  ;;  %v13294_v45 = vld [vmem:[%s13523_s12 + $0x270] ss:$72 sps:$4 sm:$0xff]  }
 0x335   : > { %16731 = vst [vmem:[#allocation6_spill] sm:$0xff] %v15841_v56  ;;  %v15844_v57 = vadd.f32 %v6749_v48, %v15712_v29  ;;  %v15847_v58 = vadd.f32 %v7766_v52, %v15718_v33  ;;  %v13300_v56 = vld [vmem:[%s13523_s12 + $0x394] ss:$72 sps:$4 sm:$0xff]  }
 0x336   : > { %16730 = vst [vmem:[#allocation5_spill] sm:$0xff] %v15835_v47  ;;  %8280 = vmatmul.mubr.bf16.gmra.mrb[116].mxu0 %v13266_v63  ;;  %8377 = vmatmul.mubr.bf16.gmra.mrb[116].mxu1 %v13267_v0  ;;  %v13270_v63 = vld [vmem:[%s13523_s12 + $0x380] ss:$72 sps:$4 sm:$0xff]  }
 0x337   : > { %16732 = vst [vmem:[#allocation7_spill] sm:$0xff] %v15847_v58  ;;  %8287 = vmatprep.mubr.bf16.mxu0 %v13268_v3  ;;  %8384 = vmatprep.mubr.bf16.mxu1 %v13269_v4  ;;  %v13271_v0 = vld [vmem:[%s13523_s12 + $0x388] ss:$72 sps:$4 sm:$0xff]   ;;  %v13295_v47 = vld [vmem:[%s13523_s12 + $0x278] ss:$72 sps:$4 sm:$0xff]  }
 0x339   : > { %v6753_v5 = vpop.f32.mrb[12].mxu0  ;;  %v7770_v7 = vpop.f32.mrb[12].mxu1 }
 0x33a   : > { %v6755_v8 = vpop.f32.mrb[13].mxu0  ;;  %v7772_v15 = vpop.f32.mrb[13].mxu1  ;;  %v15862_v23 = vadd.f32 %v6753_v5, %v15704_v25  ;;  %v15865_v24 = vadd.f32 %v7770_v7, %v15709_v28  ;;  %v13272_v5 = vld [vmem:[%s13523_s12 + $0x414] ss:$72 sps:$4 sm:$0xff]  }
 0x33b   : > { %v6757_v16 = vpop.f32.mrb[14].mxu0  ;;  %v7774_v17 = vpop.f32.mrb[14].mxu1  ;;  %v15874_v35 = vadd.f32 %v6755_v8, %v15712_v29  ;;  %v15877_v36 = vadd.f32 %v7772_v15, %v15718_v33  ;;  %v13273_v7 = vld [vmem:[%s13523_s12 + $0x41c] ss:$72 sps:$4 sm:$0xff]  }
 0x33c   : > { %16733 = vst [vmem:[#allocation8_spill] sm:$0xff] %v15865_v24  ;;  %v15868_v30 = vadd.f32 %v6757_v16, %v15704_v25  ;;  %v15871_v31 = vadd.f32 %v7774_v17, %v15709_v28  ;;  %v6759_v32 = vpop.f32.mrb[15].mxu0  ;;  %v7776_v34 = vpop.f32.mrb[15].mxu1 }
 0x33d   : > { %16735 = vst [vmem:[#allocation10_spill] sm:$0xff] %v15877_v36  ;;  %v15880_v37 = vadd.f32 %v6759_v32, %v15712_v29  ;;  %v15883_v39 = vadd.f32 %v7776_v34, %v15718_v33 }
 0x33e   : > { %16734 = vst [vmem:[#allocation9_spill] sm:$0xff] %v15871_v31  ;;  %8288 = vmatmul.mubr.bf16.gmra.mrb[120].mxu0 %v13270_v63  ;;  %8385 = vmatmul.mubr.bf16.gmra.mrb[120].mxu1 %v13271_v0  ;;  %v13284_v31 = vld [vmem:[%s13523_s12 + $0x154] ss:$72 sps:$4 sm:$0xff]  }
 0x33f   : > { %16736 = vst [vmem:[#allocation11_spill] sm:$0xff] %v15883_v39  ;;  %8295 = vmatprep.mubr.bf16.mxu0 %v13272_v5  ;;  %8392 = vmatprep.mubr.bf16.mxu1 %v13273_v7 }
 0x341   : > { %v6763_v8 = vpop.f32.mrb[16].mxu0  ;;  %v7780_v15 = vpop.f32.mrb[16].mxu1 }
 0x342   : > { %v6765_v16 = vpop.f32.mrb[17].mxu0  ;;  %v7782_v17 = vpop.f32.mrb[17].mxu1  ;;  %v15898_v63 = vadd.f32 %v6763_v8, %v15704_v25  ;;  %v15901_v0 = vadd.f32 %v7780_v15, %v15709_v28 }
 0x343   : > { %v6767_v32 = vpop.f32.mrb[18].mxu0  ;;  %v7784_v34 = vpop.f32.mrb[18].mxu1  ;;  %v15910_v62 = vadd.f32 %v6765_v16, %v15712_v29  ;;  %v15913_v2 = vadd.f32 %v7782_v17, %v15718_v33 }
 0x344   : > { %16737 = vst [vmem:[#allocation12_spill] sm:$0xff] %v15901_v0  ;;  %v15904_v52 = vadd.f32 %v6767_v32, %v15704_v25  ;;  %v15907_v5 = vadd.f32 %v7784_v34, %v15709_v28  ;;  %v6769_v7 = vpop.f32.mrb[19].mxu0  ;;  %v7786_v4 = vpop.f32.mrb[19].mxu1  ;;  %v13280_v0 = vld [vmem:[%s13523_s12 + $0xc4] ss:$72 sps:$4 sm:$0xff]  }
 0x345   : > { %16739 = vst [vmem:[#allocation14_spill] sm:$0xff] %v15913_v2  ;;  %v15916_v8 = vadd.f32 %v6769_v7, %v15712_v29  ;;  %v15919_v15 = vadd.f32 %v7786_v4, %v15718_v33  ;;  %v13276_v7 = vld [vmem:[%s13523_s12 + $0x34] ss:$72 sps:$4 sm:$0xff]   ;;  %v13282_v2 = vld [vmem:[%s13523_s12 + $0xc0] ss:$72 sps:$4 sm:$0xff]  }
 0x346   : > { %16738 = vst [vmem:[#allocation13_spill] sm:$0xff] %v15907_v5  ;;  %8296 = vmatmul.mubr.bf16.gmra.mrb[124].mxu0 %v13274_v22  ;;  %8393 = vmatmul.mubr.bf16.gmra.mrb[124].mxu1 %v13275_v27  ;;  %v13277_v4 = vld [vmem:[%s13523_s12 + $0x3c] ss:$72 sps:$4 sm:$0xff]  }
 0x347   : > { %16740 = vst [vmem:[#allocation15_spill] sm:$0xff] %v15919_v15  ;;  %8433 = vmatprep.mubr.bf16.mxu0 %v13276_v7  ;;  %8530 = vmatprep.mubr.bf16.mxu1 %v13277_v4  ;;  %v13117_v22 = vld [vmem:[%s16694_s1 + $0x1410] ss:$20 sps:$4 sm:$0xff]  }
 0x348   : > { %v13283_v15 = vld [vmem:[%s13523_s12 + $0xc8] ss:$72 sps:$4 sm:$0xff]  }
 0x349   : > { %v6773_v55 = vpop.f32.mrb[20].mxu0  ;;  %v7790_v60 = vpop.f32.mrb[20].mxu1 }
 0x34a   : > { %v6775_v32 = vpop.f32.mrb[21].mxu0  ;;  %v7792_v48 = vpop.f32.mrb[21].mxu1  ;;  %v15937_v27 = vadd.f32 %v6773_v55, %v15704_v25  ;;  %v15940_v17 = vadd.f32 %v7790_v60, %v15709_v28 }
 0x34b   : > { %v6777_v3 = vpop.f32.mrb[22].mxu0  ;;  %v7794_v34 = vpop.f32.mrb[22].mxu1  ;;  %v15952_v55 = vadd.f32 %v6775_v32, %v15712_v29  ;;  %v15955_v21 = vadd.f32 %v7792_v48, %v15718_v33  ;;  %v13279_v48 = vld [vmem:[%s13523_s12 + $0x38] ss:$72 sps:$4 sm:$0xff]  }
 0x34c   : > { %16741 = vst [vmem:[#allocation16_spill] sm:$0xff] %v15940_v17  ;;  %v15943_v7 = vadd.f32 %v6777_v3, %v15704_v25  ;;  %v15946_v4 = vadd.f32 %v7794_v34, %v15709_v28  ;;  %v6779_v16 = vpop.f32.mrb[23].mxu0  ;;  %v7796_v61 = vpop.f32.mrb[23].mxu1  ;;  %v13127_v34 = vld [vmem:[%s16696_s3] sm:$0xff]   ;;  %v13119_v32 = vld [vmem:[%s16694_s1 + $0x1438] ss:$20 sps:$4 sm:$0xff]  }
 0x34d   : > { %16743 = vst [vmem:[#allocation18_spill] sm:$0xff] %v15955_v21  ;;  %v15958_v60 = vadd.f32 %v6779_v16, %v15712_v29  ;;  %v15961_v3 = vadd.f32 %v7796_v61, %v15718_v33  ;;  %v13128_v16 = vld [vmem:[%s16696_s3 + $0x48] sm:$0xff]  }
 0x34e   : > { %16742 = vst [vmem:[#allocation17_spill] sm:$0xff] %v15946_v4  ;;  %8434 = vmatmul.mubr.bf16.vlgmr.msra.gmra.mrb[128].mxu0 %v13278_v54  ;;  %8531 = vmatmul.mubr.bf16.vlgmr.msra.gmra.mrb[128].mxu1 %v13279_v48  ;;  %v13281_v54 = vld [vmem:[%s13523_s12 + $0xcc] ss:$72 sps:$4 sm:$0xff]  }
 0x34f   : > { %16744 = vst [vmem:[#allocation19_spill] sm:$0xff] %v15961_v3  ;;  %11036 = vmatpush3.bf16.msra.mxu0 %v13117_v22  ;;  %8441 = vmatprep.mubr.bf16.mxu0 %v13280_v0  ;;  %v13120_v48 = vld [vmem:[%s16694_s1 + $0x15a0] ss:$20 sps:$4 sm:$0xff]   ;;  %v13129_v22 = vld [vmem:[%s16696_s3 + $0x8] sm:$0xff]  }
 0x350   : > { %8538 = vmatprep.mubr.bf16.mxu1 %v13281_v54  ;;  %11037 = vmatprep.subr.bf16.mxu0 %v13118_v1 }
 0x351   : > { %v6783_v26 = vpop.f32.mrb[24].mxu0  ;;  %v7800_v17 = vpop.f32.mrb[24].mxu1  ;;  %11100 = vmatpush3.bf16.msra.mxu1 %v13127_v34 }
 0x352   : > { %v6785_v59 = vpop.f32.mrb[25].mxu0  ;;  %v7802_v0 = vpop.f32.mrb[25].mxu1  ;;  %11101 = vmatprep.subr.bf16.mxu1 %v13128_v16  ;;  %v15991_v54 = vadd.f32 %v6783_v26, %v15704_v25  ;;  %v15994_v1 = vadd.f32 %v7800_v17, %v15709_v28  ;;  %v13131_v26 = vld [vmem:[%s16696_s3 + $0x50] sm:$0xff]  }
 0x353   : > { %v6787_v61 = vpop.f32.mrb[26].mxu0  ;;  %v7804_v4 = vpop.f32.mrb[26].mxu1  ;;  %11038 = vmatpush3.bf16.msra.mxu0 %v13119_v32  ;;  %v13121_v32 = vld [vmem:[%s16694_s1 + $0x1460] ss:$20 sps:$4 sm:$0xff]   ;;  %v16009_v17 = vadd.f32 %v6785_v59, %v15712_v29  ;;  %v16012_v16 = vadd.f32 %v7802_v0, %v15718_v33  ;;  %v13285_v0 = vld [vmem:[%s13523_s12 + $0x15c] ss:$72 sps:$4 sm:$0xff]  }
 0x354   : > { %16745 = vst [vmem:[#allocation20_spill] sm:$0xff] %v15994_v1  ;;  %v15997_v21 = vadd.f32 %v6787_v61, %v15704_v25  ;;  %v16000_v34 = vadd.f32 %v7804_v4, %v15709_v28  ;;  %v6789_v3 = vpop.f32.mrb[27].mxu0  ;;  %v7806_v5 = vpop.f32.mrb[27].mxu1  ;;  %11039 = vmatprep.subr.bf16.mxu0 %v13120_v48  ;;  %v13122_v48 = vld [vmem:[%s16694_s1 + $0x15c8] ss:$20 sps:$4 sm:$0xff]   ;;  %v13133_v59 = vld [vmem:[%s16696_s3 + $0x10] sm:$0xff]  }
 0x355   : > { %16747 = vst [vmem:[#allocation22_spill] sm:$0xff] %v16012_v16  ;;  %v16015_v4 = vadd.f32 %v6789_v3, %v15712_v29  ;;  %v16018_v61 = vadd.f32 %v7806_v5, %v15718_v33  ;;  %11102 = vmatpush3.bf16.msra.mxu1 %v13129_v22  ;;  %v13134_v5 = vld [vmem:[%s16696_s3 + $0x58] sm:$0xff]   ;;  %v13124_v22 = vld [vmem:[%s16694_s1 + $0x15f0] ss:$20 sps:$4 sm:$0xff]  }
 0x356   : > { %16746 = vst [vmem:[#allocation21_spill] sm:$0xff] %v16000_v34  ;;  %8442 = vmatmul.mubr.bf16.gmra.mrb[132].mxu0 %v13282_v2  ;;  %8539 = vmatmul.mubr.bf16.gmra.mrb[132].mxu1 %v13283_v15  ;;  %v13123_v2 = vld [vmem:[%s16694_s1 + $0x1488] ss:$20 sps:$4 sm:$0xff]  }
 0x357   : > { %16748 = vst [vmem:[#allocation23_spill] sm:$0xff] %v16018_v61  ;;  %8449 = vmatprep.mubr.bf16.mxu0 %v13284_v31  ;;  %8546 = vmatprep.mubr.bf16.mxu1 %v13285_v0  ;;  %v13135_v31 = vld [vmem:[%s16696_s3 + $0x18] sm:$0xff]  }
 0x358   : > { %11040 = vmatpush3.bf16.msra.mxu0 %v13121_v32  ;;  %11103 = vmatprep.subr.bf16.mxu1 %v13131_v26 }
 0x359   : > { %v6793_v15 = vpop.f32.mrb[28].mxu0  ;;  %v7810_v3 = vpop.f32.mrb[28].mxu1  ;;  %11041 = vmatprep.subr.bf16.mxu0 %v13122_v48  ;;  %11104 = vmatpush3.bf16.msra.mxu1 %v13133_v59 }
 0x35a   : > { %v6795_v24 = vpop.f32.mrb[29].mxu0  ;;  %v7812_v0 = vpop.f32.mrb[29].mxu1  ;;  %11105 = vmatprep.subr.bf16.mxu1 %v13134_v5  ;;  %v16051_v32 = vadd.f32 %v6793_v15, %v15704_v25  ;;  %v16054_v34 = vadd.f32 %v7810_v3, %v15709_v28  ;;  %v13126_v15 = vld [vmem:[%s16694_s1 + $0x14b0] ss:$20 sps:$4 sm:$0xff]  }
 0x35b   : > { %v6797_v1 = vpop.f32.mrb[30].mxu0  ;;  %v7814_v26 = vpop.f32.mrb[30].mxu1  ;;  %v16057_v48 = vadd.f32 %v6795_v24, %v15712_v29  ;;  %v13137_v24 = vld [vmem:[%s16696_s3 + $0x60] sm:$0xff]   ;;  %v16072_v3 = vadd.f32 %v7812_v0, %v15718_v33 }
 0x35c   : > { %16749 = vst [vmem:[#allocation24_spill] sm:$0xff] %v16054_v34  ;;  %v16060_v59 = vadd.f32 %v6797_v1, %v15704_v25  ;;  %v16063_v16 = vadd.f32 %v7814_v26, %v15709_v28  ;;  %v6799_v61 = vpop.f32.mrb[31].mxu0  ;;  %v7816_v5 = vpop.f32.mrb[31].mxu1  ;;  %11042 = vmatpush3.bf16.msra.mxu0 %v13123_v2  ;;  %v1314_v1 = vsub.s32 4, %v15666_v9  ;;  %v13130_v2 = vld [vmem:[%s16694_s1 + $0x1618] ss:$20 sps:$4 sm:$0xff]  }
 0x35d   : > { %16751 = vst [vmem:[#allocation26_spill] sm:$0xff] %v16072_v3  ;;  %v16075_v25 = vadd.f32 %v6799_v61, %v15712_v29  ;;  %v16078_v28 = vadd.f32 %v7816_v5, %v15718_v33  ;;  %11043 = vmatprep.subr.bf16.mxu0 %v13124_v22  ;;  %11106 = vmatpush3.bf16.msra.mxu1 %v13135_v31  ;;  %v13139_v0 = vld [vmem:[%s16696_s3 + $0x20] sm:$0xff]   ;;  %v13286_v61 = vld [vmem:[%s13523_s12 + $0x150] ss:$72 sps:$4 sm:$0xff]   ;;  %v13140_v22 = vld [vmem:[%s16696_s3 + $0x68] sm:$0xff]  }
 0x35e   : > { %16750 = vst [vmem:[#allocation25_spill] sm:$0xff] %v16063_v16  ;;  %8450 = vmatmul.mubr.bf16.gmra.mrb[136].mxu0 %v13286_v61  ;;  %v13287_v9 = vld [vmem:[%s13523_s12 + $0x158] ss:$72 sps:$4 sm:$0xff]   ;;  %v13288_v5 = vld [vmem:[%s13523_s12 + $0x1e4] ss:$72 sps:$4 sm:$0xff]   ;;  %11107 = vmatprep.subr.bf16.mxu1 %v13137_v24  ;;  %v16106_v33 = vrot.slane %v15680_v13, %v1314_v1  ;;  %v13143_v3 = vld [vmem:[%s16696_s3 + $0x70] sm:$0xff]  }
 0x35f   : > { %16752 = vst [vmem:[#allocation27_spill] sm:$0xff] %v16078_v28  ;;  %8547 = vmatmul.mubr.bf16.gmra.mrb[136].mxu1 %v13287_v9  ;;  %8457 = vmatprep.mubr.bf16.mxu0 %v13288_v5  ;;  %v13289_v29 = vld [vmem:[%s13523_s12 + $0x1ec] ss:$72 sps:$4 sm:$0xff]   ;;  %v13291_v28 = vld [vmem:[%s13523_s12 + $0x1e8] ss:$72 sps:$4 sm:$0xff]  }
 0x360   : > { %8554 = vmatprep.mubr.bf16.mxu1 %v13289_v29  ;;  %11044 = vmatpush3.bf16.msra.mxu0 %v13126_v15  ;;  %v13132_v61 = vld [vmem:[%s16694_s1 + $0x14d8] ss:$20 sps:$4 sm:$0xff]   ;;  %v13136_v26 = vld [vmem:[%s16694_s1 + $0x1640] ss:$20 sps:$4 sm:$0xff]  }
 0x361   : > { %v10539_v9 = vpop.f32.mrb[32].mxu0  ;;  %v10603_v34 = vpop.f32.mrb[32].mxu1  ;;  %11045 = vmatprep.subr.bf16.mxu0 %v13130_v2  ;;  %11108 = vmatpush3.bf16.msra.mxu1 %v13139_v0  ;;  %v13141_v15 = vld [vmem:[%s16696_s3 + $0x28] sm:$0xff]   ;;  %v13138_v0 = vld [vmem:[%s16694_s1 + $0x1500] ss:$20 sps:$4 sm:$0xff]  }
 0x362   : > { %v10540_v29 = vpop.f32.mrb[33].mxu0  ;;  %v10604_v5 = vpop.f32.mrb[33].mxu1  ;;  %11109 = vmatprep.subr.bf16.mxu1 %v13140_v22 }
 0x363   : > { %v10541_v31 = vadd.f32 %v10540_v29, %v10539_v9  ;;  %v10542_v24 = vpop.f32.mrb[34].mxu0  ;;  %v10605_v16 = vadd.f32 %v10604_v5, %v10603_v34  ;;  %v10606_v13 = vpop.f32.mrb[34].mxu1  ;;  %v13142_v34 = vld [vmem:[%s16694_s1 + $0x1668] ss:$20 sps:$4 sm:$0xff]  }
 0x364   : > { %v10543_v1 = vpop.f32.mrb[35].mxu0  ;;  %v10607_v2 = vpop.f32.mrb[35].mxu1  ;;  %11046 = vmatpush3.bf16.msra.mxu0 %v13132_v61  ;;  %v13145_v61 = vld [vmem:[%s16696_s3 + $0x30] sm:$0xff]   ;;  %v13290_v5 = vld [vmem:[%s13523_s12 + $0x1e0] ss:$72 sps:$4 sm:$0xff]  }
 0x365   : > { %v7854_v22 = vadd.f32 %v10541_v31, %v16106_v33  ;;  %v10544_v9 = vadd.f32 %v10543_v1, %v10542_v24  ;;  %v10608_v29 = vadd.f32 %v10607_v2, %v10606_v13  ;;  %11047 = vmatprep.subr.bf16.mxu0 %v13136_v26  ;;  %11110 = vmatpush3.bf16.msra.mxu1 %v13141_v15  ;;  %v13146_v31 = vld [vmem:[%s16696_s3 + $0x78] sm:$0xff]  }
 0x366   : > { %8458 = vmatmul.mubr.bf16.gmra.mrb[140].mxu0 %v13290_v5  ;;  %v13292_v15 = vld [vmem:[%s13523_s12 + $0x274] ss:$72 sps:$4 sm:$0xff]   ;;  %11111 = vmatprep.subr.bf16.mxu1 %v13143_v3 }
 0x367   : > { %8555 = vmatmul.mubr.bf16.gmra.mrb[140].mxu1 %v13291_v28  ;;  %v7857_v24 = vadd.f32 %v10544_v9, %v16106_v33  ;;  %v16133_v26 = vadd.f32 %v10605_v16, %v7854_v22  ;;  %8465 = vmatprep.mubr.bf16.mxu0 %v13292_v15  ;;  %v13293_v13 = vld [vmem:[%s13523_s12 + $0x27c] ss:$72 sps:$4 sm:$0xff]  }
 0x368   : > { %8562 = vmatprep.mubr.bf16.mxu1 %v13293_v13  ;;  %11048 = vmatpush3.bf16.msra.mxu0 %v13138_v0  ;;  %v13144_v1 = vld [vmem:[%s16694_s1 + $0x1528] ss:$20 sps:$4 sm:$0xff]   ;;  %v13148_v22 = vld [vmem:[%s16696_s3 + $0xc0] sm:$0xff]  }
 0x369   : > { %v16140_v2 = vadd.f32 %v10608_v29, %v7857_v24  ;;  %v10545_v28 = vpop.f32.mrb[36].mxu0  ;;  %v10609_v5 = vpop.f32.mrb[36].mxu1  ;;  %11049 = vmatprep.subr.bf16.mxu0 %v13142_v34  ;;  %11112 = vmatpush3.bf16.msra.mxu1 %v13145_v61  ;;  %v13147_v16 = vld [vmem:[%s16696_s3 + $0x38] sm:$0xff]  }
 0x36a   : > { %v10546_v3 = vpop.f32.mrb[37].mxu0  ;;  %v10610_v0 = vpop.f32.mrb[37].mxu1  ;;  %11113 = vmatprep.subr.bf16.mxu1 %v13146_v31 }
 0x36b   : > { %v10547_v9 = vadd.f32 %v10546_v3, %v10545_v28  ;;  %v10548_v29 = vpop.f32.mrb[38].mxu0  ;;  %v10611_v24 = vadd.f32 %v10610_v0, %v10609_v5  ;;  %v10612_v15 = vpop.f32.mrb[38].mxu1  ;;  %v13296_v5 = vld [vmem:[%s13523_s12 + $0x304] ss:$72 sps:$4 sm:$0xff]  }
 0x36c   : > { %v10549_v34 = vpop.f32.mrb[39].mxu0  ;;  %v10613_v61 = vpop.f32.mrb[39].mxu1  ;;  %11050 = vmatpush3.bf16.msra.mxu0 %v13144_v1  ;;  %v13297_v3 = vld [vmem:[%s13523_s12 + $0x30c] ss:$72 sps:$4 sm:$0xff]  }
 0x36d   : > { %v7862_v13 = vadd.f32 %v10547_v9, %v16106_v33  ;;  %v10550_v36 = vadd.f32 %v10549_v34, %v10548_v29  ;;  %v10614_v39 = vadd.f32 %v10613_v61, %v10612_v15  ;;  %11114 = vmatpush3.bf16.msra.mxu1 %v13147_v16  ;;  %11163 = vmatprep.subr.bf16.mxu0 %v13148_v22 }
 0x36e   : > { %8466 = vmatmul.mubr.bf16.gmra.mrb[144].mxu0 %v13294_v45 }
 0x36f   : > { %8563 = vmatmul.mubr.bf16.gmra.mrb[144].mxu1 %v13295_v47  ;;  %v7865_v31 = vadd.f32 %v10550_v36, %v16106_v33  ;;  %v16152_v28 = vadd.f32 %v10611_v24, %v7862_v13  ;;  %8473 = vmatprep.mubr.bf16.mxu0 %v13296_v5  ;;  %v13298_v5 = vld [vmem:[%s13523_s12 + $0x300] ss:$72 sps:$4 sm:$0xff]  }
 0x370   : > { %8570 = vmatprep.mubr.bf16.mxu1 %v13297_v3 }
 0x371   : > { %v16156_v1 = vadd.f32 %v10614_v39, %v7865_v31  ;;  %v10551_v0 = vpop.f32.mrb[40].mxu0  ;;  %v10615_v9 = vpop.f32.mrb[40].mxu1  ;;  %v13299_v39 = vld [vmem:[%s13523_s12 + $0x308] ss:$72 sps:$4 sm:$0xff]  }
 0x372   : > { %v10552_v16 = vpop.f32.mrb[41].mxu0  ;;  %v10616_v22 = vpop.f32.mrb[41].mxu1 }
 0x373   : > { %v10553_v45 = vadd.f32 %v10552_v16, %v10551_v0  ;;  %v10554_v29 = vpop.f32.mrb[42].mxu0  ;;  %v10617_v47 = vadd.f32 %v10616_v22, %v10615_v9  ;;  %v10618_v36 = vpop.f32.mrb[42].mxu1  ;;  %v13301_v0 = vld [vmem:[%s13523_s12 + $0x39c] ss:$72 sps:$4 sm:$0xff]  }
 0x374   : > { %v10555_v24 = vpop.f32.mrb[43].mxu0  ;;  %v10619_v15 = vpop.f32.mrb[43].mxu1 }
 0x375   : > { %v7870_v34 = vadd.f32 %v10553_v45, %v16106_v33  ;;  %v10556_v61 = vadd.f32 %v10555_v24, %v10554_v29  ;;  %v10620_v13 = vadd.f32 %v10619_v15, %v10618_v36 }
 0x376   : > { %8474 = vmatmul.mubr.bf16.gmra.mrb[148].mxu0 %v13298_v5 }
 0x377   : > { %8571 = vmatmul.mubr.bf16.gmra.mrb[148].mxu1 %v13299_v39  ;;  %v7873_v31 = vadd.f32 %v10556_v61, %v16106_v33  ;;  %v16162_v3 = vadd.f32 %v10617_v47, %v7870_v34  ;;  %8481 = vmatprep.mubr.bf16.mxu0 %v13300_v56 }
 0x378   : > { %8578 = vmatprep.mubr.bf16.mxu1 %v13301_v0  ;;  %v13302_v0 = vld [vmem:[%s13523_s12 + $0x390] ss:$72 sps:$4 sm:$0xff]  }
 0x379   : > { %v16166_v9 = vadd.f32 %v10620_v13, %v7873_v31  ;;  %v10557_v16 = vpop.f32.mrb[44].mxu0  ;;  %v10621_v22 = vpop.f32.mrb[44].mxu1  ;;  %v13303_v13 = vld [vmem:[%s13523_s12 + $0x398] ss:$72 sps:$4 sm:$0xff]  }
 0x37a   : > { %v10558_v45 = vpop.f32.mrb[45].mxu0  ;;  %v10622_v29 = vpop.f32.mrb[45].mxu1 }
 0x37b   : > { %v10559_v36 = vadd.f32 %v10558_v45, %v10557_v16  ;;  %v10560_v24 = vpop.f32.mrb[46].mxu0  ;;  %v10623_v15 = vadd.f32 %v10622_v29, %v10621_v22  ;;  %v10624_v61 = vpop.f32.mrb[46].mxu1  ;;  %v13305_v16 = vld [vmem:[%s13523_s12 + $0x42c] ss:$72 sps:$4 sm:$0xff]  }
 0x37c   : > { %v10561_v47 = vpop.f32.mrb[47].mxu0  ;;  %v10625_v34 = vpop.f32.mrb[47].mxu1 }
 0x37d   : > { %v7878_v56 = vadd.f32 %v10559_v36, %v16106_v33  ;;  %v10562_v5 = vadd.f32 %v10561_v47, %v10560_v24  ;;  %v10626_v39 = vadd.f32 %v10625_v34, %v10624_v61 }
 0x37e   : > { %8482 = vmatmul.mubr.bf16.gmra.mrb[152].mxu0 %v13302_v0 }
 0x37f   : > { %8579 = vmatmul.mubr.bf16.gmra.mrb[152].mxu1 %v13303_v13  ;;  %v7881_v31 = vadd.f32 %v10562_v5, %v16106_v33  ;;  %v16172_v58 = vadd.f32 %v10623_v15, %v7878_v56  ;;  %8489 = vmatprep.mubr.bf16.mxu0 %v13304_v10 }
 0x380   : > { %8586 = vmatprep.mubr.bf16.mxu1 %v13305_v16 }
 0x381   : > { %v16176_v22 = vadd.f32 %v10626_v39, %v7881_v31  ;;  %v10563_v45 = vpop.f32.mrb[48].mxu0  ;;  %v10627_v29 = vpop.f32.mrb[48].mxu1  ;;  %v13307_v39 = vld [vmem:[%s13523_s12 + $0x428] ss:$72 sps:$4 sm:$0xff]  }
 0x382   : > { %v10564_v36 = vpop.f32.mrb[49].mxu0  ;;  %v10628_v24 = vpop.f32.mrb[49].mxu1 }
 0x383   : > { %v10565_v61 = vadd.f32 %v10564_v36, %v10563_v45  ;;  %v10566_v47 = vpop.f32.mrb[50].mxu0  ;;  %v10629_v34 = vadd.f32 %v10628_v24, %v10627_v29  ;;  %v10630_v0 = vpop.f32.mrb[50].mxu1  ;;  %v16753_v45 = vpack.c.bf16 %v15751_v50, %v15733_v42  ;;  %v13308_v29 = vld [vmem:[%s13523_s12 + $0x44] ss:$72 sps:$4 sm:$0xff]  }
 0x384   : > { %v10567_v5 = vpop.f32.mrb[51].mxu0  ;;  %v10631_v15 = vpop.f32.mrb[51].mxu1  ;;  %v13149_v42 = vld [vmem:[%s16696_s3 + $0x80] sm:$0xff]  }
 0x385   : > { %v7886_v56 = vadd.f32 %v10565_v61, %v16106_v33  ;;  %v10568_v10 = vadd.f32 %v10567_v5, %v10566_v47  ;;  %v10632_v13 = vadd.f32 %v10631_v15, %v10630_v0 }
 0x386   : > { %8490 = vmatmul.mubr.bf16.gmra.mrb[156].mxu0 %v13306_v14 }
 0x387   : > { %8587 = vmatmul.mubr.bf16.gmra.mrb[156].mxu1 %v13307_v39  ;;  %v7889_v31 = vadd.f32 %v10568_v10, %v16106_v33  ;;  %v16182_v16 = vadd.f32 %v10629_v34, %v7886_v56  ;;  %8627 = vmatprep.mubr.bf16.mxu0 %v13308_v29  ;;  %v16754_v29 = vpack.c.bf16 %v15736_v43, %v15727_v38  ;;  %v13152_v43 = vld [vmem:[%s16696_s3 + $0xd0] sm:$0xff]  }
 0x388   : > { %9091 = vmatprep.mubr.bf16.mxu1 %v16753_v45  ;;  %v13309_v45 = vld [vmem:[%s13523_s12 + $0x40] ss:$72 sps:$4 sm:$0xff]  }
 0x389   : > { %v16188_v36 = vadd.f32 %v10632_v13, %v7889_v31  ;;  %v10569_v24 = vpop.f32.mrb[52].mxu0  ;;  %v10633_v61 = vpop.f32.mrb[52].mxu1  ;;  %v13150_v31 = vld [vmem:[%s16696_s3 + $0xc8] sm:$0xff]  }
 0x38a   : > { %v10570_v47 = vpop.f32.mrb[53].mxu0  ;;  %v10634_v0 = vpop.f32.mrb[53].mxu1 }
 0x38b   : > { %v10571_v14 = vadd.f32 %v10570_v47, %v10569_v24  ;;  %v10572_v5 = vpop.f32.mrb[54].mxu0  ;;  %v10635_v15 = vadd.f32 %v10634_v0, %v10633_v61  ;;  %v10636_v10 = vpop.f32.mrb[54].mxu1  ;;  %v16755_v47 = vpack.c.bf16 %v15808_v19, %v15793_v11  ;;  %v13310_v0 = vld [vmem:[%s13523_s12 + $0xd4] ss:$72 sps:$4 sm:$0xff]  }
 0x38c   : > { %v10573_v34 = vpop.f32.mrb[55].mxu0  ;;  %v10637_v56 = vpop.f32.mrb[55].mxu1 }
 0x38d   : > { %v7894_v50 = vadd.f32 %v10571_v14, %v16106_v33  ;;  %v10574_v13 = vadd.f32 %v10573_v34, %v10572_v5  ;;  %v10638_v39 = vadd.f32 %v10637_v56, %v10636_v10  ;;  %v13151_v14 = vld [vmem:[%s16696_s3 + $0x88] sm:$0xff]  }
 0x38e   : > { %8628 = vmatmul.mubr.bf16.vlgmr.msra.gmra.mrb[160].mxu0 %v13309_v45 }
 0x38f   : > { %9092 = vmatmul.mubr.bf16.vlgmr.msra.gmra.mrb[160].mxu1 %v16754_v29  ;;  %v7897_v24 = vadd.f32 %v10574_v13, %v16106_v33  ;;  %v16202_v61 = vadd.f32 %v10635_v15, %v7894_v50  ;;  %8635 = vmatprep.mubr.bf16.mxu0 %v13310_v0  ;;  %v16756_v0 = vpack.c.bf16 %v15796_v12, %v15787_v6  ;;  %v13156_v12 = vld [vmem:[%s16696_s3 + $0xe0] sm:$0xff]  }
 0x390   : > { %9099 = vmatprep.mubr.bf16.mxu1 %v16755_v47  ;;  %11164 = vmatpush3.bf16.msra.mxu0 %v13149_v42  ;;  %v13311_v47 = vld [vmem:[%s13523_s12 + $0xd0] ss:$72 sps:$4 sm:$0xff]  }
 0x391   : > { %v16211_v5 = vadd.f32 %v10638_v39, %v7897_v24  ;;  %v10575_v10 = vpop.f32.mrb[56].mxu0  ;;  %v10639_v38 = vpop.f32.mrb[56].mxu1  ;;  %11165 = vmatprep.subr.bf16.mxu0 %v13150_v31  ;;  %v13153_v39 = vld [vmem:[%s16696_s3 + $0x90] sm:$0xff]   ;;  %v13154_v24 = vld [vmem:[%s16696_s3 + $0xd8] sm:$0xff]  }
 0x392   : > { %v10576_v15 = vpop.f32.mrb[57].mxu0  ;;  %v10640_v11 = vpop.f32.mrb[57].mxu1 }
 0x393   : > { %v10577_v19 = vadd.f32 %v10576_v15, %v10575_v10  ;;  %v10578_v34 = vpop.f32.mrb[58].mxu0  ;;  %v10641_v56 = vadd.f32 %v10640_v11, %v10639_v38  ;;  %v10642_v42 = vpop.f32.mrb[58].mxu1  ;;  %v16757_v38 = vpack.c.bf16 %v15844_v57, %v15838_v53  ;;  %v13312_v15 = vld [vmem:[%s13523_s12 + $0x164] ss:$72 sps:$4 sm:$0xff]  }
 0x394   : > { %v10579_v50 = vpop.f32.mrb[59].mxu0  ;;  %v10643_v13 = vpop.f32.mrb[59].mxu1  ;;  %11166 = vmatpush3.bf16.msra.mxu0 %v13151_v14 }
 0x395   : > { %v7902_v31 = vadd.f32 %v10577_v19, %v16106_v33  ;;  %v10580_v45 = vadd.f32 %v10579_v50, %v10578_v34  ;;  %v10644_v29 = vadd.f32 %v10643_v13, %v10642_v42  ;;  %11167 = vmatprep.subr.bf16.mxu0 %v13152_v43  ;;  %v13155_v43 = vld [vmem:[%s16696_s3 + $0x98] sm:$0xff]  }
 0x396   : > { %8636 = vmatmul.mubr.bf16.gmra.mrb[164].mxu0 %v13311_v47  ;;  %v13158_v47 = vld [vmem:[%s16696_s3 + $0xe8] sm:$0xff]  }
 0x397   : > { %9100 = vmatmul.mubr.bf16.gmra.mrb[164].mxu1 %v16756_v0  ;;  %v7905_v14 = vadd.f32 %v10580_v45, %v16106_v33  ;;  %v16228_v10 = vadd.f32 %v10641_v56, %v7902_v31  ;;  %8643 = vmatprep.mubr.bf16.mxu0 %v13312_v15  ;;  %v13157_v31 = vld [vmem:[%s16696_s3 + $0xa0] sm:$0xff]  }
 0x398   : > { %9107 = vmatprep.mubr.bf16.mxu1 %v16757_v38  ;;  %11168 = vmatpush3.bf16.msra.mxu0 %v13153_v39  ;;  %v13313_v0 = vld [vmem:[%s13523_s12 + $0x160] ss:$72 sps:$4 sm:$0xff]  }
 0x399   : > { %v16237_v11 = vadd.f32 %v10644_v29, %v7905_v14  ;;  %v10581_v19 = vpop.f32.mrb[60].mxu0  ;;  %v10645_v6 = vpop.f32.mrb[60].mxu1  ;;  %11169 = vmatprep.subr.bf16.mxu0 %v13154_v24  ;;  %v16758_v14 = vpack.c.bf16 %v15832_v46, %v15826_v40  ;;  %v13160_v46 = vld [vmem:[%s16696_s3 + $0xf0] sm:$0xff]  }
 0x39a   : > { %v10582_v34 = vpop.f32.mrb[61].mxu0  ;;  %v10646_v53 = vpop.f32.mrb[61].mxu1 }
 0x39b   : > { %v10583_v57 = vadd.f32 %v10582_v34, %v10581_v19  ;;  %v10584_v56 = vpop.f32.mrb[62].mxu0  ;;  %v10647_v42 = vadd.f32 %v10646_v53, %v10645_v6  ;;  %v10648_v50 = vpop.f32.mrb[62].mxu1  ;;  %v13314_v19 = vld [vmem:[%s13523_s12 + $0x1f4] ss:$72 sps:$4 sm:$0xff]   ;;  %v13159_v6 = vld [vmem:[%s16696_s3 + $0xa8] sm:$0xff]  }
 0x39c   : > { %v10585_v13 = vpop.f32.mrb[63].mxu0  ;;  %v10649_v39 = vpop.f32.mrb[63].mxu1  ;;  %11170 = vmatpush3.bf16.msra.mxu0 %v13155_v43  ;;  %v16759_v43 = vpack.c.bf16 %v15880_v37, %v15874_v35 }
 0x39d   : > { %v7910_v45 = vadd.f32 %v10583_v57, %v16106_v33  ;;  %v10586_v29 = vadd.f32 %v10585_v13, %v10584_v56  ;;  %v10650_v24 = vadd.f32 %v10649_v39, %v10648_v50  ;;  %11171 = vmatprep.subr.bf16.mxu0 %v13156_v12  ;;  %v13161_v13 = vld [vmem:[%s16696_s3 + $0xb0] sm:$0xff]  }
 0x39e   : > { %8644 = vmatmul.mubr.bf16.gmra.mrb[168].mxu0 %v13313_v0 }
 0x39f   : > { %9108 = vmatmul.mubr.bf16.gmra.mrb[168].mxu1 %v16758_v14  ;;  %v7913_v38 = vadd.f32 %v10586_v29, %v16106_v33  ;;  %v16254_v15 = vadd.f32 %v10647_v42, %v7910_v45  ;;  %8651 = vmatprep.mubr.bf16.mxu0 %v13314_v19  ;;  %v13162_v29 = vld [vmem:[%s16696_s3 + $0xf8] sm:$0xff]  }
 0x3a0   : > { %9115 = vmatprep.mubr.bf16.mxu1 %v16759_v43  ;;  %11172 = vmatpush3.bf16.msra.mxu0 %v13157_v31  ;;  %v13163_v43 = vld [vmem:[%s16696_s3 + $0xb8] sm:$0xff]  }
 0x3a1   : > { %v16263_v12 = vadd.f32 %v10650_v24, %v7913_v38  ;;  %v10667_v34 = vpop.f32.mrb[64].mxu0  ;;  %v10731_v40 = vpop.f32.mrb[64].mxu1  ;;  %11173 = vmatprep.subr.bf16.mxu0 %v13158_v47  ;;  %v13315_v24 = vld [vmem:[%s13523_s12 + $0x1f0] ss:$72 sps:$4 sm:$0xff]   ;;  %v16760_v47 = vpack.c.bf16 %v15868_v30, %v15862_v23  ;;  %v13316_v38 = vld [vmem:[%s13523_s12 + $0x284] ss:$72 sps:$4 sm:$0xff]  }
 0x3a2   : > { %v10668_v33 = vpop.f32.mrb[65].mxu0  ;;  %v10732_v35 = vpop.f32.mrb[65].mxu1 }
 0x3a3   : > { %v10669_v37 = vadd.f32 %v10668_v33, %v10667_v34  ;;  %v10670_v53 = vpop.f32.mrb[66].mxu0  ;;  %v10733_v57 = vadd.f32 %v10732_v35, %v10731_v40  ;;  %v10734_v56 = vpop.f32.mrb[66].mxu1 }
 0x3a4   : > { %v10671_v42 = vpop.f32.mrb[67].mxu0  ;;  %v10735_v50 = vpop.f32.mrb[67].mxu1  ;;  %11174 = vmatpush3.bf16.msra.mxu0 %v13159_v6 }
 0x3a5   : > { %v8048_v39 = vadd.f32 %v10669_v37, %v16133_v26  ;;  %v10672_v31 = vadd.f32 %v10671_v42, %v10670_v53  ;;  %v10736_v45 = vadd.f32 %v10735_v50, %v10734_v56  ;;  %11175 = vmatprep.subr.bf16.mxu0 %v13160_v46  ;;  %v16761_v26 = vpack.c.bf16 %v15916_v8, %v15910_v62 }
 0x3a6   : > { %8652 = vmatmul.mubr.bf16.gmra.mrb[172].mxu0 %v13315_v24  ;;  %v16762_v56 = vpack.c.bf16 %v15904_v52, %v15898_v63 }
 0x3a7   : > { %9116 = vmatmul.mubr.bf16.gmra.mrb[172].mxu1 %v16760_v47  ;;  %v8051_v0 = vadd.f32 %v10672_v31, %v16140_v2  ;;  %v16280_v14 = vadd.f32 %v10733_v57, %v8048_v39  ;;  %8659 = vmatprep.mubr.bf16.mxu0 %v13316_v38  ;;  %v13317_v57 = vld [vmem:[%s13523_s12 + $0x280] ss:$72 sps:$4 sm:$0xff]   ;;  %v13318_v39 = vld [vmem:[%s13523_s12 + $0x314] ss:$72 sps:$4 sm:$0xff]  }
 0x3a8   : > { %9123 = vmatprep.mubr.bf16.mxu1 %v16761_v26  ;;  %11176 = vmatpush3.bf16.msra.mxu0 %v13161_v13  ;;  %v16763_v13 = vpack.c.bf16 %v15958_v60, %v15952_v55 }
 0x3a9   : > { %v16289_v19 = vadd.f32 %v10736_v45, %v8051_v0  ;;  %v10673_v23 = vpop.f32.mrb[68].mxu0  ;;  %v10737_v30 = vpop.f32.mrb[68].mxu1  ;;  %11177 = vmatprep.subr.bf16.mxu0 %v13162_v29 }
 0x3aa   : > { %v10674_v2 = vpop.f32.mrb[69].mxu0  ;;  %v10738_v6 = vpop.f32.mrb[69].mxu1 }
 0x3ab   : > { %v10675_v34 = vadd.f32 %v10674_v2, %v10673_v23  ;;  %v10676_v40 = vpop.f32.mrb[70].mxu0  ;;  %v10739_v62 = vadd.f32 %v10738_v6, %v10737_v30  ;;  %v10740_v8 = vpop.f32.mrb[70].mxu1  ;;  %v16764_v23 = vpack.c.bf16 %v15943_v7, %v15937_v27  ;;  %v16765_v6 = vpack.c.bf16 %v16015_v4, %v16009_v17 }
 0x3ac   : > { %v10677_v46 = vpop.f32.mrb[71].mxu0  ;;  %v10741_v33 = vpop.f32.mrb[71].mxu1  ;;  %11178 = vmatpush3.bf16.msra.mxu0 %v13163_v43  ;;  %v13319_v43 = vld [vmem:[%s13523_s12 + $0x310] ss:$72 sps:$4 sm:$0xff]  }
 0x3ad   : > { %v8056_v35 = vadd.f32 %v10675_v34, %v16152_v28  ;;  %v10678_v37 = vadd.f32 %v10677_v46, %v10676_v40  ;;  %v10742_v53 = vadd.f32 %v10741_v33, %v10740_v8  ;;  %v13320_v34 = vld [vmem:[%s13523_s12 + $0x3a4] ss:$72 sps:$4 sm:$0xff]  }
 0x3ae   : > { %8660 = vmatmul.mubr.bf16.gmra.mrb[176].mxu0 %v13317_v57  ;;  %v13321_v57 = vld [vmem:[%s13523_s12 + $0x3a0] ss:$72 sps:$4 sm:$0xff]  }
 0x3af   : > { %9124 = vmatmul.mubr.bf16.gmra.mrb[176].mxu1 %v16762_v56  ;;  %v8059_v42 = vadd.f32 %v10678_v37, %v16156_v1  ;;  %v16297_v50 = vadd.f32 %v10739_v62, %v8056_v35  ;;  %8667 = vmatprep.mubr.bf16.mxu0 %v13318_v39  ;;  %v16766_v56 = vpack.c.bf16 %v15997_v21, %v15991_v54 }
 0x3b0   : > { %9131 = vmatprep.mubr.bf16.mxu1 %v16763_v13  ;;  %v16767_v39 = vpack.c.bf16 %v16075_v25, %v16057_v48  ;;  %v13323_v25 = vld [vmem:[%s13523_s12 + $0x430] ss:$72 sps:$4 sm:$0xff]  }
 0x3b1   : > { %v16303_v28 = vadd.f32 %v10742_v53, %v8059_v42  ;;  %v10679_v31 = vpop.f32.mrb[72].mxu0  ;;  %v10743_v45 = vpop.f32.mrb[72].mxu1 }
 0x3b2   : > { %v10680_v29 = vpop.f32.mrb[73].mxu0  ;;  %v10744_v24 = vpop.f32.mrb[73].mxu1 }
 0x3b3   : > { %v10681_v52 = vadd.f32 %v10680_v29, %v10679_v31  ;;  %v10682_v63 = vpop.f32.mrb[74].mxu0  ;;  %v10745_v47 = vadd.f32 %v10744_v24, %v10743_v45  ;;  %v10746_v1 = vpop.f32.mrb[74].mxu1  ;;  %v13322_v31 = vld [vmem:[%s13523_s12 + $0x434] ss:$72 sps:$4 sm:$0xff]  }
 0x3b4   : > { %v10683_v0 = vpop.f32.mrb[75].mxu0  ;;  %v10747_v26 = vpop.f32.mrb[75].mxu1 }
 0x3b5   : > { %v8064_v38 = vadd.f32 %v10681_v52, %v16162_v3  ;;  %v10684_v55 = vadd.f32 %v10683_v0, %v10682_v63  ;;  %v10748_v60 = vadd.f32 %v10747_v26, %v10746_v1 }
 0x3b6   : > { %8668 = vmatmul.mubr.bf16.gmra.mrb[180].mxu0 %v13319_v43  ;;  %v16769_v43 = vpack.c.bf16 %v15754_v51, %v15748_v49  ;;  %v13164_v49 = vld [vmem:[%s16696_s3 + $0x100] sm:$0xff]   ;;  %v16770_v51 = vpack.c.bf16 %v15739_v44, %v15730_v41 }
 0x3b7   : > { %9132 = vmatmul.mubr.bf16.gmra.mrb[180].mxu1 %v16764_v23  ;;  %v8067_v30 = vadd.f32 %v10684_v55, %v16166_v9  ;;  %v16311_v2 = vadd.f32 %v10745_v47, %v8064_v38  ;;  %8675 = vmatprep.mubr.bf16.mxu0 %v13320_v34  ;;  %v16768_v38 = vpack.c.bf16 %v16060_v59, %v16051_v32 }
 0x3b8   : > { %9139 = vmatprep.mubr.bf16.mxu1 %v16765_v6  ;;  %11259 = vmatprep.subr.bf16.mxu1 %v13164_v49 }
 0x3b9   : > { %v16317_v3 = vadd.f32 %v10748_v60, %v8067_v30  ;;  %v10685_v40 = vpop.f32.mrb[76].mxu0  ;;  %v10749_v62 = vpop.f32.mrb[76].mxu1  ;;  %11260 = vmatpush3.bf16.msra.mxu1 %v13164_v49 }
 0x3ba   : > { %v10686_v8 = vpop.f32.mrb[77].mxu0  ;;  %v10750_v46 = vpop.f32.mrb[77].mxu1 }
 0x3bb   : > { %v10687_v27 = vadd.f32 %v10686_v8, %v10685_v40  ;;  %v10688_v7 = vpop.f32.mrb[78].mxu0  ;;  %v10751_v33 = vadd.f32 %v10750_v46, %v10749_v62  ;;  %v10752_v9 = vpop.f32.mrb[78].mxu1 }
 0x3bc   : > { %v10689_v35 = vpop.f32.mrb[79].mxu0  ;;  %v10753_v37 = vpop.f32.mrb[79].mxu1 }
 0x3bd   : > { %v8072_v53 = vadd.f32 %v10687_v27, %v16172_v58  ;;  %v10690_v17 = vadd.f32 %v10689_v35, %v10688_v7  ;;  %v10754_v4 = vadd.f32 %v10753_v37, %v10752_v9  ;;  %v16771_v35 = vpack.c.bf16 %v15811_v20, %v15805_v18  ;;  %v13165_v18 = vld [vmem:[%s16696_s3 + $0x108] sm:$0xff]  }
 0x3be   : > { %8676 = vmatmul.mubr.bf16.gmra.mrb[184].mxu0 %v13321_v57  ;;  %v16772_v20 = vld [vmem:[#allocation3_spill] sm:$0xff]  ;;  %11261 = vmatprep.subr.bf16.mxu1 %v13165_v18 }
 0x3bf   : > { %9140 = vmatmul.mubr.bf16.gmra.mrb[184].mxu1 %v16766_v56  ;;  %v8075_v42 = vadd.f32 %v10690_v17, %v16176_v22  ;;  %v16325_v13 = vadd.f32 %v10751_v33, %v8072_v53  ;;  %8683 = vmatprep.mubr.bf16.mxu0 %v13322_v31 }
 0x3c0   : > { %9147 = vmatprep.mubr.bf16.mxu1 %v16767_v39  ;;  %11262 = vmatpush3.bf16.msra.mxu1 %v13165_v18 }
 0x3c1   : > { %v16331_v58 = vadd.f32 %v10754_v4, %v8075_v42  ;;  %v10691_v45 = vpop.f32.mrb[80].mxu0  ;;  %v10755_v29 = vpop.f32.mrb[80].mxu1 }
 0x3c2   : > { %v10692_v24 = vpop.f32.mrb[81].mxu0  ;;  %v10756_v52 = vpop.f32.mrb[81].mxu1 }
 0x3c3   : > { %v10693_v63 = vadd.f32 %v10692_v24, %v10691_v45  ;;  %v10694_v21 = vpop.f32.mrb[82].mxu0  ;;  %v10757_v54 = vadd.f32 %v10756_v52, %v10755_v29  ;;  %v10758_v47 = vpop.f32.mrb[82].mxu1  ;;  %v16773_v29 = vld [vmem:[#allocation2_spill] sm:$0xff] }
 0x3c4   : > { %v10695_v22 = vpop.f32.mrb[83].mxu0  ;;  %v10759_v1 = vpop.f32.mrb[83].mxu1  ;;  %v16774_v24 = vpack.c.bf16 %v16772_v20, %v16773_v29  ;;  %v16787_v29 = vld [vmem:[#allocation15_spill] sm:$0xff] }
 0x3c5   : > { %v8080_v0 = vadd.f32 %v10693_v63, %v16182_v16  ;;  %v10696_v26 = vadd.f32 %v10695_v22, %v10694_v21  ;;  %v10760_v48 = vadd.f32 %v10759_v1, %v10758_v47  ;;  %v16775_v21 = vld [vmem:[#allocation7_spill] sm:$0xff] }
 0x3c6   : > { %8684 = vmatmul.mubr.bf16.gmra.mrb[188].mxu0 %v13323_v25 }
 0x3c7   : > { %9148 = vmatmul.mubr.bf16.gmra.mrb[188].mxu1 %v16768_v38  ;;  %v8083_v55 = vadd.f32 %v10696_v26, %v16188_v36  ;;  %v16339_v60 = vadd.f32 %v10757_v54, %v8080_v0  ;;  %9188 = vmatprep.mubr.bf16.mxu0 %v16769_v43  ;;  %v16776_v54 = vld [vmem:[#allocation6_spill] sm:$0xff]  ;;  %v13166_v0 = vld [vmem:[%s16696_s3 + $0x110] sm:$0xff]  }
 0x3c8   : > { %v16777_v47 = vpack.c.bf16 %v16775_v21, %v16776_v54  ;;  %11263 = vmatprep.subr.bf16.mxu1 %v13166_v0 }
 0x3c9   : > { %v16344_v23 = vadd.f32 %v10760_v48, %v8083_v55  ;;  %v10697_v30 = vpop.f32.mrb[84].mxu0  ;;  %v10761_v16 = vpop.f32.mrb[84].mxu1  ;;  %11264 = vmatpush3.bf16.msra.mxu1 %v13166_v0 }
 0x3ca   : > { %v10698_v6 = vpop.f32.mrb[85].mxu0  ;;  %v10762_v34 = vpop.f32.mrb[85].mxu1 }
 0x3cb   : > { %v10699_v40 = vadd.f32 %v10698_v6, %v10697_v30  ;;  %v10700_v62 = vpop.f32.mrb[86].mxu0  ;;  %v10763_v8 = vadd.f32 %v10762_v34, %v10761_v16  ;;  %v10764_v46 = vpop.f32.mrb[86].mxu1 }
 0x3cc   : > { %v10701_v32 = vpop.f32.mrb[87].mxu0  ;;  %v10765_v59 = vpop.f32.mrb[87].mxu1 }
 0x3cd   : > { %v8088_v36 = vadd.f32 %v10699_v40, %v16202_v61  ;;  %v10702_v27 = vadd.f32 %v10701_v32, %v10700_v62  ;;  %v10766_v7 = vadd.f32 %v10765_v59, %v10764_v46  ;;  %v13167_v40 = vld [vmem:[%s16696_s3 + $0x118] sm:$0xff]  }
 0x3ce   : > { %9189 = vmatmul.mubr.bf16.vlgmr.msra.gmra.mrb[192].mxu0 %v16770_v51  ;;  %v16778_v62 = vld [vmem:[#allocation5_spill] sm:$0xff]  ;;  %11265 = vmatprep.subr.bf16.mxu1 %v13167_v40 }
 0x3cf   : > { %v8091_v33 = vadd.f32 %v10702_v27, %v16211_v5  ;;  %v16354_v9 = vadd.f32 %v10763_v8, %v8088_v36  ;;  %9196 = vmatprep.mubr.bf16.mxu0 %v16771_v35  ;;  %v16779_v8 = vld [vmem:[#allocation4_spill] sm:$0xff]  ;;  %v16781_v36 = vld [vmem:[#allocation11_spill] sm:$0xff]  ;;  %v16782_v27 = vld [vmem:[#allocation10_spill] sm:$0xff]  ;;  %11266 = vmatpush3.bf16.msra.mxu1 %v13167_v40 }
 0x3d0   : > { %v16780_v46 = vpack.c.bf16 %v16778_v62, %v16779_v8  ;;  %v16793_v8 = vld [vmem:[#allocation19_spill] sm:$0xff] }
 0x3d1   : > { %v16359_v61 = vadd.f32 %v10766_v7, %v8091_v33  ;;  %v10703_v37 = vpop.f32.mrb[88].mxu0  ;;  %v10767_v53 = vpop.f32.mrb[88].mxu1  ;;  %v16783_v7 = vpack.c.bf16 %v16781_v36, %v16782_v27  ;;  %v13168_v33 = vld [vmem:[%s16696_s3 + $0x120] sm:$0xff]  }
 0x3d2   : > { %v10704_v17 = vpop.f32.mrb[89].mxu0  ;;  %v10768_v4 = vpop.f32.mrb[89].mxu1  ;;  %11267 = vmatprep.subr.bf16.mxu1 %v13168_v33 }
 0x3d3   : > { %v10705_v57 = vadd.f32 %v10704_v17, %v10703_v37  ;;  %v10706_v56 = vpop.f32.mrb[90].mxu0  ;;  %v10769_v41 = vadd.f32 %v10768_v4, %v10767_v53  ;;  %v10770_v44 = vpop.f32.mrb[90].mxu1  ;;  %11268 = vmatpush3.bf16.msra.mxu1 %v13168_v33 }
 0x3d4   : > { %v10707_v42 = vpop.f32.mrb[91].mxu0  ;;  %v10771_v5 = vpop.f32.mrb[91].mxu1 }
 0x3d5   : > { %v8096_v39 = vadd.f32 %v10705_v57, %v16228_v10  ;;  %v10708_v31 = vadd.f32 %v10707_v42, %v10706_v56  ;;  %v10772_v45 = vadd.f32 %v10771_v5, %v10770_v44  ;;  %v13169_v5 = vld [vmem:[%s16696_s3 + $0x128] sm:$0xff]  }
 0x3d6   : > { %9197 = vmatmul.mubr.bf16.gmra.mrb[196].mxu0 %v16774_v24  ;;  %v16788_v24 = vld [vmem:[#allocation14_spill] sm:$0xff]  ;;  %11269 = vmatprep.subr.bf16.mxu1 %v13169_v5 }
 0x3d7   : > { %v8099_v52 = vadd.f32 %v10708_v31, %v16237_v11  ;;  %v16369_v63 = vadd.f32 %v10769_v41, %v8096_v39  ;;  %9204 = vmatprep.mubr.bf16.mxu0 %v16777_v47  ;;  %v16784_v39 = vld [vmem:[#allocation9_spill] sm:$0xff]  ;;  %v16785_v31 = vld [vmem:[#allocation8_spill] sm:$0xff]  ;;  %11270 = vmatpush3.bf16.msra.mxu1 %v13169_v5  ;;  %v16799_v5 = vld [vmem:[#allocation23_spill] sm:$0xff] }
 0x3d8   : > { %v13170_v47 = vld [vmem:[%s16696_s3 + $0x130] sm:$0xff]  }
 0x3d9   : > { %v16374_v10 = vadd.f32 %v10772_v45, %v8099_v52  ;;  %v10709_v22 = vpop.f32.mrb[92].mxu0  ;;  %v10773_v1 = vpop.f32.mrb[92].mxu1  ;;  %v16786_v45 = vpack.c.bf16 %v16784_v39, %v16785_v31  ;;  %v16789_v52 = vpack.c.bf16 %v16787_v29, %v16788_v24  ;;  %11271 = vmatprep.subr.bf16.mxu1 %v13170_v47  ;;  %v16800_v39 = vld [vmem:[#allocation22_spill] sm:$0xff] }
 0x3da   : > { %v10710_v26 = vpop.f32.mrb[93].mxu0  ;;  %v10774_v48 = vpop.f32.mrb[93].mxu1  ;;  %v16801_v31 = vpack.c.bf16 %v16799_v5, %v16800_v39 }
 0x3db   : > { %v10711_v25 = vadd.f32 %v10710_v26, %v10709_v22  ;;  %v10712_v11 = vpop.f32.mrb[94].mxu0  ;;  %v10775_v38 = vadd.f32 %v10774_v48, %v10773_v1  ;;  %v10776_v55 = vpop.f32.mrb[94].mxu1  ;;  %11272 = vmatpush3.bf16.msra.mxu1 %v13170_v47 }
 0x3dc   : > { %v10713_v43 = vpop.f32.mrb[95].mxu0  ;;  %v10777_v30 = vpop.f32.mrb[95].mxu1 }
 0x3dd   : > { %v8104_v16 = vadd.f32 %v10711_v25, %v16254_v15  ;;  %v10714_v6 = vadd.f32 %v10713_v43, %v10712_v11  ;;  %v10778_v34 = vadd.f32 %v10777_v30, %v10776_v55  ;;  %v13171_v30 = vld [vmem:[%s16696_s3 + $0x138] sm:$0xff]  }
 0x3de   : > { %9205 = vmatmul.mubr.bf16.gmra.mrb[200].mxu0 %v16780_v46  ;;  %v16794_v46 = vld [vmem:[#allocation18_spill] sm:$0xff]  ;;  %11273 = vmatprep.subr.bf16.mxu1 %v13171_v30 }
 0x3df   : > { %v8107_v32 = vadd.f32 %v10714_v6, %v16263_v12  ;;  %v16387_v59 = vadd.f32 %v10775_v38, %v8104_v16  ;;  %9212 = vmatprep.mubr.bf16.mxu0 %v16783_v7  ;;  %v16790_v16 = vld [vmem:[#allocation13_spill] sm:$0xff]  ;;  %v16791_v6 = vld [vmem:[#allocation12_spill] sm:$0xff]  ;;  %11274 = vmatpush3.bf16.msra.mxu1 %v13171_v30 }
 0x3e1   : > { %v16392_v15 = vadd.f32 %v10778_v34, %v8107_v32  ;;  %v10795_v49 = vpop.f32.mrb[96].mxu0  ;;  %v10859_v51 = vpop.f32.mrb[96].mxu1  ;;  %v16792_v34 = vpack.c.bf16 %v16790_v16, %v16791_v6  ;;  %v16795_v32 = vpack.c.bf16 %v16793_v8, %v16794_v46 }
 0x3e2   : > { %v10796_v35 = vpop.f32.mrb[97].mxu0  ;;  %v10860_v37 = vpop.f32.mrb[97].mxu1 }
 0x3e3   : > { %v10797_v53 = vadd.f32 %v10796_v35, %v10795_v49  ;;  %v10798_v12 = vpop.f32.mrb[98].mxu0  ;;  %v10861_v17 = vadd.f32 %v10860_v37, %v10859_v51  ;;  %v10862_v4 = vpop.f32.mrb[98].mxu1 }
 0x3e4   : > { %v10799_v57 = vpop.f32.mrb[99].mxu0  ;;  %v10863_v56 = vpop.f32.mrb[99].mxu1 }
 0x3e5   : > { %v8242_v41 = vadd.f32 %v10797_v53, %v16280_v14  ;;  %v10800_v44 = vadd.f32 %v10799_v57, %v10798_v12  ;;  %v10864_v42 = vadd.f32 %v10863_v56, %v10862_v4  ;;  %v16796_v57 = vld [vmem:[#allocation17_spill] sm:$0xff]  ;;  %v16797_v56 = vld [vmem:[#allocation16_spill] sm:$0xff] }
 0x3e6   : > { %9213 = vmatmul.mubr.bf16.gmra.mrb[204].mxu0 %v16786_v45 }
 0x3e7   : > { %v8245_v18 = vadd.f32 %v10800_v44, %v16289_v19  ;;  %v16405_v20 = vadd.f32 %v10861_v17, %v8242_v41  ;;  %9220 = vmatprep.mubr.bf16.mxu0 %v16789_v52  ;;  %v16798_v41 = vpack.c.bf16 %v16796_v57, %v16797_v56 }
 0x3e9   : > { %v16410_v14 = vadd.f32 %v10864_v42, %v8245_v18  ;;  %v10801_v21 = vpop.f32.mrb[100].mxu0  ;;  %v10865_v54 = vpop.f32.mrb[100].mxu1 }
 0x3ea   : > { %v10802_v22 = vpop.f32.mrb[101].mxu0  ;;  %v10866_v1 = vpop.f32.mrb[101].mxu1 }
 0x3eb   : > { %v10803_v0 = vadd.f32 %v10802_v22, %v10801_v21  ;;  %v10804_v19 = vpop.f32.mrb[102].mxu0  ;;  %v10867_v26 = vadd.f32 %v10866_v1, %v10865_v54  ;;  %v10868_v48 = vpop.f32.mrb[102].mxu1 }
 0x3ec   : > { %v10805_v25 = vpop.f32.mrb[103].mxu0  ;;  %v10869_v11 = vpop.f32.mrb[103].mxu1 }
 0x3ed   : > { %v8250_v38 = vadd.f32 %v10803_v0, %v16297_v50  ;;  %v10806_v55 = vadd.f32 %v10805_v25, %v10804_v19  ;;  %v10870_v43 = vadd.f32 %v10869_v11, %v10868_v48  ;;  %v16803_v48 = vld [vmem:[#allocation20_spill] sm:$0xff] }
 0x3ee   : > { %9221 = vmatmul.mubr.bf16.gmra.mrb[208].mxu0 %v16792_v34 }
 0x3ef   : > { %v8253_v40 = vadd.f32 %v10806_v55, %v16303_v28  ;;  %v16423_v62 = vadd.f32 %v10867_v26, %v8250_v38  ;;  %9228 = vmatprep.mubr.bf16.mxu0 %v16795_v32  ;;  %v16802_v26 = vld [vmem:[#allocation21_spill] sm:$0xff]  ;;  %v16805_v55 = vld [vmem:[#allocation27_spill] sm:$0xff] }
 0x3f0   : > { %v16804_v25 = vpack.c.bf16 %v16802_v26, %v16803_v48 }
 0x3f1   : > { %v16428_v50 = vadd.f32 %v10870_v43, %v8253_v40  ;;  %v10807_v36 = vpop.f32.mrb[104].mxu0  ;;  %v10871_v27 = vpop.f32.mrb[104].mxu1  ;;  %v16806_v43 = vld [vmem:[#allocation26_spill] sm:$0xff] }
 0x3f2   : > { %v10808_v7 = vpop.f32.mrb[105].mxu0  ;;  %v10872_v49 = vpop.f32.mrb[105].mxu1  ;;  %v16807_v30 = vpack.c.bf16 %v16805_v55, %v16806_v43 }
 0x3f3   : > { %v10809_v51 = vadd.f32 %v10808_v7, %v10807_v36  ;;  %v10810_v33 = vpop.f32.mrb[106].mxu0  ;;  %v10873_v35 = vadd.f32 %v10872_v49, %v10871_v27  ;;  %v10874_v37 = vpop.f32.mrb[106].mxu1 }
 0x3f4   : > { %v10811_v53 = vpop.f32.mrb[107].mxu0  ;;  %v10875_v28 = vpop.f32.mrb[107].mxu1 }
 0x3f5   : > { %v8258_v12 = vadd.f32 %v10809_v51, %v16311_v2  ;;  %v10812_v17 = vadd.f32 %v10811_v53, %v10810_v33  ;;  %v10876_v4 = vadd.f32 %v10875_v28, %v10874_v37  ;;  %v16808_v33 = vld [vmem:[#allocation25_spill] sm:$0xff] }
 0x3f6   : > { %9229 = vmatmul.mubr.bf16.gmra.mrb[212].mxu0 %v16798_v41 }
 0x3f7   : > { %v8261_v44 = vadd.f32 %v10812_v17, %v16317_v3  ;;  %v16435_v42 = vadd.f32 %v10873_v35, %v8258_v12  ;;  %9236 = vmatprep.mubr.bf16.mxu0 %v16801_v31  ;;  %v16809_v35 = vld [vmem:[#allocation24_spill] sm:$0xff] }
 0x3f8   : > { %v16810_v37 = vpack.c.bf16 %v16808_v33, %v16809_v35 }
 0x3f9   : > { %v16440_v45 = vadd.f32 %v10876_v4, %v8261_v44  ;;  %v10813_v18 = vpop.f32.mrb[108].mxu0  ;;  %v10877_v29 = vpop.f32.mrb[108].mxu1 }
 0x3fa   : > { %v10814_v24 = vpop.f32.mrb[109].mxu0  ;;  %v10878_v2 = vpop.f32.mrb[109].mxu1 }
 0x3fb   : > { %v10815_v52 = vadd.f32 %v10814_v24, %v10813_v18  ;;  %v10816_v21 = vpop.f32.mrb[110].mxu0  ;;  %v10879_v54 = vadd.f32 %v10878_v2, %v10877_v29  ;;  %v10880_v47 = vpop.f32.mrb[110].mxu1 }
 0x3fc   : > { %v10817_v22 = vpop.f32.mrb[111].mxu0  ;;  %v10881_v1 = vpop.f32.mrb[111].mxu1 }
 0x3fd   : > { %v8266_v3 = vadd.f32 %v10815_v52, %v16325_v13  ;;  %v10818_v0 = vadd.f32 %v10817_v22, %v10816_v21  ;;  %v10882_v19 = vadd.f32 %v10881_v1, %v10880_v47 }
 0x3fe   : > { %9237 = vmatmul.mubr.bf16.gmra.mrb[216].mxu0 %v16804_v25 }
 0x3ff   : > { %v8269_v11 = vadd.f32 %v10818_v0, %v16331_v58  ;;  %v16447_v38 = vadd.f32 %v10879_v54, %v8266_v3  ;;  %9244 = vmatprep.mubr.bf16.mxu0 %v16807_v30 }
 0x401   : > { %v16452_v16 = vadd.f32 %v10882_v19, %v8269_v11  ;;  %v10819_v6 = vpop.f32.mrb[112].mxu0  ;;  %v10883_v34 = vpop.f32.mrb[112].mxu1 }
 0x402   : > { %v10820_v40 = vpop.f32.mrb[113].mxu0  ;;  %v10884_v13 = vpop.f32.mrb[113].mxu1 }
 0x403   : > { %v10821_v8 = vadd.f32 %v10820_v40, %v10819_v6  ;;  %v10822_v46 = vpop.f32.mrb[114].mxu0  ;;  %v10885_v32 = vadd.f32 %v10884_v13, %v10883_v34  ;;  %v10886_v36 = vpop.f32.mrb[114].mxu1 }
 0x404   : > { %v10823_v27 = vpop.f32.mrb[115].mxu0  ;;  %v10887_v7 = vpop.f32.mrb[115].mxu1 }
 0x405   : > { %v8274_v58 = vadd.f32 %v10821_v8, %v16339_v60  ;;  %v10824_v49 = vadd.f32 %v10823_v27, %v10822_v46  ;;  %v10888_v51 = vadd.f32 %v10887_v7, %v10886_v36 }
 0x406   : > { %9245 = vmatmul.mubr.bf16.gmra.mrb[220].mxu0 %v16810_v37 }
 0x407   : > { %v8277_v53 = vadd.f32 %v10824_v49, %v16344_v23  ;;  %v16459_v28 = vadd.f32 %v10885_v32, %v8274_v58 }
 0x409   : > { %v16461_v12 = vadd.f32 %v10888_v51, %v8277_v53  ;;  %v10825_v17 = vpop.f32.mrb[116].mxu0  ;;  %v10889_v4 = vpop.f32.mrb[116].mxu1 }
 0x40a   : > { %v10826_v57 = vpop.f32.mrb[117].mxu0  ;;  %v10890_v56 = vpop.f32.mrb[117].mxu1 }
 0x40b   : > { %v10827_v41 = vadd.f32 %v10826_v57, %v10825_v17  ;;  %v10828_v44 = vpop.f32.mrb[118].mxu0  ;;  %v10891_v5 = vadd.f32 %v10890_v56, %v10889_v4  ;;  %v10892_v60 = vpop.f32.mrb[118].mxu1 }
 0x40c   : > { %v10829_v39 = vpop.f32.mrb[119].mxu0  ;;  %v10893_v31 = vpop.f32.mrb[119].mxu1 }
 0x40d   : > { %v8282_v18 = vadd.f32 %v10827_v41, %v16354_v9  ;;  %v10830_v29 = vadd.f32 %v10829_v39, %v10828_v44  ;;  %v10894_v24 = vadd.f32 %v10893_v31, %v10892_v60 }
 0x40f   : > { %v8285_v23 = vadd.f32 %v10830_v29, %v16359_v61  ;;  %v16465_v2 = vadd.f32 %v10891_v5, %v8282_v18 }
 0x411   : > { %v16467_v52 = vadd.f32 %v10894_v24, %v8285_v23  ;;  %v10831_v21 = vpop.f32.mrb[120].mxu0  ;;  %v10895_v54 = vpop.f32.mrb[120].mxu1 }
 0x412   : > { %v10832_v47 = vpop.f32.mrb[121].mxu0  ;;  %v10896_v22 = vpop.f32.mrb[121].mxu1 }
 0x413   : > { %v10833_v1 = vadd.f32 %v10832_v47, %v10831_v21  ;;  %v10834_v3 = vpop.f32.mrb[122].mxu0  ;;  %v10897_v0 = vadd.f32 %v10896_v22, %v10895_v54  ;;  %v10898_v19 = vpop.f32.mrb[122].mxu1 }
 0x414   : > { %v10835_v26 = vpop.f32.mrb[123].mxu0  ;;  %v10899_v48 = vpop.f32.mrb[123].mxu1 }
 0x415   : > { %v8290_v9 = vadd.f32 %v10833_v1, %v16369_v63  ;;  %v10836_v25 = vadd.f32 %v10835_v26, %v10834_v3  ;;  %v10900_v11 = vadd.f32 %v10899_v48, %v10898_v19 }
 0x417   : > { %v8293_v61 = vadd.f32 %v10836_v25, %v16374_v10  ;;  %v16471_v55 = vadd.f32 %v10897_v0, %v8290_v9 }
 0x419   : > { %v16473_v43 = vadd.f32 %v10900_v11, %v8293_v61  ;;  %v10837_v30 = vpop.f32.mrb[124].mxu0  ;;  %v10901_v6 = vpop.f32.mrb[124].mxu1 }
 0x41a   : > { %v10838_v34 = vpop.f32.mrb[125].mxu0  ;;  %v10902_v40 = vpop.f32.mrb[125].mxu1 }
 0x41b   : > { %v10839_v13 = vadd.f32 %v10838_v34, %v10837_v30  ;;  %v10840_v8 = vpop.f32.mrb[126].mxu0  ;;  %v10903_v46 = vadd.f32 %v10902_v40, %v10901_v6  ;;  %v10904_v32 = vpop.f32.mrb[126].mxu1 }
 0x41c   : > { %v10841_v36 = vpop.f32.mrb[127].mxu0  ;;  %v10905_v27 = vpop.f32.mrb[127].mxu1 }
 0x41d   : > { %v8298_v63 = vadd.f32 %v10839_v13, %v16387_v59  ;;  %v10842_v7 = vadd.f32 %v10841_v36, %v10840_v8  ;;  %v10906_v58 = vadd.f32 %v10905_v27, %v10904_v32 }
 0x41f   : > { %v8301_v10 = vadd.f32 %v10842_v7, %v16392_v15  ;;  %v16477_v49 = vadd.f32 %v10903_v46, %v8298_v63 }
 0x421   : > { %v16479_v51 = vadd.f32 %v10906_v58, %v8301_v10  ;;  %v10923_v33 = vpop.f32.mrb[128].mxu0  ;;  %v10987_v35 = vpop.f32.mrb[128].mxu1 }
 0x422   : > { %v10924_v37 = vpop.f32.mrb[129].mxu0  ;;  %v10988_v53 = vpop.f32.mrb[129].mxu1 }
 0x423   : > { %v10925_v17 = vadd.f32 %v10924_v37, %v10923_v33  ;;  %v10926_v4 = vpop.f32.mrb[130].mxu0  ;;  %v10989_v57 = vadd.f32 %v10988_v53, %v10987_v35  ;;  %v10990_v56 = vpop.f32.mrb[130].mxu1 }
 0x424   : > { %v10927_v41 = vpop.f32.mrb[131].mxu0  ;;  %v10991_v44 = vpop.f32.mrb[131].mxu1 }
 0x425   : > { %v8436_v59 = vadd.f32 %v10925_v17, %v16405_v20  ;;  %v10928_v5 = vadd.f32 %v10927_v41, %v10926_v4  ;;  %v10992_v60 = vadd.f32 %v10991_v44, %v10990_v56 }
 0x427   : > { %v8439_v15 = vadd.f32 %v10928_v5, %v16410_v14  ;;  %v16483_v39 = vadd.f32 %v10989_v57, %v8436_v59 }
 0x429   : > { %v16485_v31 = vadd.f32 %v10992_v60, %v8439_v15  ;;  %v10929_v18 = vpop.f32.mrb[132].mxu0  ;;  %v10993_v29 = vpop.f32.mrb[132].mxu1 }
 0x42a   : > { %v10930_v24 = vpop.f32.mrb[133].mxu0  ;;  %v10994_v23 = vpop.f32.mrb[133].mxu1 }
 0x42b   : > { %v10931_v21 = vadd.f32 %v10930_v24, %v10929_v18  ;;  %v10932_v54 = vpop.f32.mrb[134].mxu0  ;;  %v10995_v47 = vadd.f32 %v10994_v23, %v10993_v29  ;;  %v10996_v22 = vpop.f32.mrb[134].mxu1 }
 0x42c   : > { %v10933_v1 = vpop.f32.mrb[135].mxu0  ;;  %v10997_v3 = vpop.f32.mrb[135].mxu1 }
 0x42d   : > { %v8444_v20 = vadd.f32 %v10931_v21, %v16423_v62  ;;  %v10934_v0 = vadd.f32 %v10933_v1, %v10932_v54  ;;  %v10998_v19 = vadd.f32 %v10997_v3, %v10996_v22 }
 0x42f   : > { %v8447_v14 = vadd.f32 %v10934_v0, %v16428_v50  ;;  %v16489_v26 = vadd.f32 %v10995_v47, %v8444_v20 }
 0x431   : > { %v16491_v48 = vadd.f32 %v10998_v19, %v8447_v14  ;;  %v10935_v9 = vpop.f32.mrb[136].mxu0 }
 0x432   : > { %v10999_v25 = vpop.f32.mrb[136].mxu1  ;;  %v10936_v11 = vpop.f32.mrb[137].mxu0 }
 0x433   : > { %v11000_v61 = vpop.f32.mrb[137].mxu1  ;;  %v10937_v30 = vadd.f32 %v10936_v11, %v10935_v9  ;;  %v10938_v6 = vpop.f32.mrb[138].mxu0 }
 0x434   : > { %v11001_v34 = vadd.f32 %v11000_v61, %v10999_v25  ;;  %v11002_v40 = vpop.f32.mrb[138].mxu1  ;;  %v10939_v13 = vpop.f32.mrb[139].mxu0 }
 0x435   : > { %v11003_v8 = vpop.f32.mrb[139].mxu1  ;;  %v8452_v62 = vadd.f32 %v10937_v30, %v16435_v42  ;;  %v10940_v46 = vadd.f32 %v10939_v13, %v10938_v6 }
 0x436   : > { %v11004_v32 = vadd.f32 %v11003_v8, %v11002_v40 }
 0x437   : > { %v8455_v50 = vadd.f32 %v10940_v46, %v16440_v45  ;;  %v16495_v36 = vadd.f32 %v11001_v34, %v8452_v62 }
 0x439   : > { %v16497_v27 = vadd.f32 %v11004_v32, %v8455_v50  ;;  %v10941_v63 = vpop.f32.mrb[140].mxu0 }
 0x43a   : > { %v11005_v7 = vpop.f32.mrb[140].mxu1  ;;  %v10942_v58 = vpop.f32.mrb[141].mxu0 }
 0x43b   : > { %v11006_v10 = vpop.f32.mrb[141].mxu1  ;;  %v10943_v33 = vadd.f32 %v10942_v58, %v10941_v63  ;;  %v10944_v35 = vpop.f32.mrb[142].mxu0 }
 0x43c   : > { %v11007_v37 = vadd.f32 %v11006_v10, %v11005_v7  ;;  %v11008_v53 = vpop.f32.mrb[142].mxu1  ;;  %v10945_v17 = vpop.f32.mrb[143].mxu0 }
 0x43d   : > { %v11009_v4 = vpop.f32.mrb[143].mxu1  ;;  %v8460_v42 = vadd.f32 %v10943_v33, %v16447_v38  ;;  %v10946_v57 = vadd.f32 %v10945_v17, %v10944_v35 }
 0x43e   : > { %v11010_v56 = vadd.f32 %v11009_v4, %v11008_v53 }
 0x43f   : > { %v8463_v45 = vadd.f32 %v10946_v57, %v16452_v16  ;;  %v16501_v41 = vadd.f32 %v11007_v37, %v8460_v42 }
 0x441   : > { %v16503_v44 = vadd.f32 %v11010_v56, %v8463_v45  ;;  %v10947_v59 = vpop.f32.mrb[144].mxu0 }
 0x442   : > { %v11011_v5 = vpop.f32.mrb[144].mxu1  ;;  %v10948_v60 = vpop.f32.mrb[145].mxu0 }
 0x443   : > { %v11012_v15 = vpop.f32.mrb[145].mxu1  ;;  %v10949_v18 = vadd.f32 %v10948_v60, %v10947_v59  ;;  %v10950_v29 = vpop.f32.mrb[146].mxu0 }
 0x444   : > { %v11013_v24 = vadd.f32 %v11012_v15, %v11011_v5  ;;  %v11014_v23 = vpop.f32.mrb[146].mxu1  ;;  %v10951_v21 = vpop.f32.mrb[147].mxu0 }
 0x445   : > { %v11015_v54 = vpop.f32.mrb[147].mxu1  ;;  %v8468_v38 = vadd.f32 %v10949_v18, %v16459_v28  ;;  %v10952_v47 = vadd.f32 %v10951_v21, %v10950_v29 }
 0x446   : > { %v11016_v22 = vadd.f32 %v11015_v54, %v11014_v23 }
 0x447   : > { %v8471_v16 = vadd.f32 %v10952_v47, %v16461_v12  ;;  %v16507_v1 = vadd.f32 %v11013_v24, %v8468_v38 }
 0x449   : > { %v16509_v3 = vadd.f32 %v11016_v22, %v8471_v16  ;;  %v10953_v20 = vpop.f32.mrb[148].mxu0 }
 0x44a   : > { %v11017_v0 = vpop.f32.mrb[148].mxu1  ;;  %v10954_v19 = vpop.f32.mrb[149].mxu0 }
 0x44b   : > { %v11018_v14 = vpop.f32.mrb[149].mxu1  ;;  %v10955_v9 = vadd.f32 %v10954_v19, %v10953_v20  ;;  %v10956_v25 = vpop.f32.mrb[150].mxu0 }
 0x44c   : > { %v11019_v11 = vadd.f32 %v11018_v14, %v11017_v0  ;;  %v11020_v61 = vpop.f32.mrb[150].mxu1  ;;  %v10957_v30 = vpop.f32.mrb[151].mxu0 }
 0x44d   : > { %v11021_v6 = vpop.f32.mrb[151].mxu1  ;;  %v8476_v28 = vadd.f32 %v10955_v9, %v16465_v2  ;;  %v10958_v34 = vadd.f32 %v10957_v30, %v10956_v25 }
 0x44e   : > { %v11022_v40 = vadd.f32 %v11021_v6, %v11020_v61 }
 0x44f   : > { %v8479_v12 = vadd.f32 %v10958_v34, %v16467_v52  ;;  %v16513_v13 = vadd.f32 %v11019_v11, %v8476_v28 }
 0x451   : > { %v16515_v8 = vadd.f32 %v11022_v40, %v8479_v12  ;;  %v10959_v62 = vpop.f32.mrb[152].mxu0 }
 0x452   : > { %v11023_v46 = vpop.f32.mrb[152].mxu1  ;;  %v10960_v32 = vpop.f32.mrb[153].mxu0 }
 0x453   : > { %v11024_v50 = vpop.f32.mrb[153].mxu1  ;;  %v10961_v63 = vadd.f32 %v10960_v32, %v10959_v62  ;;  %v10962_v7 = vpop.f32.mrb[154].mxu0 }
 0x454   : > { %v11025_v58 = vadd.f32 %v11024_v50, %v11023_v46  ;;  %v11026_v10 = vpop.f32.mrb[154].mxu1  ;;  %v10963_v33 = vpop.f32.mrb[155].mxu0 }
 0x455   : > { %v11027_v35 = vpop.f32.mrb[155].mxu1  ;;  %v8484_v2 = vadd.f32 %v10961_v63, %v16471_v55  ;;  %v10964_v37 = vadd.f32 %v10963_v33, %v10962_v7 }
 0x456   : > { %v11028_v53 = vadd.f32 %v11027_v35, %v11026_v10 }
 0x457   : > { %v8487_v52 = vadd.f32 %v10964_v37, %v16473_v43  ;;  %v16519_v17 = vadd.f32 %v11025_v58, %v8484_v2  ;;  %v13172_v43 = vld [vmem:[%s16698_s5] sm:$0xff]   ;;  %v13173_v37 = vld [vmem:[%s16698_s5 + $0x8] sm:$0xff]  }
 0x458   : > { %11291 = vmatprep.subr.bf16.mxu1 %v13172_v43 }
 0x459   : > { %v16521_v4 = vadd.f32 %v11028_v53, %v8487_v52  ;;  %v10965_v42 = vpop.f32.mrb[156].mxu0 }
 0x45a   : > { %v11029_v57 = vpop.f32.mrb[156].mxu1  ;;  %v10966_v56 = vpop.f32.mrb[157].mxu0 }
 0x45b   : > { %v11030_v45 = vpop.f32.mrb[157].mxu1  ;;  %v10967_v59 = vadd.f32 %v10966_v56, %v10965_v42  ;;  %v10968_v5 = vpop.f32.mrb[158].mxu0 }
 0x45c   : > { %v11031_v60 = vadd.f32 %v11030_v45, %v11029_v57  ;;  %v11032_v15 = vpop.f32.mrb[158].mxu1  ;;  %v10969_v18 = vpop.f32.mrb[159].mxu0 }
 0x45d   : > { %v11033_v29 = vpop.f32.mrb[159].mxu1  ;;  %v8492_v55 = vadd.f32 %v10967_v59, %v16477_v49  ;;  %v10970_v24 = vadd.f32 %v10969_v18, %v10968_v5 }
 0x45e   : > { %v11034_v23 = vadd.f32 %v11033_v29, %v11032_v15  ;;  %v13174_v15 = vld [vmem:[%s16698_s5 + $0x10] sm:$0xff]  }
 0x45f   : > { %v8495_v21 = vadd.f32 %v10970_v24, %v16479_v51  ;;  %v16528_v54 = vadd.f32 %v11031_v60, %v8492_v55 }
 0x461   : > { %v16530_v38 = vadd.f32 %v11034_v23, %v8495_v21  ;;  %v11051_v47 = vpop.f32.mrb[160].mxu0  ;;  %v13175_v23 = vld [vmem:[%s16698_s5 + $0x18] sm:$0xff]  }
 0x462   : > { %v11115_v22 = vpop.f32.mrb[160].mxu1  ;;  %v11052_v16 = vpop.f32.mrb[161].mxu0 }
 0x463   : > { %v11116_v20 = vpop.f32.mrb[161].mxu1  ;;  %v11053_v0 = vadd.f32 %v11052_v16, %v11051_v47  ;;  %v11054_v49 = vpop.f32.mrb[162].mxu0 }
 0x464   : > { %v16532_v19 = vadd.f32 %v11116_v20, %v11115_v22  ;;  %v11118_v14 = vpop.f32.mrb[162].mxu1  ;;  %v11055_v9 = vpop.f32.mrb[163].mxu0 }
 0x465   : > { %v11119_v25 = vpop.f32.mrb[163].mxu1  ;;  %v8630_v11 = vadd.f32 %v11053_v0, %v16483_v39  ;;  %v11056_v61 = vadd.f32 %v11055_v9, %v11054_v49  ;;  %v13176_v9 = vld [vmem:[%s16698_s5 + $0x20] sm:$0xff]  }
 0x466   : > { %v16535_v51 = vadd.f32 %v11119_v25, %v11118_v14 }
 0x467   : > { %v8633_v30 = vadd.f32 %v11056_v61, %v16485_v31 }
 0x469   : > { %v11057_v6 = vpop.f32.mrb[164].mxu0  ;;  %v8696_v34 = vpack.c.bf16 %v8633_v30, %v8630_v11 }
 0x46a   : > { %v11121_v28 = vpop.f32.mrb[164].mxu1  ;;  %v11058_v40 = vpop.f32.mrb[165].mxu0 }
 0x46b   : > { %v11122_v12 = vpop.f32.mrb[165].mxu1  ;;  %v11059_v62 = vadd.f32 %v11058_v40, %v11057_v6  ;;  %v11060_v32 = vpop.f32.mrb[166].mxu0  ;;  %11275 = vmatprep.mubr.bf16.mxu1 %v8696_v34  ;;  %v13177_v6 = vld [vmem:[%s16698_s5 + $0x28] sm:$0xff]  }
 0x46c   : > { %v16538_v46 = vadd.f32 %v11122_v12, %v11121_v28  ;;  %v11124_v50 = vpop.f32.mrb[166].mxu1  ;;  %v11061_v63 = vpop.f32.mrb[167].mxu0 }
 0x46d   : > { %v11125_v7 = vpop.f32.mrb[167].mxu1  ;;  %v8638_v39 = vadd.f32 %v11059_v62, %v16489_v26  ;;  %v11062_v58 = vadd.f32 %v11061_v63, %v11060_v32 }
 0x46e   : > { %v16541_v10 = vadd.f32 %v11125_v7, %v11124_v50 }
 0x46f   : > { %v8641_v31 = vadd.f32 %v11062_v58, %v16491_v48 }
 0x471   : > { %v8701_v33 = vpack.c.bf16 %v8641_v31, %v8638_v39  ;;  %v11063_v35 = vpop.f32.mrb[168].mxu0 }
 0x472   : > { %v11127_v2 = vpop.f32.mrb[168].mxu1  ;;  %v11064_v53 = vpop.f32.mrb[169].mxu0 }
 0x473   : > { %v11128_v52 = vpop.f32.mrb[169].mxu1  ;;  %v11065_v42 = vadd.f32 %v11064_v53, %v11063_v35  ;;  %v11066_v56 = vpop.f32.mrb[170].mxu0  ;;  %11276 = vmatmul.mubr.bf16.vlgmr.msra.gmra.mrb[192].mxu1 %v8701_v33 }
 0x474   : > { %v16547_v57 = vadd.f32 %v11128_v52, %v11127_v2  ;;  %v11130_v45 = vpop.f32.mrb[170].mxu1  ;;  %v11067_v26 = vpop.f32.mrb[171].mxu0  ;;  %11292 = vmatpush3.bf16.msra.mxu1 %v13172_v43 }
 0x475   : > { %v11131_v59 = vpop.f32.mrb[171].mxu1  ;;  %v8646_v48 = vadd.f32 %v11065_v42, %v16495_v36  ;;  %v11068_v5 = vadd.f32 %v11067_v26, %v11066_v56  ;;  %11293 = vmatprep.subr.bf16.mxu1 %v13173_v37 }
 0x476   : > { %v16550_v60 = vadd.f32 %v11131_v59, %v11130_v45 }
 0x477   : > { %v8649_v18 = vadd.f32 %v11068_v5, %v16497_v27 }
 0x478   : > { %11294 = vmatpush3.bf16.msra.mxu1 %v13173_v37 }
 0x479   : > { %v11069_v29 = vpop.f32.mrb[172].mxu0  ;;  %v8706_v24 = vpack.c.bf16 %v8649_v18, %v8646_v48  ;;  %11295 = vmatprep.subr.bf16.mxu1 %v13174_v15 }
 0x47a   : > { %v11133_v55 = vpop.f32.mrb[172].mxu1  ;;  %v11070_v36 = vpop.f32.mrb[173].mxu0 }
 0x47b   : > { %v11134_v43 = vpop.f32.mrb[173].mxu1  ;;  %v11071_v21 = vadd.f32 %v11070_v36, %v11069_v29  ;;  %v11072_v22 = vpop.f32.mrb[174].mxu0  ;;  %11279 = vmatprep.mubr.bf16.mxu1 %v8706_v24 }
 0x47c   : > { %v16559_v47 = vadd.f32 %v11134_v43, %v11133_v55  ;;  %v11136_v16 = vpop.f32.mrb[174].mxu1  ;;  %v11073_v20 = vpop.f32.mrb[175].mxu0  ;;  %11296 = vmatpush3.bf16.msra.mxu1 %v13174_v15 }
 0x47d   : > { %v11137_v0 = vpop.f32.mrb[175].mxu1  ;;  %v8654_v27 = vadd.f32 %v11071_v21, %v16501_v41  ;;  %v11074_v49 = vadd.f32 %v11073_v20, %v11072_v22  ;;  %11297 = vmatprep.subr.bf16.mxu1 %v13175_v23 }
 0x47e   : > { %v16562_v14 = vadd.f32 %v11137_v0, %v11136_v16 }
 0x47f   : > { %v8657_v25 = vadd.f32 %v11074_v49, %v16503_v44 }
 0x480   : > { %11298 = vmatpush3.bf16.msra.mxu1 %v13175_v23 }
 0x481   : > { %v11075_v11 = vpop.f32.mrb[176].mxu0  ;;  %v8711_v30 = vpack.c.bf16 %v8657_v25, %v8654_v27  ;;  %11299 = vmatprep.subr.bf16.mxu1 %v13176_v9 }
 0x482   : > { %v11139_v61 = vpop.f32.mrb[176].mxu1  ;;  %v11076_v41 = vpop.f32.mrb[177].mxu0 }
 0x483   : > { %v11140_v28 = vpop.f32.mrb[177].mxu1  ;;  %v11077_v34 = vadd.f32 %v11076_v41, %v11075_v11  ;;  %v11078_v12 = vpop.f32.mrb[178].mxu0  ;;  %11280 = vmatmul.mubr.bf16.gmra.mrb[196].mxu1 %v8711_v30 }
 0x484   : > { %v16571_v40 = vadd.f32 %v11140_v28, %v11139_v61  ;;  %v11142_v62 = vpop.f32.mrb[178].mxu1  ;;  %v11079_v32 = vpop.f32.mrb[179].mxu0  ;;  %11300 = vmatpush3.bf16.msra.mxu1 %v13176_v9 }
 0x485   : > { %v11143_v50 = vpop.f32.mrb[179].mxu1  ;;  %v8662_v44 = vadd.f32 %v11077_v34, %v16507_v1  ;;  %v11080_v63 = vadd.f32 %v11079_v32, %v11078_v12  ;;  %11301 = vmatprep.subr.bf16.mxu1 %v13177_v6  ;;  %v16598_v12 = vld [vmem:[%s16697_s4] ss:$0 sm:$0xff] }
 0x486   : > { %v16574_v7 = vadd.f32 %v11143_v50, %v11142_v62 }
 0x487   : > { %v8665_v39 = vadd.f32 %v11080_v63, %v16509_v3 }
 0x488   : > { %11302 = vmatpush3.bf16.msra.mxu1 %v13177_v6 }
 0x489   : > { %v11081_v58 = vpop.f32.mrb[180].mxu0  ;;  %v8716_v33 = vpack.c.bf16 %v8665_v39, %v8662_v44  ;;  %v9094_v44 = vadd.f32 %v16532_v19, %v16598_v12 }
 0x48a   : > { %v11145_v31 = vpop.f32.mrb[180].mxu1  ;;  %v11082_v35 = vpop.f32.mrb[181].mxu0 }
 0x48b   : > { %v11146_v2 = vpop.f32.mrb[181].mxu1  ;;  %v11083_v37 = vadd.f32 %v11082_v35, %v11081_v58  ;;  %v11084_v52 = vpop.f32.mrb[182].mxu0  ;;  %11283 = vmatprep.mubr.bf16.mxu1 %v8716_v33  ;;  %v9097_v58 = vadd.f32 %v16535_v51, %v16598_v12 }
 0x48c   : > { %v16577_v53 = vadd.f32 %v11146_v2, %v11145_v31  ;;  %v11148_v42 = vpop.f32.mrb[182].mxu1  ;;  %v11085_v56 = vpop.f32.mrb[183].mxu0 }
 0x48d   : > { %v11149_v1 = vpop.f32.mrb[183].mxu1  ;;  %v8670_v45 = vadd.f32 %v11083_v37, %v16513_v13  ;;  %v11086_v26 = vadd.f32 %v11085_v56, %v11084_v52  ;;  %v9102_v37 = vadd.f32 %v16538_v46, %v16598_v12  ;;  %v9105_v56 = vadd.f32 %v16541_v10, %v16598_v12 }
 0x48e   : > { %v16580_v59 = vadd.f32 %v11149_v1, %v11148_v42  ;;  %v9113_v46 = vadd.f32 %v16550_v60, %v16598_v12 }
 0x48f   : > { %v8673_v3 = vadd.f32 %v11086_v26, %v16515_v8 }
 0x491   : > { %v11087_v48 = vpop.f32.mrb[184].mxu0  ;;  %v8721_v15 = vpack.c.bf16 %v8673_v3, %v8670_v45 }
 0x492   : > { %v11151_v5 = vpop.f32.mrb[184].mxu1  ;;  %v11088_v18 = vpop.f32.mrb[185].mxu0 }
 0x493   : > { %v11152_v29 = vpop.f32.mrb[185].mxu1  ;;  %v11089_v55 = vadd.f32 %v11088_v18, %v11087_v48  ;;  %v11090_v23 = vpop.f32.mrb[186].mxu0  ;;  %11284 = vmatmul.mubr.bf16.gmra.mrb[200].mxu1 %v8721_v15  ;;  %v9110_v48 = vadd.f32 %v16547_v57, %v16598_v12  ;;  %v9121_v57 = vadd.f32 %v16562_v14, %v16598_v12  ;;  %v13178_v14 = vld [vmem:[%s16698_s5 + $0x30] sm:$0xff]  }
 0x494   : > { %v16583_v24 = vadd.f32 %v11152_v29, %v11151_v5  ;;  %v11154_v36 = vpop.f32.mrb[186].mxu1  ;;  %v11091_v43 = vpop.f32.mrb[187].mxu0  ;;  %11303 = vmatprep.subr.bf16.mxu1 %v13178_v14 }
 0x495   : > { %v11155_v21 = vpop.f32.mrb[187].mxu1  ;;  %v8678_v13 = vadd.f32 %v11089_v55, %v16519_v17  ;;  %v11092_v22 = vadd.f32 %v11091_v43, %v11090_v23  ;;  %v9118_v43 = vadd.f32 %v16559_v47, %v16598_v12  ;;  %v9129_v47 = vadd.f32 %v16574_v7, %v16598_v12  ;;  %11304 = vmatpush3.bf16.msra.mxu1 %v13178_v14 }
 0x496   : > { %v16586_v16 = vadd.f32 %v11155_v21, %v11154_v36  ;;  %v9134_v7 = vadd.f32 %v16577_v53, %v16598_v12 }
 0x497   : > { %v8681_v8 = vadd.f32 %v11092_v22, %v16521_v4 }
 0x498   : > { %v9145_v53 = vadd.f32 %v16586_v16, %v16598_v12 }
 0x499   : > { %v11093_v20 = vpop.f32.mrb[188].mxu0  ;;  %v8726_v27 = vpack.c.bf16 %v8681_v8, %v8678_v13 }
 0x49a   : > { %v11157_v0 = vpop.f32.mrb[188].mxu1  ;;  %v11094_v49 = vpop.f32.mrb[189].mxu0 }
 0x49b   : > { %v11158_v9 = vpop.f32.mrb[189].mxu1  ;;  %v11095_v25 = vadd.f32 %v11094_v49, %v11093_v20  ;;  %v11096_v61 = vpop.f32.mrb[190].mxu0  ;;  %11287 = vmatprep.mubr.bf16.mxu1 %v8726_v27  ;;  %v9126_v49 = vadd.f32 %v16571_v40, %v16598_v12  ;;  %v13179_v40 = vld [vmem:[%s16698_s5 + $0x38] sm:$0xff]  }
 0x49c   : > { %v16589_v11 = vadd.f32 %v11158_v9, %v11157_v0  ;;  %v11160_v30 = vpop.f32.mrb[190].mxu1  ;;  %v11097_v6 = vpop.f32.mrb[191].mxu0  ;;  %11305 = vmatprep.subr.bf16.mxu1 %v13179_v40 }
 0x49d   : > { %v11161_v41 = vpop.f32.mrb[191].mxu1  ;;  %v8686_v17 = vadd.f32 %v11095_v25, %v16528_v54  ;;  %v11098_v28 = vadd.f32 %v11097_v6, %v11096_v61  ;;  %11306 = vmatpush3.bf16.msra.mxu1 %v13179_v40 }
 0x49e   : > { %v16592_v34 = vadd.f32 %v11161_v41, %v11160_v30 }
 0x49f   : > { %v8689_v4 = vadd.f32 %v11098_v28, %v16530_v38 }
 0x4a1   : > { %v11179_v62 = vpop.f32.mrb[192].mxu0  ;;  %v8731_v32 = vpack.c.bf16 %v8689_v4, %v8686_v17 }
 0x4a2   : > { %v11180_v50 = vpop.f32.mrb[193].mxu0 }
 0x4a3   : > { %v11181_v63 = vadd.f32 %v11180_v50, %v11179_v62  ;;  %v11182_v39 = vpop.f32.mrb[194].mxu0  ;;  %11288 = vmatmul.mubr.bf16.gmra.mrb[204].mxu1 %v8731_v32  ;;  %v9137_v50 = vadd.f32 %v16580_v59, %v16598_v12  ;;  %v9150_v59 = vadd.f32 %v16589_v11, %v16598_v12 }
 0x4a4   : > { %v11183_v54 = vpop.f32.mrb[195].mxu0 }
 0x4a5   : > { %v11184_v31 = vadd.f32 %v11183_v54, %v11182_v39  ;;  %v16604_v38 = vadd.f32 %v11181_v63, %v9094_v44 }
 0x4a7   : > { %v16606_v33 = vadd.f32 %v11184_v31, %v9097_v58  ;;  %v9142_v31 = vadd.f32 %v16583_v24, %v16598_v12  ;;  %v9153_v24 = vadd.f32 %v16592_v34, %v16598_v12 }
 0x4a9   : > { %v11185_v35 = vpop.f32.mrb[196].mxu0 }
 0x4aa   : > { %v11186_v2 = vpop.f32.mrb[197].mxu0 }
 0x4ab   : > { %v11187_v52 = vadd.f32 %v11186_v2, %v11185_v35  ;;  %v11188_v42 = vpop.f32.mrb[198].mxu0 }
 0x4ac   : > { %v11189_v19 = vpop.f32.mrb[199].mxu0 }
 0x4ad   : > { %v11190_v1 = vadd.f32 %v11189_v19, %v11188_v42  ;;  %v16612_v45 = vadd.f32 %v11187_v52, %v9102_v37 }
 0x4af   : > { %v16614_v51 = vadd.f32 %v11190_v1, %v9105_v56 }
 0x4b1   : > { %v11191_v26 = vpop.f32.mrb[200].mxu0 }
 0x4b2   : > { %v11192_v3 = vpop.f32.mrb[201].mxu0 }
 0x4b3   : > { %v11193_v5 = vadd.f32 %v11192_v3, %v11191_v26  ;;  %v11194_v15 = vpop.f32.mrb[202].mxu0 }
 0x4b4   : > { %v11195_v18 = vpop.f32.mrb[203].mxu0 }
 0x4b5   : > { %v11196_v29 = vadd.f32 %v11195_v18, %v11194_v15  ;;  %v16620_v55 = vadd.f32 %v11193_v5, %v9110_v48 }
 0x4b7   : > { %v16622_v10 = vadd.f32 %v11196_v29, %v9113_v46 }
 0x4b9   : > { %v11197_v23 = vpop.f32.mrb[204].mxu0 }
 0x4ba   : > { %v11198_v36 = vpop.f32.mrb[205].mxu0 }
 0x4bb   : > { %v11199_v21 = vadd.f32 %v11198_v36, %v11197_v23  ;;  %v11200_v13 = vpop.f32.mrb[206].mxu0 }
 0x4bc   : > { %v11201_v22 = vpop.f32.mrb[207].mxu0 }
 0x4bd   : > { %v11202_v8 = vadd.f32 %v11201_v22, %v11200_v13  ;;  %v9215_v20 = vadd.f32 %v11199_v21, %v9118_v43 }
 0x4bf   : > { %v16628_v0 = vadd.f32 %v11202_v8, %v9121_v57 }
 0x4c1   : > { %v11203_v60 = vpop.f32.mrb[208].mxu0 }
 0x4c2   : > { %v11204_v27 = vpop.f32.mrb[209].mxu0 }
 0x4c3   : > { %v11205_v9 = vadd.f32 %v11204_v27, %v11203_v60  ;;  %v11206_v25 = vpop.f32.mrb[210].mxu0 }
 0x4c4   : > { %v11207_v61 = vpop.f32.mrb[211].mxu0 }
 0x4c5   : > { %v11208_v30 = vadd.f32 %v11207_v61, %v11206_v25  ;;  %v16637_v6 = vadd.f32 %v11205_v9, %v9126_v49 }
 0x4c7   : > { %v16639_v41 = vadd.f32 %v11208_v30, %v9129_v47 }
 0x4c9   : > { %v11209_v17 = vpop.f32.mrb[212].mxu0 }
 0x4ca   : > { %v11210_v28 = vpop.f32.mrb[213].mxu0 }
 0x4cb   : > { %v11211_v4 = vadd.f32 %v11210_v28, %v11209_v17  ;;  %v11212_v62 = vpop.f32.mrb[214].mxu0 }
 0x4cc   : > { %v11213_v32 = vpop.f32.mrb[215].mxu0 }
 0x4cd   : > { %v11214_v44 = vadd.f32 %v11213_v32, %v11212_v62  ;;  %v9231_v63 = vadd.f32 %v11211_v4, %v9134_v7 }
 0x4cf   : > { %v9234_v39 = vadd.f32 %v11214_v44, %v9137_v50 }
 0x4d1   : > { %v11215_v54 = vpop.f32.mrb[216].mxu0 }
 0x4d2   : > { %v11216_v58 = vpop.f32.mrb[217].mxu0 }
 0x4d3   : > { %v11217_v35 = vadd.f32 %v11216_v58, %v11215_v54  ;;  %v11218_v2 = vpop.f32.mrb[218].mxu0 }
 0x4d4   : > { %v11219_v37 = vpop.f32.mrb[219].mxu0 }
 0x4d5   : > { %v11220_v52 = vadd.f32 %v11219_v37, %v11218_v2  ;;  %v9239_v42 = vadd.f32 %v11217_v35, %v9142_v31 }
 0x4d7   : > { %v9242_v19 = vadd.f32 %v11220_v52, %v9145_v53 }
 0x4d9   : > { %v11221_v56 = vpop.f32.mrb[220].mxu0 }
 0x4da   : > { %v11222_v1 = vpop.f32.mrb[221].mxu0 }
 0x4db   : > { %v11223_v26 = vadd.f32 %v11222_v1, %v11221_v56  ;;  %v11224_v3 = vpop.f32.mrb[222].mxu0 }
 0x4dc   : > { %v11225_v48 = vpop.f32.mrb[223].mxu0 }
 0x4dd   : > { %v11226_v5 = vadd.f32 %v11225_v48, %v11224_v3  ;;  %v9247_v15 = vadd.f32 %v11223_v26, %v9150_v59 }
 0x4df   : > { %v9250_v18 = vadd.f32 %v11226_v5, %v9153_v24 }
 0x546   : > { %v11277_v46 = vpop.f32.mrb[192].mxu1 }
 0x547   : > { %v9296_v16 = vadd.f32 %v11277_v46, %v16612_v45  ;;  %v9287_v29 = vpop.f32.mrb[193].mxu1 }
 0x548   : > { %v9288_v23 = vadd.f32 %v9287_v29, %v16604_v38  ;;  %v11278_v36 = vpop.f32.mrb[194].mxu1 }
 0x549   : > { %v9299_v43 = vadd.f32 %v11278_v36, %v16614_v51  ;;  %v9290_v21 = vpop.f32.mrb[195].mxu1 }
 0x54a   : > { %v9291_v11 = vadd.f32 %v9290_v21, %v16606_v33 }
 0x54b   : > { %v9351_v13 = vpack.c.bf16 %v9299_v43, %v9296_v16 }
 0x54c   : > { %v9350_v22 = vpack.c.bf16 %v9291_v11, %v9288_v23 }
 0x54e   : > { %11307 = vmatprep.mubr.bf16.mxu1 %v9350_v22 }
 0x54f   : > { %11308 = vmatmul.mubr.bf16.vlgmr.msra.gmra.mrb[208].mxu1 %v9351_v13 }
 0x556   : > { %v11281_v34 = vpop.f32.mrb[196].mxu1 }
 0x557   : > { %v9312_v12 = vadd.f32 %v11281_v34, %v9215_v20  ;;  %v9303_v57 = vpop.f32.mrb[197].mxu1 }
 0x558   : > { %v9304_v8 = vadd.f32 %v9303_v57, %v16620_v55  ;;  %v11282_v60 = vpop.f32.mrb[198].mxu1 }
 0x559   : > { %v9315_v45 = vadd.f32 %v11282_v60, %v16628_v0  ;;  %v9306_v27 = vpop.f32.mrb[199].mxu1 }
 0x55a   : > { %v9307_v38 = vadd.f32 %v9306_v27, %v16622_v10 }
 0x55b   : > { %v9353_v49 = vpack.c.bf16 %v9315_v45, %v9312_v12 }
 0x55c   : > { %v9352_v51 = vpack.c.bf16 %v9307_v38, %v9304_v8 }
 0x55e   : > { %11311 = vmatprep.mubr.bf16.mxu1 %v9352_v51 }
 0x55f   : > { %11312 = vmatmul.mubr.bf16.gmra.mrb[212].mxu1 %v9353_v49 }
 0x566   : > { %v11285_v33 = vpop.f32.mrb[200].mxu1 }
 0x567   : > { %v9328_v9 = vadd.f32 %v11285_v33, %v9231_v63  ;;  %v9319_v25 = vpop.f32.mrb[201].mxu1 }
 0x568   : > { %v9320_v61 = vadd.f32 %v9319_v25, %v16637_v6  ;;  %v11286_v47 = vpop.f32.mrb[202].mxu1 }
 0x569   : > { %v9331_v20 = vadd.f32 %v11286_v47, %v9234_v39  ;;  %v9322_v30 = vpop.f32.mrb[203].mxu1 }
 0x56a   : > { %v9323_v55 = vadd.f32 %v9322_v30, %v16639_v41  ;;  %v10512_v41 = vld [vmem:[%s16699_s6] ss:$0 sm:$0xff] }
 0x56b   : > { %v9355_v14 = vpack.c.bf16 %v9331_v20, %v9328_v9 }
 0x56c   : > { %v9354_v0 = vpack.c.bf16 %v9323_v55, %v9320_v61 }
 0x56e   : > { %11315 = vmatprep.mubr.bf16.mxu1 %v9354_v0 }
 0x56f   : > { %11316 = vmatmul.mubr.bf16.gmra.mrb[216].mxu1 %v9355_v14 }
 0x576   : > { %v11289_v10 = vpop.f32.mrb[204].mxu1 }
 0x577   : > { %v9344_v17 = vadd.f32 %v11289_v10, %v9247_v15  ;;  %v9335_v40 = vpop.f32.mrb[205].mxu1 }
 0x578   : > { %v9336_v28 = vadd.f32 %v9335_v40, %v9239_v42  ;;  %v11290_v7 = vpop.f32.mrb[206].mxu1 }
 0x579   : > { %v9347_v4 = vadd.f32 %v11290_v7, %v9250_v18  ;;  %v9338_v62 = vpop.f32.mrb[207].mxu1 }
 0x57a   : > { %v9339_v32 = vadd.f32 %v9338_v62, %v9242_v19 }
 0x57b   : > { %v9357_v50 = vpack.c.bf16 %v9347_v4, %v9344_v17 }
 0x57c   : > { %v9356_v6 = vpack.c.bf16 %v9339_v32, %v9336_v28 }
 0x57e   : > { %11319 = vmatprep.mubr.bf16.mxu1 %v9356_v6 }
 0x57f   : > { %11320 = vmatmul.mubr.bf16.gmra.mrb[220].mxu1 %v9357_v50 }
 0x622   : > { %v11309_v44 = vpop.f32.mrb[208].mxu1 }
 0x623   : > { %v9472_v63 = vadd.f32 %v11309_v44, %v10512_v41  ;;  %v9463_v39 = vpop.f32.mrb[209].mxu1 }
 0x624   : > { %v9464_v54 = vadd.f32 %v10512_v41, %v9463_v39  ;;  %v11310_v58 = vpop.f32.mrb[210].mxu1 }
 0x625   : > { %9528 = vst [vmem:[%s16672_s29 + $0x10] sm:$0xff] %v9472_v63  ;;  %v9475_v31 = vadd.f32 %v11310_v58, %v10512_v41  ;;  %v9466_v35 = vpop.f32.mrb[211].mxu1 }
 0x626   : > { %9526 = vst [vmem:[%s16672_s29] sm:$0xff] %v9464_v54  ;;  %v9467_v2 = vadd.f32 %v10512_v41, %v9466_v35 }
 0x627   : > { %9529 = vst [vmem:[%s16672_s29 + $0x18] sm:$0xff] %v9475_v31 }
 0x628   : > { %9527 = vst [vmem:[%s16672_s29 + $0x8] sm:$0xff] %v9467_v2 }
 0x632   : > { %v11313_v37 = vpop.f32.mrb[212].mxu1 }
 0x633   : > { %v9488_v53 = vadd.f32 %v11313_v37, %v10512_v41  ;;  %v9479_v52 = vpop.f32.mrb[213].mxu1 }
 0x634   : > { %v9480_v42 = vadd.f32 %v10512_v41, %v9479_v52  ;;  %v11314_v19 = vpop.f32.mrb[214].mxu1 }
 0x635   : > { %9532 = vst [vmem:[%s16672_s29 + $0x30] sm:$0xff] %v9488_v53  ;;  %v9491_v56 = vadd.f32 %v11314_v19, %v10512_v41  ;;  %v9482_v1 = vpop.f32.mrb[215].mxu1 }
 0x636   : > { %9530 = vst [vmem:[%s16672_s29 + $0x20] sm:$0xff] %v9480_v42  ;;  %v9483_v59 = vadd.f32 %v10512_v41, %v9482_v1 }
 0x637   : > { %9533 = vst [vmem:[%s16672_s29 + $0x38] sm:$0xff] %v9491_v56 }
 0x638   : > { %9531 = vst [vmem:[%s16672_s29 + $0x28] sm:$0xff] %v9483_v59 }
 0x642   : > { %v11317_v26 = vpop.f32.mrb[216].mxu1 }
 0x643   : > { %v9504_v3 = vadd.f32 %v11317_v26, %v10512_v41  ;;  %v9495_v48 = vpop.f32.mrb[217].mxu1 }
 0x644   : > { %v9496_v24 = vadd.f32 %v10512_v41, %v9495_v48  ;;  %v11318_v5 = vpop.f32.mrb[218].mxu1 }
 0x645   : > { %9536 = vst [vmem:[%s16672_s29 + $0x50] sm:$0xff] %v9504_v3  ;;  %v9507_v15 = vadd.f32 %v11318_v5, %v10512_v41  ;;  %v9498_v18 = vpop.f32.mrb[219].mxu1 }
 0x646   : > { %9534 = vst [vmem:[%s16672_s29 + $0x40] sm:$0xff] %v9496_v24  ;;  %v9499_v46 = vadd.f32 %v10512_v41, %v9498_v18 }
 0x647   : > { %9537 = vst [vmem:[%s16672_s29 + $0x58] sm:$0xff] %v9507_v15 }
 0x648   : > { %9535 = vst [vmem:[%s16672_s29 + $0x48] sm:$0xff] %v9499_v46 }
 0x652   : > { %v11321_v16 = vpop.f32.mrb[220].mxu1 }
 0x653   : > { %v9520_v29 = vadd.f32 %v11321_v16, %v10512_v41  ;;  %v9511_v23 = vpop.f32.mrb[221].mxu1 }
 0x654   : > { %v9512_v36 = vadd.f32 %v10512_v41, %v9511_v23  ;;  %v11322_v43 = vpop.f32.mrb[222].mxu1 }
 0x655   : > { %9540 = vst [vmem:[%s16672_s29 + $0x70] sm:$0xff] %v9520_v29  ;;  %v9523_v21 = vadd.f32 %v11322_v43, %v10512_v41  ;;  %v9514_v11 = vpop.f32.mrb[223].mxu1 }
 0x656   : > { %9538 = vst [vmem:[%s16672_s29 + $0x60] sm:$0xff] %v9512_v36  ;;  %v9515_v13 = vadd.f32 %v10512_v41, %v9514_v11 }
 0x657   : > { %9541 = vst [vmem:[%s16672_s29 + $0x78] sm:$0xff] %v9523_v21 }
 0x658   : > { %9539 = vst [vmem:[%s16672_s29 + $0x68] sm:$0xff] %v9515_v13 }
 0x659 PF: > { %s17_s24 = sadd.s32 1, %s13330_s24  }
 0x65a   : > { %p14_p4 = scmp.ge.s32.totalorder %s17_s24, 4  }
 0x65c   :  { %16 = sbr.rel (!%p14_p4) target bundleno = 1 (0x1), region = 78 }

</bundles_post_ra>
